<compile_context>
chip_gen: v7x
topology: tpu7x:2x2x1
jax: 0.10.0
libtpu: 0.0.40
codegen_flags: <defaults>
</compile_context>

<pallas_src>
import functools

import jax
import jax.numpy as jnp
from jax import lax
from jax.experimental import pallas as pl
from jax.experimental.pallas import tpu as pltpu


def _round_up(x, m):
    return (x + m - 1) // m * m


# Cap on rows per batch block: per unrolled step the live fused tile is
# (batch_block, 8*Hp) f32; 16 rows keeps vreg pressure safely under 64 vregs.
_MAX_BATCH_BLOCK = 16


def _num_tensorcores():
    """Best-effort TensorCores-per-chip (v7x has 2; v5e/v6e have 1)."""
    try:
        kind = jax.devices()[0].device_kind.lower()
        return 2 if ("v7" in kind or "7x" in kind) else 1
    except Exception:
        return 1


def _charrnn_kernel(ids_ref, h0_ref, c0_ref,
                    w_ih0_ref, b0_ref,
                    w0f_ref, b1_ref,
                    w1f_ref, fc_b_ref,
                    out_ref, hn_ref, cn_ref,
                    gates_ref):
    """One batch-block of the 2-layer LSTM + FC head.

    ids_ref:   (Bblk, T)        int32 char ids
    h0/c0_ref: (2, Bblk, Hp)    f32 initial state per layer (padded lanes zero)
    w_ih0_ref: (Vp, 4Hp)        bf16, gate g in columns [g*Hp, g*Hp+H)
    b0_ref:    (1, 4Hp)         f32 (bias_ih0 + bias_hh0, zero in padded lanes)
    w0f_ref:   (Hp, 8Hp)        bf16  [w_hh0 | w_ih1]
    b1_ref:    (1, 4Hp)         f32 (bias_ih1 + bias_hh1)
    w1f_ref:   (Hp, 4Hp+Op)     bf16  [w_hh1 | fc_w]
    fc_b_ref:  (1, Op)          f32
    out_ref:   (Bblk, T*Op)     f32 logits, batch-major, step t in cols [t*Op, (t+1)*Op)
    hn/cn_ref: (2, Bblk, Hp)    f32 final state
    gates_ref: (T*Bblk, 4Hp)    f32 scratch: hoisted layer-0 input-side gates
    """
    Bblk, T = ids_ref.shape
    Vp = w_ih0_ref.shape[0]
    Hp = h0_ref.shape[-1]
    G = 4 * Hp
    Op = fc_b_ref.shape[-1]
    mxu = w0f_ref.dtype

    # ---- Hoisted layer-0 input-side gates: one-hot(ids) @ w_ih0 + b0 ---------
    # Only the 4-byte ids cross HBM; the one-hot row is rebuilt with an iota
    # compare and fed to the MXU.  All of this is off the recurrent chain.
    ids = ids_ref[...]                                      # (Bblk, T) int32
    w_ih0 = w_ih0_ref[...]                                  # load once
    b0 = jnp.broadcast_to(b0_ref[...], (Bblk, G))           # hoisted broadcast
    lane_iota = lax.broadcasted_iota(jnp.int32, (Bblk, Vp), 1)
    for t in range(T):                                      # static, tiny matmuls
        onehot_t = (ids[:, t:t + 1] == lane_iota).astype(mxu)
        gates_ref[pl.ds(t * Bblk, Bblk), :] = (
            jnp.dot(onehot_t, w_ih0, preferred_element_type=jnp.float32) + b0)

    # ---- Fused, interleaved 2-layer recurrence + FC head ---------------------
    w0f = w0f_ref[...]                                      # (Hp, 8Hp)
    w1f = w1f_ref[...]                                      # (Hp, 4Hp+Op)
    b1 = jnp.broadcast_to(b1_ref[...], (Bblk, G))
    fc_b = jnp.broadcast_to(fc_b_ref[...], (Bblk, Op))

    h0 = h0_ref[0]
    c0 = c0_ref[0]
    h1 = h0_ref[1]
    c1 = c0_ref[1]

    # Pipeline prologue: recurrent-side products of the initial states.
    rec0 = jnp.dot(h0.astype(mxu), w0f[:, :G], preferred_element_type=jnp.float32)
    rec1 = jnp.dot(h1.astype(mxu), w1f[:, :G], preferred_element_type=jnp.float32)

    def lstm_cell(gates, c):
        # Gate slices are 128-lane aligned (Hp % 128 == 0): clean vreg slices.
        i_g = jax.nn.sigmoid(gates[:, 0 * Hp:1 * Hp])
        f_g = jax.nn.sigmoid(gates[:, 1 * Hp:2 * Hp])
        g_g = jnp.tanh(gates[:, 2 * Hp:3 * Hp])
        o_g = jax.nn.sigmoid(gates[:, 3 * Hp:4 * Hp])
        c_new = f_g * c + i_g * g_g
        h_new = o_g * jnp.tanh(c_new)
        return h_new, c_new

    # T is small & static: fully unrolled.  Layer-0 step t+1 and layer-1 step t
    # are independent given (h0_t, h1_{t-1}), so the LLO scheduler interleaves
    # the two chains (MXU push of one hides result-pop/EUP latency of the other).
    for t in range(T):
        # Layer 0, step t.
        g0 = gates_ref[pl.ds(t * Bblk, Bblk), :] + rec0
        h0, c0 = lstm_cell(g0, c0)
        fused0 = jnp.dot(h0.astype(mxu), w0f, preferred_element_type=jnp.float32)
        rec0 = fused0[:, :G]                                # -> layer-0 step t+1

        # Layer 1, step t (inter-layer dropout is identity in eval mode).
        g1 = fused0[:, G:] + b1 + rec1
        h1, c1 = lstm_cell(g1, c1)
        fused1 = jnp.dot(h1.astype(mxu), w1f, preferred_element_type=jnp.float32)
        rec1 = fused1[:, :G]                                # -> layer-1 step t+1

        # FC logits straight to the batch-major output slab: lane-dense,
        # 128-aligned column window (Op % 128 == 0, start t*Op % 128 == 0).
        out_ref[:, pl.ds(t * Op, Op)] = fused1[:, G:] + fc_b

    hn_ref[0] = h0
    hn_ref[1] = h1
    cn_ref[0] = c0
    cn_ref[1] = c1


@functools.partial(jax.jit, static_argnames=("vocab", "batch_block"))
def _char_rnn_forward_ids(ids_bt, h0, c0, params, vocab, batch_block):
    """ids_bt: (B, T) int32 char ids; h0/c0: (2, B, H) f32."""
    B, T = ids_bt.shape
    H = h0.shape[-1]
    Hp = params["w0f"].shape[0]
    G = 4 * Hp
    Op = params["fc_b"].shape[-1]
    Vp = params["w_ih0"].shape[0]

    B_pad = _round_up(B, batch_block)

    # Zero-pad batch rows and hidden lanes.  Padded hidden/cell lanes stay
    # exactly 0 through the LSTM because padded c0 lanes, padded weight columns
    # and padded bias lanes are all zero (documented precondition).
    ids_p = jnp.zeros((B_pad, T), jnp.int32).at[:B, :].set(ids_bt.astype(jnp.int32))
    h0_p = jnp.zeros((2, B_pad, Hp), jnp.float32).at[:, :B, :H].set(h0)
    c0_p = jnp.zeros((2, B_pad, Hp), jnp.float32).at[:, :B, :H].set(c0)

    grid = (B_pad // batch_block,)

    ids_spec = pl.BlockSpec((batch_block, T), lambda b: (b, 0))
    state_spec = pl.BlockSpec((2, batch_block, Hp), lambda b: (0, b, 0))
    out_spec = pl.BlockSpec((batch_block, T * Op), lambda b: (b, 0))
    full2d = lambda r, c: pl.BlockSpec((r, c), lambda b: (0, 0))

    out_p, hn_p, cn_p = pl.pallas_call(
        _charrnn_kernel,
        out_shape=(
            jax.ShapeDtypeStruct((B_pad, T * Op), jnp.float32),
            jax.ShapeDtypeStruct((2, B_pad, Hp), jnp.float32),
            jax.ShapeDtypeStruct((2, B_pad, Hp), jnp.float32),
        ),
        grid_spec=pltpu.PrefetchScalarGridSpec(
            num_scalar_prefetch=0,
            grid=grid,
            in_specs=[
                ids_spec,                      # char ids
                state_spec,                    # h0
                state_spec,                    # c0
                full2d(Vp, G),                 # w_ih0
                full2d(1, G),                  # b0
                full2d(Hp, 2 * G),             # w0f = [w_hh0 | w_ih1]
                full2d(1, G),                  # b1
                full2d(Hp, G + Op),            # w1f = [w_hh1 | fc_w]
                full2d(1, Op),                 # fc_b
            ],
            out_specs=(out_spec, state_spec, state_spec),
            scratch_shapes=[
                pltpu.VMEM((T * batch_block, G), jnp.float32),  # hoisted input gates
            ],
        ),
        compiler_params=pltpu.CompilerParams(
            dimension_semantics=("parallel",)),   # batch blocks are independent
    )(
        ids_p, h0_p, c0_p,
        params["w_ih0"], params["b0"],
        params["w0f"], params["b1"],
        params["w1f"], params["fc_b"],
    )

    # Output is already batch-major: row b holds [t0 logits | t1 logits | ...],
    # so only free row-major reshapes remain (PyTorch row order is (b, t)).
    out = out_p[:B].reshape(B, T, Op)[:, :, :vocab].reshape(B * T, vocab)
    hn = hn_p[:, :B, :H]
    cn = cn_p[:, :B, :H]
    return out, (hn, cn)


def char_rnn_forward(x_btv, h0, c0, params, *, batch_block=None):
    """CharRNN.forward: x_btv is (B, T, V) batch_first one-hot input.

    Returns (out, (hn, cn)) with out of shape (B*T, V) in PyTorch row order.
    nn.Dropout / the LSTM inter-layer dropout are identity (eval mode).
    """
    B, T, V = x_btv.shape
    if batch_block is None:
        # One batch block per TensorCore: grid=(1,) on single-TC v5e/v6e (no
        # serial grid-step overhead, max rows per MXU push), grid=(2,) parallel
        # on dual-TC v7x.  Capped so the unrolled fused loop does not spill.
        n_tc = _num_tensorcores()
        batch_block = min(_MAX_BATCH_BLOCK,
                          _round_up(max(1, -(-B // n_tc)), 8))
    # x is one-hot, so x @ w_ih0 == w_ih0[ids]: ship only the int ids to the
    # kernel (4 bytes/token) and rebuild the one-hot in-kernel.
    ids = jnp.argmax(x_btv, axis=-1).astype(jnp.int32)
    return _char_rnn_forward_ids(ids, h0, c0, params, V, batch_block)


# ----------------------------------------------------------------------------
# Parameter construction: PyTorch-shaped raw params + padded/packed kernel params
# ----------------------------------------------------------------------------
def init_raw_params(key, vocab, hidden):
    """Deterministic synthetic parameters in PyTorch LSTM/Linear shapes."""
    ks = jax.random.split(key, 10)
    scale = 1.0 / jnp.sqrt(float(hidden))

    def u(k, shape):
        return jax.random.uniform(k, shape, jnp.float32, -scale, scale)

    return {
        "w_ih0": u(ks[0], (4 * hidden, vocab)),    # weight_ih_l0
        "w_hh0": u(ks[1], (4 * hidden, hidden)),   # weight_hh_l0
        "b_ih0": u(ks[2], (4 * hidden,)),
        "b_hh0": u(ks[3], (4 * hidden,)),
        "w_ih1": u(ks[4], (4 * hidden, hidden)),   # weight_ih_l1
        "w_hh1": u(ks[5], (4 * hidden, hidden)),   # weight_hh_l1
        "b_ih1": u(ks[6], (4 * hidden,)),
        "b_hh1": u(ks[7], (4 * hidden,)),
        "fc_w": u(ks[8], (vocab, hidden)),         # fc.weight
        "fc_b": u(ks[9], (vocab,)),                # fc.bias
    }


def _pack_gate_weight(w, in_dim, in_pad, h, h_pad, dtype):
    """(4H, in) PyTorch gate weight -> (in_pad, 4*H_pad), gates 128-lane aligned."""
    w4 = w.reshape(4, h, in_dim)
    buf = jnp.zeros((4, h_pad, in_pad), jnp.float32).at[:, :h, :in_dim].set(w4)
    return buf.transpose(2, 0, 1).reshape(in_pad, 4 * h_pad).astype(dtype)


def _pack_gate_bias(b_ih, b_hh, h, h_pad):
    b4 = (b_ih + b_hh).reshape(4, h)
    buf = jnp.zeros((4, h_pad), jnp.float32).at[:, :h].set(b4)
    return buf.reshape(1, 4 * h_pad)


def prepare_params(raw, vocab, hidden, mxu_dtype=jnp.bfloat16):
    """Pad/transpose/cast/fuse for the kernel (bf16 MXU operands, f32 biases)."""
    H, V = hidden, vocab
    Hp, Vp, Op = _round_up(H, 128), _round_up(V, 128), _round_up(V, 128)
    w_hh0 = _pack_gate_weight(raw["w_hh0"], H, Hp, H, Hp, mxu_dtype)
    w_ih1 = _pack_gate_weight(raw["w_ih1"], H, Hp, H, Hp, mxu_dtype)
    w_hh1 = _pack_gate_weight(raw["w_hh1"], H, Hp, H, Hp, mxu_dtype)
    fc_w = (jnp.zeros((Hp, Op), jnp.float32)
            .at[:H, :V].set(raw["fc_w"].T).astype(mxu_dtype))
    return {
        "w_ih0": _pack_gate_weight(raw["w_ih0"], V, Vp, H, Hp, mxu_dtype),
        "b0": _pack_gate_bias(raw["b_ih0"], raw["b_hh0"], H, Hp),
        "w0f": jnp.concatenate([w_hh0, w_ih1], axis=1),     # (Hp, 8Hp)
        "b1": _pack_gate_bias(raw["b_ih1"], raw["b_hh1"], H, Hp),
        "w1f": jnp.concatenate([w_hh1, fc_w], axis=1),      # (Hp, 4Hp+Op)
        "fc_b": jnp.zeros((1, Op), jnp.float32).at[0, :V].set(raw["fc_b"]),
    }


# ----------------------------------------------------------------------------
# Pure-JAX reference (f32) for a correctness check
# ----------------------------------------------------------------------------
def reference_forward(x_btv, h0, c0, raw):
    H = h0.shape[-1]

    def run(x_seq, h, c, w_ih, w_hh, b_ih, b_hh):
        outs = []
        for t in range(x_seq.shape[0]):
            g = x_seq[t] @ w_ih.T + h @ w_hh.T + b_ih + b_hh
            i = jax.nn.sigmoid(g[:, 0 * H:1 * H])
            f = jax.nn.sigmoid(g[:, 1 * H:2 * H])
            gg = jnp.tanh(g[:, 2 * H:3 * H])
            o = jax.nn.sigmoid(g[:, 3 * H:4 * H])
            c = f * c + i * gg
            h = o * jnp.tanh(c)
            outs.append(h)
        return jnp.stack(outs), h, c

    x_tbv = jnp.transpose(x_btv, (1, 0, 2))
    s0, h0f, c0f = run(x_tbv, h0[0], c0[0],
                       raw["w_ih0"], raw["w_hh0"], raw["b_ih0"], raw["b_hh0"])
    s1, h1f, c1f = run(s0, h0[1], c0[1],
                       raw["w_ih1"], raw["w_hh1"], raw["b_ih1"], raw["b_hh1"])
    out_bt = jnp.transpose(s1, (1, 0, 2)).reshape(-1, H)
    out = out_bt @ raw["fc_w"].T + raw["fc_b"]
    return out, (jnp.stack([h0f, h1f]), jnp.stack([c0f, c1f]))


if __name__ == "__main__":
    # Small shapes consistent with the module: vocab=len(tokens)=32, hidden=32,
    # layers=2, batch=16, seq=8.
    B, T, VOCAB, HIDDEN, LAYERS = 16, 8, 32, 32, 2

    key = jax.random.PRNGKey(0)
    k_x, k_p = jax.random.split(key)

    # One-hot character input, batch_first: (B, T, V) — what CharRNN.forward sees.
    ids = jax.random.randint(k_x, (B, T), 0, VOCAB)
    x = jax.nn.one_hot(ids, VOCAB, dtype=jnp.float32)

    # init_hidden(batch_size): zeros of shape (n_layers, B, n_hidden)
    h0 = jnp.zeros((LAYERS, B, HIDDEN), jnp.float32)
    c0 = jnp.zeros((LAYERS, B, HIDDEN), jnp.float32)

    raw = init_raw_params(k_p, VOCAB, HIDDEN)
    params = prepare_params(raw, VOCAB, HIDDEN)

    out, (hn, cn) = char_rnn_forward(x, h0, c0, params)
    jax.block_until_ready((out, hn, cn))

    assert out.shape == (B * T, VOCAB)
    assert hn.shape == (LAYERS, B, HIDDEN) and cn.shape == (LAYERS, B, HIDDEN)

    # Loose tolerance: kernel uses bf16 MXU operands (f32 accumulation).
    ref_out, (ref_hn, ref_cn) = reference_forward(x, h0, c0, raw)
    err_out = float(jnp.max(jnp.abs(out - ref_out)))
    err_hn = float(jnp.max(jnp.abs(hn - ref_hn)))
    err_cn = float(jnp.max(jnp.abs(cn - ref_cn)))
    assert err_out < 5e-2 and err_hn < 5e-2 and err_cn < 5e-2, (
        f"mismatch: out={err_out} hn={err_hn} cn={err_cn}")

    print("KERNEL_OK")
</pallas_src>

<mosaic_0001>
module attributes {stable_mosaic.version = 11 : i64} {
  func.func @_charrnn_kernel(%arg0: i32, %arg1: memref<16x8xi32, #tpu.memory_space<vmem>>, %arg2: memref<2x16x128xf32, #tpu.memory_space<vmem>>, %arg3: memref<2x16x128xf32, #tpu.memory_space<vmem>>, %arg4: memref<128x512xbf16, #tpu.memory_space<vmem>>, %arg5: memref<1x512xf32, #tpu.memory_space<vmem>>, %arg6: memref<128x1024xbf16, #tpu.memory_space<vmem>>, %arg7: memref<1x512xf32, #tpu.memory_space<vmem>>, %arg8: memref<128x640xbf16, #tpu.memory_space<vmem>>, %arg9: memref<1x128xf32, #tpu.memory_space<vmem>>, %arg10: memref<16x1024xf32, #tpu.memory_space<vmem>>, %arg11: memref<2x16x128xf32, #tpu.memory_space<vmem>>, %arg12: memref<2x16x128xf32, #tpu.memory_space<vmem>>, %arg13: memref<128x512xf32, #tpu.memory_space<vmem>>) attributes {dimension_semantics = [#tpu.dimension_semantics<parallel>], iteration_bounds = array<i64: 1>, scalar_prefetch = 0 : i64, scratch_operands = 1 : i64, tpu.core_type = #tpu.core_type<tc>, window_params = [{transform_indices = @transform_0, window_bounds = array<i64: 16, 8>}, {transform_indices = @transform_1, window_bounds = array<i64: 2, 16, 128>}, {transform_indices = @transform_2, window_bounds = array<i64: 2, 16, 128>}, {pipeline_mode = #tpu.pipeline_mode<synchronous>, transform_indices = @transform_3, window_bounds = array<i64: 128, 512>}, {pipeline_mode = #tpu.pipeline_mode<synchronous>, transform_indices = @transform_4, window_bounds = array<i64: 1, 512>}, {pipeline_mode = #tpu.pipeline_mode<synchronous>, transform_indices = @transform_5, window_bounds = array<i64: 128, 1024>}, {pipeline_mode = #tpu.pipeline_mode<synchronous>, transform_indices = @transform_6, window_bounds = array<i64: 1, 512>}, {pipeline_mode = #tpu.pipeline_mode<synchronous>, transform_indices = @transform_7, window_bounds = array<i64: 128, 640>}, {pipeline_mode = #tpu.pipeline_mode<synchronous>, transform_indices = @transform_8, window_bounds = array<i64: 1, 128>}, {transform_indices = @transform_9, window_bounds = array<i64: 16, 1024>}, {transform_indices = @transform_10, window_bounds = array<i64: 2, 16, 128>}, {transform_indices = @transform_11, window_bounds = array<i64: 2, 16, 128>}]} {
    %c0 = arith.constant 0 : index
    %c0_0 = arith.constant 0 : index
    %0 = vector.load %arg1[%c0, %c0_0] : memref<16x8xi32, #tpu.memory_space<vmem>>, vector<16x8xi32>
    %c0_1 = arith.constant 0 : index
    %c0_2 = arith.constant 0 : index
    %1 = vector.load %arg4[%c0_1, %c0_2] : memref<128x512xbf16, #tpu.memory_space<vmem>>, vector<128x512xbf16>
    %c0_3 = arith.constant 0 : index
    %c0_4 = arith.constant 0 : index
    %2 = vector.load %arg5[%c0_3, %c0_4] : memref<1x512xf32, #tpu.memory_space<vmem>>, vector<1x512xf32>
    %3 = vector.shape_cast %2 : vector<1x512xf32> to vector<1x512xf32>
    %4 = vector.broadcast %3 : vector<1x512xf32> to vector<16x512xf32>
    %5 = tpu.iota {dimensions = array<i32: 1>} : vector<16x128xi32>
    %6 = vector.extract_strided_slice %0 {offsets = [0, 0], sizes = [16, 1], strides = [1, 1]} : vector<16x8xi32> to vector<16x1xi32>
    %7 = vector.broadcast %6 : vector<16x1xi32> to vector<16x128xi32>
    %8 = arith.cmpi eq, %7, %5 : vector<16x128xi32>
    %9 = arith.extui %8 : vector<16x128xi1> to vector<16x128xi32>
    %10 = arith.sitofp %9 : vector<16x128xi32> to vector<16x128xf32>
    %11 = arith.truncf %10 : vector<16x128xf32> to vector<16x128xbf16>
    %cst = arith.constant dense<0.000000e+00> : vector<16x512xf32>
    %12 = tpu.matmul %11, %1, %cst {dimension_numbers = #tpu.dot_dimension_numbers<[1], [0], [0], [1], [0, 0, 1, 1], [], []>} : vector<16x128xbf16>, vector<128x512xbf16>, vector<16x512xf32> -> vector<16x512xf32>
    %13 = arith.addf %12, %4 : vector<16x512xf32>
    %c0_5 = arith.constant 0 : index
    %c0_6 = arith.constant 0 : index
    %14 = vector.load %arg13[%c0_5, %c0_6] : memref<128x512xf32, #tpu.memory_space<vmem>>, vector<16x512xf32>
    tpu.vector_store %arg13[%c0_5, %c0_6], %13 {strides = array<i32>} : memref<128x512xf32, #tpu.memory_space<vmem>>, vector<16x512xf32>,
    %15 = vector.extract_strided_slice %0 {offsets = [0, 1], sizes = [16, 1], strides = [1, 1]} : vector<16x8xi32> to vector<16x1xi32>
    %16 = vector.broadcast %15 : vector<16x1xi32> to vector<16x128xi32>
    %17 = arith.cmpi eq, %16, %5 : vector<16x128xi32>
    %18 = arith.extui %17 : vector<16x128xi1> to vector<16x128xi32>
    %19 = arith.sitofp %18 : vector<16x128xi32> to vector<16x128xf32>
    %20 = arith.truncf %19 : vector<16x128xf32> to vector<16x128xbf16>
    %cst_7 = arith.constant dense<0.000000e+00> : vector<16x512xf32>
    %21 = tpu.matmul %20, %1, %cst_7 {dimension_numbers = #tpu.dot_dimension_numbers<[1], [0], [0], [1], [0, 0, 1, 1], [], []>} : vector<16x128xbf16>, vector<128x512xbf16>, vector<16x512xf32> -> vector<16x512xf32>
    %22 = arith.addf %21, %4 : vector<16x512xf32>
    %c16 = arith.constant 16 : index
    %c0_8 = arith.constant 0 : index
    %23 = vector.load %arg13[%c16, %c0_8] : memref<128x512xf32, #tpu.memory_space<vmem>>, vector<16x512xf32>
    tpu.vector_store %arg13[%c16, %c0_8], %22 {strides = array<i32>} : memref<128x512xf32, #tpu.memory_space<vmem>>, vector<16x512xf32>,
    %24 = vector.extract_strided_slice %0 {offsets = [0, 2], sizes = [16, 1], strides = [1, 1]} : vector<16x8xi32> to vector<16x1xi32>
    %25 = vector.broadcast %24 : vector<16x1xi32> to vector<16x128xi32>
    %26 = arith.cmpi eq, %25, %5 : vector<16x128xi32>
    %27 = arith.extui %26 : vector<16x128xi1> to vector<16x128xi32>
    %28 = arith.sitofp %27 : vector<16x128xi32> to vector<16x128xf32>
    %29 = arith.truncf %28 : vector<16x128xf32> to vector<16x128xbf16>
    %cst_9 = arith.constant dense<0.000000e+00> : vector<16x512xf32>
    %30 = tpu.matmul %29, %1, %cst_9 {dimension_numbers = #tpu.dot_dimension_numbers<[1], [0], [0], [1], [0, 0, 1, 1], [], []>} : vector<16x128xbf16>, vector<128x512xbf16>, vector<16x512xf32> -> vector<16x512xf32>
    %31 = arith.addf %30, %4 : vector<16x512xf32>
    %c32 = arith.constant 32 : index
    %c0_10 = arith.constant 0 : index
    %32 = vector.load %arg13[%c32, %c0_10] : memref<128x512xf32, #tpu.memory_space<vmem>>, vector<16x512xf32>
    tpu.vector_store %arg13[%c32, %c0_10], %31 {strides = array<i32>} : memref<128x512xf32, #tpu.memory_space<vmem>>, vector<16x512xf32>,
    %33 = vector.extract_strided_slice %0 {offsets = [0, 3], sizes = [16, 1], strides = [1, 1]} : vector<16x8xi32> to vector<16x1xi32>
    %34 = vector.broadcast %33 : vector<16x1xi32> to vector<16x128xi32>
    %35 = arith.cmpi eq, %34, %5 : vector<16x128xi32>
    %36 = arith.extui %35 : vector<16x128xi1> to vector<16x128xi32>
    %37 = arith.sitofp %36 : vector<16x128xi32> to vector<16x128xf32>
    %38 = arith.truncf %37 : vector<16x128xf32> to vector<16x128xbf16>
    %cst_11 = arith.constant dense<0.000000e+00> : vector<16x512xf32>
    %39 = tpu.matmul %38, %1, %cst_11 {dimension_numbers = #tpu.dot_dimension_numbers<[1], [0], [0], [1], [0, 0, 1, 1], [], []>} : vector<16x128xbf16>, vector<128x512xbf16>, vector<16x512xf32> -> vector<16x512xf32>
    %40 = arith.addf %39, %4 : vector<16x512xf32>
    %c48 = arith.constant 48 : index
    %c0_12 = arith.constant 0 : index
    %41 = vector.load %arg13[%c48, %c0_12] : memref<128x512xf32, #tpu.memory_space<vmem>>, vector<16x512xf32>
    tpu.vector_store %arg13[%c48, %c0_12], %40 {strides = array<i32>} : memref<128x512xf32, #tpu.memory_space<vmem>>, vector<16x512xf32>,
    %42 = vector.extract_strided_slice %0 {offsets = [0, 4], sizes = [16, 1], strides = [1, 1]} : vector<16x8xi32> to vector<16x1xi32>
    %43 = vector.broadcast %42 : vector<16x1xi32> to vector<16x128xi32>
    %44 = arith.cmpi eq, %43, %5 : vector<16x128xi32>
    %45 = arith.extui %44 : vector<16x128xi1> to vector<16x128xi32>
    %46 = arith.sitofp %45 : vector<16x128xi32> to vector<16x128xf32>
    %47 = arith.truncf %46 : vector<16x128xf32> to vector<16x128xbf16>
    %cst_13 = arith.constant dense<0.000000e+00> : vector<16x512xf32>
    %48 = tpu.matmul %47, %1, %cst_13 {dimension_numbers = #tpu.dot_dimension_numbers<[1], [0], [0], [1], [0, 0, 1, 1], [], []>} : vector<16x128xbf16>, vector<128x512xbf16>, vector<16x512xf32> -> vector<16x512xf32>
    %49 = arith.addf %48, %4 : vector<16x512xf32>
    %c64 = arith.constant 64 : index
    %c0_14 = arith.constant 0 : index
    %50 = vector.load %arg13[%c64, %c0_14] : memref<128x512xf32, #tpu.memory_space<vmem>>, vector<16x512xf32>
    tpu.vector_store %arg13[%c64, %c0_14], %49 {strides = array<i32>} : memref<128x512xf32, #tpu.memory_space<vmem>>, vector<16x512xf32>,
    %51 = vector.extract_strided_slice %0 {offsets = [0, 5], sizes = [16, 1], strides = [1, 1]} : vector<16x8xi32> to vector<16x1xi32>
    %52 = vector.broadcast %51 : vector<16x1xi32> to vector<16x128xi32>
    %53 = arith.cmpi eq, %52, %5 : vector<16x128xi32>
    %54 = arith.extui %53 : vector<16x128xi1> to vector<16x128xi32>
    %55 = arith.sitofp %54 : vector<16x128xi32> to vector<16x128xf32>
    %56 = arith.truncf %55 : vector<16x128xf32> to vector<16x128xbf16>
    %cst_15 = arith.constant dense<0.000000e+00> : vector<16x512xf32>
    %57 = tpu.matmul %56, %1, %cst_15 {dimension_numbers = #tpu.dot_dimension_numbers<[1], [0], [0], [1], [0, 0, 1, 1], [], []>} : vector<16x128xbf16>, vector<128x512xbf16>, vector<16x512xf32> -> vector<16x512xf32>
    %58 = arith.addf %57, %4 : vector<16x512xf32>
    %c80 = arith.constant 80 : index
    %c0_16 = arith.constant 0 : index
    %59 = vector.load %arg13[%c80, %c0_16] : memref<128x512xf32, #tpu.memory_space<vmem>>, vector<16x512xf32>
    tpu.vector_store %arg13[%c80, %c0_16], %58 {strides = array<i32>} : memref<128x512xf32, #tpu.memory_space<vmem>>, vector<16x512xf32>,
    %60 = vector.extract_strided_slice %0 {offsets = [0, 6], sizes = [16, 1], strides = [1, 1]} : vector<16x8xi32> to vector<16x1xi32>
    %61 = vector.broadcast %60 : vector<16x1xi32> to vector<16x128xi32>
    %62 = arith.cmpi eq, %61, %5 : vector<16x128xi32>
    %63 = arith.extui %62 : vector<16x128xi1> to vector<16x128xi32>
    %64 = arith.sitofp %63 : vector<16x128xi32> to vector<16x128xf32>
    %65 = arith.truncf %64 : vector<16x128xf32> to vector<16x128xbf16>
    %cst_17 = arith.constant dense<0.000000e+00> : vector<16x512xf32>
    %66 = tpu.matmul %65, %1, %cst_17 {dimension_numbers = #tpu.dot_dimension_numbers<[1], [0], [0], [1], [0, 0, 1, 1], [], []>} : vector<16x128xbf16>, vector<128x512xbf16>, vector<16x512xf32> -> vector<16x512xf32>
    %67 = arith.addf %66, %4 : vector<16x512xf32>
    %c96 = arith.constant 96 : index
    %c0_18 = arith.constant 0 : index
    %68 = vector.load %arg13[%c96, %c0_18] : memref<128x512xf32, #tpu.memory_space<vmem>>, vector<16x512xf32>
    tpu.vector_store %arg13[%c96, %c0_18], %67 {strides = array<i32>} : memref<128x512xf32, #tpu.memory_space<vmem>>, vector<16x512xf32>,
    %69 = vector.extract_strided_slice %0 {offsets = [0, 7], sizes = [16, 1], strides = [1, 1]} : vector<16x8xi32> to vector<16x1xi32>
    %70 = vector.broadcast %69 : vector<16x1xi32> to vector<16x128xi32>
    %71 = arith.cmpi eq, %70, %5 : vector<16x128xi32>
    %72 = arith.extui %71 : vector<16x128xi1> to vector<16x128xi32>
    %73 = arith.sitofp %72 : vector<16x128xi32> to vector<16x128xf32>
    %74 = arith.truncf %73 : vector<16x128xf32> to vector<16x128xbf16>
    %cst_19 = arith.constant dense<0.000000e+00> : vector<16x512xf32>
    %75 = tpu.matmul %74, %1, %cst_19 {dimension_numbers = #tpu.dot_dimension_numbers<[1], [0], [0], [1], [0, 0, 1, 1], [], []>} : vector<16x128xbf16>, vector<128x512xbf16>, vector<16x512xf32> -> vector<16x512xf32>
    %76 = arith.addf %75, %4 : vector<16x512xf32>
    %c112 = arith.constant 112 : index
    %c0_20 = arith.constant 0 : index
    %77 = vector.load %arg13[%c112, %c0_20] : memref<128x512xf32, #tpu.memory_space<vmem>>, vector<16x512xf32>
    tpu.vector_store %arg13[%c112, %c0_20], %76 {strides = array<i32>} : memref<128x512xf32, #tpu.memory_space<vmem>>, vector<16x512xf32>,
    %c0_21 = arith.constant 0 : index
    %c0_22 = arith.constant 0 : index
    %78 = vector.load %arg6[%c0_21, %c0_22] : memref<128x1024xbf16, #tpu.memory_space<vmem>>, vector<128x1024xbf16>
    %c0_23 = arith.constant 0 : index
    %c0_24 = arith.constant 0 : index
    %79 = vector.load %arg8[%c0_23, %c0_24] : memref<128x640xbf16, #tpu.memory_space<vmem>>, vector<128x640xbf16>
    %c0_25 = arith.constant 0 : index
    %c0_26 = arith.constant 0 : index
    %80 = vector.load %arg7[%c0_25, %c0_26] : memref<1x512xf32, #tpu.memory_space<vmem>>, vector<1x512xf32>
    %81 = vector.shape_cast %80 : vector<1x512xf32> to vector<1x512xf32>
    %82 = vector.broadcast %81 : vector<1x512xf32> to vector<16x512xf32>
    %c0_27 = arith.constant 0 : index
    %c0_28 = arith.constant 0 : index
    %83 = vector.load %arg9[%c0_27, %c0_28] : memref<1x128xf32, #tpu.memory_space<vmem>>, vector<1x128xf32>
    %84 = vector.shape_cast %83 : vector<1x128xf32> to vector<1x128xf32>
    %85 = vector.broadcast %84 : vector<1x128xf32> to vector<16x128xf32>
    %c0_29 = arith.constant 0 : index
    %c0_30 = arith.constant 0 : index
    %c0_31 = arith.constant 0 : index
    %86 = vector.load %arg2[%c0_29, %c0_30, %c0_31] : memref<2x16x128xf32, #tpu.memory_space<vmem>>, vector<1x16x128xf32>
    %87 = vector.shape_cast %86 : vector<1x16x128xf32> to vector<16x128xf32>
    %c0_32 = arith.constant 0 : index
    %c0_33 = arith.constant 0 : index
    %c0_34 = arith.constant 0 : index
    %88 = vector.load %arg3[%c0_32, %c0_33, %c0_34] : memref<2x16x128xf32, #tpu.memory_space<vmem>>, vector<1x16x128xf32>
    %89 = vector.shape_cast %88 : vector<1x16x128xf32> to vector<16x128xf32>
    %c1 = arith.constant 1 : index
    %c0_35 = arith.constant 0 : index
    %c0_36 = arith.constant 0 : index
    %90 = vector.load %arg2[%c1, %c0_35, %c0_36] : memref<2x16x128xf32, #tpu.memory_space<vmem>>, vector<1x16x128xf32>
    %91 = vector.shape_cast %90 : vector<1x16x128xf32> to vector<16x128xf32>
    %c1_37 = arith.constant 1 : index
    %c0_38 = arith.constant 0 : index
    %c0_39 = arith.constant 0 : index
    %92 = vector.load %arg3[%c1_37, %c0_38, %c0_39] : memref<2x16x128xf32, #tpu.memory_space<vmem>>, vector<1x16x128xf32>
    %93 = vector.shape_cast %92 : vector<1x16x128xf32> to vector<16x128xf32>
    %94 = arith.truncf %87 : vector<16x128xf32> to vector<16x128xbf16>
    %95 = vector.extract_strided_slice %78 {offsets = [0, 0], sizes = [128, 512], strides = [1, 1]} : vector<128x1024xbf16> to vector<128x512xbf16>
    %cst_40 = arith.constant dense<0.000000e+00> : vector<16x512xf32>
    %96 = tpu.matmul %94, %95, %cst_40 {dimension_numbers = #tpu.dot_dimension_numbers<[1], [0], [0], [1], [0, 0, 1, 1], [], []>} : vector<16x128xbf16>, vector<128x512xbf16>, vector<16x512xf32> -> vector<16x512xf32>
    %97 = arith.truncf %91 : vector<16x128xf32> to vector<16x128xbf16>
    %98 = vector.extract_strided_slice %79 {offsets = [0, 0], sizes = [128, 512], strides = [1, 1]} : vector<128x640xbf16> to vector<128x512xbf16>
    %cst_41 = arith.constant dense<0.000000e+00> : vector<16x512xf32>
    %99 = tpu.matmul %97, %98, %cst_41 {dimension_numbers = #tpu.dot_dimension_numbers<[1], [0], [0], [1], [0, 0, 1, 1], [], []>} : vector<16x128xbf16>, vector<128x512xbf16>, vector<16x512xf32> -> vector<16x512xf32>
    %c0_42 = arith.constant 0 : index
    %c0_43 = arith.constant 0 : index
    %100 = vector.load %arg13[%c0_42, %c0_43] : memref<128x512xf32, #tpu.memory_space<vmem>>, vector<16x512xf32>
    %101 = arith.addf %100, %96 : vector<16x512xf32>
    %102 = vector.extract_strided_slice %101 {offsets = [0, 0], sizes = [16, 128], strides = [1, 1]} : vector<16x512xf32> to vector<16x128xf32>
    %103 = arith.negf %102 : vector<16x128xf32>
    %104 = math.exp %103 : vector<16x128xf32>
    %cst_44 = arith.constant 1.000000e+00 : f32
    %105 = vector.broadcast %cst_44 : f32 to vector<16x128xf32>
    %106 = arith.addf %105, %104 : vector<16x128xf32>
    %107 = arith.divf %105, %106 : vector<16x128xf32>
    %108 = vector.extract_strided_slice %101 {offsets = [0, 128], sizes = [16, 128], strides = [1, 1]} : vector<16x512xf32> to vector<16x128xf32>
    %109 = arith.negf %108 : vector<16x128xf32>
    %110 = math.exp %109 : vector<16x128xf32>
    %cst_45 = arith.constant 1.000000e+00 : f32
    %111 = vector.broadcast %cst_45 : f32 to vector<16x128xf32>
    %112 = arith.addf %111, %110 : vector<16x128xf32>
    %113 = arith.divf %111, %112 : vector<16x128xf32>
    %114 = vector.extract_strided_slice %101 {offsets = [0, 256], sizes = [16, 128], strides = [1, 1]} : vector<16x512xf32> to vector<16x128xf32>
    %115 = math.tanh %114 : vector<16x128xf32>
    %116 = vector.extract_strided_slice %101 {offsets = [0, 384], sizes = [16, 128], strides = [1, 1]} : vector<16x512xf32> to vector<16x128xf32>
    %117 = arith.negf %116 : vector<16x128xf32>
    %118 = math.exp %117 : vector<16x128xf32>
    %cst_46 = arith.constant 1.000000e+00 : f32
    %119 = vector.broadcast %cst_46 : f32 to vector<16x128xf32>
    %120 = arith.addf %119, %118 : vector<16x128xf32>
    %121 = arith.divf %119, %120 : vector<16x128xf32>
    %122 = arith.mulf %113, %89 : vector<16x128xf32>
    %123 = arith.mulf %107, %115 : vector<16x128xf32>
    %124 = arith.addf %122, %123 : vector<16x128xf32>
    %125 = math.tanh %124 : vector<16x128xf32>
    %126 = arith.mulf %121, %125 : vector<16x128xf32>
    %127 = arith.truncf %126 : vector<16x128xf32> to vector<16x128xbf16>
    %cst_47 = arith.constant dense<0.000000e+00> : vector<16x1024xf32>
    %128 = tpu.matmul %127, %78, %cst_47 {dimension_numbers = #tpu.dot_dimension_numbers<[1], [0], [0], [1], [0, 0, 1, 1], [], []>} : vector<16x128xbf16>, vector<128x1024xbf16>, vector<16x1024xf32> -> vector<16x1024xf32>
    %129 = vector.extract_strided_slice %128 {offsets = [0, 0], sizes = [16, 512], strides = [1, 1]} : vector<16x1024xf32> to vector<16x512xf32>
    %130 = vector.extract_strided_slice %128 {offsets = [0, 512], sizes = [16, 512], strides = [1, 1]} : vector<16x1024xf32> to vector<16x512xf32>
    %131 = arith.addf %130, %82 : vector<16x512xf32>
    %132 = arith.addf %131, %99 : vector<16x512xf32>
    %133 = vector.extract_strided_slice %132 {offsets = [0, 0], sizes = [16, 128], strides = [1, 1]} : vector<16x512xf32> to vector<16x128xf32>
    %134 = arith.negf %133 : vector<16x128xf32>
    %135 = math.exp %134 : vector<16x128xf32>
    %cst_48 = arith.constant 1.000000e+00 : f32
    %136 = vector.broadcast %cst_48 : f32 to vector<16x128xf32>
    %137 = arith.addf %136, %135 : vector<16x128xf32>
    %138 = arith.divf %136, %137 : vector<16x128xf32>
    %139 = vector.extract_strided_slice %132 {offsets = [0, 128], sizes = [16, 128], strides = [1, 1]} : vector<16x512xf32> to vector<16x128xf32>
    %140 = arith.negf %139 : vector<16x128xf32>
    %141 = math.exp %140 : vector<16x128xf32>
    %cst_49 = arith.constant 1.000000e+00 : f32
    %142 = vector.broadcast %cst_49 : f32 to vector<16x128xf32>
    %143 = arith.addf %142, %141 : vector<16x128xf32>
    %144 = arith.divf %142, %143 : vector<16x128xf32>
    %145 = vector.extract_strided_slice %132 {offsets = [0, 256], sizes = [16, 128], strides = [1, 1]} : vector<16x512xf32> to vector<16x128xf32>
    %146 = math.tanh %145 : vector<16x128xf32>
    %147 = vector.extract_strided_slice %132 {offsets = [0, 384], sizes = [16, 128], strides = [1, 1]} : vector<16x512xf32> to vector<16x128xf32>
    %148 = arith.negf %147 : vector<16x128xf32>
    %149 = math.exp %148 : vector<16x128xf32>
    %cst_50 = arith.constant 1.000000e+00 : f32
    %150 = vector.broadcast %cst_50 : f32 to vector<16x128xf32>
    %151 = arith.addf %150, %149 : vector<16x128xf32>
    %152 = arith.divf %150, %151 : vector<16x128xf32>
    %153 = arith.mulf %144, %93 : vector<16x128xf32>
    %154 = arith.mulf %138, %146 : vector<16x128xf32>
    %155 = arith.addf %153, %154 : vector<16x128xf32>
    %156 = math.tanh %155 : vector<16x128xf32>
    %157 = arith.mulf %152, %156 : vector<16x128xf32>
    %158 = arith.truncf %157 : vector<16x128xf32> to vector<16x128xbf16>
    %cst_51 = arith.constant dense<0.000000e+00> : vector<16x640xf32>
    %159 = tpu.matmul %158, %79, %cst_51 {dimension_numbers = #tpu.dot_dimension_numbers<[1], [0], [0], [1], [0, 0, 1, 1], [], []>} : vector<16x128xbf16>, vector<128x640xbf16>, vector<16x640xf32> -> vector<16x640xf32>
    %160 = vector.extract_strided_slice %159 {offsets = [0, 0], sizes = [16, 512], strides = [1, 1]} : vector<16x640xf32> to vector<16x512xf32>
    %161 = vector.extract_strided_slice %159 {offsets = [0, 512], sizes = [16, 128], strides = [1, 1]} : vector<16x640xf32> to vector<16x128xf32>
    %162 = arith.addf %161, %85 : vector<16x128xf32>
    %c0_52 = arith.constant 0 : index
    %c0_53 = arith.constant 0 : index
    %163 = vector.load %arg10[%c0_52, %c0_53] : memref<16x1024xf32, #tpu.memory_space<vmem>>, vector<16x128xf32>
    tpu.vector_store %arg10[%c0_52, %c0_53], %162 {strides = array<i32>} : memref<16x1024xf32, #tpu.memory_space<vmem>>, vector<16x128xf32>,
    %c16_54 = arith.constant 16 : index
    %c0_55 = arith.constant 0 : index
    %164 = vector.load %arg13[%c16_54, %c0_55] : memref<128x512xf32, #tpu.memory_space<vmem>>, vector<16x512xf32>
    %165 = arith.addf %164, %129 : vector<16x512xf32>
    %166 = vector.extract_strided_slice %165 {offsets = [0, 0], sizes = [16, 128], strides = [1, 1]} : vector<16x512xf32> to vector<16x128xf32>
    %167 = arith.negf %166 : vector<16x128xf32>
    %168 = math.exp %167 : vector<16x128xf32>
    %cst_56 = arith.constant 1.000000e+00 : f32
    %169 = vector.broadcast %cst_56 : f32 to vector<16x128xf32>
    %170 = arith.addf %169, %168 : vector<16x128xf32>
    %171 = arith.divf %169, %170 : vector<16x128xf32>
    %172 = vector.extract_strided_slice %165 {offsets = [0, 128], sizes = [16, 128], strides = [1, 1]} : vector<16x512xf32> to vector<16x128xf32>
    %173 = arith.negf %172 : vector<16x128xf32>
    %174 = math.exp %173 : vector<16x128xf32>
    %cst_57 = arith.constant 1.000000e+00 : f32
    %175 = vector.broadcast %cst_57 : f32 to vector<16x128xf32>
    %176 = arith.addf %175, %174 : vector<16x128xf32>
    %177 = arith.divf %175, %176 : vector<16x128xf32>
    %178 = vector.extract_strided_slice %165 {offsets = [0, 256], sizes = [16, 128], strides = [1, 1]} : vector<16x512xf32> to vector<16x128xf32>
    %179 = math.tanh %178 : vector<16x128xf32>
    %180 = vector.extract_strided_slice %165 {offsets = [0, 384], sizes = [16, 128], strides = [1, 1]} : vector<16x512xf32> to vector<16x128xf32>
    %181 = arith.negf %180 : vector<16x128xf32>
    %182 = math.exp %181 : vector<16x128xf32>
    %cst_58 = arith.constant 1.000000e+00 : f32
    %183 = vector.broadcast %cst_58 : f32 to vector<16x128xf32>
    %184 = arith.addf %183, %182 : vector<16x128xf32>
    %185 = arith.divf %183, %184 : vector<16x128xf32>
    %186 = arith.mulf %177, %124 : vector<16x128xf32>
    %187 = arith.mulf %171, %179 : vector<16x128xf32>
    %188 = arith.addf %186, %187 : vector<16x128xf32>
    %189 = math.tanh %188 : vector<16x128xf32>
    %190 = arith.mulf %185, %189 : vector<16x128xf32>
    %191 = arith.truncf %190 : vector<16x128xf32> to vector<16x128xbf16>
    %cst_59 = arith.constant dense<0.000000e+00> : vector<16x1024xf32>
    %192 = tpu.matmul %191, %78, %cst_59 {dimension_numbers = #tpu.dot_dimension_numbers<[1], [0], [0], [1], [0, 0, 1, 1], [], []>} : vector<16x128xbf16>, vector<128x1024xbf16>, vector<16x1024xf32> -> vector<16x1024xf32>
    %193 = vector.extract_strided_slice %192 {offsets = [0, 0], sizes = [16, 512], strides = [1, 1]} : vector<16x1024xf32> to vector<16x512xf32>
    %194 = vector.extract_strided_slice %192 {offsets = [0, 512], sizes = [16, 512], strides = [1, 1]} : vector<16x1024xf32> to vector<16x512xf32>
    %195 = arith.addf %194, %82 : vector<16x512xf32>
    %196 = arith.addf %195, %160 : vector<16x512xf32>
    %197 = vector.extract_strided_slice %196 {offsets = [0, 0], sizes = [16, 128], strides = [1, 1]} : vector<16x512xf32> to vector<16x128xf32>
    %198 = arith.negf %197 : vector<16x128xf32>
    %199 = math.exp %198 : vector<16x128xf32>
    %cst_60 = arith.constant 1.000000e+00 : f32
    %200 = vector.broadcast %cst_60 : f32 to vector<16x128xf32>
    %201 = arith.addf %200, %199 : vector<16x128xf32>
    %202 = arith.divf %200, %201 : vector<16x128xf32>
    %203 = vector.extract_strided_slice %196 {offsets = [0, 128], sizes = [16, 128], strides = [1, 1]} : vector<16x512xf32> to vector<16x128xf32>
    %204 = arith.negf %203 : vector<16x128xf32>
    %205 = math.exp %204 : vector<16x128xf32>
    %cst_61 = arith.constant 1.000000e+00 : f32
    %206 = vector.broadcast %cst_61 : f32 to vector<16x128xf32>
    %207 = arith.addf %206, %205 : vector<16x128xf32>
    %208 = arith.divf %206, %207 : vector<16x128xf32>
    %209 = vector.extract_strided_slice %196 {offsets = [0, 256], sizes = [16, 128], strides = [1, 1]} : vector<16x512xf32> to vector<16x128xf32>
    %210 = math.tanh %209 : vector<16x128xf32>
    %211 = vector.extract_strided_slice %196 {offsets = [0, 384], sizes = [16, 128], strides = [1, 1]} : vector<16x512xf32> to vector<16x128xf32>
    %212 = arith.negf %211 : vector<16x128xf32>
    %213 = math.exp %212 : vector<16x128xf32>
    %cst_62 = arith.constant 1.000000e+00 : f32
    %214 = vector.broadcast %cst_62 : f32 to vector<16x128xf32>
    %215 = arith.addf %214, %213 : vector<16x128xf32>
    %216 = arith.divf %214, %215 : vector<16x128xf32>
    %217 = arith.mulf %208, %155 : vector<16x128xf32>
    %218 = arith.mulf %202, %210 : vector<16x128xf32>
    %219 = arith.addf %217, %218 : vector<16x128xf32>
    %220 = math.tanh %219 : vector<16x128xf32>
    %221 = arith.mulf %216, %220 : vector<16x128xf32>
    %222 = arith.truncf %221 : vector<16x128xf32> to vector<16x128xbf16>
    %cst_63 = arith.constant dense<0.000000e+00> : vector<16x640xf32>
    %223 = tpu.matmul %222, %79, %cst_63 {dimension_numbers = #tpu.dot_dimension_numbers<[1], [0], [0], [1], [0, 0, 1, 1], [], []>} : vector<16x128xbf16>, vector<128x640xbf16>, vector<16x640xf32> -> vector<16x640xf32>
    %224 = vector.extract_strided_slice %223 {offsets = [0, 0], sizes = [16, 512], strides = [1, 1]} : vector<16x640xf32> to vector<16x512xf32>
    %225 = vector.extract_strided_slice %223 {offsets = [0, 512], sizes = [16, 128], strides = [1, 1]} : vector<16x640xf32> to vector<16x128xf32>
    %226 = arith.addf %225, %85 : vector<16x128xf32>
    %c0_64 = arith.constant 0 : index
    %c128 = arith.constant 128 : index
    %227 = vector.load %arg10[%c0_64, %c128] : memref<16x1024xf32, #tpu.memory_space<vmem>>, vector<16x128xf32>
    tpu.vector_store %arg10[%c0_64, %c128], %226 {strides = array<i32>} : memref<16x1024xf32, #tpu.memory_space<vmem>>, vector<16x128xf32>,
    %c32_65 = arith.constant 32 : index
    %c0_66 = arith.constant 0 : index
    %228 = vector.load %arg13[%c32_65, %c0_66] : memref<128x512xf32, #tpu.memory_space<vmem>>, vector<16x512xf32>
    %229 = arith.addf %228, %193 : vector<16x512xf32>
    %230 = vector.extract_strided_slice %229 {offsets = [0, 0], sizes = [16, 128], strides = [1, 1]} : vector<16x512xf32> to vector<16x128xf32>
    %231 = arith.negf %230 : vector<16x128xf32>
    %232 = math.exp %231 : vector<16x128xf32>
    %cst_67 = arith.constant 1.000000e+00 : f32
    %233 = vector.broadcast %cst_67 : f32 to vector<16x128xf32>
    %234 = arith.addf %233, %232 : vector<16x128xf32>
    %235 = arith.divf %233, %234 : vector<16x128xf32>
    %236 = vector.extract_strided_slice %229 {offsets = [0, 128], sizes = [16, 128], strides = [1, 1]} : vector<16x512xf32> to vector<16x128xf32>
    %237 = arith.negf %236 : vector<16x128xf32>
    %238 = math.exp %237 : vector<16x128xf32>
    %cst_68 = arith.constant 1.000000e+00 : f32
    %239 = vector.broadcast %cst_68 : f32 to vector<16x128xf32>
    %240 = arith.addf %239, %238 : vector<16x128xf32>
    %241 = arith.divf %239, %240 : vector<16x128xf32>
    %242 = vector.extract_strided_slice %229 {offsets = [0, 256], sizes = [16, 128], strides = [1, 1]} : vector<16x512xf32> to vector<16x128xf32>
    %243 = math.tanh %242 : vector<16x128xf32>
    %244 = vector.extract_strided_slice %229 {offsets = [0, 384], sizes = [16, 128], strides = [1, 1]} : vector<16x512xf32> to vector<16x128xf32>
    %245 = arith.negf %244 : vector<16x128xf32>
    %246 = math.exp %245 : vector<16x128xf32>
    %cst_69 = arith.constant 1.000000e+00 : f32
    %247 = vector.broadcast %cst_69 : f32 to vector<16x128xf32>
    %248 = arith.addf %247, %246 : vector<16x128xf32>
    %249 = arith.divf %247, %248 : vector<16x128xf32>
    %250 = arith.mulf %241, %188 : vector<16x128xf32>
    %251 = arith.mulf %235, %243 : vector<16x128xf32>
    %252 = arith.addf %250, %251 : vector<16x128xf32>
    %253 = math.tanh %252 : vector<16x128xf32>
    %254 = arith.mulf %249, %253 : vector<16x128xf32>
    %255 = arith.truncf %254 : vector<16x128xf32> to vector<16x128xbf16>
    %cst_70 = arith.constant dense<0.000000e+00> : vector<16x1024xf32>
    %256 = tpu.matmul %255, %78, %cst_70 {dimension_numbers = #tpu.dot_dimension_numbers<[1], [0], [0], [1], [0, 0, 1, 1], [], []>} : vector<16x128xbf16>, vector<128x1024xbf16>, vector<16x1024xf32> -> vector<16x1024xf32>
    %257 = vector.extract_strided_slice %256 {offsets = [0, 0], sizes = [16, 512], strides = [1, 1]} : vector<16x1024xf32> to vector<16x512xf32>
    %258 = vector.extract_strided_slice %256 {offsets = [0, 512], sizes = [16, 512], strides = [1, 1]} : vector<16x1024xf32> to vector<16x512xf32>
    %259 = arith.addf %258, %82 : vector<16x512xf32>
    %260 = arith.addf %259, %224 : vector<16x512xf32>
    %261 = vector.extract_strided_slice %260 {offsets = [0, 0], sizes = [16, 128], strides = [1, 1]} : vector<16x512xf32> to vector<16x128xf32>
    %262 = arith.negf %261 : vector<16x128xf32>
    %263 = math.exp %262 : vector<16x128xf32>
    %cst_71 = arith.constant 1.000000e+00 : f32
    %264 = vector.broadcast %cst_71 : f32 to vector<16x128xf32>
    %265 = arith.addf %264, %263 : vector<16x128xf32>
    %266 = arith.divf %264, %265 : vector<16x128xf32>
    %267 = vector.extract_strided_slice %260 {offsets = [0, 128], sizes = [16, 128], strides = [1, 1]} : vector<16x512xf32> to vector<16x128xf32>
    %268 = arith.negf %267 : vector<16x128xf32>
    %269 = math.exp %268 : vector<16x128xf32>
    %cst_72 = arith.constant 1.000000e+00 : f32
    %270 = vector.broadcast %cst_72 : f32 to vector<16x128xf32>
    %271 = arith.addf %270, %269 : vector<16x128xf32>
    %272 = arith.divf %270, %271 : vector<16x128xf32>
    %273 = vector.extract_strided_slice %260 {offsets = [0, 256], sizes = [16, 128], strides = [1, 1]} : vector<16x512xf32> to vector<16x128xf32>
    %274 = math.tanh %273 : vector<16x128xf32>
    %275 = vector.extract_strided_slice %260 {offsets = [0, 384], sizes = [16, 128], strides = [1, 1]} : vector<16x512xf32> to vector<16x128xf32>
    %276 = arith.negf %275 : vector<16x128xf32>
    %277 = math.exp %276 : vector<16x128xf32>
    %cst_73 = arith.constant 1.000000e+00 : f32
    %278 = vector.broadcast %cst_73 : f32 to vector<16x128xf32>
    %279 = arith.addf %278, %277 : vector<16x128xf32>
    %280 = arith.divf %278, %279 : vector<16x128xf32>
    %281 = arith.mulf %272, %219 : vector<16x128xf32>
    %282 = arith.mulf %266, %274 : vector<16x128xf32>
    %283 = arith.addf %281, %282 : vector<16x128xf32>
    %284 = math.tanh %283 : vector<16x128xf32>
    %285 = arith.mulf %280, %284 : vector<16x128xf32>
    %286 = arith.truncf %285 : vector<16x128xf32> to vector<16x128xbf16>
    %cst_74 = arith.constant dense<0.000000e+00> : vector<16x640xf32>
    %287 = tpu.matmul %286, %79, %cst_74 {dimension_numbers = #tpu.dot_dimension_numbers<[1], [0], [0], [1], [0, 0, 1, 1], [], []>} : vector<16x128xbf16>, vector<128x640xbf16>, vector<16x640xf32> -> vector<16x640xf32>
    %288 = vector.extract_strided_slice %287 {offsets = [0, 0], sizes = [16, 512], strides = [1, 1]} : vector<16x640xf32> to vector<16x512xf32>
    %289 = vector.extract_strided_slice %287 {offsets = [0, 512], sizes = [16, 128], strides = [1, 1]} : vector<16x640xf32> to vector<16x128xf32>
    %290 = arith.addf %289, %85 : vector<16x128xf32>
    %c0_75 = arith.constant 0 : index
    %c256 = arith.constant 256 : index
    %291 = vector.load %arg10[%c0_75, %c256] : memref<16x1024xf32, #tpu.memory_space<vmem>>, vector<16x128xf32>
    tpu.vector_store %arg10[%c0_75, %c256], %290 {strides = array<i32>} : memref<16x1024xf32, #tpu.memory_space<vmem>>, vector<16x128xf32>,
    %c48_76 = arith.constant 48 : index
    %c0_77 = arith.constant 0 : index
    %292 = vector.load %arg13[%c48_76, %c0_77] : memref<128x512xf32, #tpu.memory_space<vmem>>, vector<16x512xf32>
    %293 = arith.addf %292, %257 : vector<16x512xf32>
    %294 = vector.extract_strided_slice %293 {offsets = [0, 0], sizes = [16, 128], strides = [1, 1]} : vector<16x512xf32> to vector<16x128xf32>
    %295 = arith.negf %294 : vector<16x128xf32>
    %296 = math.exp %295 : vector<16x128xf32>
    %cst_78 = arith.constant 1.000000e+00 : f32
    %297 = vector.broadcast %cst_78 : f32 to vector<16x128xf32>
    %298 = arith.addf %297, %296 : vector<16x128xf32>
    %299 = arith.divf %297, %298 : vector<16x128xf32>
    %300 = vector.extract_strided_slice %293 {offsets = [0, 128], sizes = [16, 128], strides = [1, 1]} : vector<16x512xf32> to vector<16x128xf32>
    %301 = arith.negf %300 : vector<16x128xf32>
    %302 = math.exp %301 : vector<16x128xf32>
    %cst_79 = arith.constant 1.000000e+00 : f32
    %303 = vector.broadcast %cst_79 : f32 to vector<16x128xf32>
    %304 = arith.addf %303, %302 : vector<16x128xf32>
    %305 = arith.divf %303, %304 : vector<16x128xf32>
    %306 = vector.extract_strided_slice %293 {offsets = [0, 256], sizes = [16, 128], strides = [1, 1]} : vector<16x512xf32> to vector<16x128xf32>
    %307 = math.tanh %306 : vector<16x128xf32>
    %308 = vector.extract_strided_slice %293 {offsets = [0, 384], sizes = [16, 128], strides = [1, 1]} : vector<16x512xf32> to vector<16x128xf32>
    %309 = arith.negf %308 : vector<16x128xf32>
    %310 = math.exp %309 : vector<16x128xf32>
    %cst_80 = arith.constant 1.000000e+00 : f32
    %311 = vector.broadcast %cst_80 : f32 to vector<16x128xf32>
    %312 = arith.addf %311, %310 : vector<16x128xf32>
    %313 = arith.divf %311, %312 : vector<16x128xf32>
    %314 = arith.mulf %305, %252 : vector<16x128xf32>
    %315 = arith.mulf %299, %307 : vector<16x128xf32>
    %316 = arith.addf %314, %315 : vector<16x128xf32>
    %317 = math.tanh %316 : vector<16x128xf32>
    %318 = arith.mulf %313, %317 : vector<16x128xf32>
    %319 = arith.truncf %318 : vector<16x128xf32> to vector<16x128xbf16>
    %cst_81 = arith.constant dense<0.000000e+00> : vector<16x1024xf32>
    %320 = tpu.matmul %319, %78, %cst_81 {dimension_numbers = #tpu.dot_dimension_numbers<[1], [0], [0], [1], [0, 0, 1, 1], [], []>} : vector<16x128xbf16>, vector<128x1024xbf16>, vector<16x1024xf32> -> vector<16x1024xf32>
    %321 = vector.extract_strided_slice %320 {offsets = [0, 0], sizes = [16, 512], strides = [1, 1]} : vector<16x1024xf32> to vector<16x512xf32>
    %322 = vector.extract_strided_slice %320 {offsets = [0, 512], sizes = [16, 512], strides = [1, 1]} : vector<16x1024xf32> to vector<16x512xf32>
    %323 = arith.addf %322, %82 : vector<16x512xf32>
    %324 = arith.addf %323, %288 : vector<16x512xf32>
    %325 = vector.extract_strided_slice %324 {offsets = [0, 0], sizes = [16, 128], strides = [1, 1]} : vector<16x512xf32> to vector<16x128xf32>
    %326 = arith.negf %325 : vector<16x128xf32>
    %327 = math.exp %326 : vector<16x128xf32>
    %cst_82 = arith.constant 1.000000e+00 : f32
    %328 = vector.broadcast %cst_82 : f32 to vector<16x128xf32>
    %329 = arith.addf %328, %327 : vector<16x128xf32>
    %330 = arith.divf %328, %329 : vector<16x128xf32>
    %331 = vector.extract_strided_slice %324 {offsets = [0, 128], sizes = [16, 128], strides = [1, 1]} : vector<16x512xf32> to vector<16x128xf32>
    %332 = arith.negf %331 : vector<16x128xf32>
    %333 = math.exp %332 : vector<16x128xf32>
    %cst_83 = arith.constant 1.000000e+00 : f32
    %334 = vector.broadcast %cst_83 : f32 to vector<16x128xf32>
    %335 = arith.addf %334, %333 : vector<16x128xf32>
    %336 = arith.divf %334, %335 : vector<16x128xf32>
    %337 = vector.extract_strided_slice %324 {offsets = [0, 256], sizes = [16, 128], strides = [1, 1]} : vector<16x512xf32> to vector<16x128xf32>
    %338 = math.tanh %337 : vector<16x128xf32>
    %339 = vector.extract_strided_slice %324 {offsets = [0, 384], sizes = [16, 128], strides = [1, 1]} : vector<16x512xf32> to vector<16x128xf32>
    %340 = arith.negf %339 : vector<16x128xf32>
    %341 = math.exp %340 : vector<16x128xf32>
    %cst_84 = arith.constant 1.000000e+00 : f32
    %342 = vector.broadcast %cst_84 : f32 to vector<16x128xf32>
    %343 = arith.addf %342, %341 : vector<16x128xf32>
    %344 = arith.divf %342, %343 : vector<16x128xf32>
    %345 = arith.mulf %336, %283 : vector<16x128xf32>
    %346 = arith.mulf %330, %338 : vector<16x128xf32>
    %347 = arith.addf %345, %346 : vector<16x128xf32>
    %348 = math.tanh %347 : vector<16x128xf32>
    %349 = arith.mulf %344, %348 : vector<16x128xf32>
    %350 = arith.truncf %349 : vector<16x128xf32> to vector<16x128xbf16>
    %cst_85 = arith.constant dense<0.000000e+00> : vector<16x640xf32>
    %351 = tpu.matmul %350, %79, %cst_85 {dimension_numbers = #tpu.dot_dimension_numbers<[1], [0], [0], [1], [0, 0, 1, 1], [], []>} : vector<16x128xbf16>, vector<128x640xbf16>, vector<16x640xf32> -> vector<16x640xf32>
    %352 = vector.extract_strided_slice %351 {offsets = [0, 0], sizes = [16, 512], strides = [1, 1]} : vector<16x640xf32> to vector<16x512xf32>
    %353 = vector.extract_strided_slice %351 {offsets = [0, 512], sizes = [16, 128], strides = [1, 1]} : vector<16x640xf32> to vector<16x128xf32>
    %354 = arith.addf %353, %85 : vector<16x128xf32>
    %c0_86 = arith.constant 0 : index
    %c384 = arith.constant 384 : index
    %355 = vector.load %arg10[%c0_86, %c384] : memref<16x1024xf32, #tpu.memory_space<vmem>>, vector<16x128xf32>
    tpu.vector_store %arg10[%c0_86, %c384], %354 {strides = array<i32>} : memref<16x1024xf32, #tpu.memory_space<vmem>>, vector<16x128xf32>,
    %c64_87 = arith.constant 64 : index
    %c0_88 = arith.constant 0 : index
    %356 = vector.load %arg13[%c64_87, %c0_88] : memref<128x512xf32, #tpu.memory_space<vmem>>, vector<16x512xf32>
    %357 = arith.addf %356, %321 : vector<16x512xf32>
    %358 = vector.extract_strided_slice %357 {offsets = [0, 0], sizes = [16, 128], strides = [1, 1]} : vector<16x512xf32> to vector<16x128xf32>
    %359 = arith.negf %358 : vector<16x128xf32>
    %360 = math.exp %359 : vector<16x128xf32>
    %cst_89 = arith.constant 1.000000e+00 : f32
    %361 = vector.broadcast %cst_89 : f32 to vector<16x128xf32>
    %362 = arith.addf %361, %360 : vector<16x128xf32>
    %363 = arith.divf %361, %362 : vector<16x128xf32>
    %364 = vector.extract_strided_slice %357 {offsets = [0, 128], sizes = [16, 128], strides = [1, 1]} : vector<16x512xf32> to vector<16x128xf32>
    %365 = arith.negf %364 : vector<16x128xf32>
    %366 = math.exp %365 : vector<16x128xf32>
    %cst_90 = arith.constant 1.000000e+00 : f32
    %367 = vector.broadcast %cst_90 : f32 to vector<16x128xf32>
    %368 = arith.addf %367, %366 : vector<16x128xf32>
    %369 = arith.divf %367, %368 : vector<16x128xf32>
    %370 = vector.extract_strided_slice %357 {offsets = [0, 256], sizes = [16, 128], strides = [1, 1]} : vector<16x512xf32> to vector<16x128xf32>
    %371 = math.tanh %370 : vector<16x128xf32>
    %372 = vector.extract_strided_slice %357 {offsets = [0, 384], sizes = [16, 128], strides = [1, 1]} : vector<16x512xf32> to vector<16x128xf32>
    %373 = arith.negf %372 : vector<16x128xf32>
    %374 = math.exp %373 : vector<16x128xf32>
    %cst_91 = arith.constant 1.000000e+00 : f32
    %375 = vector.broadcast %cst_91 : f32 to vector<16x128xf32>
    %376 = arith.addf %375, %374 : vector<16x128xf32>
    %377 = arith.divf %375, %376 : vector<16x128xf32>
    %378 = arith.mulf %369, %316 : vector<16x128xf32>
    %379 = arith.mulf %363, %371 : vector<16x128xf32>
    %380 = arith.addf %378, %379 : vector<16x128xf32>
    %381 = math.tanh %380 : vector<16x128xf32>
    %382 = arith.mulf %377, %381 : vector<16x128xf32>
    %383 = arith.truncf %382 : vector<16x128xf32> to vector<16x128xbf16>
    %cst_92 = arith.constant dense<0.000000e+00> : vector<16x1024xf32>
    %384 = tpu.matmul %383, %78, %cst_92 {dimension_numbers = #tpu.dot_dimension_numbers<[1], [0], [0], [1], [0, 0, 1, 1], [], []>} : vector<16x128xbf16>, vector<128x1024xbf16>, vector<16x1024xf32> -> vector<16x1024xf32>
    %385 = vector.extract_strided_slice %384 {offsets = [0, 0], sizes = [16, 512], strides = [1, 1]} : vector<16x1024xf32> to vector<16x512xf32>
    %386 = vector.extract_strided_slice %384 {offsets = [0, 512], sizes = [16, 512], strides = [1, 1]} : vector<16x1024xf32> to vector<16x512xf32>
    %387 = arith.addf %386, %82 : vector<16x512xf32>
    %388 = arith.addf %387, %352 : vector<16x512xf32>
    %389 = vector.extract_strided_slice %388 {offsets = [0, 0], sizes = [16, 128], strides = [1, 1]} : vector<16x512xf32> to vector<16x128xf32>
    %390 = arith.negf %389 : vector<16x128xf32>
    %391 = math.exp %390 : vector<16x128xf32>
    %cst_93 = arith.constant 1.000000e+00 : f32
    %392 = vector.broadcast %cst_93 : f32 to vector<16x128xf32>
    %393 = arith.addf %392, %391 : vector<16x128xf32>
    %394 = arith.divf %392, %393 : vector<16x128xf32>
    %395 = vector.extract_strided_slice %388 {offsets = [0, 128], sizes = [16, 128], strides = [1, 1]} : vector<16x512xf32> to vector<16x128xf32>
    %396 = arith.negf %395 : vector<16x128xf32>
    %397 = math.exp %396 : vector<16x128xf32>
    %cst_94 = arith.constant 1.000000e+00 : f32
    %398 = vector.broadcast %cst_94 : f32 to vector<16x128xf32>
    %399 = arith.addf %398, %397 : vector<16x128xf32>
    %400 = arith.divf %398, %399 : vector<16x128xf32>
    %401 = vector.extract_strided_slice %388 {offsets = [0, 256], sizes = [16, 128], strides = [1, 1]} : vector<16x512xf32> to vector<16x128xf32>
    %402 = math.tanh %401 : vector<16x128xf32>
    %403 = vector.extract_strided_slice %388 {offsets = [0, 384], sizes = [16, 128], strides = [1, 1]} : vector<16x512xf32> to vector<16x128xf32>
    %404 = arith.negf %403 : vector<16x128xf32>
    %405 = math.exp %404 : vector<16x128xf32>
    %cst_95 = arith.constant 1.000000e+00 : f32
    %406 = vector.broadcast %cst_95 : f32 to vector<16x128xf32>
    %407 = arith.addf %406, %405 : vector<16x128xf32>
    %408 = arith.divf %406, %407 : vector<16x128xf32>
    %409 = arith.mulf %400, %347 : vector<16x128xf32>
    %410 = arith.mulf %394, %402 : vector<16x128xf32>
    %411 = arith.addf %409, %410 : vector<16x128xf32>
    %412 = math.tanh %411 : vector<16x128xf32>
    %413 = arith.mulf %408, %412 : vector<16x128xf32>
    %414 = arith.truncf %413 : vector<16x128xf32> to vector<16x128xbf16>
    %cst_96 = arith.constant dense<0.000000e+00> : vector<16x640xf32>
    %415 = tpu.matmul %414, %79, %cst_96 {dimension_numbers = #tpu.dot_dimension_numbers<[1], [0], [0], [1], [0, 0, 1, 1], [], []>} : vector<16x128xbf16>, vector<128x640xbf16>, vector<16x640xf32> -> vector<16x640xf32>
    %416 = vector.extract_strided_slice %415 {offsets = [0, 0], sizes = [16, 512], strides = [1, 1]} : vector<16x640xf32> to vector<16x512xf32>
    %417 = vector.extract_strided_slice %415 {offsets = [0, 512], sizes = [16, 128], strides = [1, 1]} : vector<16x640xf32> to vector<16x128xf32>
    %418 = arith.addf %417, %85 : vector<16x128xf32>
    %c0_97 = arith.constant 0 : index
    %c512 = arith.constant 512 : index
    %419 = vector.load %arg10[%c0_97, %c512] : memref<16x1024xf32, #tpu.memory_space<vmem>>, vector<16x128xf32>
    tpu.vector_store %arg10[%c0_97, %c512], %418 {strides = array<i32>} : memref<16x1024xf32, #tpu.memory_space<vmem>>, vector<16x128xf32>,
    %c80_98 = arith.constant 80 : index
    %c0_99 = arith.constant 0 : index
    %420 = vector.load %arg13[%c80_98, %c0_99] : memref<128x512xf32, #tpu.memory_space<vmem>>, vector<16x512xf32>
    %421 = arith.addf %420, %385 : vector<16x512xf32>
    %422 = vector.extract_strided_slice %421 {offsets = [0, 0], sizes = [16, 128], strides = [1, 1]} : vector<16x512xf32> to vector<16x128xf32>
    %423 = arith.negf %422 : vector<16x128xf32>
    %424 = math.exp %423 : vector<16x128xf32>
    %cst_100 = arith.constant 1.000000e+00 : f32
    %425 = vector.broadcast %cst_100 : f32 to vector<16x128xf32>
    %426 = arith.addf %425, %424 : vector<16x128xf32>
    %427 = arith.divf %425, %426 : vector<16x128xf32>
    %428 = vector.extract_strided_slice %421 {offsets = [0, 128], sizes = [16, 128], strides = [1, 1]} : vector<16x512xf32> to vector<16x128xf32>
    %429 = arith.negf %428 : vector<16x128xf32>
    %430 = math.exp %429 : vector<16x128xf32>
    %cst_101 = arith.constant 1.000000e+00 : f32
    %431 = vector.broadcast %cst_101 : f32 to vector<16x128xf32>
    %432 = arith.addf %431, %430 : vector<16x128xf32>
    %433 = arith.divf %431, %432 : vector<16x128xf32>
    %434 = vector.extract_strided_slice %421 {offsets = [0, 256], sizes = [16, 128], strides = [1, 1]} : vector<16x512xf32> to vector<16x128xf32>
    %435 = math.tanh %434 : vector<16x128xf32>
    %436 = vector.extract_strided_slice %421 {offsets = [0, 384], sizes = [16, 128], strides = [1, 1]} : vector<16x512xf32> to vector<16x128xf32>
    %437 = arith.negf %436 : vector<16x128xf32>
    %438 = math.exp %437 : vector<16x128xf32>
    %cst_102 = arith.constant 1.000000e+00 : f32
    %439 = vector.broadcast %cst_102 : f32 to vector<16x128xf32>
    %440 = arith.addf %439, %438 : vector<16x128xf32>
    %441 = arith.divf %439, %440 : vector<16x128xf32>
    %442 = arith.mulf %433, %380 : vector<16x128xf32>
    %443 = arith.mulf %427, %435 : vector<16x128xf32>
    %444 = arith.addf %442, %443 : vector<16x128xf32>
    %445 = math.tanh %444 : vector<16x128xf32>
    %446 = arith.mulf %441, %445 : vector<16x128xf32>
    %447 = arith.truncf %446 : vector<16x128xf32> to vector<16x128xbf16>
    %cst_103 = arith.constant dense<0.000000e+00> : vector<16x1024xf32>
    %448 = tpu.matmul %447, %78, %cst_103 {dimension_numbers = #tpu.dot_dimension_numbers<[1], [0], [0], [1], [0, 0, 1, 1], [], []>} : vector<16x128xbf16>, vector<128x1024xbf16>, vector<16x1024xf32> -> vector<16x1024xf32>
    %449 = vector.extract_strided_slice %448 {offsets = [0, 0], sizes = [16, 512], strides = [1, 1]} : vector<16x1024xf32> to vector<16x512xf32>
    %450 = vector.extract_strided_slice %448 {offsets = [0, 512], sizes = [16, 512], strides = [1, 1]} : vector<16x1024xf32> to vector<16x512xf32>
    %451 = arith.addf %450, %82 : vector<16x512xf32>
    %452 = arith.addf %451, %416 : vector<16x512xf32>
    %453 = vector.extract_strided_slice %452 {offsets = [0, 0], sizes = [16, 128], strides = [1, 1]} : vector<16x512xf32> to vector<16x128xf32>
    %454 = arith.negf %453 : vector<16x128xf32>
    %455 = math.exp %454 : vector<16x128xf32>
    %cst_104 = arith.constant 1.000000e+00 : f32
    %456 = vector.broadcast %cst_104 : f32 to vector<16x128xf32>
    %457 = arith.addf %456, %455 : vector<16x128xf32>
    %458 = arith.divf %456, %457 : vector<16x128xf32>
    %459 = vector.extract_strided_slice %452 {offsets = [0, 128], sizes = [16, 128], strides = [1, 1]} : vector<16x512xf32> to vector<16x128xf32>
    %460 = arith.negf %459 : vector<16x128xf32>
    %461 = math.exp %460 : vector<16x128xf32>
    %cst_105 = arith.constant 1.000000e+00 : f32
    %462 = vector.broadcast %cst_105 : f32 to vector<16x128xf32>
    %463 = arith.addf %462, %461 : vector<16x128xf32>
    %464 = arith.divf %462, %463 : vector<16x128xf32>
    %465 = vector.extract_strided_slice %452 {offsets = [0, 256], sizes = [16, 128], strides = [1, 1]} : vector<16x512xf32> to vector<16x128xf32>
    %466 = math.tanh %465 : vector<16x128xf32>
    %467 = vector.extract_strided_slice %452 {offsets = [0, 384], sizes = [16, 128], strides = [1, 1]} : vector<16x512xf32> to vector<16x128xf32>
    %468 = arith.negf %467 : vector<16x128xf32>
    %469 = math.exp %468 : vector<16x128xf32>
    %cst_106 = arith.constant 1.000000e+00 : f32
    %470 = vector.broadcast %cst_106 : f32 to vector<16x128xf32>
    %471 = arith.addf %470, %469 : vector<16x128xf32>
    %472 = arith.divf %470, %471 : vector<16x128xf32>
    %473 = arith.mulf %464, %411 : vector<16x128xf32>
    %474 = arith.mulf %458, %466 : vector<16x128xf32>
    %475 = arith.addf %473, %474 : vector<16x128xf32>
    %476 = math.tanh %475 : vector<16x128xf32>
    %477 = arith.mulf %472, %476 : vector<16x128xf32>
    %478 = arith.truncf %477 : vector<16x128xf32> to vector<16x128xbf16>
    %cst_107 = arith.constant dense<0.000000e+00> : vector<16x640xf32>
    %479 = tpu.matmul %478, %79, %cst_107 {dimension_numbers = #tpu.dot_dimension_numbers<[1], [0], [0], [1], [0, 0, 1, 1], [], []>} : vector<16x128xbf16>, vector<128x640xbf16>, vector<16x640xf32> -> vector<16x640xf32>
    %480 = vector.extract_strided_slice %479 {offsets = [0, 0], sizes = [16, 512], strides = [1, 1]} : vector<16x640xf32> to vector<16x512xf32>
    %481 = vector.extract_strided_slice %479 {offsets = [0, 512], sizes = [16, 128], strides = [1, 1]} : vector<16x640xf32> to vector<16x128xf32>
    %482 = arith.addf %481, %85 : vector<16x128xf32>
    %c0_108 = arith.constant 0 : index
    %c640 = arith.constant 640 : index
    %483 = vector.load %arg10[%c0_108, %c640] : memref<16x1024xf32, #tpu.memory_space<vmem>>, vector<16x128xf32>
    tpu.vector_store %arg10[%c0_108, %c640], %482 {strides = array<i32>} : memref<16x1024xf32, #tpu.memory_space<vmem>>, vector<16x128xf32>,
    %c96_109 = arith.constant 96 : index
    %c0_110 = arith.constant 0 : index
    %484 = vector.load %arg13[%c96_109, %c0_110] : memref<128x512xf32, #tpu.memory_space<vmem>>, vector<16x512xf32>
    %485 = arith.addf %484, %449 : vector<16x512xf32>
    %486 = vector.extract_strided_slice %485 {offsets = [0, 0], sizes = [16, 128], strides = [1, 1]} : vector<16x512xf32> to vector<16x128xf32>
    %487 = arith.negf %486 : vector<16x128xf32>
    %488 = math.exp %487 : vector<16x128xf32>
    %cst_111 = arith.constant 1.000000e+00 : f32
    %489 = vector.broadcast %cst_111 : f32 to vector<16x128xf32>
    %490 = arith.addf %489, %488 : vector<16x128xf32>
    %491 = arith.divf %489, %490 : vector<16x128xf32>
    %492 = vector.extract_strided_slice %485 {offsets = [0, 128], sizes = [16, 128], strides = [1, 1]} : vector<16x512xf32> to vector<16x128xf32>
    %493 = arith.negf %492 : vector<16x128xf32>
    %494 = math.exp %493 : vector<16x128xf32>
    %cst_112 = arith.constant 1.000000e+00 : f32
    %495 = vector.broadcast %cst_112 : f32 to vector<16x128xf32>
    %496 = arith.addf %495, %494 : vector<16x128xf32>
    %497 = arith.divf %495, %496 : vector<16x128xf32>
    %498 = vector.extract_strided_slice %485 {offsets = [0, 256], sizes = [16, 128], strides = [1, 1]} : vector<16x512xf32> to vector<16x128xf32>
    %499 = math.tanh %498 : vector<16x128xf32>
    %500 = vector.extract_strided_slice %485 {offsets = [0, 384], sizes = [16, 128], strides = [1, 1]} : vector<16x512xf32> to vector<16x128xf32>
    %501 = arith.negf %500 : vector<16x128xf32>
    %502 = math.exp %501 : vector<16x128xf32>
    %cst_113 = arith.constant 1.000000e+00 : f32
    %503 = vector.broadcast %cst_113 : f32 to vector<16x128xf32>
    %504 = arith.addf %503, %502 : vector<16x128xf32>
    %505 = arith.divf %503, %504 : vector<16x128xf32>
    %506 = arith.mulf %497, %444 : vector<16x128xf32>
    %507 = arith.mulf %491, %499 : vector<16x128xf32>
    %508 = arith.addf %506, %507 : vector<16x128xf32>
    %509 = math.tanh %508 : vector<16x128xf32>
    %510 = arith.mulf %505, %509 : vector<16x128xf32>
    %511 = arith.truncf %510 : vector<16x128xf32> to vector<16x128xbf16>
    %cst_114 = arith.constant dense<0.000000e+00> : vector<16x1024xf32>
    %512 = tpu.matmul %511, %78, %cst_114 {dimension_numbers = #tpu.dot_dimension_numbers<[1], [0], [0], [1], [0, 0, 1, 1], [], []>} : vector<16x128xbf16>, vector<128x1024xbf16>, vector<16x1024xf32> -> vector<16x1024xf32>
    %513 = vector.extract_strided_slice %512 {offsets = [0, 0], sizes = [16, 512], strides = [1, 1]} : vector<16x1024xf32> to vector<16x512xf32>
    %514 = vector.extract_strided_slice %512 {offsets = [0, 512], sizes = [16, 512], strides = [1, 1]} : vector<16x1024xf32> to vector<16x512xf32>
    %515 = arith.addf %514, %82 : vector<16x512xf32>
    %516 = arith.addf %515, %480 : vector<16x512xf32>
    %517 = vector.extract_strided_slice %516 {offsets = [0, 0], sizes = [16, 128], strides = [1, 1]} : vector<16x512xf32> to vector<16x128xf32>
    %518 = arith.negf %517 : vector<16x128xf32>
    %519 = math.exp %518 : vector<16x128xf32>
    %cst_115 = arith.constant 1.000000e+00 : f32
    %520 = vector.broadcast %cst_115 : f32 to vector<16x128xf32>
    %521 = arith.addf %520, %519 : vector<16x128xf32>
    %522 = arith.divf %520, %521 : vector<16x128xf32>
    %523 = vector.extract_strided_slice %516 {offsets = [0, 128], sizes = [16, 128], strides = [1, 1]} : vector<16x512xf32> to vector<16x128xf32>
    %524 = arith.negf %523 : vector<16x128xf32>
    %525 = math.exp %524 : vector<16x128xf32>
    %cst_116 = arith.constant 1.000000e+00 : f32
    %526 = vector.broadcast %cst_116 : f32 to vector<16x128xf32>
    %527 = arith.addf %526, %525 : vector<16x128xf32>
    %528 = arith.divf %526, %527 : vector<16x128xf32>
    %529 = vector.extract_strided_slice %516 {offsets = [0, 256], sizes = [16, 128], strides = [1, 1]} : vector<16x512xf32> to vector<16x128xf32>
    %530 = math.tanh %529 : vector<16x128xf32>
    %531 = vector.extract_strided_slice %516 {offsets = [0, 384], sizes = [16, 128], strides = [1, 1]} : vector<16x512xf32> to vector<16x128xf32>
    %532 = arith.negf %531 : vector<16x128xf32>
    %533 = math.exp %532 : vector<16x128xf32>
    %cst_117 = arith.constant 1.000000e+00 : f32
    %534 = vector.broadcast %cst_117 : f32 to vector<16x128xf32>
    %535 = arith.addf %534, %533 : vector<16x128xf32>
    %536 = arith.divf %534, %535 : vector<16x128xf32>
    %537 = arith.mulf %528, %475 : vector<16x128xf32>
    %538 = arith.mulf %522, %530 : vector<16x128xf32>
    %539 = arith.addf %537, %538 : vector<16x128xf32>
    %540 = math.tanh %539 : vector<16x128xf32>
    %541 = arith.mulf %536, %540 : vector<16x128xf32>
    %542 = arith.truncf %541 : vector<16x128xf32> to vector<16x128xbf16>
    %cst_118 = arith.constant dense<0.000000e+00> : vector<16x640xf32>
    %543 = tpu.matmul %542, %79, %cst_118 {dimension_numbers = #tpu.dot_dimension_numbers<[1], [0], [0], [1], [0, 0, 1, 1], [], []>} : vector<16x128xbf16>, vector<128x640xbf16>, vector<16x640xf32> -> vector<16x640xf32>
    %544 = vector.extract_strided_slice %543 {offsets = [0, 0], sizes = [16, 512], strides = [1, 1]} : vector<16x640xf32> to vector<16x512xf32>
    %545 = vector.extract_strided_slice %543 {offsets = [0, 512], sizes = [16, 128], strides = [1, 1]} : vector<16x640xf32> to vector<16x128xf32>
    %546 = arith.addf %545, %85 : vector<16x128xf32>
    %c0_119 = arith.constant 0 : index
    %c768 = arith.constant 768 : index
    %547 = vector.load %arg10[%c0_119, %c768] : memref<16x1024xf32, #tpu.memory_space<vmem>>, vector<16x128xf32>
    tpu.vector_store %arg10[%c0_119, %c768], %546 {strides = array<i32>} : memref<16x1024xf32, #tpu.memory_space<vmem>>, vector<16x128xf32>,
    %c112_120 = arith.constant 112 : index
    %c0_121 = arith.constant 0 : index
    %548 = vector.load %arg13[%c112_120, %c0_121] : memref<128x512xf32, #tpu.memory_space<vmem>>, vector<16x512xf32>
    %549 = arith.addf %548, %513 : vector<16x512xf32>
    %550 = vector.extract_strided_slice %549 {offsets = [0, 0], sizes = [16, 128], strides = [1, 1]} : vector<16x512xf32> to vector<16x128xf32>
    %551 = arith.negf %550 : vector<16x128xf32>
    %552 = math.exp %551 : vector<16x128xf32>
    %cst_122 = arith.constant 1.000000e+00 : f32
    %553 = vector.broadcast %cst_122 : f32 to vector<16x128xf32>
    %554 = arith.addf %553, %552 : vector<16x128xf32>
    %555 = arith.divf %553, %554 : vector<16x128xf32>
    %556 = vector.extract_strided_slice %549 {offsets = [0, 128], sizes = [16, 128], strides = [1, 1]} : vector<16x512xf32> to vector<16x128xf32>
    %557 = arith.negf %556 : vector<16x128xf32>
    %558 = math.exp %557 : vector<16x128xf32>
    %cst_123 = arith.constant 1.000000e+00 : f32
    %559 = vector.broadcast %cst_123 : f32 to vector<16x128xf32>
    %560 = arith.addf %559, %558 : vector<16x128xf32>
    %561 = arith.divf %559, %560 : vector<16x128xf32>
    %562 = vector.extract_strided_slice %549 {offsets = [0, 256], sizes = [16, 128], strides = [1, 1]} : vector<16x512xf32> to vector<16x128xf32>
    %563 = math.tanh %562 : vector<16x128xf32>
    %564 = vector.extract_strided_slice %549 {offsets = [0, 384], sizes = [16, 128], strides = [1, 1]} : vector<16x512xf32> to vector<16x128xf32>
    %565 = arith.negf %564 : vector<16x128xf32>
    %566 = math.exp %565 : vector<16x128xf32>
    %cst_124 = arith.constant 1.000000e+00 : f32
    %567 = vector.broadcast %cst_124 : f32 to vector<16x128xf32>
    %568 = arith.addf %567, %566 : vector<16x128xf32>
    %569 = arith.divf %567, %568 : vector<16x128xf32>
    %570 = arith.mulf %561, %508 : vector<16x128xf32>
    %571 = arith.mulf %555, %563 : vector<16x128xf32>
    %572 = arith.addf %570, %571 : vector<16x128xf32>
    %573 = math.tanh %572 : vector<16x128xf32>
    %574 = arith.mulf %569, %573 : vector<16x128xf32>
    %575 = arith.truncf %574 : vector<16x128xf32> to vector<16x128xbf16>
    %cst_125 = arith.constant dense<0.000000e+00> : vector<16x1024xf32>
    %576 = tpu.matmul %575, %78, %cst_125 {dimension_numbers = #tpu.dot_dimension_numbers<[1], [0], [0], [1], [0, 0, 1, 1], [], []>} : vector<16x128xbf16>, vector<128x1024xbf16>, vector<16x1024xf32> -> vector<16x1024xf32>
    %577 = vector.extract_strided_slice %576 {offsets = [0, 512], sizes = [16, 512], strides = [1, 1]} : vector<16x1024xf32> to vector<16x512xf32>
    %578 = arith.addf %577, %82 : vector<16x512xf32>
    %579 = arith.addf %578, %544 : vector<16x512xf32>
    %580 = vector.extract_strided_slice %579 {offsets = [0, 0], sizes = [16, 128], strides = [1, 1]} : vector<16x512xf32> to vector<16x128xf32>
    %581 = arith.negf %580 : vector<16x128xf32>
    %582 = math.exp %581 : vector<16x128xf32>
    %cst_126 = arith.constant 1.000000e+00 : f32
    %583 = vector.broadcast %cst_126 : f32 to vector<16x128xf32>
    %584 = arith.addf %583, %582 : vector<16x128xf32>
    %585 = arith.divf %583, %584 : vector<16x128xf32>
    %586 = vector.extract_strided_slice %579 {offsets = [0, 128], sizes = [16, 128], strides = [1, 1]} : vector<16x512xf32> to vector<16x128xf32>
    %587 = arith.negf %586 : vector<16x128xf32>
    %588 = math.exp %587 : vector<16x128xf32>
    %cst_127 = arith.constant 1.000000e+00 : f32
    %589 = vector.broadcast %cst_127 : f32 to vector<16x128xf32>
    %590 = arith.addf %589, %588 : vector<16x128xf32>
    %591 = arith.divf %589, %590 : vector<16x128xf32>
    %592 = vector.extract_strided_slice %579 {offsets = [0, 256], sizes = [16, 128], strides = [1, 1]} : vector<16x512xf32> to vector<16x128xf32>
    %593 = math.tanh %592 : vector<16x128xf32>
    %594 = vector.extract_strided_slice %579 {offsets = [0, 384], sizes = [16, 128], strides = [1, 1]} : vector<16x512xf32> to vector<16x128xf32>
    %595 = arith.negf %594 : vector<16x128xf32>
    %596 = math.exp %595 : vector<16x128xf32>
    %cst_128 = arith.constant 1.000000e+00 : f32
    %597 = vector.broadcast %cst_128 : f32 to vector<16x128xf32>
    %598 = arith.addf %597, %596 : vector<16x128xf32>
    %599 = arith.divf %597, %598 : vector<16x128xf32>
    %600 = arith.mulf %591, %539 : vector<16x128xf32>
    %601 = arith.mulf %585, %593 : vector<16x128xf32>
    %602 = arith.addf %600, %601 : vector<16x128xf32>
    %603 = math.tanh %602 : vector<16x128xf32>
    %604 = arith.mulf %599, %603 : vector<16x128xf32>
    %605 = arith.truncf %604 : vector<16x128xf32> to vector<16x128xbf16>
    %cst_129 = arith.constant dense<0.000000e+00> : vector<16x640xf32>
    %606 = tpu.matmul %605, %79, %cst_129 {dimension_numbers = #tpu.dot_dimension_numbers<[1], [0], [0], [1], [0, 0, 1, 1], [], []>} : vector<16x128xbf16>, vector<128x640xbf16>, vector<16x640xf32> -> vector<16x640xf32>
    %607 = vector.extract_strided_slice %606 {offsets = [0, 512], sizes = [16, 128], strides = [1, 1]} : vector<16x640xf32> to vector<16x128xf32>
    %608 = arith.addf %607, %85 : vector<16x128xf32>
    %c0_130 = arith.constant 0 : index
    %c896 = arith.constant 896 : index
    %609 = vector.load %arg10[%c0_130, %c896] : memref<16x1024xf32, #tpu.memory_space<vmem>>, vector<16x128xf32>
    tpu.vector_store %arg10[%c0_130, %c896], %608 {strides = array<i32>} : memref<16x1024xf32, #tpu.memory_space<vmem>>, vector<16x128xf32>,
    %c0_131 = arith.constant 0 : index
    %c0_132 = arith.constant 0 : index
    %c0_133 = arith.constant 0 : index
    %610 = vector.load %arg11[%c0_131, %c0_132, %c0_133] : memref<2x16x128xf32, #tpu.memory_space<vmem>>, vector<1x16x128xf32>
    %611 = vector.shape_cast %610 : vector<1x16x128xf32> to vector<16x128xf32>
    %612 = vector.shape_cast %574 : vector<16x128xf32> to vector<1x16x128xf32>
    tpu.vector_store %arg11[%c0_131, %c0_132, %c0_133], %612 {strides = array<i32>} : memref<2x16x128xf32, #tpu.memory_space<vmem>>, vector<1x16x128xf32>,
    %c1_134 = arith.constant 1 : index
    %c0_135 = arith.constant 0 : index
    %c0_136 = arith.constant 0 : index
    %613 = vector.load %arg11[%c1_134, %c0_135, %c0_136] : memref<2x16x128xf32, #tpu.memory_space<vmem>>, vector<1x16x128xf32>
    %614 = vector.shape_cast %613 : vector<1x16x128xf32> to vector<16x128xf32>
    %615 = vector.shape_cast %604 : vector<16x128xf32> to vector<1x16x128xf32>
    tpu.vector_store %arg11[%c1_134, %c0_135, %c0_136], %615 {strides = array<i32>} : memref<2x16x128xf32, #tpu.memory_space<vmem>>, vector<1x16x128xf32>,
    %c0_137 = arith.constant 0 : index
    %c0_138 = arith.constant 0 : index
    %c0_139 = arith.constant 0 : index
    %616 = vector.load %arg12[%c0_137, %c0_138, %c0_139] : memref<2x16x128xf32, #tpu.memory_space<vmem>>, vector<1x16x128xf32>
    %617 = vector.shape_cast %616 : vector<1x16x128xf32> to vector<16x128xf32>
    %618 = vector.shape_cast %572 : vector<16x128xf32> to vector<1x16x128xf32>
    tpu.vector_store %arg12[%c0_137, %c0_138, %c0_139], %618 {strides = array<i32>} : memref<2x16x128xf32, #tpu.memory_space<vmem>>, vector<1x16x128xf32>,
    %c1_140 = arith.constant 1 : index
    %c0_141 = arith.constant 0 : index
    %c0_142 = arith.constant 0 : index
    %619 = vector.load %arg12[%c1_140, %c0_141, %c0_142] : memref<2x16x128xf32, #tpu.memory_space<vmem>>, vector<1x16x128xf32>
    %620 = vector.shape_cast %619 : vector<1x16x128xf32> to vector<16x128xf32>
    %621 = vector.shape_cast %602 : vector<16x128xf32> to vector<1x16x128xf32>
    tpu.vector_store %arg12[%c1_140, %c0_141, %c0_142], %621 {strides = array<i32>} : memref<2x16x128xf32, #tpu.memory_space<vmem>>, vector<1x16x128xf32>,
    return
  }
  func.func @transform_0(%arg0: i32) -> (i32, i32) {
    %c0_i32 = arith.constant 0 : i32
    %c0_i32_0 = arith.constant 0 : i32
    return %arg0, %c0_i32 : i32, i32
  }
  func.func @transform_1(%arg0: i32) -> (i32, i32, i32) {
    %c0_i32 = arith.constant 0 : i32
    %c0_i32_0 = arith.constant 0 : i32
    %c0_i32_1 = arith.constant 0 : i32
    return %c0_i32, %arg0, %c0_i32_0 : i32, i32, i32
  }
  func.func @transform_2(%arg0: i32) -> (i32, i32, i32) {
    %c0_i32 = arith.constant 0 : i32
    %c0_i32_0 = arith.constant 0 : i32
    %c0_i32_1 = arith.constant 0 : i32
    return %c0_i32, %arg0, %c0_i32_0 : i32, i32, i32
  }
  func.func @transform_3(%arg0: i32) -> (i32, i32) {
    %c0_i32 = arith.constant 0 : i32
    %c0_i32_0 = arith.constant 0 : i32
    %c0_i32_1 = arith.constant 0 : i32
    return %c0_i32, %c0_i32_0 : i32, i32
  }
  func.func @transform_4(%arg0: i32) -> (i32, i32) {
    %c0_i32 = arith.constant 0 : i32
    %c0_i32_0 = arith.constant 0 : i32
    %c0_i32_1 = arith.constant 0 : i32
    return %c0_i32, %c0_i32_0 : i32, i32
  }
  func.func @transform_5(%arg0: i32) -> (i32, i32) {
    %c0_i32 = arith.constant 0 : i32
    %c0_i32_0 = arith.constant 0 : i32
    %c0_i32_1 = arith.constant 0 : i32
    return %c0_i32, %c0_i32_0 : i32, i32
  }
  func.func @transform_6(%arg0: i32) -> (i32, i32) {
    %c0_i32 = arith.constant 0 : i32
    %c0_i32_0 = arith.constant 0 : i32
    %c0_i32_1 = arith.constant 0 : i32
    return %c0_i32, %c0_i32_0 : i32, i32
  }
  func.func @transform_7(%arg0: i32) -> (i32, i32) {
    %c0_i32 = arith.constant 0 : i32
    %c0_i32_0 = arith.constant 0 : i32
    %c0_i32_1 = arith.constant 0 : i32
    return %c0_i32, %c0_i32_0 : i32, i32
  }
  func.func @transform_8(%arg0: i32) -> (i32, i32) {
    %c0_i32 = arith.constant 0 : i32
    %c0_i32_0 = arith.constant 0 : i32
    %c0_i32_1 = arith.constant 0 : i32
    return %c0_i32, %c0_i32_0 : i32, i32
  }
  func.func @transform_9(%arg0: i32) -> (i32, i32) {
    %c0_i32 = arith.constant 0 : i32
    %c0_i32_0 = arith.constant 0 : i32
    return %arg0, %c0_i32 : i32, i32
  }
  func.func @transform_10(%arg0: i32) -> (i32, i32, i32) {
    %c0_i32 = arith.constant 0 : i32
    %c0_i32_0 = arith.constant 0 : i32
    %c0_i32_1 = arith.constant 0 : i32
    return %c0_i32, %arg0, %c0_i32_0 : i32, i32, i32
  }
  func.func @transform_11(%arg0: i32) -> (i32, i32, i32) {
    %c0_i32 = arith.constant 0 : i32
    %c0_i32_0 = arith.constant 0 : i32
    %c0_i32_1 = arith.constant 0 : i32
    return %c0_i32, %arg0, %c0_i32_0 : i32, i32, i32
  }
}

</mosaic_0001>

<bundles_post_ra>
// kernel: _char_rnn_forward_ids.1
= control target key start
LH: loop header
LB: loop body
LE: loop exit
PB: predicated region body
PF: predicated region fallthrough
CT: control target
= control target key end

     0   :  { %17 = vsyncpa [#allocation4], 0  ;;  %s9414_s0 = inlined_call_operand.vmem [shape: s32[16,8], index: 0, kind: input, shape index: {}]   ;;  %s9415_s1 = inlined_call_operand.vmem [shape: f32[2,16,128], index: 1, kind: input, shape index: {}]   ;;  %s9416_s2 = inlined_call_operand.vmem [shape: f32[2,16,128], index: 2, kind: input, shape index: {}]   ;;  %s9417_s3 = inlined_call_operand.hbm [shape: bf16[128,512], index: 3, kind: input, shape index: {}]   ;;  %s9418_s4 = inlined_call_operand.vmem [shape: f32[1,512], index: 4, kind: input, shape index: {}]   ;;  %s9419_s5 = inlined_call_operand.hbm [shape: bf16[128,1024], index: 5, kind: input, shape index: {}]   ;;  %s9420_s6 = inlined_call_operand.vmem [shape: f32[1,512], index: 6, kind: input, shape index: {}]   ;;  %s9421_s7 = inlined_call_operand.hbm [shape: bf16[128,640], index: 7, kind: input, shape index: {}]   ;;  %s9422_s8 = inlined_call_operand.vmem [shape: f32[1,128], index: 8, kind: input, shape index: {}]   ;;  %s9423_s9 = inlined_call_operand.vmem [shape: f32[16,1024], index: 9, kind: output, shape index: {0}]   ;;  %s9424_s10 = inlined_call_operand.hbm [shape: f32[2,16,128], index: 10, kind: output, shape index: {1}]   ;;  %s9425_s11 = inlined_call_operand.hbm [shape: f32[2,16,128], index: 11, kind: output, shape index: {2}]  }
   0x1   :  { %18 = vsyncpa [#allocation7], 0 }
   0x2   :  { %19 = vsyncpa [#allocation5], 0 }
   0x3   :  { %20 = vsyncpa [#allocation11], 0  ;;  %s7013_s17 = smov [#allocation6]   ;;  %s6895_s21 = scalar_lea.hbm %s9419_s5, 8192 }
   0x4   :  { %s46_s18 = sshll.u32 %s7013_s17, 4  ;;  %p6896_p0 = scmp.ne.s32.totalorder %s9419_s5, %s6895_s21  ;;  %s47_s18 = int_to_ptr.vmem [resolvable:$true] %s46_s18 }
   0x5   :  { %p6899_p1 = scmp.lt.u32.totalorder %s6895_s21, %s9419_s5 }
   0x7   :  { %p6901_p2 = pnand %p6899_p1, %p6896_p0 }
   0x9   :  { %6904 = shalt.err (!%p6901_p2)
}
   0xa   :  { %s6905_s26 = scalar_lea.vmem %s47_s18, 8192  ;;  %p6910_p4 = scmp.lt.s32.totalorder %s47_s18, %s47_s18 }
   0xb   :  { %p6906_p3 = scmp.ne.s32.totalorder %s47_s18, %s6905_s26  ;;  %p6911_p5 = scmp.lt.s32.totalorder %s6905_s26, %s6905_s26 }
   0xd   :  { %p6912_p6 = por %p6911_p5, %p6910_p4 }
   0xf   :  { %p6913_p7 = pnand %p6912_p6, %p6906_p3 }
  0x11   :  { %6916 = shalt.err (!%p6913_p7)
}
  0x12   :  { %s7014_s27 = smov 512   ;;  %s7015_s28 = smov 32  }
  0x13   :  { %52 = dma.hbm_to_vmem [thread:$0]  %s9419_s5, 8192, %s47_s18, [#allocation7], %s7014_s27, %s7014_s27, %s7015_s28  }
  0x14   :  { %s7016_s12 = smov [#allocation3]   ;;  %s6917_s16 = scalar_lea.hbm %s9417_s3, 4096 }
  0x15   :  { %s32_s13 = sshll.u32 %s7016_s12, 4  ;;  %p6918_p8 = scmp.ne.s32.totalorder %s9417_s3, %s6917_s16  ;;  %s33_s13 = int_to_ptr.vmem [resolvable:$true] %s32_s13 }
  0x16   :  { %p6921_p9 = scmp.lt.u32.totalorder %s6917_s16, %s9417_s3 }
  0x18   :  { %p6923_p10 = pnand %p6921_p9, %p6918_p8 }
  0x1a   :  { %6926 = shalt.err (!%p6923_p10)
}
  0x1b   :  { %s6927_s22 = scalar_lea.vmem %s33_s13, 4096  ;;  %p6932_p12 = scmp.lt.s32.totalorder %s33_s13, %s33_s13 }
  0x1c   :  { %p6928_p11 = scmp.ne.s32.totalorder %s33_s13, %s6927_s22  ;;  %p6933_p13 = scmp.lt.s32.totalorder %s6927_s22, %s6927_s22 }
  0x1e   :  { %p6934_p0 = por %p6933_p13, %p6932_p12 }
  0x20   :  { %p6935_p1 = pnand %p6934_p0, %p6928_p11 }
  0x22   :  { %6938 = shalt.err (!%p6935_p1)
}
  0x23   :  { %s7017_s5 = smov 256   ;;  %s7018_s18 = smov 16  }
  0x24   :  { %38 = dma.hbm_to_vmem [thread:$0]  %s9417_s3, 4096, %s33_s13, [#allocation4], %s7017_s5, %s7017_s5, %s7018_s18  }
  0x25   :  { %s7019_s25 = smov [#allocation8]   ;;  %s6939_s29 = scalar_lea.hbm %s9421_s7, 5120 }
  0x26   :  { %s60_s26 = sshll.u32 %s7019_s25, 4  ;;  %p6940_p2 = scmp.ne.s32.totalorder %s9421_s7, %s6939_s29  ;;  %s61_s26 = int_to_ptr.vmem [resolvable:$true] %s60_s26 }
  0x27   :  { %p6943_p3 = scmp.lt.u32.totalorder %s6939_s29, %s9421_s7 }
  0x29   :  { %p6945_p4 = pnand %p6943_p3, %p6940_p2 }
  0x2b   :  { %6948 = shalt.err (!%p6945_p4)
}
  0x2c   :  { %s6949_s16 = scalar_lea.vmem %s61_s26, 5120  ;;  %p6954_p6 = scmp.lt.s32.totalorder %s61_s26, %s61_s26 }
  0x2d   :  { %p6950_p5 = scmp.ne.s32.totalorder %s61_s26, %s6949_s16  ;;  %p6955_p7 = scmp.lt.s32.totalorder %s6949_s16, %s6949_s16 }
  0x2f   :  { %p6956_p8 = por %p6955_p7, %p6954_p6 }
  0x31   :  { %p6957_p9 = pnand %p6956_p8, %p6950_p5 }
  0x33   :  { %6960 = shalt.err (!%p6957_p9)
}
  0x34   :  { %s7020_s3 = smov 320   ;;  %s7021_s13 = smov 20  }
  0x35   :  { %66 = dma.hbm_to_vmem [thread:$0]  %s9421_s7, 5120, %s61_s26, [#allocation7], %s7020_s3, %s7020_s3, %s7021_s13  }
  0x36   :  { %7005 = dma.done.wait [#allocation4], 4096  }
  0x37   :  { %7006 = vsyncadd [#allocation4], 4294963200 }
  0x38   :  { %7007 = dma.done.wait [#allocation7], 13312  }
  0x39   :  { %7008 = vsyncadd [#allocation7], 4294953984  ;;  %v9427_v0 = vmov 0   ;;  %v7023_v1 = vmov 1   ;;  %v7139_v2 = vld [vmem:[%s9414_s0] sm:$0xff]  ;;  %v7144_v3 = vld [vmem:[%s9414_s0 + $0x8] sm:$0xff]  ;;  %v9426_v42 = vlaneseq }
  0x3a   :  { %6143 = vset.pattern.permute.xlu0 %v9427_v0  ;;  %6144 = vset.pattern.permute.xlu1 %v7023_v1  ;;  %v7148_v4 = vld [vmem:[#allocation3 + $0x4] ss:$16 sps:$4 sm:$0xff]   ;;  %v7150_v5 = vld [vmem:[#allocation3 + $0xc] ss:$16 sps:$4 sm:$0xff]   ;;  %v7152_v6 = vld [vmem:[#allocation3] ss:$16 sps:$4 sm:$0xff]  }
  0x3b   :  { %342 = vmatprep.mubr.bf16.mxu0 %v9427_v0  ;;  %385 = vmatprep.mubr.bf16.mxu1 %v9427_v0  ;;  %v7155_v7 = vld [vmem:[#allocation3 + $0x8] ss:$16 sps:$4 sm:$0xff]   ;;  %v7159_v8 = vld [vmem:[#allocation3 + $0x24] ss:$16 sps:$4 sm:$0xff]   ;;  %v7163_v9 = vld [vmem:[#allocation3 + $0x2c] ss:$16 sps:$4 sm:$0xff]  }
  0x3c   :  { %138 = vperm.xlu0 %6143, %v7139_v2   ;;  %405 = vperm.xlu1 %6144, %v7139_v2   ;;  %v7165_v10 = vld [vmem:[#allocation3 + $0x20] ss:$16 sps:$4 sm:$0xff]   ;;  %v7169_v11 = vld [vmem:[#allocation3 + $0x28] ss:$16 sps:$4 sm:$0xff]   ;;  %v7172_v12 = vld [vmem:[#allocation3 + $0x44] ss:$16 sps:$4 sm:$0xff]  }
  0x3d   :  { %310 = vmatprep.subr.bf16.mxu0 %v7148_v4  ;;  %353 = vmatprep.subr.bf16.mxu1 %v7150_v5  ;;  %v7175_v13 = vld [vmem:[#allocation3 + $0x4c] ss:$16 sps:$4 sm:$0xff]   ;;  %v7177_v14 = vld [vmem:[#allocation3 + $0x40] ss:$16 sps:$4 sm:$0xff]   ;;  %v7024_v15 = vmov 2   ;;  %v7025_v21 = vmov 3  }
  0x3e   :  { %311 = vmatpush1.bf16.msra.mxu0 %v7152_v6  ;;  %354 = vmatpush1.bf16.msra.mxu1 %v7155_v7  ;;  %v7179_v16 = vld [vmem:[#allocation3 + $0x64] ss:$16 sps:$4 sm:$0xff]   ;;  %v7185_v17 = vld [vmem:[#allocation3 + $0x48] ss:$16 sps:$4 sm:$0xff]   ;;  %v7189_v18 = vld [vmem:[#allocation3 + $0x60] ss:$16 sps:$4 sm:$0xff]  }
  0x3f   :  { %312 = vmatprep.subr.bf16.mxu0 %v7159_v8  ;;  %355 = vmatprep.subr.bf16.mxu1 %v7163_v9  ;;  %v7192_v19 = vld [vmem:[#allocation3 + $0x6c] ss:$16 sps:$4 sm:$0xff]   ;;  %v7194_v20 = vld [vmem:[#allocation3 + $0x84] ss:$16 sps:$4 sm:$0xff]   ;;  %v7198_v22 = vld [vmem:[#allocation3 + $0x68] ss:$16 sps:$4 sm:$0xff]  }
  0x40   :  { %141 = vperm.xlu0 %6143, %v7144_v3   ;;  %408 = vperm.xlu1 %6144, %v7144_v3   ;;  %v7202_v23 = vld [vmem:[#allocation3 + $0x8c] ss:$16 sps:$4 sm:$0xff]   ;;  %v7204_v24 = vld [vmem:[#allocation3 + $0x80] ss:$16 sps:$4 sm:$0xff]   ;;  %v7208_v25 = vld [vmem:[#allocation3 + $0xa4] ss:$16 sps:$4 sm:$0xff]  }
  0x41   :  { %v7210_v26 = vld [vmem:[#allocation3 + $0x88] ss:$16 sps:$4 sm:$0xff]   ;;  %v7026_v27 = vmov 4   ;;  %v7214_v28 = vld [vmem:[#allocation3 + $0xa0] ss:$16 sps:$4 sm:$0xff]   ;;  %v7027_v39 = vmov 5  }
  0x42   :  { %313 = vmatpush1.bf16.msra.mxu0 %v7165_v10  ;;  %356 = vmatpush1.bf16.msra.mxu1 %v7169_v11  ;;  %v7218_v29 = vld [vmem:[#allocation3 + $0xac] ss:$16 sps:$4 sm:$0xff]   ;;  %v7220_v30 = vld [vmem:[#allocation3 + $0xc4] ss:$16 sps:$4 sm:$0xff]   ;;  %v7222_v31 = vld [vmem:[#allocation3 + $0xa8] ss:$16 sps:$4 sm:$0xff]  }
  0x43   :  { %314 = vmatprep.subr.bf16.mxu0 %v7172_v12  ;;  %357 = vmatprep.subr.bf16.mxu1 %v7175_v13  ;;  %v7225_v32 = vld [vmem:[#allocation3 + $0xc0] ss:$16 sps:$4 sm:$0xff]   ;;  %v7227_v33 = vld [vmem:[#allocation3 + $0xcc] ss:$16 sps:$4 sm:$0xff]   ;;  %v7229_v34 = vld [vmem:[#allocation3 + $0xe4] ss:$16 sps:$4 sm:$0xff]  }
  0x44   :  { %6146 = vset.pattern.permute.xlu1 %v7024_v15  ;;  %6145 = vset.pattern.permute.xlu0 %v7024_v15  ;;  %v7235_v35 = vld [vmem:[#allocation3 + $0xc8] ss:$16 sps:$4 sm:$0xff]   ;;  %v7238_v36 = vld [vmem:[#allocation3 + $0xe0] ss:$16 sps:$4 sm:$0xff]   ;;  %v7240_v37 = vld [vmem:[#allocation3 + $0xec] ss:$16 sps:$4 sm:$0xff]  }
  0x45   :  { %515 = vperm.xlu1 %6146, %v7144_v3   ;;  %512 = vperm.xlu0 %6145, %v7139_v2   ;;  %v7246_v38 = vld [vmem:[#allocation3 + $0xe8] ss:$16 sps:$4 sm:$0xff]   ;;  %v7028_v40 = vmov 6   ;;  %v7029_v41 = vmov 7   ;;  %v7261_v44 = vand.u32 127, %v9426_v42  ;;  %v1153_v60 = vld [vmem:[#allocation6] sm:$0xff] }
  0x46   :  { %315 = vmatpush1.bf16.msra.mxu0 %v7177_v14  ;;  %358 = vmatpush1.bf16.msra.mxu1 %v7185_v17  ;;  %v7030_v46 = vmov 1.0|1.0   ;;  %v1157_v61 = vld [vmem:[#allocation6 + $0x20] sm:$0xff]  ;;  %v1154_v62 = vld [vmem:[#allocation6 + $0x8] sm:$0xff]  ;;  %s7033_s0 = smov [#allocation9]  }
  0x47   :  { %316 = vmatprep.subr.bf16.mxu0 %v7179_v16  ;;  %359 = vmatprep.subr.bf16.mxu1 %v7192_v19  ;;  %v1158_v63 = vld [vmem:[#allocation6 + $0x28] sm:$0xff]  ;;  %s5315_s5 = sshll.u32 %s7033_s0, 4  ;;  %s5316_s5 = int_to_ptr.vmem [resolvable:$true] %s5315_s5 }
  0x48   :  { %v1174_v15 = vld [vmem:[#allocation6 + $0xa8] sm:$0xff]  ;;  %s6961_s18 = scalar_lea.vmem %s5316_s5, 512  ;;  %p6966_p11 = scmp.lt.s32.totalorder %s5316_s5, %s5316_s5 }
  0x49   :  { %6147 = vset.pattern.permute.xlu1 %v7025_v21  ;;  %6148 = vset.pattern.permute.xlu0 %v7025_v21  ;;  %v1181_v21 = vld [vmem:[#allocation6 + $0xe0] sm:$0xff]  ;;  %v7725_v42 = vld [vmem:[#allocation8 + $0x118] ss:$20 sps:$4 sm:$0xff]   ;;  %p6962_p10 = scmp.ne.s32.totalorder %s5316_s5, %s6961_s18  ;;  %p6967_p12 = scmp.lt.s32.totalorder %s6961_s18, %s6961_s18 }
  0x4a   :  { %619 = vperm.xlu1 %6147, %v7139_v2   ;;  %622 = vperm.xlu0 %6148, %v7144_v3  }
  0x4b   :  { %317 = vmatpush1.bf16.msra.mxu0 %v7189_v18  ;;  %360 = vmatpush1.bf16.msra.mxu1 %v7198_v22  ;;  %p6968_p13 = por %p6967_p12, %p6966_p11 }
  0x4c   :  { %318 = vmatprep.subr.bf16.mxu0 %v7194_v20  ;;  %361 = vmatprep.subr.bf16.mxu1 %v7202_v23 }
  0x4d   :  { %p6969_p0 = pnand %p6968_p13, %p6962_p10 }
  0x4e   :  { %6149 = vset.pattern.permute.xlu1 %v7026_v27  ;;  %6150 = vset.pattern.permute.xlu0 %v7027_v39 }
  0x4f   :  { %319 = vmatpush1.bf16.msra.mxu0 %v7204_v24  ;;  %726 = vperm.xlu1 %6149, %v7139_v2  }
  0x50   :  { %320 = vmatprep.subr.bf16.mxu0 %v7208_v25  ;;  %362 = vmatpush1.bf16.msra.mxu1 %v7210_v26 }
  0x51   :  { %363 = vmatprep.subr.bf16.mxu1 %v7218_v29  ;;  %833 = vperm.xlu0 %6150, %v7139_v2  }
  0x53   :  { %321 = vmatpush1.bf16.msra.mxu0 %v7214_v28  ;;  %729 = vperm.xlu1 %6149, %v7144_v3  }
  0x54   :  { %322 = vmatprep.subr.bf16.mxu0 %v7220_v30  ;;  %364 = vmatpush1.bf16.msra.mxu1 %v7222_v31 }
  0x55   :  { %365 = vmatprep.subr.bf16.mxu1 %v7227_v33  ;;  %6153 = vset.pattern.permute.xlu0 %v7028_v40 }
  0x56   :  { %943 = vperm.xlu0 %6153, %v7144_v3  }
  0x57   :  { %323 = vmatpush1.bf16.msra.mxu0 %v7225_v32  ;;  %6151 = vset.pattern.permute.xlu1 %v7027_v39  ;;  %v1198_v39 = vld [vmem:[#allocation6 + $0x168] sm:$0xff] }
  0x58   :  { %324 = vmatprep.subr.bf16.mxu0 %v7229_v34  ;;  %366 = vmatpush1.bf16.msra.mxu1 %v7235_v35 }
  0x59   :  { %367 = vmatprep.subr.bf16.mxu1 %v7240_v37  ;;  %836 = vperm.xlu1 %6151, %v7144_v3  }
  0x5a   :  { %6155 = vset.pattern.permute.xlu0 %v7029_v41 }
  0x5b   :  { %325 = vmatpush1.bf16.msra.mxu0 %v7238_v36 }
  0x5c   :  { %417 = vmatprep.subr.bf16.mxu0 %v7148_v4  ;;  %368 = vmatpush1.bf16.msra.mxu1 %v7246_v38 }
  0x5d   :  { %460 = vmatprep.subr.bf16.mxu1 %v7150_v5  ;;  %6152 = vset.pattern.permute.xlu1 %v7028_v40 }
  0x5e   :  { %940 = vperm.xlu1 %6152, %v7139_v2  }
  0x62   :  { %6154 = vset.pattern.permute.xlu1 %v7029_v41 }
  0x63   :  { %1047 = vperm.xlu1 %6154, %v7139_v2   ;;  %v7525_v2 = vcombine.high %v1153_v60, %v1157_v61 }
  0x65   :  { %9737 = vst [vmem:[#allocation16_spill] sm:$0xff] %v7525_v2 }
  0x67   :  { %1050 = vperm.xlu1 %6154, %v7144_v3   ;;  %v7527_v3 = vcombine.high %v1154_v62, %v1158_v63 }
  0x69   :  { %9738 = vst [vmem:[#allocation17_spill] sm:$0xff] %v7527_v3 }
  0xbb   :  { %v139_v43 = vpop.permute.xlu0 %138  ;;  %v406_v47 = vpop.permute.xlu1 %405 }
  0xbc   :  { %vm143_vm0 = vcmp.eq.s32.totalorder %v139_v43, %v7261_v44  ;;  %vm410_vm3 = vcmp.eq.s32.totalorder %v406_v47, %v7261_v44  ;;  %v1202_v47 = vld [vmem:[#allocation6 + $0x188] sm:$0xff] }
  0xbf   :  { %v142_v45 = vpop.permute.xlu0 %141  ;;  %v409_v48 = vpop.permute.xlu1 %408 }
  0xc0   :  { %vm144_vm1 = vcmp.eq.s32.totalorder %v142_v45, %v7261_v44  ;;  %vm411_vm4 = vcmp.eq.s32.totalorder %v409_v48, %v7261_v44  ;;  %v1201_v45 = vld [vmem:[#allocation6 + $0x180] sm:$0xff]  ;;  %v1206_v48 = vld [vmem:[#allocation6 + $0x1a8] sm:$0xff] }
  0xc1   :  { %vm5380_vm2 = vmpackc.low %vm144_vm1, %vm143_vm0 }
  0xc2   :  { %5381 = vmatmul.mubr.msk.bf16.vlgmr.msra.gmra.mrb[0].mxu0 %vm5380_vm2, %v7030_v46  ;;  %5383 = vmatmul.mubr.msk.bf16.vlgmr.msra.gmra.mrb[0].mxu1 %vm5380_vm2, %v7030_v46  ;;  %vm5386_vm5 = vmpackc.low %vm411_vm4, %vm410_vm3 }
  0xc3   :  { %418 = vmatpush1.bf16.msra.mxu0 %v7152_v6  ;;  %461 = vmatpush1.bf16.msra.mxu1 %v7155_v7 }
  0xc4   :  { %419 = vmatprep.subr.bf16.mxu0 %v7159_v8  ;;  %462 = vmatprep.subr.bf16.mxu1 %v7163_v9  ;;  %v516_v49 = vpop.permute.xlu1 %515  ;;  %v513_v50 = vpop.permute.xlu0 %512 }
  0xc5   :  { %449 = vmatprep.mubr.bf16.mxu0 %v9427_v0  ;;  %492 = vmatprep.mubr.bf16.mxu1 %v9427_v0  ;;  %vm518_vm6 = vcmp.eq.s32.totalorder %v516_v49, %v7261_v44  ;;  %vm517_vm7 = vcmp.eq.s32.totalorder %v513_v50, %v7261_v44 }
  0xc6   :  { %vm5392_vm8 = vmpackc.low %vm518_vm6, %vm517_vm7 }
  0xc7   :  { %420 = vmatpush1.bf16.msra.mxu0 %v7165_v10  ;;  %463 = vmatpush1.bf16.msra.mxu1 %v7169_v11 }
  0xc8   :  { %421 = vmatprep.subr.bf16.mxu0 %v7172_v12  ;;  %464 = vmatprep.subr.bf16.mxu1 %v7175_v13 }
  0xc9   :  { %v620_v51 = vpop.permute.xlu1 %619  ;;  %v623_v52 = vpop.permute.xlu0 %622 }
  0xca   :  { %vm624_vm9 = vcmp.eq.s32.totalorder %v620_v51, %v7261_v44  ;;  %vm625_vm10 = vcmp.eq.s32.totalorder %v623_v52, %v7261_v44  ;;  %v7605_v52 = vcombine.high %v1202_v47, %v1206_v48 }
  0xcb   :  { %422 = vmatpush1.bf16.msra.mxu0 %v7177_v14  ;;  %465 = vmatpush1.bf16.msra.mxu1 %v7185_v17  ;;  %vm5398_vm11 = vmpackc.low %vm625_vm10, %vm624_vm9 }
  0xcc   :  { %423 = vmatprep.subr.bf16.mxu0 %v7179_v16  ;;  %466 = vmatprep.subr.bf16.mxu1 %v7192_v19  ;;  %9760 = vst [vmem:[#allocation39_spill] sm:$0xff] %v7605_v52 }
  0xce   :  { %v727_v53 = vpop.permute.xlu1 %726 }
  0xcf   :  { %424 = vmatpush1.bf16.msra.mxu0 %v7189_v18  ;;  %467 = vmatpush1.bf16.msra.mxu1 %v7198_v22  ;;  %vm731_vm12 = vcmp.eq.s32.totalorder %v727_v53, %v7261_v44  ;;  %v1209_v53 = vld [vmem:[#allocation6 + $0x1c0] sm:$0xff] }
  0xd0   :  { %425 = vmatprep.subr.bf16.mxu0 %v7194_v20  ;;  %468 = vmatprep.subr.bf16.mxu1 %v7202_v23  ;;  %v834_v56 = vpop.permute.xlu0 %833 }
  0xd1   :  { %vm838_vm0 = vcmp.eq.s32.totalorder %v834_v56, %v7261_v44  ;;  %v1214_v56 = vld [vmem:[#allocation6 + $0x1e8] sm:$0xff] }
  0xd2   :  { %v730_v54 = vpop.permute.xlu1 %729 }
  0xd3   :  { %426 = vmatpush1.bf16.msra.mxu0 %v7204_v24  ;;  %469 = vmatpush1.bf16.msra.mxu1 %v7210_v26  ;;  %vm732_vm13 = vcmp.eq.s32.totalorder %v730_v54, %v7261_v44  ;;  %v1213_v54 = vld [vmem:[#allocation6 + $0x1e0] sm:$0xff] }
  0xd4   :  { %427 = vmatprep.subr.bf16.mxu0 %v7208_v25  ;;  %470 = vmatprep.subr.bf16.mxu1 %v7218_v29  ;;  %vm5404_vm14 = vmpackc.low %vm732_vm13, %vm731_vm12 }
  0xd5   :  { %v944_v58 = vpop.permute.xlu0 %943 }
  0xd6   :  { %vm946_vm3 = vcmp.eq.s32.totalorder %v944_v58, %v7261_v44  ;;  %v7611_v58 = vcombine.low %v1202_v47, %v1206_v48  ;;  %v7699_v47 = vld [vmem:[#allocation8 + $0xd4] ss:$20 sps:$4 sm:$0xff]  }
  0xd7   :  { %428 = vmatpush1.bf16.msra.mxu0 %v7214_v28  ;;  %471 = vmatpush1.bf16.msra.mxu1 %v7222_v31  ;;  %v7701_v48 = vld [vmem:[#allocation8 + $0xc8] ss:$20 sps:$4 sm:$0xff]  }
  0xd8   :  { %429 = vmatprep.subr.bf16.mxu0 %v7220_v30  ;;  %472 = vmatprep.subr.bf16.mxu1 %v7227_v33  ;;  %v837_v55 = vpop.permute.xlu1 %836  ;;  %9762 = vst [vmem:[#allocation41_spill] sm:$0xff] %v7611_v58 }
  0xd9   :  { %vm839_vm15 = vcmp.eq.s32.totalorder %v837_v55, %v7261_v44  ;;  %v1210_v55 = vld [vmem:[#allocation6 + $0x1c8] sm:$0xff] }
  0xda   :  { %vm5410_vm1 = vmpackc.low %vm839_vm15, %vm838_vm0 }
  0xdb   :  { %430 = vmatpush1.bf16.msra.mxu0 %v7225_v32  ;;  %473 = vmatpush1.bf16.msra.mxu1 %v7235_v35 }
  0xdc   :  { %431 = vmatprep.subr.bf16.mxu0 %v7229_v34  ;;  %474 = vmatprep.subr.bf16.mxu1 %v7240_v37 }
  0xdd   :  { %v941_v57 = vpop.permute.xlu1 %940 }
  0xde   :  { %vm945_vm2 = vcmp.eq.s32.totalorder %v941_v57, %v7261_v44 }
  0xdf   :  { %432 = vmatpush1.bf16.msra.mxu0 %v7238_v36  ;;  %475 = vmatpush1.bf16.msra.mxu1 %v7246_v38  ;;  %vm5416_vm4 = vmpackc.low %vm946_vm3, %vm945_vm2 }
  0xe0   :  { %524 = vmatprep.subr.bf16.mxu0 %v7148_v4  ;;  %567 = vmatprep.subr.bf16.mxu1 %v7150_v5 }
  0xe2   :  { %5387 = vmatmul.mubr.msk.bf16.vlgmr.msra.gmra.mrb[4].mxu0 %vm5386_vm5, %v7030_v46  ;;  %5389 = vmatmul.mubr.msk.bf16.vlgmr.msra.gmra.mrb[4].mxu1 %vm5386_vm5, %v7030_v46  ;;  %v1048_v59 = vpop.permute.xlu1 %1047 }
  0xe3   :  { %525 = vmatpush1.bf16.msra.mxu0 %v7152_v6  ;;  %568 = vmatpush1.bf16.msra.mxu1 %v7155_v7  ;;  %vm1052_vm5 = vcmp.eq.s32.totalorder %v1048_v59, %v7261_v44  ;;  %v7615_v59 = vcombine.high %v1209_v53, %v1213_v54 }
  0xe4   :  { %526 = vmatprep.subr.bf16.mxu0 %v7159_v8  ;;  %569 = vmatprep.subr.bf16.mxu1 %v7163_v9 }
  0xe5   :  { %556 = vmatprep.mubr.bf16.mxu0 %v9427_v0  ;;  %599 = vmatprep.mubr.bf16.mxu1 %v9427_v0  ;;  %9763 = vst [vmem:[#allocation42_spill] sm:$0xff] %v7615_v59 }
  0xe6   :  { %v1051_v1 = vpop.permute.xlu1 %1050 }
  0xe7   :  { %527 = vmatpush1.bf16.msra.mxu0 %v7165_v10  ;;  %570 = vmatpush1.bf16.msra.mxu1 %v7169_v11  ;;  %vm1053_vm6 = vcmp.eq.s32.totalorder %v1051_v1, %v7261_v44  ;;  %v1295_v1 = vld [vmem:[%s9415_s1 + $0x8] sm:$0xff] }
  0xe8   :  { %528 = vmatprep.subr.bf16.mxu0 %v7172_v12  ;;  %571 = vmatprep.subr.bf16.mxu1 %v7175_v13  ;;  %vm5422_vm7 = vmpackc.low %vm1053_vm6, %vm1052_vm5 }
  0xeb   :  { %529 = vmatpush1.bf16.msra.mxu0 %v7177_v14  ;;  %572 = vmatpush1.bf16.msra.mxu1 %v7185_v17 }
  0xec   :  { %530 = vmatprep.subr.bf16.mxu0 %v7179_v16  ;;  %573 = vmatprep.subr.bf16.mxu1 %v7192_v19 }
  0xef   :  { %531 = vmatpush1.bf16.msra.mxu0 %v7189_v18  ;;  %574 = vmatpush1.bf16.msra.mxu1 %v7198_v22 }
  0xf0   :  { %532 = vmatprep.subr.bf16.mxu0 %v7194_v20  ;;  %575 = vmatprep.subr.bf16.mxu1 %v7202_v23 }
  0xf3   :  { %533 = vmatpush1.bf16.msra.mxu0 %v7204_v24  ;;  %576 = vmatpush1.bf16.msra.mxu1 %v7210_v26 }
  0xf4   :  { %534 = vmatprep.subr.bf16.mxu0 %v7208_v25  ;;  %577 = vmatprep.subr.bf16.mxu1 %v7218_v29 }
  0xf7   :  { %535 = vmatpush1.bf16.msra.mxu0 %v7214_v28  ;;  %578 = vmatpush1.bf16.msra.mxu1 %v7222_v31 }
  0xf8   :  { %536 = vmatprep.subr.bf16.mxu0 %v7220_v30  ;;  %579 = vmatprep.subr.bf16.mxu1 %v7227_v33 }
  0xfb   :  { %537 = vmatpush1.bf16.msra.mxu0 %v7225_v32  ;;  %580 = vmatpush1.bf16.msra.mxu1 %v7235_v35 }
  0xfc   :  { %538 = vmatprep.subr.bf16.mxu0 %v7229_v34  ;;  %581 = vmatprep.subr.bf16.mxu1 %v7240_v37 }
  0xff   :  { %539 = vmatpush1.bf16.msra.mxu0 %v7238_v36  ;;  %582 = vmatpush1.bf16.msra.mxu1 %v7246_v38 }
 0x100   :  { %631 = vmatprep.subr.bf16.mxu0 %v7148_v4  ;;  %674 = vmatprep.subr.bf16.mxu1 %v7150_v5 }
 0x102   :  { %5393 = vmatmul.mubr.msk.bf16.vlgmr.msra.gmra.mrb[8].mxu0 %vm5392_vm8, %v7030_v46  ;;  %5395 = vmatmul.mubr.msk.bf16.vlgmr.msra.gmra.mrb[8].mxu1 %vm5392_vm8, %v7030_v46  ;;  %vm7032_vm8 = vmmov 0  }
 0x103   :  { %632 = vmatpush1.bf16.msra.mxu0 %v7152_v6  ;;  %675 = vmatpush1.bf16.msra.mxu1 %v7155_v7 }
 0x104   :  { %633 = vmatprep.subr.bf16.mxu0 %v7159_v8  ;;  %676 = vmatprep.subr.bf16.mxu1 %v7163_v9 }
 0x105   :  { %663 = vmatprep.mubr.bf16.mxu0 %v9427_v0  ;;  %706 = vmatprep.mubr.bf16.mxu1 %v9427_v0 }
 0x107   :  { %634 = vmatpush1.bf16.msra.mxu0 %v7165_v10  ;;  %677 = vmatpush1.bf16.msra.mxu1 %v7169_v11 }
 0x108   :  { %635 = vmatprep.subr.bf16.mxu0 %v7172_v12  ;;  %678 = vmatprep.subr.bf16.mxu1 %v7175_v13 }
 0x10b   :  { %636 = vmatpush1.bf16.msra.mxu0 %v7177_v14  ;;  %679 = vmatpush1.bf16.msra.mxu1 %v7185_v17 }
 0x10c   :  { %637 = vmatprep.subr.bf16.mxu0 %v7179_v16  ;;  %680 = vmatprep.subr.bf16.mxu1 %v7192_v19 }
 0x10f   :  { %638 = vmatpush1.bf16.msra.mxu0 %v7189_v18  ;;  %681 = vmatpush1.bf16.msra.mxu1 %v7198_v22 }
 0x110   :  { %639 = vmatprep.subr.bf16.mxu0 %v7194_v20  ;;  %682 = vmatprep.subr.bf16.mxu1 %v7202_v23 }
 0x113   :  { %640 = vmatpush1.bf16.msra.mxu0 %v7204_v24  ;;  %683 = vmatpush1.bf16.msra.mxu1 %v7210_v26 }
 0x114   :  { %641 = vmatprep.subr.bf16.mxu0 %v7208_v25  ;;  %684 = vmatprep.subr.bf16.mxu1 %v7218_v29 }
 0x117   :  { %642 = vmatpush1.bf16.msra.mxu0 %v7214_v28  ;;  %685 = vmatpush1.bf16.msra.mxu1 %v7222_v31 }
 0x118   :  { %643 = vmatprep.subr.bf16.mxu0 %v7220_v30  ;;  %686 = vmatprep.subr.bf16.mxu1 %v7227_v33 }
 0x11b   :  { %644 = vmatpush1.bf16.msra.mxu0 %v7225_v32  ;;  %687 = vmatpush1.bf16.msra.mxu1 %v7235_v35 }
 0x11c   :  { %645 = vmatprep.subr.bf16.mxu0 %v7229_v34  ;;  %688 = vmatprep.subr.bf16.mxu1 %v7240_v37 }
 0x11f   :  { %646 = vmatpush1.bf16.msra.mxu0 %v7238_v36  ;;  %689 = vmatpush1.bf16.msra.mxu1 %v7246_v38 }
 0x120   :  { %738 = vmatprep.subr.bf16.mxu0 %v7148_v4  ;;  %781 = vmatprep.subr.bf16.mxu1 %v7150_v5 }
 0x122   :  { %5399 = vmatmul.mubr.msk.bf16.vlgmr.msra.gmra.mrb[12].mxu0 %vm5398_vm11, %v7030_v46  ;;  %5401 = vmatmul.mubr.msk.bf16.vlgmr.msra.gmra.mrb[12].mxu1 %vm5398_vm11, %v7030_v46 }
 0x123   :  { %739 = vmatpush1.bf16.msra.mxu0 %v7152_v6  ;;  %782 = vmatpush1.bf16.msra.mxu1 %v7155_v7 }
 0x124   :  { %740 = vmatprep.subr.bf16.mxu0 %v7159_v8  ;;  %783 = vmatprep.subr.bf16.mxu1 %v7163_v9 }
 0x125   :  { %770 = vmatprep.mubr.bf16.mxu0 %v9427_v0  ;;  %813 = vmatprep.mubr.bf16.mxu1 %v9427_v0 }
 0x127   :  { %741 = vmatpush1.bf16.msra.mxu0 %v7165_v10  ;;  %784 = vmatpush1.bf16.msra.mxu1 %v7169_v11 }
 0x128   :  { %742 = vmatprep.subr.bf16.mxu0 %v7172_v12  ;;  %785 = vmatprep.subr.bf16.mxu1 %v7175_v13 }
 0x12b   :  { %743 = vmatpush1.bf16.msra.mxu0 %v7177_v14  ;;  %786 = vmatpush1.bf16.msra.mxu1 %v7185_v17 }
 0x12c   :  { %744 = vmatprep.subr.bf16.mxu0 %v7179_v16  ;;  %787 = vmatprep.subr.bf16.mxu1 %v7192_v19 }
 0x12f   :  { %745 = vmatpush1.bf16.msra.mxu0 %v7189_v18  ;;  %788 = vmatpush1.bf16.msra.mxu1 %v7198_v22 }
 0x130   :  { %746 = vmatprep.subr.bf16.mxu0 %v7194_v20  ;;  %789 = vmatprep.subr.bf16.mxu1 %v7202_v23 }
 0x133   :  { %747 = vmatpush1.bf16.msra.mxu0 %v7204_v24  ;;  %790 = vmatpush1.bf16.msra.mxu1 %v7210_v26 }
 0x134   :  { %748 = vmatprep.subr.bf16.mxu0 %v7208_v25  ;;  %791 = vmatprep.subr.bf16.mxu1 %v7218_v29 }
 0x137   :  { %749 = vmatpush1.bf16.msra.mxu0 %v7214_v28  ;;  %792 = vmatpush1.bf16.msra.mxu1 %v7222_v31 }
 0x138   :  { %750 = vmatprep.subr.bf16.mxu0 %v7220_v30  ;;  %793 = vmatprep.subr.bf16.mxu1 %v7227_v33 }
 0x13b   :  { %751 = vmatpush1.bf16.msra.mxu0 %v7225_v32  ;;  %794 = vmatpush1.bf16.msra.mxu1 %v7235_v35 }
 0x13c   :  { %752 = vmatprep.subr.bf16.mxu0 %v7229_v34  ;;  %795 = vmatprep.subr.bf16.mxu1 %v7240_v37 }
 0x13f   :  { %753 = vmatpush1.bf16.msra.mxu0 %v7238_v36  ;;  %796 = vmatpush1.bf16.msra.mxu1 %v7246_v38 }
 0x140   :  { %845 = vmatprep.subr.bf16.mxu0 %v7148_v4  ;;  %888 = vmatprep.subr.bf16.mxu1 %v7150_v5 }
 0x142   :  { %5405 = vmatmul.mubr.msk.bf16.vlgmr.msra.gmra.mrb[16].mxu0 %vm5404_vm14, %v7030_v46  ;;  %5407 = vmatmul.mubr.msk.bf16.vlgmr.msra.gmra.mrb[16].mxu1 %vm5404_vm14, %v7030_v46 }
 0x143   :  { %846 = vmatpush1.bf16.msra.mxu0 %v7152_v6  ;;  %889 = vmatpush1.bf16.msra.mxu1 %v7155_v7 }
 0x144   :  { %847 = vmatprep.subr.bf16.mxu0 %v7159_v8  ;;  %890 = vmatprep.subr.bf16.mxu1 %v7163_v9 }
 0x145   :  { %877 = vmatprep.mubr.bf16.mxu0 %v9427_v0  ;;  %920 = vmatprep.mubr.bf16.mxu1 %v9427_v0 }
 0x147   :  { %848 = vmatpush1.bf16.msra.mxu0 %v7165_v10  ;;  %891 = vmatpush1.bf16.msra.mxu1 %v7169_v11 }
 0x148   :  { %849 = vmatprep.subr.bf16.mxu0 %v7172_v12  ;;  %892 = vmatprep.subr.bf16.mxu1 %v7175_v13 }
 0x14b   :  { %850 = vmatpush1.bf16.msra.mxu0 %v7177_v14  ;;  %893 = vmatpush1.bf16.msra.mxu1 %v7185_v17 }
 0x14c   :  { %851 = vmatprep.subr.bf16.mxu0 %v7179_v16  ;;  %894 = vmatprep.subr.bf16.mxu1 %v7192_v19 }
 0x14f   :  { %852 = vmatpush1.bf16.msra.mxu0 %v7189_v18  ;;  %895 = vmatpush1.bf16.msra.mxu1 %v7198_v22 }
 0x150   :  { %853 = vmatprep.subr.bf16.mxu0 %v7194_v20  ;;  %896 = vmatprep.subr.bf16.mxu1 %v7202_v23 }
 0x153   :  { %854 = vmatpush1.bf16.msra.mxu0 %v7204_v24  ;;  %897 = vmatpush1.bf16.msra.mxu1 %v7210_v26 }
 0x154   :  { %855 = vmatprep.subr.bf16.mxu0 %v7208_v25  ;;  %898 = vmatprep.subr.bf16.mxu1 %v7218_v29 }
 0x157   :  { %856 = vmatpush1.bf16.msra.mxu0 %v7214_v28  ;;  %899 = vmatpush1.bf16.msra.mxu1 %v7222_v31 }
 0x158   :  { %857 = vmatprep.subr.bf16.mxu0 %v7220_v30  ;;  %900 = vmatprep.subr.bf16.mxu1 %v7227_v33 }
 0x15b   :  { %858 = vmatpush1.bf16.msra.mxu0 %v7225_v32  ;;  %901 = vmatpush1.bf16.msra.mxu1 %v7235_v35 }
 0x15c   :  { %859 = vmatprep.subr.bf16.mxu0 %v7229_v34  ;;  %902 = vmatprep.subr.bf16.mxu1 %v7240_v37 }
 0x15f   :  { %860 = vmatpush1.bf16.msra.mxu0 %v7238_v36  ;;  %903 = vmatpush1.bf16.msra.mxu1 %v7246_v38 }
 0x160   :  { %952 = vmatprep.subr.bf16.mxu0 %v7148_v4  ;;  %995 = vmatprep.subr.bf16.mxu1 %v7150_v5 }
 0x162   :  { %5411 = vmatmul.mubr.msk.bf16.vlgmr.msra.gmra.mrb[20].mxu0 %vm5410_vm1, %v7030_v46  ;;  %5413 = vmatmul.mubr.msk.bf16.vlgmr.msra.gmra.mrb[20].mxu1 %vm5410_vm1, %v7030_v46 }
 0x163   :  { %953 = vmatpush1.bf16.msra.mxu0 %v7152_v6  ;;  %996 = vmatpush1.bf16.msra.mxu1 %v7155_v7 }
 0x164   :  { %954 = vmatprep.subr.bf16.mxu0 %v7159_v8  ;;  %997 = vmatprep.subr.bf16.mxu1 %v7163_v9 }
 0x165   :  { %984 = vmatprep.mubr.bf16.mxu0 %v9427_v0  ;;  %1027 = vmatprep.mubr.bf16.mxu1 %v9427_v0 }
 0x167   :  { %955 = vmatpush1.bf16.msra.mxu0 %v7165_v10  ;;  %998 = vmatpush1.bf16.msra.mxu1 %v7169_v11 }
 0x168   :  { %956 = vmatprep.subr.bf16.mxu0 %v7172_v12  ;;  %999 = vmatprep.subr.bf16.mxu1 %v7175_v13 }
 0x16b   :  { %957 = vmatpush1.bf16.msra.mxu0 %v7177_v14  ;;  %1000 = vmatpush1.bf16.msra.mxu1 %v7185_v17 }
 0x16c   :  { %958 = vmatprep.subr.bf16.mxu0 %v7179_v16  ;;  %1001 = vmatprep.subr.bf16.mxu1 %v7192_v19 }
 0x16f   :  { %959 = vmatpush1.bf16.msra.mxu0 %v7189_v18  ;;  %1002 = vmatpush1.bf16.msra.mxu1 %v7198_v22 }
 0x170   :  { %960 = vmatprep.subr.bf16.mxu0 %v7194_v20  ;;  %1003 = vmatprep.subr.bf16.mxu1 %v7202_v23 }
 0x173   :  { %961 = vmatpush1.bf16.msra.mxu0 %v7204_v24  ;;  %1004 = vmatpush1.bf16.msra.mxu1 %v7210_v26 }
 0x174   :  { %962 = vmatprep.subr.bf16.mxu0 %v7208_v25  ;;  %1005 = vmatprep.subr.bf16.mxu1 %v7218_v29 }
 0x177   :  { %963 = vmatpush1.bf16.msra.mxu0 %v7214_v28  ;;  %1006 = vmatpush1.bf16.msra.mxu1 %v7222_v31 }
 0x178   :  { %964 = vmatprep.subr.bf16.mxu0 %v7220_v30  ;;  %1007 = vmatprep.subr.bf16.mxu1 %v7227_v33 }
 0x17b   :  { %965 = vmatpush1.bf16.msra.mxu0 %v7225_v32  ;;  %1008 = vmatpush1.bf16.msra.mxu1 %v7235_v35 }
 0x17c   :  { %966 = vmatprep.subr.bf16.mxu0 %v7229_v34  ;;  %1009 = vmatprep.subr.bf16.mxu1 %v7240_v37 }
 0x17f   :  { %967 = vmatpush1.bf16.msra.mxu0 %v7238_v36  ;;  %1010 = vmatpush1.bf16.msra.mxu1 %v7246_v38 }
 0x180   :  { %1059 = vmatprep.subr.bf16.mxu0 %v7148_v4  ;;  %1102 = vmatprep.subr.bf16.mxu1 %v7150_v5  ;;  %v1161_v4 = vld [vmem:[#allocation6 + $0x40] sm:$0xff] }
 0x181   :  { %v1165_v5 = vld [vmem:[#allocation6 + $0x60] sm:$0xff] }
 0x182   :  { %5417 = vmatmul.mubr.msk.bf16.vlgmr.msra.gmra.mrb[24].mxu0 %vm5416_vm4, %v7030_v46  ;;  %5419 = vmatmul.mubr.msk.bf16.vlgmr.msra.gmra.mrb[24].mxu1 %vm5416_vm4, %v7030_v46 }
 0x183   :  { %1060 = vmatpush1.bf16.msra.mxu0 %v7152_v6  ;;  %1103 = vmatpush1.bf16.msra.mxu1 %v7155_v7  ;;  %v1162_v6 = vld [vmem:[#allocation6 + $0x48] sm:$0xff] }
 0x184   :  { %1061 = vmatprep.subr.bf16.mxu0 %v7159_v8  ;;  %1104 = vmatprep.subr.bf16.mxu1 %v7163_v9  ;;  %v1166_v7 = vld [vmem:[#allocation6 + $0x68] sm:$0xff]  ;;  %v7533_v8 = vcombine.low %v1153_v60, %v1157_v61  ;;  %v7535_v9 = vcombine.low %v1154_v62, %v1158_v63  ;;  %v7617_v60 = vcombine.high %v1210_v55, %v1214_v56  ;;  %v1294_v63 = vld [vmem:[%s9415_s1] sm:$0xff] }
 0x185   :  { %1091 = vmatprep.mubr.bf16.mxu0 %v9427_v0  ;;  %1134 = vmatprep.mubr.bf16.mxu1 %v9427_v0  ;;  %v7621_v61 = vcombine.low %v1209_v53, %v1213_v54  ;;  %v7623_v62 = vcombine.low %v1210_v55, %v1214_v56  ;;  %v7703_v53 = vld [vmem:[#allocation8 + $0xd0] ss:$20 sps:$4 sm:$0xff]   ;;  %v7709_v54 = vld [vmem:[#allocation8 + $0xf4] ss:$20 sps:$4 sm:$0xff]  }
 0x186   :  { %9739 = vst [vmem:[#allocation18_spill] sm:$0xff] %v7533_v8  ;;  %9764 = vst [vmem:[#allocation43_spill] sm:$0xff] %v7617_v60  ;;  %v7711_v55 = vld [vmem:[#allocation8 + $0xfc] ss:$20 sps:$4 sm:$0xff]  }
 0x187   :  { %1062 = vmatpush1.bf16.msra.mxu0 %v7165_v10  ;;  %1105 = vmatpush1.bf16.msra.mxu1 %v7169_v11  ;;  %v7539_v10 = vcombine.high %v1161_v4, %v1165_v5  ;;  %v7541_v11 = vcombine.high %v1162_v6, %v1166_v7  ;;  %9765 = vst [vmem:[#allocation44_spill] sm:$0xff] %v7621_v61  ;;  %9766 = vst [vmem:[#allocation45_spill] sm:$0xff] %v7623_v62  ;;  %v7713_v56 = vld [vmem:[#allocation8 + $0xf0] ss:$20 sps:$4 sm:$0xff]  }
 0x188   :  { %1063 = vmatprep.subr.bf16.mxu0 %v7172_v12  ;;  %1106 = vmatprep.subr.bf16.mxu1 %v7175_v13  ;;  %v1169_v12 = vld [vmem:[#allocation6 + $0x80] sm:$0xff]  ;;  %9767 = vst [vmem:[#allocation46_spill] sm:$0xff] %v7711_v55  ;;  %9768 = vst [vmem:[#allocation47_spill] sm:$0xff] %v7713_v56 }
 0x189   :  { %9740 = vst [vmem:[#allocation19_spill] sm:$0xff] %v7539_v10  ;;  %v1173_v13 = vld [vmem:[#allocation6 + $0xa0] sm:$0xff] }
 0x18b   :  { %1064 = vmatpush1.bf16.msra.mxu0 %v7177_v14  ;;  %1107 = vmatpush1.bf16.msra.mxu1 %v7185_v17  ;;  %v1170_v14 = vld [vmem:[#allocation6 + $0x88] sm:$0xff]  ;;  %v7549_v17 = vcombine.low %v1162_v6, %v1166_v7  ;;  %v1304_v6 = vpack.c.bf16 %v1295_v1, %v1294_v63  ;;  %v7639_v7 = vld [vmem:[#allocation8] ss:$20 sps:$4 sm:$0xff]   ;;  %v7721_v1 = vld [vmem:[#allocation8 + $0x11c] ss:$20 sps:$4 sm:$0xff]  }
 0x18c   :  { %1065 = vmatprep.subr.bf16.mxu0 %v7179_v16  ;;  %1108 = vmatprep.subr.bf16.mxu1 %v7192_v19  ;;  %v7547_v16 = vcombine.low %v1161_v4, %v1165_v5  ;;  %v7555_v19 = vcombine.high %v1170_v14, %v1174_v15  ;;  %v7633_v4 = vld [vmem:[#allocation8 + $0x4] ss:$20 sps:$4 sm:$0xff]   ;;  %v7635_v5 = vld [vmem:[#allocation8 + $0xc] ss:$20 sps:$4 sm:$0xff]  }
 0x18d   :  { %9742 = vst [vmem:[#allocation21_spill] sm:$0xff] %v7549_v17  ;;  %v7715_v63 = vld [vmem:[#allocation8 + $0xf8] ss:$20 sps:$4 sm:$0xff]  }
 0x18e   :  { %9741 = vst [vmem:[#allocation20_spill] sm:$0xff] %v7547_v16  ;;  %9744 = vst [vmem:[#allocation23_spill] sm:$0xff] %v7555_v19 }
 0x18f   :  { %1066 = vmatpush1.bf16.msra.mxu0 %v7189_v18  ;;  %1109 = vmatpush1.bf16.msra.mxu1 %v7198_v22  ;;  %v7553_v18 = vcombine.high %v1169_v12, %v1173_v13  ;;  %v1178_v22 = vld [vmem:[#allocation6 + $0xc8] sm:$0xff]  ;;  %9769 = vst [vmem:[#allocation48_spill] sm:$0xff] %v7715_v63 }
 0x190   :  { %1067 = vmatprep.subr.bf16.mxu0 %v7194_v20  ;;  %1110 = vmatprep.subr.bf16.mxu1 %v7202_v23  ;;  %v1177_v20 = vld [vmem:[#allocation6 + $0xc0] sm:$0xff]  ;;  %v1182_v23 = vld [vmem:[#allocation6 + $0xe8] sm:$0xff] }
 0x191   :  { %9743 = vst [vmem:[#allocation22_spill] sm:$0xff] %v7553_v18  ;;  %v7569_v27 = vcombine.high %v1178_v22, %v1182_v23 }
 0x193   :  { %1068 = vmatpush1.bf16.msra.mxu0 %v7204_v24  ;;  %1111 = vmatpush1.bf16.msra.mxu1 %v7210_v26  ;;  %v7561_v24 = vcombine.low %v1169_v12, %v1173_v13  ;;  %v7567_v26 = vcombine.high %v1177_v20, %v1181_v21  ;;  %9748 = vst [vmem:[#allocation27_spill] sm:$0xff] %v7569_v27  ;;  %v7641_v12 = vld [vmem:[#allocation8 + $0x8] ss:$20 sps:$4 sm:$0xff]   ;;  %v7645_v13 = vld [vmem:[#allocation8 + $0x2c] ss:$20 sps:$4 sm:$0xff]  }
 0x194   :  { %1069 = vmatprep.subr.bf16.mxu0 %v7208_v25  ;;  %1112 = vmatprep.subr.bf16.mxu1 %v7218_v29  ;;  %v7563_v25 = vcombine.low %v1170_v14, %v1174_v15  ;;  %v1189_v29 = vld [vmem:[#allocation6 + $0x120] sm:$0xff]  ;;  %v7647_v14 = vld [vmem:[#allocation8 + $0x34] ss:$20 sps:$4 sm:$0xff]  }
 0x195   :  { %9745 = vst [vmem:[#allocation24_spill] sm:$0xff] %v7561_v24  ;;  %9747 = vst [vmem:[#allocation26_spill] sm:$0xff] %v7567_v26  ;;  %v7651_v15 = vld [vmem:[#allocation8 + $0x28] ss:$20 sps:$4 sm:$0xff]  }
 0x196   :  { %9746 = vst [vmem:[#allocation25_spill] sm:$0xff] %v7563_v25 }
 0x197   :  { %1070 = vmatpush1.bf16.msra.mxu0 %v7214_v28  ;;  %1113 = vmatpush1.bf16.msra.mxu1 %v7222_v31  ;;  %v1185_v28 = vld [vmem:[#allocation6 + $0x100] sm:$0xff]  ;;  %v1190_v31 = vld [vmem:[#allocation6 + $0x128] sm:$0xff] }
 0x198   :  { %1071 = vmatprep.subr.bf16.mxu0 %v7220_v30  ;;  %1114 = vmatprep.subr.bf16.mxu1 %v7227_v33  ;;  %v1186_v30 = vld [vmem:[#allocation6 + $0x108] sm:$0xff]  ;;  %v7575_v33 = vcombine.low %v1178_v22, %v1182_v23  ;;  %v7585_v40 = vcombine.low %v1185_v28, %v1189_v29  ;;  %v7659_v22 = vld [vmem:[#allocation8 + $0x5c] ss:$20 sps:$4 sm:$0xff]  }
 0x199   :  { %v7587_v41 = vcombine.low %v1186_v30, %v1190_v31  ;;  %v7665_v23 = vld [vmem:[#allocation8 + $0x50] ss:$20 sps:$4 sm:$0xff]  }
 0x19a   :  { %9750 = vst [vmem:[#allocation29_spill] sm:$0xff] %v7575_v33  ;;  %9753 = vst [vmem:[#allocation32_spill] sm:$0xff] %v7585_v40 }
 0x19b   :  { %1072 = vmatpush1.bf16.msra.mxu0 %v7225_v32  ;;  %1115 = vmatpush1.bf16.msra.mxu1 %v7235_v35  ;;  %v7573_v32 = vcombine.low %v1177_v20, %v1181_v21  ;;  %v7581_v35 = vcombine.high %v1186_v30, %v1190_v31  ;;  %9754 = vst [vmem:[#allocation33_spill] sm:$0xff] %v7587_v41  ;;  %v7653_v20 = vld [vmem:[#allocation8 + $0x30] ss:$20 sps:$4 sm:$0xff]   ;;  %v7657_v21 = vld [vmem:[#allocation8 + $0x54] ss:$20 sps:$4 sm:$0xff]  }
 0x19c   :  { %1073 = vmatprep.subr.bf16.mxu0 %v7229_v34  ;;  %1116 = vmatprep.subr.bf16.mxu1 %v7240_v37  ;;  %v7579_v34 = vcombine.high %v1185_v28, %v1189_v29  ;;  %v1197_v37 = vld [vmem:[#allocation6 + $0x160] sm:$0xff]  ;;  %v7667_v28 = vld [vmem:[#allocation8 + $0x58] ss:$20 sps:$4 sm:$0xff]   ;;  %v7671_v29 = vld [vmem:[#allocation8 + $0x7c] ss:$20 sps:$4 sm:$0xff]  }
 0x19d   :  { %9749 = vst [vmem:[#allocation28_spill] sm:$0xff] %v7573_v32  ;;  %9752 = vst [vmem:[#allocation31_spill] sm:$0xff] %v7581_v35  ;;  %v7673_v30 = vld [vmem:[#allocation8 + $0x84] ss:$20 sps:$4 sm:$0xff]  }
 0x19e   :  { %9751 = vst [vmem:[#allocation30_spill] sm:$0xff] %v7579_v34  ;;  %v7677_v31 = vld [vmem:[#allocation8 + $0x78] ss:$20 sps:$4 sm:$0xff]  }
 0x19f   :  { %1074 = vmatpush1.bf16.msra.mxu0 %v7238_v36  ;;  %1117 = vmatpush1.bf16.msra.mxu1 %v7246_v38  ;;  %v1193_v36 = vld [vmem:[#allocation6 + $0x140] sm:$0xff]  ;;  %v1194_v38 = vld [vmem:[#allocation6 + $0x148] sm:$0xff] }
 0x1a0   :  { %1465 = vmatprep.subr.bf16.mxu0 %v7525_v2  ;;  %1508 = vmatprep.subr.bf16.mxu1 %v7527_v3  ;;  %v7591_v43 = vcombine.high %v1193_v36, %v1197_v37  ;;  %v7593_v44 = vcombine.high %v1194_v38, %v1198_v39  ;;  %v7597_v49 = vcombine.low %v1193_v36, %v1197_v37  ;;  %v7679_v36 = vld [vmem:[#allocation8 + $0x80] ss:$20 sps:$4 sm:$0xff]   ;;  %v7685_v37 = vld [vmem:[#allocation8 + $0xa4] ss:$20 sps:$4 sm:$0xff]  }
 0x1a1   :  { %v7599_v50 = vcombine.low %v1194_v38, %v1198_v39  ;;  %v7687_v38 = vld [vmem:[#allocation8 + $0xac] ss:$20 sps:$4 sm:$0xff]  }
 0x1a2   :  { %5423 = vmatmul.mubr.msk.bf16.vlgmr.msra.gmra.mrb[28].mxu0 %vm5422_vm7, %v7030_v46  ;;  %5425 = vmatmul.mubr.msk.bf16.vlgmr.msra.gmra.mrb[28].mxu1 %vm5422_vm7, %v7030_v46  ;;  %9755 = vst [vmem:[#allocation34_spill] sm:$0xff] %v7591_v43  ;;  %9756 = vst [vmem:[#allocation35_spill] sm:$0xff] %v7593_v44  ;;  %v1205_v46 = vld [vmem:[#allocation6 + $0x1a0] sm:$0xff] }
 0x1a3   :  { %1466 = vmatpush1.bf16.msra.mxu0 %v7533_v8  ;;  %1509 = vmatpush1.bf16.msra.mxu1 %v7535_v9  ;;  %9757 = vst [vmem:[#allocation36_spill] sm:$0xff] %v7597_v49  ;;  %9758 = vst [vmem:[#allocation37_spill] sm:$0xff] %v7599_v50  ;;  %v7603_v51 = vcombine.high %v1201_v45, %v1205_v46  ;;  %v7609_v57 = vcombine.low %v1201_v45, %v1205_v46  ;;  %v7689_v39 = vld [vmem:[#allocation8 + $0xa0] ss:$20 sps:$4 sm:$0xff]   ;;  %v7691_v45 = vld [vmem:[#allocation8 + $0xa8] ss:$20 sps:$4 sm:$0xff]  }
 0x1a4   :  { %1467 = vmatprep.subr.bf16.mxu0 %v7539_v10  ;;  %1510 = vmatprep.subr.bf16.mxu1 %v7541_v11  ;;  %v7697_v46 = vld [vmem:[#allocation8 + $0xcc] ss:$20 sps:$4 sm:$0xff]  }
 0x1a5   :  { %1497 = vmatprep.mubr.bf16.mxu0 %v9427_v0  ;;  %1540 = vmatprep.mubr.bf16.mxu1 %v9427_v0  ;;  %9759 = vst [vmem:[#allocation38_spill] sm:$0xff] %v7603_v51  ;;  %9761 = vst [vmem:[#allocation40_spill] sm:$0xff] %v7609_v57 }
 0x1a7   :  { %1468 = vmatpush1.bf16.msra.mxu0 %v7547_v16  ;;  %1511 = vmatpush1.bf16.msra.mxu1 %v7549_v17 }
 0x1a8   :  { %1469 = vmatprep.subr.bf16.mxu0 %v7553_v18  ;;  %1512 = vmatprep.subr.bf16.mxu1 %v7555_v19 }
 0x1ab   :  { %1470 = vmatpush1.bf16.msra.mxu0 %v7561_v24  ;;  %1513 = vmatpush1.bf16.msra.mxu1 %v7563_v25 }
 0x1ac   :  { %1471 = vmatprep.subr.bf16.mxu0 %v7567_v26  ;;  %1514 = vmatprep.subr.bf16.mxu1 %v7569_v27 }
 0x1af   :  { %1472 = vmatpush1.bf16.msra.mxu0 %v7573_v32  ;;  %1515 = vmatpush1.bf16.msra.mxu1 %v7575_v33 }
 0x1b0   :  { %1473 = vmatprep.subr.bf16.mxu0 %v7579_v34  ;;  %1516 = vmatprep.subr.bf16.mxu1 %v7581_v35 }
 0x1b3   :  { %1474 = vmatpush1.bf16.msra.mxu0 %v7585_v40  ;;  %1517 = vmatpush1.bf16.msra.mxu1 %v7587_v41 }
 0x1b4   :  { %1475 = vmatprep.subr.bf16.mxu0 %v7591_v43  ;;  %1518 = vmatprep.subr.bf16.mxu1 %v7593_v44 }
 0x1b7   :  { %1476 = vmatpush1.bf16.msra.mxu0 %v7597_v49  ;;  %1519 = vmatpush1.bf16.msra.mxu1 %v7599_v50 }
 0x1b8   :  { %1477 = vmatprep.subr.bf16.mxu0 %v7603_v51  ;;  %1520 = vmatprep.subr.bf16.mxu1 %v7605_v52 }
 0x1bb   :  { %1478 = vmatpush1.bf16.msra.mxu0 %v7609_v57  ;;  %1521 = vmatpush1.bf16.msra.mxu1 %v7611_v58 }
 0x1bc   :  { %1479 = vmatprep.subr.bf16.mxu0 %v7615_v59  ;;  %1522 = vmatprep.subr.bf16.mxu1 %v7617_v60 }
 0x1bf   :  { %1480 = vmatpush1.bf16.msra.mxu0 %v7621_v61  ;;  %1523 = vmatpush1.bf16.msra.mxu1 %v7623_v62 }
 0x1c0   :  { %1712 = vmatprep.subr.bf16.mxu0 %v7633_v4  ;;  %1755 = vmatprep.subr.bf16.mxu1 %v7635_v5 }
 0x1c2   :  { %1498 = vmatmul.mubr.bf16.vlgmr.msra.gmra.mrb[0].mxu0 %v1304_v6  ;;  %1541 = vmatmul.mubr.bf16.vlgmr.msra.gmra.mrb[0].mxu1 %v1304_v6  ;;  %v7723_v6 = vld [vmem:[#allocation8 + $0x124] ss:$20 sps:$4 sm:$0xff]  }
 0x1c3   :  { %1713 = vmatpush1.bf16.msra.mxu0 %v7639_v7  ;;  %1756 = vmatpush1.bf16.msra.mxu1 %v7641_v12 }
 0x1c4   :  { %1714 = vmatprep.subr.bf16.mxu0 %v7645_v13  ;;  %1757 = vmatprep.subr.bf16.mxu1 %v7647_v14 }
 0x1c5   :  { %1744 = vmatprep.mubr.bf16.mxu0 %v9427_v0  ;;  %1787 = vmatprep.mubr.bf16.mxu1 %v9427_v0  ;;  %v7727_v0 = vld [vmem:[#allocation8 + $0x120] ss:$20 sps:$4 sm:$0xff]  }
 0x1c7   :  { %1715 = vmatpush1.bf16.msra.mxu0 %v7651_v15  ;;  %1758 = vmatpush1.bf16.msra.mxu1 %v7653_v20 }
 0x1c8   :  { %1716 = vmatprep.subr.bf16.mxu0 %v7657_v21  ;;  %1759 = vmatprep.subr.bf16.mxu1 %v7659_v22 }
 0x1cb   :  { %1717 = vmatpush1.bf16.msra.mxu0 %v7665_v23  ;;  %1760 = vmatpush1.bf16.msra.mxu1 %v7667_v28 }
 0x1cc   :  { %1718 = vmatprep.subr.bf16.mxu0 %v7671_v29  ;;  %1761 = vmatprep.subr.bf16.mxu1 %v7673_v30 }
 0x1cf   :  { %1719 = vmatpush1.bf16.msra.mxu0 %v7677_v31  ;;  %1762 = vmatpush1.bf16.msra.mxu1 %v7679_v36 }
 0x1d0   :  { %1720 = vmatprep.subr.bf16.mxu0 %v7685_v37  ;;  %1763 = vmatprep.subr.bf16.mxu1 %v7687_v38 }
 0x1d3   :  { %1721 = vmatpush1.bf16.msra.mxu0 %v7689_v39  ;;  %1764 = vmatpush1.bf16.msra.mxu1 %v7691_v45 }
 0x1d4   :  { %1722 = vmatprep.subr.bf16.mxu0 %v7697_v46  ;;  %1765 = vmatprep.subr.bf16.mxu1 %v7699_v47 }
 0x1d7   :  { %1723 = vmatpush1.bf16.msra.mxu0 %v7701_v48  ;;  %1766 = vmatpush1.bf16.msra.mxu1 %v7703_v53 }
 0x1d8   :  { %1724 = vmatprep.subr.bf16.mxu0 %v7709_v54  ;;  %1767 = vmatprep.subr.bf16.mxu1 %v7711_v55 }
 0x1db   :  { %1725 = vmatpush1.bf16.msra.mxu0 %v7713_v56  ;;  %1768 = vmatpush1.bf16.msra.mxu1 %v7715_v63  ;;  %v5427_v63 = vld [vmem:[%s9415_s1 + $0x10] sm:$0xff]  ;;  %v5428_v56 = vld [vmem:[%s9415_s1 + $0x18] sm:$0xff] }
 0x1dc   :  { %1726 = vmatprep.subr.bf16.mxu0 %v7721_v1  ;;  %1769 = vmatprep.subr.bf16.mxu1 %v7723_v6  ;;  %v1551_v55 = vpack.c.bf16 %v5428_v56, %v5427_v63  ;;  %v1159_v56 = vld [vmem:[#allocation6 + $0x30] sm:$0xff]  ;;  %v1156_v63 = vld [vmem:[#allocation6 + $0x18] sm:$0xff] }
 0x1df   :  { %1727 = vmatpush1.bf16.msra.mxu0 %v7725_v42  ;;  %1770 = vmatpush1.bf16.msra.mxu1 %v7727_v0 }
 0x1e0   :  { %2023 = vmatprep.subr.bf16.mxu0 %v7525_v2  ;;  %2066 = vmatprep.subr.bf16.mxu1 %v7527_v3  ;;  %v9770_v2 = vmov 0  }
 0x1e2   :  { %1745 = vmatmul.mubr.bf16.vlgmr.msra.gmra.mrb[32].mxu0 %v1551_v55  ;;  %1788 = vmatmul.mubr.bf16.vlgmr.msra.gmra.mrb[32].mxu1 %v1551_v55  ;;  %v1155_v55 = vld [vmem:[#allocation6 + $0x10] sm:$0xff] }
 0x1e3   :  { %2024 = vmatpush1.bf16.msra.mxu0 %v7533_v8  ;;  %2067 = vmatpush1.bf16.msra.mxu1 %v7535_v9 }
 0x1e4   :  { %2025 = vmatprep.subr.bf16.mxu0 %v7539_v10  ;;  %2068 = vmatprep.subr.bf16.mxu1 %v7541_v11 }
 0x1e5   :  { %2055 = vmatprep.mubr.bf16.mxu0 %v9770_v2  ;;  %2098 = vmatprep.mubr.bf16.mxu1 %v9770_v2 }
 0x1e7   :  { %2026 = vmatpush1.bf16.msra.mxu0 %v7547_v16  ;;  %2069 = vmatpush1.bf16.msra.mxu1 %v7549_v17 }
 0x1e8   :  { %2027 = vmatprep.subr.bf16.mxu0 %v7553_v18  ;;  %2070 = vmatprep.subr.bf16.mxu1 %v7555_v19 }
 0x1eb   :  { %2028 = vmatpush1.bf16.msra.mxu0 %v7561_v24  ;;  %2071 = vmatpush1.bf16.msra.mxu1 %v7563_v25 }
 0x1ec   :  { %2029 = vmatprep.subr.bf16.mxu0 %v7567_v26  ;;  %2072 = vmatprep.subr.bf16.mxu1 %v7569_v27  ;;  %v113_v26 = vld [vmem:[%s9418_s4] sm:$0xf]  ;;  %v1184_v27 = vld [vmem:[#allocation6 + $0xf8] sm:$0xff] }
 0x1ef   :  { %2030 = vmatpush1.bf16.msra.mxu0 %v7573_v32  ;;  %2073 = vmatpush1.bf16.msra.mxu1 %v7575_v33  ;;  %v1180_v33 = vld [vmem:[#allocation6 + $0xd8] sm:$0xff] }
 0x1f0   :  { %2031 = vmatprep.subr.bf16.mxu0 %v7579_v34  ;;  %2074 = vmatprep.subr.bf16.mxu1 %v7581_v35  ;;  %v1160_v34 = vld [vmem:[#allocation6 + $0x38] sm:$0xff]  ;;  %v1167_v35 = vld [vmem:[#allocation6 + $0x70] sm:$0xff] }
 0x1f3   :  { %2032 = vmatpush1.bf16.msra.mxu0 %v7585_v40  ;;  %2075 = vmatpush1.bf16.msra.mxu1 %v7587_v41  ;;  %v9775_v40 = vlaneseq }
 0x1f4   :  { %2033 = vmatprep.subr.bf16.mxu0 %v7591_v43  ;;  %2076 = vmatprep.subr.bf16.mxu1 %v7593_v44  ;;  %v7771_v43 = vcombine.high %v1155_v55, %v1159_v56 }
 0x1f6   :  { %9771 = vst [vmem:[#allocation49_spill] sm:$0xff] %v7771_v43 }
 0x1f7   :  { %2034 = vmatpush1.bf16.msra.mxu0 %v7597_v49  ;;  %2077 = vmatpush1.bf16.msra.mxu1 %v7599_v50  ;;  %v7773_v49 = vcombine.high %v1156_v63, %v1160_v34 }
 0x1f8   :  { %2035 = vmatprep.subr.bf16.mxu0 %v7603_v51  ;;  %2078 = vmatprep.subr.bf16.mxu1 %v7605_v52  ;;  %v7779_v51 = vcombine.low %v1155_v55, %v1159_v56 }
 0x1f9   :  { %9772 = vst [vmem:[#allocation50_spill] sm:$0xff] %v7773_v49 }
 0x1fa   :  { %9773 = vst [vmem:[#allocation51_spill] sm:$0xff] %v7779_v51 }
 0x1fb   :  { %2036 = vmatpush1.bf16.msra.mxu0 %v7609_v57  ;;  %2079 = vmatpush1.bf16.msra.mxu1 %v7611_v58  ;;  %v7781_v57 = vcombine.low %v1156_v63, %v1160_v34 }
 0x1fc   :  { %2037 = vmatprep.subr.bf16.mxu0 %v7615_v59  ;;  %2080 = vmatprep.subr.bf16.mxu1 %v7617_v60  ;;  %v7784_v59 = vshrl.u32 %v9775_v40, 7 }
 0x1fd   :  { %9774 = vst [vmem:[#allocation52_spill] sm:$0xff] %v7781_v57 }
 0x1fe   :  { %v9468_v32 = vsub.s32 0, %v7784_v59  ;;  %v9482_v40 = vsub.s32 3, %v7784_v59 }
 0x1ff   :  { %2038 = vmatpush1.bf16.msra.mxu0 %v7621_v61  ;;  %2081 = vmatpush1.bf16.msra.mxu1 %v7623_v62  ;;  %v9473_v61 = vsub.s32 1, %v7784_v59 }
 0x200   :  { %2109 = vmatprep.subr.bf16.mxu0 %v7771_v43  ;;  %2152 = vmatprep.subr.bf16.mxu1 %v7773_v49  ;;  %v7793_v43 = vrot.slane %v113_v26, %v9468_v32  ;;  %v9485_v32 = vsub.s32 2, %v7784_v59  ;;  %v7806_v52 = vrot.slane %v113_v26, %v9482_v40 }
 0x201   :  { %v7797_v55 = vrot.slane %v113_v26, %v9473_v61 }
 0x202   :  { %9776 = vst [vmem:[#allocation53_spill] sm:$0xff] %v7793_v43  ;;  %9778 = vst [vmem:[#allocation55_spill] sm:$0xff] %v7806_v52 }
 0x203   :  { %9777 = vst [vmem:[#allocation54_spill] sm:$0xff] %v7797_v55 }
 0x295   :  { %v1499_v34 = vpop.f32.mrb[0].mxu0  ;;  %v1542_v56 = vpop.f32.mrb[0].mxu1 }
 0x296   :  { %v5863_v63 = vadd.f32 %v1499_v34, %v7793_v43  ;;  %v1501_v24 = vpop.f32.mrb[1].mxu0  ;;  %v1544_v18 = vpop.f32.mrb[1].mxu1 }
 0x297   :  { %v5864_v16 = vadd.f32 %v1501_v24, %v7797_v55  ;;  %v1503_v10 = vpop.f32.mrb[2].mxu0  ;;  %v1546_v8 = vpop.f32.mrb[2].mxu1  ;;  %v5868_v44 = vadd.f32 %v1544_v18, %v7806_v52 }
 0x298   :  { %v5495_v49 = vmul.f32 -1.442695, %v5863_v63  ;;  %v5865_v62 = vadd.f32 %v1503_v10, %v7793_v43  ;;  %v1505_v60 = vpop.f32.mrb[3].mxu0  ;;  %v1548_v61 = vpop.f32.mrb[3].mxu1  ;;  %v7811_v63 = vrot.slane %v113_v26, %v9485_v32 }
 0x299   :  { %v5497_v58 = vmul.f32 -1.442695, %v5864_v16  ;;  %v5866_v34 = vadd.f32 %v1505_v60, %v7797_v55  ;;  %v5499_v16 = vmul.f32 -1.442695, %v5868_v44  ;;  %v5870_v40 = vadd.f32 %v1548_v61, %v7806_v52 }
 0x29a   :  { %6260 = vpow2.f32 %v5495_v49  ;;  %v5496_v50 = vmul.f32 -1.442695, %v5865_v62  ;;  %9779 = vst [vmem:[#allocation56_spill] sm:$0xff] %v7811_v63  ;;  %v5867_v10 = vadd.f32 %v1542_v56, %v7811_v63  ;;  %v5869_v41 = vadd.f32 %v1546_v8, %v7811_v63 }
 0x29b   :  { %6262 = vpow2.f32 %v5497_v58  ;;  %v5498_v24 = vmul.f32 -1.442695, %v5866_v34  ;;  %v5500_v62 = vmul.f32 -1.442695, %v5870_v40 }
 0x29c   :  { %6264 = vpow2.f32 %v5496_v50 }
 0x29d   :  { %6266 = vpow2.f32 %v5498_v24  ;;  %v1296_v24 = vld [vmem:[%s9416_s2] sm:$0xff] }
 0x29e   :  { %6268 = vtanh.f32 %v5867_v10 }
 0x29f   :  { %6270 = vpow2.f32 %v5499_v16 }
 0x2a0   :  { %6272 = vtanh.f32 %v5869_v41 }
 0x2a4   :  { %v6261_v60 = vpop.eup %6260 }
 0x2a5   :  { %v6263_v49 = vpop.eup %6262  ;;  %v1820_v58 = vadd.f32 1.0, %v6261_v60 }
 0x2a6   :  { %v1832_v34 = vadd.f32 1.0, %v6263_v49  ;;  %v6265_v26 = vpop.eup %6264 }
 0x2a7   :  { %6274 = vrcp.f32 %v1820_v58  ;;  %v1821_v18 = vadd.f32 1.0, %v6265_v26  ;;  %v6267_v50 = vpop.eup %6266 }
 0x2a8   :  { %6276 = vrcp.f32 %v1832_v34  ;;  %v1833_v44 = vadd.f32 1.0, %v6267_v50  ;;  %v6269_v61 = vpop.eup %6268 }
 0x2a9   :  { %6278 = vpow2.f32 %v5500_v62  ;;  %v6271_v56 = vpop.eup %6270  ;;  %v1297_v62 = vld [vmem:[%s9416_s2 + $0x8] sm:$0xff] }
 0x2aa   :  { %6280 = vrcp.f32 %v1821_v18  ;;  %v6273_v8 = vpop.eup %6272  ;;  %v1846_v58 = vadd.f32 1.0, %v6271_v56 }
 0x2ab   :  { %6282 = vrcp.f32 %v1833_v44 }
 0x2ac   :  { %6284 = vrcp.f32 %v1846_v58 }
 0x2b1   :  { %v6275_v10 = vpop.eup %6274 }
 0x2b2   :  { %v6277_v40 = vpop.eup %6276  ;;  %v1854_v16 = vmul.f32 %v6275_v10, %v6269_v61  ;;  %v1163_v10 = vld [vmem:[#allocation6 + $0x50] sm:$0xff] }
 0x2b3   :  { %v6279_v41 = vpop.eup %6278  ;;  %v1852_v60 = vmul.f32 %v6277_v40, %v1296_v24  ;;  %v7831_v58 = vcombine.high %v1163_v10, %v1167_v35 }
 0x2b4   :  { %v6281_v49 = vpop.eup %6280  ;;  %v1847_v50 = vadd.f32 1.0, %v6279_v41 }
 0x2b5   :  { %v7823_v34 = vadd.f32 %v1854_v16, %v1852_v60  ;;  %v1855_v26 = vmul.f32 %v6281_v49, %v6273_v8  ;;  %v6283_v18 = vpop.eup %6282  ;;  %v1164_v16 = vld [vmem:[#allocation6 + $0x58] sm:$0xff]  ;;  %9780 = vst [vmem:[#allocation57_spill] sm:$0xff] %v7831_v58 }
 0x2b6   :  { %v1853_v44 = vmul.f32 %v6283_v18, %v1297_v62  ;;  %v6285_v61 = vpop.eup %6284  ;;  %v1168_v60 = vld [vmem:[#allocation6 + $0x78] sm:$0xff]  ;;  %v1175_v18 = vld [vmem:[#allocation6 + $0xb0] sm:$0xff] }
 0x2b7   :  { %6286 = vtanh.f32 %v7823_v34  ;;  %v7833_v62 = vcombine.high %v1164_v16, %v1168_v60 }
 0x2b8   :  { %v7826_v32 = vadd.f32 %v1855_v26, %v1853_v44  ;;  %6288 = vrcp.f32 %v1847_v50  ;;  %v1171_v26 = vld [vmem:[#allocation6 + $0x90] sm:$0xff]  ;;  %v1172_v50 = vld [vmem:[#allocation6 + $0x98] sm:$0xff] }
 0x2b9   :  { %9781 = vst [vmem:[#allocation58_spill] sm:$0xff] %v7833_v62  ;;  %v1176_v44 = vld [vmem:[#allocation6 + $0xb8] sm:$0xff] }
 0x2ba   :  { %6290 = vtanh.f32 %v7826_v32 }
 0x2c1   :  { %v6287_v56 = vpop.eup %6286 }
 0x2c2   :  { %v6289_v24 = vpop.eup %6288  ;;  %v1860_v8 = vmul.f32 %v6287_v56, %v6285_v61  ;;  %v7839_v61 = vcombine.low %v1163_v10, %v1167_v35  ;;  %v7841_v56 = vcombine.low %v1164_v16, %v1168_v60  ;;  %v7853_v35 = vcombine.low %v1171_v26, %v1175_v18 }
 0x2c3   :  { %v7855_v10 = vcombine.low %v1172_v50, %v1176_v44  ;;  %v7861_v60 = vcombine.high %v1180_v33, %v1184_v27 }
 0x2c4   :  { %v6291_v40 = vpop.eup %6290  ;;  %9782 = vst [vmem:[#allocation59_spill] sm:$0xff] %v7839_v61  ;;  %9783 = vst [vmem:[#allocation60_spill] sm:$0xff] %v7841_v56 }
 0x2c5   :  { %v1861_v49 = vmul.f32 %v6291_v40, %v6289_v24  ;;  %v7845_v24 = vcombine.high %v1171_v26, %v1175_v18  ;;  %v7847_v40 = vcombine.high %v1172_v50, %v1176_v44  ;;  %9786 = vst [vmem:[#allocation63_spill] sm:$0xff] %v7853_v35  ;;  %9787 = vst [vmem:[#allocation64_spill] sm:$0xff] %v7855_v10 }
 0x2c6   :  { %9789 = vst [vmem:[#allocation66_spill] sm:$0xff] %v7861_v60  ;;  %v7867_v18 = vcombine.low %v1180_v33, %v1184_v27 }
 0x2c7   :  { %v7829_v41 = vpack.c.bf16 %v1861_v49, %v1860_v8  ;;  %9784 = vst [vmem:[#allocation61_spill] sm:$0xff] %v7845_v24  ;;  %9785 = vst [vmem:[#allocation62_spill] sm:$0xff] %v7847_v40  ;;  %v1179_v8 = vld [vmem:[#allocation6 + $0xd0] sm:$0xff] }
 0x2c8   :  { %v1183_v49 = vld [vmem:[#allocation6 + $0xf0] sm:$0xff]  ;;  %9791 = vst [vmem:[#allocation68_spill] sm:$0xff] %v7867_v18 }
 0x2c9   :  { %2056 = vmatmul.mubr.bf16.vlgmr.msra.gmra.mrb[4].mxu0 %v7829_v41  ;;  %2099 = vmatmul.mubr.bf16.vlgmr.msra.gmra.mrb[4].mxu1 %v7829_v41  ;;  %v7859_v16 = vcombine.high %v1179_v8, %v1183_v49  ;;  %v7865_v26 = vcombine.low %v1179_v8, %v1183_v49 }
 0x2ca   :  { %2110 = vmatpush1.bf16.msra.mxu0 %v7779_v51  ;;  %2153 = vmatpush1.bf16.msra.mxu1 %v7781_v57  ;;  %v1191_v51 = vld [vmem:[#allocation6 + $0x130] sm:$0xff]  ;;  %v1192_v57 = vld [vmem:[#allocation6 + $0x138] sm:$0xff] }
 0x2cb   :  { %2111 = vmatprep.subr.bf16.mxu0 %v7831_v58  ;;  %2154 = vmatprep.subr.bf16.mxu1 %v7833_v62  ;;  %9788 = vst [vmem:[#allocation65_spill] sm:$0xff] %v7859_v16  ;;  %v1187_v58 = vld [vmem:[#allocation6 + $0x110] sm:$0xff]  ;;  %v1188_v62 = vld [vmem:[#allocation6 + $0x118] sm:$0xff]  ;;  %9790 = vst [vmem:[#allocation67_spill] sm:$0xff] %v7865_v26 }
 0x2cc   :  { %2141 = vmatprep.mubr.bf16.mxu0 %v9770_v2  ;;  %2184 = vmatprep.mubr.bf16.mxu1 %v9770_v2  ;;  %v7871_v50 = vcombine.high %v1187_v58, %v1191_v51  ;;  %v7873_v44 = vcombine.high %v1188_v62, %v1192_v57  ;;  %v7877_v8 = vcombine.low %v1187_v58, %v1191_v51 }
 0x2cd   :  { %v7879_v27 = vcombine.low %v1188_v62, %v1192_v57 }
 0x2ce   :  { %2112 = vmatpush1.bf16.msra.mxu0 %v7839_v61  ;;  %2155 = vmatpush1.bf16.msra.mxu1 %v7841_v56  ;;  %9792 = vst [vmem:[#allocation69_spill] sm:$0xff] %v7871_v50  ;;  %9793 = vst [vmem:[#allocation70_spill] sm:$0xff] %v7873_v44  ;;  %v1199_v61 = vld [vmem:[#allocation6 + $0x170] sm:$0xff]  ;;  %v1200_v56 = vld [vmem:[#allocation6 + $0x178] sm:$0xff] }
 0x2cf   :  { %2113 = vmatprep.subr.bf16.mxu0 %v7845_v24  ;;  %2156 = vmatprep.subr.bf16.mxu1 %v7847_v40  ;;  %v1195_v24 = vld [vmem:[#allocation6 + $0x150] sm:$0xff]  ;;  %v1196_v40 = vld [vmem:[#allocation6 + $0x158] sm:$0xff]  ;;  %9794 = vst [vmem:[#allocation71_spill] sm:$0xff] %v7877_v8  ;;  %9795 = vst [vmem:[#allocation72_spill] sm:$0xff] %v7879_v27 }
 0x2d0   :  { %v7883_v33 = vcombine.high %v1195_v24, %v1199_v61  ;;  %v7885_v49 = vcombine.high %v1196_v40, %v1200_v56  ;;  %v7889_v51 = vcombine.low %v1195_v24, %v1199_v61  ;;  %v7891_v57 = vcombine.low %v1196_v40, %v1200_v56 }
 0x2d2   :  { %2114 = vmatpush1.bf16.msra.mxu0 %v7853_v35  ;;  %2157 = vmatpush1.bf16.msra.mxu1 %v7855_v10  ;;  %9796 = vst [vmem:[#allocation73_spill] sm:$0xff] %v7883_v33  ;;  %9797 = vst [vmem:[#allocation74_spill] sm:$0xff] %v7885_v49  ;;  %v1207_v35 = vld [vmem:[#allocation6 + $0x1b0] sm:$0xff]  ;;  %v1208_v10 = vld [vmem:[#allocation6 + $0x1b8] sm:$0xff] }
 0x2d3   :  { %2115 = vmatprep.subr.bf16.mxu0 %v7859_v16  ;;  %2158 = vmatprep.subr.bf16.mxu1 %v7861_v60  ;;  %v1203_v16 = vld [vmem:[#allocation6 + $0x190] sm:$0xff]  ;;  %v1204_v60 = vld [vmem:[#allocation6 + $0x198] sm:$0xff]  ;;  %9798 = vst [vmem:[#allocation75_spill] sm:$0xff] %v7889_v51  ;;  %9799 = vst [vmem:[#allocation76_spill] sm:$0xff] %v7891_v57 }
 0x2d4   :  { %v7895_v58 = vcombine.high %v1203_v16, %v1207_v35  ;;  %v7897_v62 = vcombine.high %v1204_v60, %v1208_v10  ;;  %v7901_v61 = vcombine.low %v1203_v16, %v1207_v35  ;;  %v7903_v56 = vcombine.low %v1204_v60, %v1208_v10 }
 0x2d6   :  { %2116 = vmatpush1.bf16.msra.mxu0 %v7865_v26  ;;  %2159 = vmatpush1.bf16.msra.mxu1 %v7867_v18  ;;  %9800 = vst [vmem:[#allocation77_spill] sm:$0xff] %v7895_v58  ;;  %9801 = vst [vmem:[#allocation78_spill] sm:$0xff] %v7897_v62  ;;  %v1215_v26 = vld [vmem:[#allocation6 + $0x1f0] sm:$0xff]  ;;  %v1216_v18 = vld [vmem:[#allocation6 + $0x1f8] sm:$0xff] }
 0x2d7   :  { %2117 = vmatprep.subr.bf16.mxu0 %v7871_v50  ;;  %2160 = vmatprep.subr.bf16.mxu1 %v7873_v44  ;;  %v1211_v50 = vld [vmem:[#allocation6 + $0x1d0] sm:$0xff]  ;;  %v1212_v44 = vld [vmem:[#allocation6 + $0x1d8] sm:$0xff]  ;;  %9802 = vst [vmem:[#allocation79_spill] sm:$0xff] %v7901_v61  ;;  %9803 = vst [vmem:[#allocation80_spill] sm:$0xff] %v7903_v56 }
 0x2d8   :  { %v7907_v24 = vcombine.high %v1211_v50, %v1215_v26  ;;  %v7909_v40 = vcombine.high %v1212_v44, %v1216_v18 }
 0x2da   :  { %2118 = vmatpush1.bf16.msra.mxu0 %v7877_v8  ;;  %2161 = vmatpush1.bf16.msra.mxu1 %v7879_v27  ;;  %9804 = vst [vmem:[#allocation81_spill] sm:$0xff] %v7907_v24  ;;  %9805 = vst [vmem:[#allocation82_spill] sm:$0xff] %v7909_v40 }
 0x2db   :  { %2119 = vmatprep.subr.bf16.mxu0 %v7883_v33  ;;  %2162 = vmatprep.subr.bf16.mxu1 %v7885_v49  ;;  %v7913_v33 = vcombine.low %v1211_v50, %v1215_v26  ;;  %v1265_v50 = vld [vmem:[%s9420_s6] sm:$0xf] }
 0x2dd   :  { %9806 = vst [vmem:[#allocation83_spill] sm:$0xff] %v7913_v33 }
 0x2de   :  { %2120 = vmatpush1.bf16.msra.mxu0 %v7889_v51  ;;  %2163 = vmatpush1.bf16.msra.mxu1 %v7891_v57  ;;  %v7915_v51 = vcombine.low %v1212_v44, %v1216_v18 }
 0x2df   :  { %2121 = vmatprep.subr.bf16.mxu0 %v7895_v58  ;;  %2164 = vmatprep.subr.bf16.mxu1 %v7897_v62 }
 0x2e0   :  { %9807 = vst [vmem:[#allocation84_spill] sm:$0xff] %v7915_v51 }
 0x2e2   :  { %2122 = vmatpush1.bf16.msra.mxu0 %v7901_v61  ;;  %2165 = vmatpush1.bf16.msra.mxu1 %v7903_v56 }
 0x2e3   :  { %2123 = vmatprep.subr.bf16.mxu0 %v7907_v24  ;;  %2166 = vmatprep.subr.bf16.mxu1 %v7909_v40 }
 0x2e6   :  { %2124 = vmatpush1.bf16.msra.mxu0 %v7913_v33  ;;  %2167 = vmatpush1.bf16.msra.mxu1 %v7915_v51 }
 0x2e7   :  { %2308 = vmatprep.subr.bf16.mxu0 %v7633_v4  ;;  %2351 = vmatprep.subr.bf16.mxu1 %v7635_v5  ;;  %v9808_v4 = vld [vmem:[#allocation46_spill] sm:$0xff]  ;;  %v9809_v5 = vld [vmem:[#allocation47_spill] sm:$0xff] }
 0x2e9   :  { %2142 = vmatmul.mubr.bf16.vlgmr.msra.gmra.mrb[32].mxu0 %v7829_v41  ;;  %2185 = vmatmul.mubr.bf16.vlgmr.msra.gmra.mrb[32].mxu1 %v7829_v41 }
 0x2ea   :  { %2309 = vmatpush1.bf16.msra.mxu0 %v7639_v7  ;;  %2352 = vmatpush1.bf16.msra.mxu1 %v7641_v12  ;;  %v9810_v7 = vld [vmem:[#allocation48_spill] sm:$0xff]  ;;  %v9528_v12 = vmov 0.0  }
 0x2eb   :  { %2310 = vmatprep.subr.bf16.mxu0 %v7645_v13  ;;  %2353 = vmatprep.subr.bf16.mxu1 %v7647_v14 }
 0x2ec   :  { %2340 = vmatprep.mubr.bf16.mxu0 %v9770_v2  ;;  %2383 = vmatprep.mubr.bf16.mxu1 %v9770_v2 }
 0x2ee   :  { %2311 = vmatpush1.bf16.msra.mxu0 %v7651_v15  ;;  %2354 = vmatpush1.bf16.msra.mxu1 %v7653_v20 }
 0x2ef   :  { %2312 = vmatprep.subr.bf16.mxu0 %v7657_v21  ;;  %2355 = vmatprep.subr.bf16.mxu1 %v7659_v22 }
 0x2f2   :  { %2313 = vmatpush1.bf16.msra.mxu0 %v7665_v23  ;;  %2356 = vmatpush1.bf16.msra.mxu1 %v7667_v28 }
 0x2f3   :  { %2314 = vmatprep.subr.bf16.mxu0 %v7671_v29  ;;  %2357 = vmatprep.subr.bf16.mxu1 %v7673_v30 }
 0x2f6   :  { %2315 = vmatpush1.bf16.msra.mxu0 %v7677_v31  ;;  %2358 = vmatpush1.bf16.msra.mxu1 %v7679_v36 }
 0x2f7   :  { %2316 = vmatprep.subr.bf16.mxu0 %v7685_v37  ;;  %2359 = vmatprep.subr.bf16.mxu1 %v7687_v38 }
 0x2fa   :  { %2317 = vmatpush1.bf16.msra.mxu0 %v7689_v39  ;;  %2360 = vmatpush1.bf16.msra.mxu1 %v7691_v45 }
 0x2fb   :  { %2318 = vmatprep.subr.bf16.mxu0 %v7697_v46  ;;  %2361 = vmatprep.subr.bf16.mxu1 %v7699_v47 }
 0x2fe   :  { %2319 = vmatpush1.bf16.msra.mxu0 %v7701_v48  ;;  %2362 = vmatpush1.bf16.msra.mxu1 %v7703_v53 }
 0x2ff   :  { %2320 = vmatprep.subr.bf16.mxu0 %v7709_v54  ;;  %2363 = vmatprep.subr.bf16.mxu1 %v9808_v4 }
 0x302   :  { %2321 = vmatpush1.bf16.msra.mxu0 %v9809_v5  ;;  %2364 = vmatpush1.bf16.msra.mxu1 %v9810_v7 }
 0x303   :  { %2322 = vmatprep.subr.bf16.mxu0 %v7721_v1  ;;  %2365 = vmatprep.subr.bf16.mxu1 %v7723_v6 }
 0x306   :  { %2323 = vmatpush1.bf16.msra.mxu0 %v7725_v42  ;;  %2366 = vmatpush1.bf16.msra.mxu1 %v7727_v0 }
 0x307   :  { %2547 = vmatprep.subr.bf16.mxu1 %v7527_v3  ;;  %5703 = vmatprep.subr.bf16.mxu0 %v9528_v12 }
 0x39c   :  { %v2057_v13 = vpop.f32.mrb[4].mxu0  ;;  %v2100_v14 = vpop.f32.mrb[4].mxu1 }
 0x39d   :  { %v5871_v15 = vadd.f32 %v2057_v13, %v7793_v43  ;;  %v2059_v20 = vpop.f32.mrb[5].mxu0  ;;  %v2102_v21 = vpop.f32.mrb[5].mxu1  ;;  %v5875_v46 = vadd.f32 %v2100_v14, %v7811_v63  ;;  %v9811_v13 = vsub.s32 0, %v7784_v59 }
 0x39e   :  { %v5872_v22 = vadd.f32 %v2059_v20, %v7797_v55  ;;  %v2061_v23 = vpop.f32.mrb[6].mxu0  ;;  %v2104_v28 = vpop.f32.mrb[6].mxu1  ;;  %v5876_v39 = vadd.f32 %v2102_v21, %v7806_v52 }
 0x39f   :  { %v5547_v29 = vmul.f32 -1.442695, %v5871_v15  ;;  %v5873_v42 = vadd.f32 %v2061_v23, %v7793_v43  ;;  %v2063_v30 = vpop.f32.mrb[7].mxu0  ;;  %v2106_v0 = vpop.f32.mrb[7].mxu1  ;;  %v5877_v6 = vadd.f32 %v2104_v28, %v7811_v63  ;;  %v7972_v14 = vrot.slane %v1265_v50, %v9811_v13 }
 0x3a0   :  { %v5549_v31 = vmul.f32 -1.442695, %v5872_v22  ;;  %v5874_v36 = vadd.f32 %v2063_v30, %v7797_v55  ;;  %v5878_v45 = vadd.f32 %v2106_v0, %v7806_v52  ;;  %v5551_v47 = vmul.f32 -1.442695, %v5876_v39 }
 0x3a1   :  { %6292 = vpow2.f32 %v5547_v29  ;;  %v5548_v37 = vmul.f32 -1.442695, %v5873_v42  ;;  %v9812_v22 = vsub.s32 1, %v7784_v59 }
 0x3a2   :  { %6294 = vpow2.f32 %v5549_v31  ;;  %v5550_v38 = vmul.f32 -1.442695, %v5874_v36  ;;  %v5552_v48 = vmul.f32 -1.442695, %v5878_v45 }
 0x3a3   :  { %6296 = vpow2.f32 %v5548_v37  ;;  %v7977_v23 = vrot.slane %v1265_v50, %v9812_v22 }
 0x3a4   :  { %6298 = vpow2.f32 %v5550_v38 }
 0x3a5   :  { %6300 = vtanh.f32 %v5875_v46 }
 0x3a6   :  { %6302 = vpow2.f32 %v5551_v47 }
 0x3a7   :  { %6304 = vpow2.f32 %v5552_v48 }
 0x3ab   :  { %v6293_v53 = vpop.eup %6292 }
 0x3ac   :  { %v6295_v54 = vpop.eup %6294  ;;  %v2461_v1 = vadd.f32 1.0, %v6293_v53 }
 0x3ad   :  { %v2473_v41 = vadd.f32 1.0, %v6295_v54  ;;  %v6297_v35 = vpop.eup %6296 }
 0x3ae   :  { %6306 = vrcp.f32 %v2461_v1  ;;  %v2462_v10 = vadd.f32 1.0, %v6297_v35  ;;  %v6299_v16 = vpop.eup %6298 }
 0x3af   :  { %6308 = vrcp.f32 %v2473_v41  ;;  %v2474_v60 = vadd.f32 1.0, %v6299_v16  ;;  %v6301_v26 = vpop.eup %6300 }
 0x3b0   :  { %6310 = vtanh.f32 %v5877_v6  ;;  %v6303_v18 = vpop.eup %6302 }
 0x3b1   :  { %6312 = vrcp.f32 %v2462_v10  ;;  %v6305_v44 = vpop.eup %6304  ;;  %v2487_v21 = vadd.f32 1.0, %v6303_v18 }
 0x3b2   :  { %6314 = vrcp.f32 %v2474_v60  ;;  %v2488_v29 = vadd.f32 1.0, %v6305_v44 }
 0x3b3   :  { %6316 = vrcp.f32 %v2487_v21 }
 0x3b4   :  { %6318 = vrcp.f32 %v2488_v29 }
 0x3b8   :  { %v6307_v4 = vpop.eup %6306 }
 0x3b9   :  { %v6309_v5 = vpop.eup %6308  ;;  %v2495_v7 = vmul.f32 %v6307_v4, %v6301_v26  ;;  %v9814_v26 = vsub.s32 2, %v7784_v59 }
 0x3ba   :  { %v6311_v15 = vpop.eup %6310  ;;  %v2493_v20 = vmul.f32 %v6309_v5, %v7823_v34 }
 0x3bb   :  { %v6313_v28 = vpop.eup %6312  ;;  %v7996_v18 = vrot.slane %v1265_v50, %v9814_v26 }
 0x3bc   :  { %v7979_v42 = vadd.f32 %v2495_v7, %v2493_v20  ;;  %v2496_v30 = vmul.f32 %v6313_v28, %v6311_v15  ;;  %v2143_v0 = vpop.f32.mrb[32].mxu0  ;;  %v2186_v31 = vpop.f32.mrb[32].mxu1 }
 0x3bd   :  { %v6315_v36 = vpop.eup %6314  ;;  %v2195_v37 = vadd.f32 %v2143_v0, %v7972_v14  ;;  %v2145_v38 = vpop.f32.mrb[33].mxu0  ;;  %v2197_v5 = vadd.f32 %v2186_v31, %v7996_v18 }
 0x3be   :  { %v2188_v39 = vpop.f32.mrb[33].mxu1  ;;  %v2494_v34 = vmul.f32 %v6315_v36, %v7826_v32  ;;  %v2196_v45 = vadd.f32 %v2145_v38, %v7977_v23  ;;  %v2147_v46 = vpop.f32.mrb[34].mxu0  ;;  %6320 = vtanh.f32 %v7979_v42  ;;  %v9813_v32 = vsub.s32 3, %v7784_v59 }
 0x3bf   :  { %v2190_v47 = vpop.f32.mrb[34].mxu1  ;;  %v5533_v48 = vmul.f32 -1.442695, %v2195_v37  ;;  %v2199_v53 = vadd.f32 %v2147_v46, %v7972_v14  ;;  %v2149_v54 = vpop.f32.mrb[35].mxu0 }
 0x3c0   :  { %v2192_v1 = vpop.f32.mrb[35].mxu1  ;;  %v7986_v6 = vadd.f32 %v2496_v30, %v2494_v34  ;;  %v5535_v41 = vmul.f32 -1.442695, %v2196_v45  ;;  %v2200_v35 = vadd.f32 %v2149_v54, %v7977_v23  ;;  %v7991_v10 = vrot.slane %v1265_v50, %v9813_v32  ;;  %v6317_v4 = vpop.eup %6316 }
 0x3c1   :  { %6322 = vpow2.f32 %v5533_v48  ;;  %v5534_v16 = vmul.f32 -1.442695, %v2199_v53  ;;  %v6319_v7 = vpop.eup %6318  ;;  %v2201_v22 = vadd.f32 %v2190_v47, %v7996_v18  ;;  %v5429_v48 = vld [vmem:[%s9416_s2 + $0x10] sm:$0xff] }
 0x3c2   :  { %6324 = vtanh.f32 %v7986_v6  ;;  %v5536_v60 = vmul.f32 -1.442695, %v2200_v35  ;;  %v2198_v44 = vadd.f32 %v2188_v39, %v7991_v10  ;;  %v2202_v15 = vadd.f32 %v2192_v1, %v7991_v10 }
 0x3c3   :  { %6326 = vpow2.f32 %v5535_v41 }
 0x3c4   :  { %6328 = vpow2.f32 %v5534_v16  ;;  %v5537_v13 = vmul.f32 -1.442695, %v2198_v44  ;;  %v5538_v50 = vmul.f32 -1.442695, %v2202_v15 }
 0x3c5   :  { %6330 = vpow2.f32 %v5536_v60  ;;  %v5430_v60 = vld [vmem:[%s9416_s2 + $0x18] sm:$0xff] }
 0x3c6   :  { %6332 = vtanh.f32 %v2197_v5 }
 0x3c7   :  { %6334 = vpow2.f32 %v5537_v13 }
 0x3c8   :  { %v6321_v20 = vpop.eup %6320 }
 0x3c9   :  { %v2501_v30 = vmul.f32 %v6321_v20, %v6317_v4 }
 0x3cb   :  { %v6323_v21 = vpop.eup %6322 }
 0x3cc   :  { %v6325_v28 = vpop.eup %6324  ;;  %v2217_v29 = vadd.f32 1.0, %v6323_v21 }
 0x3cd   :  { %v6327_v59 = vpop.eup %6326  ;;  %v2502_v0 = vmul.f32 %v6325_v28, %v6319_v7 }
 0x3ce   :  { %6336 = vrcp.f32 %v2217_v29  ;;  %v2229_v36 = vadd.f32 1.0, %v6327_v59  ;;  %v6329_v37 = vpop.eup %6328  ;;  %v8016_v59 = vld [vmem:[#allocation8 + $0x10] ss:$20 sps:$4 sm:$0xff]  }
 0x3cf   :  { %6338 = vtanh.f32 %v2201_v22  ;;  %v8002_v31 = vpack.c.bf16 %v2502_v0, %v2501_v30  ;;  %v2218_v38 = vadd.f32 1.0, %v6329_v37  ;;  %v6331_v39 = vpop.eup %6330  ;;  %v8020_v30 = vld [vmem:[#allocation8 + $0x38] ss:$20 sps:$4 sm:$0xff]   ;;  %v8029_v0 = vld [vmem:[#allocation8 + $0x60] ss:$20 sps:$4 sm:$0xff]  }
 0x3d0   :  { %6340 = vrcp.f32 %v2229_v36  ;;  %v2230_v34 = vadd.f32 1.0, %v6331_v39  ;;  %v6333_v45 = vpop.eup %6332  ;;  %v8035_v36 = vld [vmem:[#allocation8 + $0x88] ss:$20 sps:$4 sm:$0xff]   ;;  %v8041_v39 = vld [vmem:[#allocation8 + $0xb0] ss:$20 sps:$4 sm:$0xff]  }
 0x3d1   :  { %6342 = vpow2.f32 %v5538_v50  ;;  %v6335_v46 = vpop.eup %6334  ;;  %v9815_v37 = vld [vmem:[#allocation27_spill] sm:$0xff] }
 0x3d2   :  { %6344 = vrcp.f32 %v2218_v38  ;;  %v2243_v16 = vadd.f32 1.0, %v6335_v46  ;;  %v9816_v38 = vld [vmem:[#allocation29_spill] sm:$0xff] }
 0x3d3   :  { %6346 = vrcp.f32 %v2230_v34  ;;  %v9817_v34 = vld [vmem:[#allocation31_spill] sm:$0xff] }
 0x3d4   :  { %6348 = vrcp.f32 %v2243_v16  ;;  %v8047_v46 = vld [vmem:[#allocation8 + $0xd8] ss:$20 sps:$4 sm:$0xff]   ;;  %v9825_v16 = vld [vmem:[#allocation16_spill] sm:$0xff] }
 0x3d8   :  { %v6337_v47 = vpop.eup %6336 }
 0x3d9   :  { %v6339_v53 = vpop.eup %6338  ;;  %v2251_v54 = vmul.f32 %v6337_v47, %v6333_v45  ;;  %v9818_v45 = vld [vmem:[#allocation33_spill] sm:$0xff]  ;;  %v9819_v47 = vld [vmem:[#allocation35_spill] sm:$0xff] }
 0x3da   :  { %v6341_v1 = vpop.eup %6340 }
 0x3db   :  { %v6343_v41 = vpop.eup %6342  ;;  %v2249_v35 = vmul.f32 %v6341_v1, %v5429_v48  ;;  %v9820_v48 = vld [vmem:[#allocation37_spill] sm:$0xff] }
 0x3dc   :  { %v6345_v32 = vpop.eup %6344  ;;  %v2244_v5 = vadd.f32 1.0, %v6343_v41  ;;  %v9822_v1 = vld [vmem:[#allocation41_spill] sm:$0xff] }
 0x3dd   :  { %v8010_v26 = vadd.f32 %v2251_v54, %v2249_v35  ;;  %v2252_v44 = vmul.f32 %v6345_v32, %v6339_v53  ;;  %v6347_v4 = vpop.eup %6346  ;;  %v8053_v53 = vld [vmem:[#allocation8 + $0x100] ss:$20 sps:$4 sm:$0xff]   ;;  %v9821_v54 = vld [vmem:[#allocation39_spill] sm:$0xff]  ;;  %v9824_v32 = vld [vmem:[#allocation45_spill] sm:$0xff] }
 0x3de   :  { %v2250_v7 = vmul.f32 %v6347_v4, %v5430_v60  ;;  %v6349_v15 = vpop.eup %6348  ;;  %v8059_v41 = vld [vmem:[#allocation8 + $0x128] ss:$20 sps:$4 sm:$0xff]   ;;  %v9826_v60 = vld [vmem:[#allocation50_spill] sm:$0xff]  ;;  %v9828_v4 = vld [vmem:[#allocation52_spill] sm:$0xff] }
 0x3df   :  { %6350 = vtanh.f32 %v8010_v26  ;;  %v9823_v35 = vld [vmem:[#allocation43_spill] sm:$0xff] }
 0x3e0   :  { %v8013_v13 = vadd.f32 %v2252_v44, %v2250_v7  ;;  %6352 = vrcp.f32 %v2244_v5  ;;  %v9827_v44 = vld [vmem:[#allocation18_spill] sm:$0xff]  ;;  %v9829_v5 = vld [vmem:[#allocation19_spill] sm:$0xff] }
 0x3e1   :  { %v9830_v7 = vld [vmem:[#allocation58_spill] sm:$0xff] }
 0x3e2   :  { %6354 = vtanh.f32 %v8013_v13 }
 0x3e9   :  { %v6351_v20 = vpop.eup %6350 }
 0x3ea   :  { %v6353_v21 = vpop.eup %6352  ;;  %v2257_v28 = vmul.f32 %v6351_v20, %v6349_v15  ;;  %v9831_v15 = vld [vmem:[#allocation20_spill] sm:$0xff] }
 0x3eb   :  { %v9832_v20 = vld [vmem:[#allocation60_spill] sm:$0xff] }
 0x3ec   :  { %v6355_v22 = vpop.eup %6354 }
 0x3ed   :  { %v2258_v29 = vmul.f32 %v6355_v22, %v6353_v21  ;;  %v9833_v21 = vld [vmem:[#allocation22_spill] sm:$0xff] }
 0x3ee   :  { %v9834_v22 = vld [vmem:[#allocation62_spill] sm:$0xff] }
 0x3ef   :  { %v2259_v50 = vpack.c.bf16 %v2258_v29, %v2257_v28  ;;  %v9835_v28 = vld [vmem:[#allocation24_spill] sm:$0xff] }
 0x3f0   :  { %v9836_v29 = vld [vmem:[#allocation64_spill] sm:$0xff] }
 0x3f1   :  { %2341 = vmatmul.mubr.bf16.vlgmr.msra.gmra.mrb[36].mxu0 %v2259_v50  ;;  %2384 = vmatmul.mubr.bf16.vlgmr.msra.gmra.mrb[36].mxu1 %v2259_v50 }
 0x3f2   :  { %5704 = vmatpush3.bf16.msra.mxu0 %v8016_v59  ;;  %2548 = vmatpush1.bf16.msra.mxu1 %v7535_v9 }
 0x3f3   :  { %5705 = vmatprep.subr.bf16.mxu0 %v9528_v12  ;;  %2549 = vmatprep.subr.bf16.mxu1 %v7541_v11 }
 0x3f4   :  { %5719 = vmatprep.mubr.msk.bf16.mxu0 %vm7032_vm8, %v9528_v12  ;;  %2579 = vmatprep.mubr.bf16.mxu1 %v9770_v2 }
 0x3f6   :  { %5706 = vmatpush3.bf16.msra.mxu0 %v8020_v30  ;;  %2550 = vmatpush1.bf16.msra.mxu1 %v7549_v17 }
 0x3f7   :  { %5707 = vmatprep.subr.bf16.mxu0 %v9528_v12  ;;  %2551 = vmatprep.subr.bf16.mxu1 %v7555_v19 }
 0x3fa   :  { %5708 = vmatpush3.bf16.msra.mxu0 %v8029_v0  ;;  %2552 = vmatpush1.bf16.msra.mxu1 %v7563_v25 }
 0x3fb   :  { %5709 = vmatprep.subr.bf16.mxu0 %v9528_v12  ;;  %2553 = vmatprep.subr.bf16.mxu1 %v9815_v37 }
 0x3fe   :  { %5710 = vmatpush3.bf16.msra.mxu0 %v8035_v36  ;;  %2554 = vmatpush1.bf16.msra.mxu1 %v9816_v38  ;;  %v8101_v38 = vld [vmem:[#allocation8 + $0x4] ss:$20 sps:$4 sm:$0xff]  }
 0x3ff   :  { %5711 = vmatprep.subr.bf16.mxu0 %v9528_v12  ;;  %2555 = vmatprep.subr.bf16.mxu1 %v9817_v34  ;;  %v9846_v34 = vld [vmem:[#allocation38_spill] sm:$0xff]  ;;  %9851 = vst [vmem:[#allocation46_spill] sm:$0xff] %v8101_v38 }
 0x402   :  { %5712 = vmatpush3.bf16.msra.mxu0 %v8041_v39  ;;  %2556 = vmatpush1.bf16.msra.mxu1 %v9818_v45  ;;  %v9845_v45 = vld [vmem:[#allocation36_spill] sm:$0xff] }
 0x403   :  { %5713 = vmatprep.subr.bf16.mxu0 %v9528_v12  ;;  %2557 = vmatprep.subr.bf16.mxu1 %v9819_v47  ;;  %v9844_v47 = vld [vmem:[#allocation34_spill] sm:$0xff] }
 0x406   :  { %5714 = vmatpush3.bf16.msra.mxu0 %v8047_v46  ;;  %2558 = vmatpush1.bf16.msra.mxu1 %v9820_v48  ;;  %v9843_v48 = vld [vmem:[#allocation32_spill] sm:$0xff] }
 0x407   :  { %5715 = vmatprep.subr.bf16.mxu0 %v9528_v12  ;;  %2559 = vmatprep.subr.bf16.mxu1 %v9821_v54  ;;  %v9842_v54 = vld [vmem:[#allocation70_spill] sm:$0xff] }
 0x40a   :  { %5716 = vmatpush3.bf16.msra.mxu0 %v8053_v53  ;;  %2560 = vmatpush1.bf16.msra.mxu1 %v9822_v1  ;;  %v9841_v1 = vld [vmem:[#allocation30_spill] sm:$0xff] }
 0x40b   :  { %5717 = vmatprep.subr.bf16.mxu0 %v9528_v12  ;;  %2561 = vmatprep.subr.bf16.mxu1 %v9823_v35  ;;  %v9838_v12 = vld [vmem:[#allocation66_spill] sm:$0xff]  ;;  %v9840_v35 = vld [vmem:[#allocation68_spill] sm:$0xff] }
 0x40e   :  { %5718 = vmatpush3.bf16.msra.mxu0 %v8059_v41  ;;  %2562 = vmatpush1.bf16.msra.mxu1 %v9824_v32  ;;  %v9839_v32 = vld [vmem:[#allocation28_spill] sm:$0xff] }
 0x40f   :  { %2504 = vmatprep.subr.bf16.mxu0 %v9825_v16  ;;  %2633 = vmatprep.subr.bf16.mxu1 %v9826_v60 }
 0x411   :  { %5720 = vmatmul.mubr.bf16.vlgmr.msra.gmra.mrb[40].mxu0 %v2259_v50  ;;  %2580 = vmatmul.mubr.bf16.vlgmr.msra.gmra.mrb[8].mxu1 %v8002_v31  ;;  %v9837_v50 = vld [vmem:[#allocation26_spill] sm:$0xff] }
 0x412   :  { %2505 = vmatpush1.bf16.msra.mxu0 %v9827_v44  ;;  %2634 = vmatpush1.bf16.msra.mxu1 %v9828_v4 }
 0x413   :  { %2506 = vmatprep.subr.bf16.mxu0 %v9829_v5  ;;  %2635 = vmatprep.subr.bf16.mxu1 %v9830_v7 }
 0x414   :  { %2536 = vmatprep.mubr.bf16.mxu0 %v9770_v2  ;;  %2665 = vmatprep.mubr.bf16.mxu1 %v9770_v2 }
 0x416   :  { %2507 = vmatpush1.bf16.msra.mxu0 %v9831_v15  ;;  %2636 = vmatpush1.bf16.msra.mxu1 %v9832_v20 }
 0x417   :  { %2508 = vmatprep.subr.bf16.mxu0 %v9833_v21  ;;  %2637 = vmatprep.subr.bf16.mxu1 %v9834_v22 }
 0x41a   :  { %2509 = vmatpush1.bf16.msra.mxu0 %v9835_v28  ;;  %2638 = vmatpush1.bf16.msra.mxu1 %v9836_v29 }
 0x41b   :  { %2510 = vmatprep.subr.bf16.mxu0 %v9837_v50  ;;  %2639 = vmatprep.subr.bf16.mxu1 %v9838_v12  ;;  %v8126_v12 = vld [vmem:[#allocation8 + $0x50] ss:$20 sps:$4 sm:$0xff]  }
 0x41c   :  { %9862 = vst [vmem:[#allocation52_spill] sm:$0xff] %v8126_v12 }
 0x41e   :  { %2511 = vmatpush1.bf16.msra.mxu0 %v9839_v32  ;;  %2640 = vmatpush1.bf16.msra.mxu1 %v9840_v35  ;;  %v9847_v35 = vld [vmem:[#allocation40_spill] sm:$0xff] }
 0x41f   :  { %2512 = vmatprep.subr.bf16.mxu0 %v9841_v1  ;;  %2641 = vmatprep.subr.bf16.mxu1 %v9842_v54  ;;  %v9848_v54 = vld [vmem:[#allocation42_spill] sm:$0xff] }
 0x422   :  { %2513 = vmatpush1.bf16.msra.mxu0 %v9843_v48  ;;  %2642 = vmatpush1.bf16.msra.mxu1 %v7879_v27  ;;  %v9849_v27 = vld [vmem:[#allocation44_spill] sm:$0xff] }
 0x423   :  { %2514 = vmatprep.subr.bf16.mxu0 %v9844_v47  ;;  %2643 = vmatprep.subr.bf16.mxu1 %v7885_v49  ;;  %v9850_v49 = vld [vmem:[#allocation49_spill] sm:$0xff] }
 0x426   :  { %2515 = vmatpush1.bf16.msra.mxu0 %v9845_v45  ;;  %2644 = vmatpush1.bf16.msra.mxu1 %v7891_v57  ;;  %v8118_v57 = vld [vmem:[#allocation8 + $0x28] ss:$20 sps:$4 sm:$0xff]  }
 0x427   :  { %2516 = vmatprep.subr.bf16.mxu0 %v9846_v34  ;;  %2645 = vmatprep.subr.bf16.mxu1 %v7897_v62  ;;  %v9852_v62 = vld [vmem:[#allocation51_spill] sm:$0xff]  ;;  %9858 = vst [vmem:[#allocation50_spill] sm:$0xff] %v8118_v57 }
 0x42a   :  { %2517 = vmatpush1.bf16.msra.mxu0 %v9847_v35  ;;  %2646 = vmatpush1.bf16.msra.mxu1 %v7903_v56  ;;  %v9853_v56 = vld [vmem:[#allocation57_spill] sm:$0xff] }
 0x42b   :  { %2518 = vmatprep.subr.bf16.mxu0 %v9848_v54  ;;  %2647 = vmatprep.subr.bf16.mxu1 %v7909_v40  ;;  %v8109_v40 = vld [vmem:[#allocation8] ss:$20 sps:$4 sm:$0xff]  }
 0x42c   :  { %9854 = vst [vmem:[#allocation47_spill] sm:$0xff] %v8109_v40 }
 0x42e   :  { %2519 = vmatpush1.bf16.msra.mxu0 %v9849_v27  ;;  %2648 = vmatpush1.bf16.msra.mxu1 %v7915_v51  ;;  %v8112_v51 = vld [vmem:[#allocation8 + $0x2c] ss:$20 sps:$4 sm:$0xff]  }
 0x42f   :  { %2590 = vmatprep.subr.bf16.mxu0 %v9850_v49  ;;  %2741 = vmatprep.subr.bf16.mxu1 %v8101_v38  ;;  %9855 = vst [vmem:[#allocation48_spill] sm:$0xff] %v8112_v51  ;;  %v9856_v38 = vld [vmem:[#allocation59_spill] sm:$0xff]  ;;  %v9857_v49 = vld [vmem:[#allocation61_spill] sm:$0xff] }
 0x431   :  { %2537 = vmatmul.mubr.bf16.vlgmr.msra.gmra.mrb[8].mxu0 %v8002_v31  ;;  %2666 = vmatmul.mubr.bf16.vlgmr.msra.gmra.mrb[36].mxu1 %v8002_v31 }
 0x432   :  { %2591 = vmatpush1.bf16.msra.mxu0 %v9852_v62  ;;  %2622 = vmatprep.mubr.bf16.mxu0 %v9770_v2  ;;  %v8121_v62 = vld [vmem:[#allocation8 + $0x54] ss:$20 sps:$4 sm:$0xff]  }
 0x433   :  { %2592 = vmatprep.subr.bf16.mxu0 %v9853_v56  ;;  %2742 = vmatpush1.bf16.msra.mxu1 %v8109_v40  ;;  %9859 = vst [vmem:[#allocation18_spill] sm:$0xff] %v8121_v62  ;;  %v9860_v56 = vld [vmem:[#allocation63_spill] sm:$0xff]  ;;  %v9861_v40 = vld [vmem:[#allocation65_spill] sm:$0xff] }
 0x434   :  { %2743 = vmatprep.subr.bf16.mxu1 %v8112_v51  ;;  %2773 = vmatprep.mubr.bf16.mxu1 %v9770_v2  ;;  %v8129_v51 = vld [vmem:[#allocation8 + $0x7c] ss:$20 sps:$4 sm:$0xff]  }
 0x435   :  { %9863 = vst [vmem:[#allocation19_spill] sm:$0xff] %v8129_v51 }
 0x436   :  { %2593 = vmatpush1.bf16.msra.mxu0 %v9856_v38  ;;  %v9865_v38 = vld [vmem:[#allocation69_spill] sm:$0xff] }
 0x437   :  { %2594 = vmatprep.subr.bf16.mxu0 %v9857_v49  ;;  %2744 = vmatpush1.bf16.msra.mxu1 %v8118_v57  ;;  %v9864_v49 = vld [vmem:[#allocation67_spill] sm:$0xff] }
 0x438   :  { %2745 = vmatprep.subr.bf16.mxu1 %v8121_v62  ;;  %v8134_v57 = vld [vmem:[#allocation8 + $0x78] ss:$20 sps:$4 sm:$0xff]  }
 0x439   :  { %9866 = vst [vmem:[#allocation20_spill] sm:$0xff] %v8134_v57  ;;  %v8137_v62 = vld [vmem:[#allocation8 + $0xa4] ss:$20 sps:$4 sm:$0xff]  }
 0x43a   :  { %2595 = vmatpush1.bf16.msra.mxu0 %v9860_v56  ;;  %9867 = vst [vmem:[#allocation22_spill] sm:$0xff] %v8137_v62 }
 0x43b   :  { %2596 = vmatprep.subr.bf16.mxu0 %v9861_v40  ;;  %2746 = vmatpush1.bf16.msra.mxu1 %v8126_v12  ;;  %v9868_v40 = vld [vmem:[#allocation73_spill] sm:$0xff]  ;;  %v8142_v12 = vld [vmem:[#allocation8 + $0xa0] ss:$20 sps:$4 sm:$0xff]  }
 0x43c   :  { %2747 = vmatprep.subr.bf16.mxu1 %v8129_v51  ;;  %9869 = vst [vmem:[#allocation24_spill] sm:$0xff] %v8142_v12  ;;  %v8145_v51 = vld [vmem:[#allocation8 + $0xcc] ss:$20 sps:$4 sm:$0xff]  }
 0x43d   :  { %9870 = vst [vmem:[#allocation26_spill] sm:$0xff] %v8145_v51 }
 0x43e   :  { %2597 = vmatpush1.bf16.msra.mxu0 %v9864_v49 }
 0x43f   :  { %2598 = vmatprep.subr.bf16.mxu0 %v9865_v38  ;;  %2748 = vmatpush1.bf16.msra.mxu1 %v8134_v57  ;;  %v9871_v38 = vld [vmem:[#allocation75_spill] sm:$0xff] }
 0x440   :  { %2749 = vmatprep.subr.bf16.mxu1 %v8137_v62  ;;  %v8150_v57 = vld [vmem:[#allocation8 + $0xc8] ss:$20 sps:$4 sm:$0xff]  }
 0x441   :  { %9872 = vst [vmem:[#allocation28_spill] sm:$0xff] %v8150_v57  ;;  %v8153_v62 = vld [vmem:[#allocation8 + $0xf4] ss:$20 sps:$4 sm:$0xff]  }
 0x442   :  { %2599 = vmatpush1.bf16.msra.mxu0 %v7877_v8  ;;  %9873 = vst [vmem:[#allocation30_spill] sm:$0xff] %v8153_v62 }
 0x443   :  { %2600 = vmatprep.subr.bf16.mxu0 %v9868_v40  ;;  %2750 = vmatpush1.bf16.msra.mxu1 %v8142_v12  ;;  %v8158_v12 = vld [vmem:[#allocation8 + $0xf0] ss:$20 sps:$4 sm:$0xff]  }
 0x444   :  { %2751 = vmatprep.subr.bf16.mxu1 %v8145_v51  ;;  %9874 = vst [vmem:[#allocation85_spill] sm:$0xff] %v8158_v12  ;;  %v8161_v51 = vld [vmem:[#allocation8 + $0x11c] ss:$20 sps:$4 sm:$0xff]  }
 0x445   :  { %9875 = vst [vmem:[#allocation86_spill] sm:$0xff] %v8161_v51 }
 0x446   :  { %2601 = vmatpush1.bf16.msra.mxu0 %v9871_v38 }
 0x447   :  { %2602 = vmatprep.subr.bf16.mxu0 %v7895_v58  ;;  %2752 = vmatpush1.bf16.msra.mxu1 %v8150_v57  ;;  %v8165_v58 = vld [vmem:[#allocation8 + $0xc] ss:$20 sps:$4 sm:$0xff]  }
 0x448   :  { %2753 = vmatprep.subr.bf16.mxu1 %v8153_v62  ;;  %9876 = vst [vmem:[#allocation87_spill] sm:$0xff] %v8165_v58  ;;  %v8168_v57 = vld [vmem:[#allocation8 + $0x118] ss:$20 sps:$4 sm:$0xff]  }
 0x449   :  { %9877 = vst [vmem:[#allocation88_spill] sm:$0xff] %v8168_v57 }
 0x44a   :  { %2603 = vmatpush1.bf16.msra.mxu0 %v7901_v61  ;;  %v9878_v61 = vmov 0.0  }
 0x44b   :  { %2604 = vmatprep.subr.bf16.mxu0 %v7907_v24  ;;  %2754 = vmatpush1.bf16.msra.mxu1 %v8158_v12  ;;  %v8173_v24 = vld [vmem:[#allocation8 + $0x8] ss:$20 sps:$4 sm:$0xff]  }
 0x44c   :  { %2755 = vmatprep.subr.bf16.mxu1 %v8161_v51  ;;  %9879 = vst [vmem:[#allocation89_spill] sm:$0xff] %v8173_v24  ;;  %v8177_v51 = vld [vmem:[#allocation8 + $0x34] ss:$20 sps:$4 sm:$0xff]  }
 0x44d   :  { %9880 = vst [vmem:[#allocation90_spill] sm:$0xff] %v8177_v51 }
 0x44e   :  { %2605 = vmatpush1.bf16.msra.mxu0 %v7913_v33  ;;  %v8180_v33 = vld [vmem:[#allocation8 + $0x30] ss:$20 sps:$4 sm:$0xff]  }
 0x44f   :  { %2784 = vmatprep.subr.bf16.mxu0 %v8165_v58  ;;  %2756 = vmatpush1.bf16.msra.mxu1 %v8168_v57  ;;  %9881 = vst [vmem:[#allocation91_spill] sm:$0xff] %v8180_v33  ;;  %v8183_v58 = vld [vmem:[#allocation8 + $0x5c] ss:$20 sps:$4 sm:$0xff]   ;;  %v8186_v57 = vld [vmem:[#allocation8 + $0x58] ss:$20 sps:$4 sm:$0xff]  }
 0x450   :  { %5723 = vmatprep.subr.bf16.mxu1 %v9878_v61  ;;  %9882 = vst [vmem:[#allocation92_spill] sm:$0xff] %v8183_v58  ;;  %9883 = vst [vmem:[#allocation93_spill] sm:$0xff] %v8186_v57 }
 0x451   :  { %2623 = vmatmul.mubr.bf16.vlgmr.msra.gmra.mrb[36].mxu0 %v8002_v31  ;;  %v8189_v31 = vld [vmem:[#allocation8 + $0x84] ss:$20 sps:$4 sm:$0xff]  }
 0x452   :  { %2785 = vmatpush1.bf16.msra.mxu0 %v8173_v24  ;;  %2816 = vmatprep.mubr.bf16.mxu0 %v9770_v2  ;;  %9884 = vst [vmem:[#allocation94_spill] sm:$0xff] %v8189_v31  ;;  %v8192_v24 = vld [vmem:[#allocation8 + $0x80] ss:$20 sps:$4 sm:$0xff]  }
 0x453   :  { %2786 = vmatprep.subr.bf16.mxu0 %v8177_v51  ;;  %9885 = vst [vmem:[#allocation95_spill] sm:$0xff] %v8192_v24  ;;  %v8195_v51 = vld [vmem:[#allocation8 + $0xac] ss:$20 sps:$4 sm:$0xff]  }
 0x454   :  { %9886 = vst [vmem:[#allocation96_spill] sm:$0xff] %v8195_v51 }
 0x456   :  { %2787 = vmatpush1.bf16.msra.mxu0 %v8180_v33  ;;  %v8198_v33 = vld [vmem:[#allocation8 + $0xa8] ss:$20 sps:$4 sm:$0xff]  }
 0x457   :  { %2788 = vmatprep.subr.bf16.mxu0 %v8183_v58  ;;  %9887 = vst [vmem:[#allocation97_spill] sm:$0xff] %v8198_v33  ;;  %v8201_v58 = vld [vmem:[#allocation8 + $0xd4] ss:$20 sps:$4 sm:$0xff]  }
 0x458   :  { %9888 = vst [vmem:[#allocation98_spill] sm:$0xff] %v8201_v58 }
 0x45a   :  { %2789 = vmatpush1.bf16.msra.mxu0 %v8186_v57  ;;  %v8204_v57 = vld [vmem:[#allocation8 + $0xd0] ss:$20 sps:$4 sm:$0xff]  }
 0x45b   :  { %2790 = vmatprep.subr.bf16.mxu0 %v8189_v31  ;;  %9889 = vst [vmem:[#allocation99_spill] sm:$0xff] %v8204_v57  ;;  %v8207_v31 = vld [vmem:[#allocation8 + $0xfc] ss:$20 sps:$4 sm:$0xff]  }
 0x45c   :  { %9890 = vst [vmem:[#allocation100_spill] sm:$0xff] %v8207_v31 }
 0x45e   :  { %2791 = vmatpush1.bf16.msra.mxu0 %v8192_v24  ;;  %v8210_v24 = vld [vmem:[#allocation8 + $0xf8] ss:$20 sps:$4 sm:$0xff]  }
 0x45f   :  { %2792 = vmatprep.subr.bf16.mxu0 %v8195_v51  ;;  %9891 = vst [vmem:[#allocation101_spill] sm:$0xff] %v8210_v24  ;;  %v8213_v51 = vld [vmem:[#allocation8 + $0x124] ss:$20 sps:$4 sm:$0xff]  }
 0x460   :  { %9892 = vst [vmem:[#allocation102_spill] sm:$0xff] %v8213_v51 }
 0x462   :  { %2793 = vmatpush1.bf16.msra.mxu0 %v8198_v33  ;;  %v8216_v33 = vld [vmem:[#allocation8 + $0x120] ss:$20 sps:$4 sm:$0xff]  }
 0x463   :  { %2794 = vmatprep.subr.bf16.mxu0 %v8201_v58  ;;  %9893 = vst [vmem:[#allocation103_spill] sm:$0xff] %v8216_v33 }
 0x466   :  { %2795 = vmatpush1.bf16.msra.mxu0 %v8204_v57  ;;  %v8223_v57 = vld [vmem:[%s9422_s8] ss:$0 sm:$0xff] }
 0x467   :  { %2796 = vmatprep.subr.bf16.mxu0 %v8207_v31  ;;  %9894 = vst [vmem:[#allocation104_spill] sm:$0xff] %v8223_v57 }
 0x46a   :  { %2797 = vmatpush1.bf16.msra.mxu0 %v8210_v24 }
 0x46b   :  { %2798 = vmatprep.subr.bf16.mxu0 %v8213_v51 }
 0x46e   :  { %2799 = vmatpush1.bf16.msra.mxu0 %v8216_v33 }
 0x46f   :  { %2937 = vmatprep.subr.bf16.mxu0 %v9825_v16 }
 0x4e4   :  { %v2428_v31 = vpop.f32.mrb[40].mxu0  ;;  %v2581_v58 = vpop.f32.mrb[8].mxu1 }
 0x4e5   :  { %v2435_v12 = vadd.f32 %v8223_v57, %v2428_v31  ;;  %v5721_v24 = vpop.f32.mrb[41].mxu0  ;;  %v2583_v62 = vpop.f32.mrb[9].mxu1 }
 0x4e6   :  { %v2431_v38 = vpop.f32.mrb[42].mxu0  ;;  %v2585_v40 = vpop.f32.mrb[10].mxu1  ;;  %v5884_v20 = vadd.f32 %v2583_v62, %v7806_v52 }
 0x4e7   :  { %2437 = vst [vmem:[%s9423_s9] sm:$0xff] %v2435_v12  ;;  %v2436_v33 = vadd.f32 %v8223_v57, %v2431_v38  ;;  %v5722_v16 = vpop.f32.mrb[43].mxu0  ;;  %v2587_v51 = vpop.f32.mrb[11].mxu1 }
 0x4e8   :  { %v5563_v17 = vmul.f32 -1.442695, %v5884_v20 }
 0x4e9   :  { %2438 = vst [vmem:[%s9423_s9 + $0x40] sm:$0xff] %v2436_v33 }
 0x504   :  { %v2538_v8 = vpop.f32.mrb[8].mxu0  ;;  %v8233_v49 = vpop.f32.mrb[36].mxu1 }
 0x505   :  { %v5879_v24 = vadd.f32 %v2538_v8, %v7793_v43  ;;  %v2540_v31 = vpop.f32.mrb[9].mxu0  ;;  %v8236_v56 = vpop.f32.mrb[37].mxu1 }
 0x506   :  { %v5880_v37 = vadd.f32 %v2540_v31, %v7797_v55  ;;  %v2542_v29 = vpop.f32.mrb[10].mxu0  ;;  %v8239_v12 = vpop.f32.mrb[38].mxu1  ;;  %v5886_v31 = vadd.f32 %v2587_v51, %v7806_v52 }
 0x507   :  { %v5559_v38 = vmul.f32 -1.442695, %v5879_v24  ;;  %v5881_v16 = vadd.f32 %v2542_v29, %v7793_v43  ;;  %v2544_v57 = vpop.f32.mrb[11].mxu0  ;;  %v8242_v25 = vpop.f32.mrb[39].mxu1  ;;  %v5883_v24 = vadd.f32 %v2581_v58, %v7811_v63 }
 0x508   :  { %v5561_v33 = vmul.f32 -1.442695, %v5880_v37  ;;  %v5882_v22 = vadd.f32 %v2544_v57, %v7797_v55  ;;  %v5564_v29 = vmul.f32 -1.442695, %v5886_v31  ;;  %v5885_v57 = vadd.f32 %v2585_v40, %v7811_v63 }
 0x509   :  { %6356 = vpow2.f32 %v5559_v38  ;;  %v5560_v19 = vmul.f32 -1.442695, %v5881_v16 }
 0x50a   :  { %6358 = vpow2.f32 %v5561_v33  ;;  %v5562_v8 = vmul.f32 -1.442695, %v5882_v22 }
 0x50b   :  { %6360 = vpow2.f32 %v5560_v19 }
 0x50c   :  { %6362 = vpow2.f32 %v5562_v8 }
 0x50d   :  { %6364 = vtanh.f32 %v5883_v24 }
 0x50e   :  { %6366 = vpow2.f32 %v5563_v17 }
 0x50f   :  { %6368 = vpow2.f32 %v5564_v29 }
 0x513   :  { %v6357_v43 = vpop.eup %6356 }
 0x514   :  { %v6359_v7 = vpop.eup %6358  ;;  %v2894_v37 = vadd.f32 1.0, %v6357_v43 }
 0x515   :  { %v2906_v38 = vadd.f32 1.0, %v6359_v7  ;;  %v6361_v22 = vpop.eup %6360 }
 0x516   :  { %6370 = vrcp.f32 %v2894_v37  ;;  %v2895_v19 = vadd.f32 1.0, %v6361_v22  ;;  %v6363_v62 = vpop.eup %6362 }
 0x517   :  { %6372 = vrcp.f32 %v2906_v38  ;;  %v2907_v51 = vadd.f32 1.0, %v6363_v62  ;;  %v6365_v58 = vpop.eup %6364 }
 0x518   :  { %6374 = vtanh.f32 %v5885_v57  ;;  %v6367_v20 = vpop.eup %6366 }
 0x519   :  { %6376 = vrcp.f32 %v2895_v19  ;;  %v6369_v16 = vpop.eup %6368  ;;  %v2920_v40 = vadd.f32 1.0, %v6367_v20 }
 0x51a   :  { %6378 = vrcp.f32 %v2907_v51  ;;  %v2921_v24 = vadd.f32 1.0, %v6369_v16 }
 0x51b   :  { %6380 = vrcp.f32 %v2920_v40  ;;  %v2679_v40 = vadd.f32 %v8236_v56, %v7991_v10 }
 0x51c   :  { %6382 = vrcp.f32 %v2921_v24 }
 0x520   :  { %v6371_v33 = vpop.eup %6370 }
 0x521   :  { %v6373_v8 = vpop.eup %6372  ;;  %v2928_v17 = vmul.f32 %v6371_v33, %v6365_v58 }
 0x522   :  { %v6375_v31 = vpop.eup %6374  ;;  %v2926_v43 = vmul.f32 %v6373_v8, %v7979_v42 }
 0x523   :  { %v6377_v7 = vpop.eup %6376 }
 0x524   :  { %v8250_v29 = vadd.f32 %v2928_v17, %v2926_v43  ;;  %v2929_v37 = vmul.f32 %v6377_v7, %v6375_v31  ;;  %v2624_v38 = vpop.f32.mrb[36].mxu0  ;;  %v6379_v57 = vpop.eup %6378  ;;  %v2678_v43 = vadd.f32 %v8233_v49, %v7996_v18  ;;  %v2683_v7 = vadd.f32 %v8242_v25, %v7991_v10 }
 0x525   :  { %v2676_v22 = vadd.f32 %v2624_v38, %v7972_v14  ;;  %v2626_v19 = vpop.f32.mrb[37].mxu0  ;;  %v2927_v62 = vmul.f32 %v6379_v57, %v7986_v6  ;;  %v6381_v24 = vpop.eup %6380  ;;  %v2682_v57 = vadd.f32 %v8239_v12, %v7996_v18 }
 0x526   :  { %v2677_v51 = vadd.f32 %v2626_v19, %v7977_v23  ;;  %v2628_v58 = vpop.f32.mrb[38].mxu0  ;;  %6384 = vtanh.f32 %v8250_v29  ;;  %v6383_v38 = vpop.eup %6382 }
 0x527   :  { %v5553_v20 = vmul.f32 -1.442695, %v2676_v22  ;;  %v2680_v42 = vadd.f32 %v2628_v58, %v7972_v14  ;;  %v2630_v33 = vpop.f32.mrb[39].mxu0  ;;  %v8257_v16 = vadd.f32 %v2929_v37, %v2927_v62  ;;  %v5557_v37 = vmul.f32 -1.442695, %v2679_v40 }
 0x528   :  { %v5555_v8 = vmul.f32 -1.442695, %v2677_v51  ;;  %v2681_v17 = vadd.f32 %v2630_v33, %v7977_v23  ;;  %v5558_v62 = vmul.f32 -1.442695, %v2683_v7 }
 0x529   :  { %6386 = vpow2.f32 %v5553_v20  ;;  %v5554_v31 = vmul.f32 -1.442695, %v2680_v42 }
 0x52a   :  { %6388 = vtanh.f32 %v8257_v16  ;;  %v5556_v6 = vmul.f32 -1.442695, %v2681_v17 }
 0x52b   :  { %6390 = vpow2.f32 %v5555_v8 }
 0x52c   :  { %6392 = vpow2.f32 %v5554_v31 }
 0x52d   :  { %6394 = vpow2.f32 %v5556_v6 }
 0x52e   :  { %6396 = vtanh.f32 %v2678_v43 }
 0x52f   :  { %6398 = vpow2.f32 %v5557_v37 }
 0x530   :  { %v6385_v22 = vpop.eup %6384  ;;  %6400 = vtanh.f32 %v2682_v57 }
 0x531   :  { %v2934_v20 = vmul.f32 %v6385_v22, %v6381_v24 }
 0x533   :  { %v6387_v19 = vpop.eup %6386 }
 0x534   :  { %v6389_v51 = vpop.eup %6388  ;;  %v2698_v56 = vadd.f32 1.0, %v6387_v19 }
 0x535   :  { %v6391_v58 = vpop.eup %6390  ;;  %v2935_v49 = vmul.f32 %v6389_v51, %v6383_v38 }
 0x536   :  { %v6393_v42 = vpop.eup %6392  ;;  %6402 = vrcp.f32 %v2698_v56  ;;  %v2710_v25 = vadd.f32 1.0, %v6391_v58 }
 0x537   :  { %v6395_v33 = vpop.eup %6394  ;;  %6404 = vpow2.f32 %v5558_v62  ;;  %v2699_v8 = vadd.f32 1.0, %v6393_v42  ;;  %v8269_v17 = vpack.c.bf16 %v2935_v49, %v2934_v20 }
 0x538   :  { %6406 = vrcp.f32 %v2710_v25  ;;  %v2711_v12 = vadd.f32 1.0, %v6395_v33  ;;  %v6397_v31 = vpop.eup %6396 }
 0x539   :  { %6408 = vrcp.f32 %v2699_v8  ;;  %v6399_v6 = vpop.eup %6398 }
 0x53a   :  { %6410 = vrcp.f32 %v2711_v12  ;;  %v6401_v40 = vpop.eup %6400  ;;  %v2724_v38 = vadd.f32 1.0, %v6399_v6  ;;  %v9905_v6 = vld [vmem:[#allocation68_spill] sm:$0xff] }
 0x53c   :  { %6412 = vrcp.f32 %v2724_v38  ;;  %v9911_v38 = vld [vmem:[#allocation74_spill] sm:$0xff] }
 0x540   :  { %v6403_v43 = vpop.eup %6402 }
 0x541   :  { %v6405_v7 = vpop.eup %6404  ;;  %v2732_v37 = vmul.f32 %v6403_v43, %v6397_v31  ;;  %v9904_v31 = vld [vmem:[#allocation29_spill] sm:$0xff]  ;;  %v9907_v43 = vld [vmem:[#allocation70_spill] sm:$0xff] }
 0x542   :  { %v6407_v24 = vpop.eup %6406  ;;  %v2725_v62 = vadd.f32 1.0, %v6405_v7  ;;  %v9908_v7 = vld [vmem:[#allocation33_spill] sm:$0xff] }
 0x543   :  { %v6409_v57 = vpop.eup %6408  ;;  %v2730_v22 = vmul.f32 %v6407_v24, %v8010_v26  ;;  %v9910_v24 = vld [vmem:[#allocation35_spill] sm:$0xff] }
 0x544   :  { %v6411_v19 = vpop.eup %6410  ;;  %v2733_v51 = vmul.f32 %v6409_v57, %v6401_v40  ;;  %v9906_v40 = vld [vmem:[#allocation31_spill] sm:$0xff]  ;;  %v9912_v57 = vld [vmem:[#allocation37_spill] sm:$0xff] }
 0x545   :  { %v8272_v56 = vadd.f32 %v2732_v37, %v2730_v22  ;;  %v2731_v58 = vmul.f32 %v6411_v19, %v8013_v13  ;;  %v9895_v13 = vld [vmem:[#allocation58_spill] sm:$0xff]  ;;  %v9909_v37 = vld [vmem:[#allocation72_spill] sm:$0xff]  ;;  %v9914_v19 = vld [vmem:[#allocation39_spill] sm:$0xff] }
 0x546   :  { %v6413_v49 = vpop.eup %6412  ;;  %v9913_v22 = vld [vmem:[#allocation76_spill] sm:$0xff] }
 0x547   :  { %6414 = vtanh.f32 %v8272_v56  ;;  %v8276_v20 = vadd.f32 %v2733_v51, %v2731_v58  ;;  %v9916_v51 = vld [vmem:[#allocation41_spill] sm:$0xff]  ;;  %v9917_v58 = vld [vmem:[#allocation80_spill] sm:$0xff] }
 0x548   :  { %6416 = vrcp.f32 %v2725_v62  ;;  %v9915_v62 = vld [vmem:[#allocation78_spill] sm:$0xff] }
 0x549   :  { %6418 = vtanh.f32 %v8276_v20 }
 0x551   :  { %v6415_v42 = vpop.eup %6414 }
 0x552   :  { %v6417_v25 = vpop.eup %6416  ;;  %v2738_v26 = vmul.f32 %v6415_v42, %v6413_v49  ;;  %v9918_v49 = vld [vmem:[#allocation43_spill] sm:$0xff]  ;;  %v9919_v42 = vld [vmem:[#allocation82_spill] sm:$0xff] }
 0x553   :  { %v6419_v33 = vpop.eup %6418 }
 0x554   :  { %v2739_v8 = vmul.f32 %v6419_v33, %v6417_v25  ;;  %v9920_v25 = vld [vmem:[#allocation45_spill] sm:$0xff]  ;;  %v9921_v33 = vld [vmem:[#allocation84_spill] sm:$0xff] }
 0x556   :  { %v2740_v12 = vpack.c.bf16 %v2739_v8, %v2738_v26  ;;  %v9922_v26 = vld [vmem:[#allocation49_spill] sm:$0xff]  ;;  %v9923_v8 = vld [vmem:[#allocation46_spill] sm:$0xff] }
 0x558   :  { %2774 = vmatmul.mubr.bf16.vlgmr.msra.gmra.mrb[40].mxu1 %v2740_v12  ;;  %2817 = vmatmul.mubr.bf16.vlgmr.msra.gmra.mrb[44].mxu0 %v2740_v12 }
 0x559   :  { %5724 = vmatpush3.bf16.msra.mxu1 %v8016_v59  ;;  %2938 = vmatpush1.bf16.msra.mxu0 %v9827_v44  ;;  %v9896_v59 = vld [vmem:[#allocation21_spill] sm:$0xff] }
 0x55a   :  { %5725 = vmatprep.subr.bf16.mxu1 %v9878_v61  ;;  %2939 = vmatprep.subr.bf16.mxu0 %v9829_v5 }
 0x55b   :  { %5739 = vmatprep.mubr.msk.bf16.mxu1 %vm7032_vm8, %v9878_v61  ;;  %2969 = vmatprep.mubr.bf16.mxu0 %v9770_v2 }
 0x55d   :  { %5726 = vmatpush3.bf16.msra.mxu1 %v8020_v30  ;;  %2940 = vmatpush1.bf16.msra.mxu0 %v9831_v15  ;;  %v9897_v30 = vld [vmem:[#allocation60_spill] sm:$0xff] }
 0x55e   :  { %5727 = vmatprep.subr.bf16.mxu1 %v9878_v61  ;;  %2941 = vmatprep.subr.bf16.mxu0 %v9833_v21 }
 0x561   :  { %5728 = vmatpush3.bf16.msra.mxu1 %v8029_v0  ;;  %2942 = vmatpush1.bf16.msra.mxu0 %v9835_v28  ;;  %v9898_v0 = vld [vmem:[#allocation23_spill] sm:$0xff] }
 0x562   :  { %5729 = vmatprep.subr.bf16.mxu1 %v9878_v61  ;;  %2943 = vmatprep.subr.bf16.mxu0 %v9837_v50 }
 0x565   :  { %5730 = vmatpush3.bf16.msra.mxu1 %v8035_v36  ;;  %2944 = vmatpush1.bf16.msra.mxu0 %v9839_v32  ;;  %v9899_v36 = vld [vmem:[#allocation62_spill] sm:$0xff] }
 0x566   :  { %5731 = vmatprep.subr.bf16.mxu1 %v9878_v61  ;;  %2945 = vmatprep.subr.bf16.mxu0 %v9841_v1 }
 0x569   :  { %5732 = vmatpush3.bf16.msra.mxu1 %v8041_v39  ;;  %2946 = vmatpush1.bf16.msra.mxu0 %v9843_v48  ;;  %v9900_v39 = vld [vmem:[#allocation25_spill] sm:$0xff] }
 0x56a   :  { %5733 = vmatprep.subr.bf16.mxu1 %v9878_v61  ;;  %2947 = vmatprep.subr.bf16.mxu0 %v9844_v47 }
 0x56d   :  { %5734 = vmatpush3.bf16.msra.mxu1 %v8047_v46  ;;  %2948 = vmatpush1.bf16.msra.mxu0 %v9845_v45  ;;  %v9901_v46 = vld [vmem:[#allocation64_spill] sm:$0xff] }
 0x56e   :  { %5735 = vmatprep.subr.bf16.mxu1 %v9878_v61  ;;  %2949 = vmatprep.subr.bf16.mxu0 %v9846_v34  ;;  %v9938_v34 = vld [vmem:[#allocation20_spill] sm:$0xff] }
 0x571   :  { %5736 = vmatpush3.bf16.msra.mxu1 %v8053_v53  ;;  %2950 = vmatpush1.bf16.msra.mxu0 %v9847_v35  ;;  %v9902_v53 = vld [vmem:[#allocation27_spill] sm:$0xff] }
 0x572   :  { %5737 = vmatprep.subr.bf16.mxu1 %v9878_v61  ;;  %2951 = vmatprep.subr.bf16.mxu0 %v9848_v54  ;;  %v9926_v54 = vld [vmem:[#allocation47_spill] sm:$0xff] }
 0x573   :  { %v9932_v35 = vld [vmem:[#allocation63_spill] sm:$0xff] }
 0x575   :  { %5738 = vmatpush3.bf16.msra.mxu1 %v8059_v41  ;;  %2952 = vmatpush1.bf16.msra.mxu0 %v9849_v27  ;;  %v9903_v41 = vld [vmem:[#allocation66_spill] sm:$0xff]  ;;  %v9925_v27 = vld [vmem:[#allocation57_spill] sm:$0xff] }
 0x576   :  { %2980 = vmatprep.subr.bf16.mxu1 %v7527_v3  ;;  %3066 = vmatprep.subr.bf16.mxu0 %v9826_v60 }
 0x578   :  { %5740 = vmatmul.mubr.bf16.vlgmr.msra.gmra.mrb[44].mxu1 %v2740_v12  ;;  %2970 = vmatmul.mubr.bf16.vlgmr.msra.gmra.mrb[12].mxu0 %v8269_v17  ;;  %v9924_v12 = vld [vmem:[#allocation51_spill] sm:$0xff] }
 0x579   :  { %2981 = vmatpush1.bf16.msra.mxu1 %v7535_v9  ;;  %3067 = vmatpush1.bf16.msra.mxu0 %v9828_v4 }
 0x57a   :  { %2982 = vmatprep.subr.bf16.mxu1 %v7541_v11  ;;  %3068 = vmatprep.subr.bf16.mxu0 %v9895_v13 }
 0x57b   :  { %3012 = vmatprep.mubr.bf16.mxu1 %v9770_v2  ;;  %3098 = vmatprep.mubr.bf16.mxu0 %v9770_v2 }
 0x57d   :  { %2983 = vmatpush1.bf16.msra.mxu1 %v9896_v59  ;;  %3069 = vmatpush1.bf16.msra.mxu0 %v9897_v30 }
 0x57e   :  { %2984 = vmatprep.subr.bf16.mxu1 %v9898_v0  ;;  %3070 = vmatprep.subr.bf16.mxu0 %v9899_v36 }
 0x581   :  { %2985 = vmatpush1.bf16.msra.mxu1 %v9900_v39  ;;  %3071 = vmatpush1.bf16.msra.mxu0 %v9901_v46 }
 0x582   :  { %2986 = vmatprep.subr.bf16.mxu1 %v9902_v53  ;;  %3072 = vmatprep.subr.bf16.mxu0 %v9903_v41 }
 0x585   :  { %2987 = vmatpush1.bf16.msra.mxu1 %v9904_v31  ;;  %3073 = vmatpush1.bf16.msra.mxu0 %v9905_v6 }
 0x586   :  { %2988 = vmatprep.subr.bf16.mxu1 %v9906_v40  ;;  %3074 = vmatprep.subr.bf16.mxu0 %v9907_v43 }
 0x589   :  { %2989 = vmatpush1.bf16.msra.mxu1 %v9908_v7  ;;  %3075 = vmatpush1.bf16.msra.mxu0 %v9909_v37 }
 0x58a   :  { %2990 = vmatprep.subr.bf16.mxu1 %v9910_v24  ;;  %3076 = vmatprep.subr.bf16.mxu0 %v9911_v38 }
 0x58d   :  { %2991 = vmatpush1.bf16.msra.mxu1 %v9912_v57  ;;  %3077 = vmatpush1.bf16.msra.mxu0 %v9913_v22 }
 0x58e   :  { %2992 = vmatprep.subr.bf16.mxu1 %v9914_v19  ;;  %3078 = vmatprep.subr.bf16.mxu0 %v9915_v62  ;;  %v9934_v62 = vld [vmem:[#allocation52_spill] sm:$0xff] }
 0x591   :  { %2993 = vmatpush1.bf16.msra.mxu1 %v9916_v51  ;;  %3079 = vmatpush1.bf16.msra.mxu0 %v9917_v58  ;;  %v9931_v58 = vld [vmem:[#allocation18_spill] sm:$0xff] }
 0x592   :  { %2994 = vmatprep.subr.bf16.mxu1 %v9918_v49  ;;  %3080 = vmatprep.subr.bf16.mxu0 %v9919_v42  ;;  %v9927_v42 = vld [vmem:[#allocation48_spill] sm:$0xff] }
 0x595   :  { %2995 = vmatpush1.bf16.msra.mxu1 %v9920_v25  ;;  %3081 = vmatpush1.bf16.msra.mxu0 %v9921_v33  ;;  %v9928_v33 = vld [vmem:[#allocation59_spill] sm:$0xff] }
 0x596   :  { %3023 = vmatprep.subr.bf16.mxu1 %v9922_v26  ;;  %3174 = vmatprep.subr.bf16.mxu0 %v9923_v8  ;;  %v9929_v26 = vld [vmem:[#allocation61_spill] sm:$0xff]  ;;  %v9930_v8 = vld [vmem:[#allocation50_spill] sm:$0xff] }
 0x598   :  { %3013 = vmatmul.mubr.bf16.vlgmr.msra.gmra.mrb[12].mxu1 %v8269_v17  ;;  %3099 = vmatmul.mubr.bf16.vlgmr.msra.gmra.mrb[44].mxu0 %v8269_v17 }
 0x599   :  { %3024 = vmatpush1.bf16.msra.mxu1 %v9924_v12  ;;  %3055 = vmatprep.mubr.bf16.mxu1 %v9770_v2  ;;  %v9933_v12 = vld [vmem:[#allocation65_spill] sm:$0xff] }
 0x59a   :  { %3025 = vmatprep.subr.bf16.mxu1 %v9925_v27  ;;  %3175 = vmatpush1.bf16.msra.mxu0 %v9926_v54  ;;  %v9935_v27 = vld [vmem:[#allocation19_spill] sm:$0xff] }
 0x59b   :  { %3176 = vmatprep.subr.bf16.mxu0 %v9927_v42  ;;  %3206 = vmatprep.mubr.bf16.mxu0 %v9770_v2  ;;  %v9936_v54 = vld [vmem:[#allocation67_spill] sm:$0xff]  ;;  %v9937_v42 = vld [vmem:[#allocation69_spill] sm:$0xff] }
 0x59d   :  { %3026 = vmatpush1.bf16.msra.mxu1 %v9928_v33  ;;  %v9939_v33 = vld [vmem:[#allocation22_spill] sm:$0xff] }
 0x59e   :  { %3027 = vmatprep.subr.bf16.mxu1 %v9929_v26  ;;  %3177 = vmatpush1.bf16.msra.mxu0 %v9930_v8  ;;  %v9940_v26 = vld [vmem:[#allocation71_spill] sm:$0xff]  ;;  %v9941_v8 = vld [vmem:[#allocation73_spill] sm:$0xff] }
 0x59f   :  { %3178 = vmatprep.subr.bf16.mxu0 %v9931_v58  ;;  %v9942_v58 = vld [vmem:[#allocation24_spill] sm:$0xff] }
 0x5a1   :  { %3028 = vmatpush1.bf16.msra.mxu1 %v9932_v35  ;;  %v9943_v35 = vld [vmem:[#allocation26_spill] sm:$0xff] }
 0x5a2   :  { %3029 = vmatprep.subr.bf16.mxu1 %v9933_v12  ;;  %3179 = vmatpush1.bf16.msra.mxu0 %v9934_v62  ;;  %v9944_v12 = vld [vmem:[#allocation75_spill] sm:$0xff]  ;;  %v9945_v62 = vld [vmem:[#allocation77_spill] sm:$0xff] }
 0x5a3   :  { %3180 = vmatprep.subr.bf16.mxu0 %v9935_v27  ;;  %v9946_v27 = vld [vmem:[#allocation28_spill] sm:$0xff] }
 0x5a5   :  { %3030 = vmatpush1.bf16.msra.mxu1 %v9936_v54  ;;  %v9947_v54 = vld [vmem:[#allocation30_spill] sm:$0xff] }
 0x5a6   :  { %3031 = vmatprep.subr.bf16.mxu1 %v9937_v42  ;;  %3181 = vmatpush1.bf16.msra.mxu0 %v9938_v34  ;;  %v9948_v42 = vld [vmem:[#allocation79_spill] sm:$0xff]  ;;  %v9949_v34 = vld [vmem:[#allocation81_spill] sm:$0xff] }
 0x5a7   :  { %3182 = vmatprep.subr.bf16.mxu0 %v9939_v33  ;;  %v9950_v33 = vld [vmem:[#allocation85_spill] sm:$0xff] }
 0x5a9   :  { %3032 = vmatpush1.bf16.msra.mxu1 %v9940_v26  ;;  %v9951_v26 = vld [vmem:[#allocation86_spill] sm:$0xff] }
 0x5aa   :  { %3033 = vmatprep.subr.bf16.mxu1 %v9941_v8  ;;  %3183 = vmatpush1.bf16.msra.mxu0 %v9942_v58  ;;  %v9952_v8 = vld [vmem:[#allocation83_spill] sm:$0xff] }
 0x5ab   :  { %3184 = vmatprep.subr.bf16.mxu0 %v9943_v35  ;;  %v9953_v58 = vld [vmem:[#allocation87_spill] sm:$0xff]  ;;  %v9954_v35 = vld [vmem:[#allocation88_spill] sm:$0xff] }
 0x5ad   :  { %3034 = vmatpush1.bf16.msra.mxu1 %v9944_v12 }
 0x5ae   :  { %3035 = vmatprep.subr.bf16.mxu1 %v9945_v62  ;;  %3185 = vmatpush1.bf16.msra.mxu0 %v9946_v27  ;;  %v9955_v27 = vld [vmem:[#allocation89_spill] sm:$0xff]  ;;  %v9966_v62 = vld [vmem:[#allocation100_spill] sm:$0xff] }
 0x5af   :  { %3186 = vmatprep.subr.bf16.mxu0 %v9947_v54  ;;  %v9956_v54 = vld [vmem:[#allocation90_spill] sm:$0xff] }
 0x5b1   :  { %3036 = vmatpush1.bf16.msra.mxu1 %v9948_v42  ;;  %v9963_v42 = vld [vmem:[#allocation97_spill] sm:$0xff] }
 0x5b2   :  { %3037 = vmatprep.subr.bf16.mxu1 %v9949_v34  ;;  %3187 = vmatpush1.bf16.msra.mxu0 %v9950_v33  ;;  %v9957_v34 = vld [vmem:[#allocation91_spill] sm:$0xff]  ;;  %v9958_v33 = vld [vmem:[#allocation92_spill] sm:$0xff] }
 0x5b3   :  { %3188 = vmatprep.subr.bf16.mxu0 %v9951_v26  ;;  %v9959_v26 = vld [vmem:[#allocation93_spill] sm:$0xff] }
 0x5b5   :  { %3038 = vmatpush1.bf16.msra.mxu1 %v9952_v8  ;;  %v9960_v8 = vld [vmem:[#allocation94_spill] sm:$0xff] }
 0x5b6   :  { %3217 = vmatprep.subr.bf16.mxu1 %v9953_v58  ;;  %3189 = vmatpush1.bf16.msra.mxu0 %v9954_v35  ;;  %v9961_v58 = vld [vmem:[#allocation95_spill] sm:$0xff]  ;;  %v9962_v35 = vld [vmem:[#allocation96_spill] sm:$0xff] }
 0x5b7   :  { %5743 = vmatprep.subr.bf16.mxu0 %v9878_v61 }
 0x5b8   :  { %3056 = vmatmul.mubr.bf16.vlgmr.msra.gmra.mrb[40].mxu1 %v8269_v17  ;;  %v9964_v17 = vld [vmem:[#allocation98_spill] sm:$0xff] }
 0x5b9   :  { %3218 = vmatpush1.bf16.msra.mxu1 %v9955_v27  ;;  %3249 = vmatprep.mubr.bf16.mxu1 %v9770_v2  ;;  %v9965_v27 = vld [vmem:[#allocation99_spill] sm:$0xff] }
 0x5ba   :  { %3219 = vmatprep.subr.bf16.mxu1 %v9956_v54  ;;  %v9967_v54 = vld [vmem:[#allocation101_spill] sm:$0xff] }
 0x5bd   :  { %3220 = vmatpush1.bf16.msra.mxu1 %v9957_v34  ;;  %v9968_v34 = vld [vmem:[#allocation102_spill] sm:$0xff] }
 0x5be   :  { %3221 = vmatprep.subr.bf16.mxu1 %v9958_v33  ;;  %v9969_v33 = vld [vmem:[#allocation103_spill] sm:$0xff] }
 0x5c1   :  { %3222 = vmatpush1.bf16.msra.mxu1 %v9959_v26 }
 0x5c2   :  { %3223 = vmatprep.subr.bf16.mxu1 %v9960_v8 }
 0x5c5   :  { %3224 = vmatpush1.bf16.msra.mxu1 %v9961_v58  ;;  %v9970_v58 = vld [vmem:[#allocation104_spill] sm:$0xff] }
 0x5c6   :  { %3225 = vmatprep.subr.bf16.mxu1 %v9962_v35 }
 0x5c9   :  { %3226 = vmatpush1.bf16.msra.mxu1 %v9963_v42 }
 0x5ca   :  { %3227 = vmatprep.subr.bf16.mxu1 %v9964_v17 }
 0x5cd   :  { %3228 = vmatpush1.bf16.msra.mxu1 %v9965_v27 }
 0x5ce   :  { %3229 = vmatprep.subr.bf16.mxu1 %v9966_v62 }
 0x5d1   :  { %3230 = vmatpush1.bf16.msra.mxu1 %v9967_v54 }
 0x5d2   :  { %3231 = vmatprep.subr.bf16.mxu1 %v9968_v34  ;;  %v9971_v34 = vld [vmem:[#allocation53_spill] sm:$0xff] }
 0x5d5   :  { %3232 = vmatpush1.bf16.msra.mxu1 %v9969_v33 }
 0x5d6   :  { %3413 = vmatprep.subr.bf16.mxu1 %v7527_v3 }
 0x64b   :  { %v2861_v8 = vpop.f32.mrb[44].mxu1  ;;  %v2971_v26 = vpop.f32.mrb[12].mxu0 }
 0x64c   :  { %v2868_v35 = vadd.f32 %v9970_v58, %v2861_v8  ;;  %v5741_v12 = vpop.f32.mrb[45].mxu1  ;;  %v2973_v42 = vpop.f32.mrb[13].mxu0  ;;  %v5887_v33 = vadd.f32 %v2971_v26, %v9971_v34 }
 0x64d   :  { %v2864_v22 = vpop.f32.mrb[46].mxu1  ;;  %v2975_v17 = vpop.f32.mrb[14].mxu0  ;;  %v5888_v8 = vadd.f32 %v2973_v42, %v7797_v55 }
 0x64e   :  { %2870 = vst [vmem:[%s9423_s9 + $0x8] sm:$0xff] %v2868_v35  ;;  %v2869_v62 = vadd.f32 %v9970_v58, %v2864_v22  ;;  %v5742_v27 = vpop.f32.mrb[47].mxu1  ;;  %v2977_v54 = vpop.f32.mrb[15].mxu0  ;;  %v5571_v3 = vmul.f32 -1.442695, %v5887_v33  ;;  %v5889_v45 = vadd.f32 %v2975_v17, %v9971_v34 }
 0x64f   :  { %v5890_v12 = vadd.f32 %v2977_v54, %v7797_v55  ;;  %v5573_v38 = vmul.f32 -1.442695, %v5888_v8 }
 0x650   :  { %2871 = vst [vmem:[%s9423_s9 + $0x48] sm:$0xff] %v2869_v62  ;;  %6420 = vpow2.f32 %v5571_v3  ;;  %v5572_v35 = vmul.f32 -1.442695, %v5889_v45 }
 0x651   :  { %v5574_v47 = vmul.f32 -1.442695, %v5890_v12  ;;  %6422 = vpow2.f32 %v5573_v38 }
 0x653   :  { %6424 = vpow2.f32 %v5574_v47 }
 0x654   :  { %6426 = vpow2.f32 %v5572_v35 }
 0x65a   :  { %v6421_v22 = vpop.eup %6420 }
 0x65b   :  { %v6423_v58 = vpop.eup %6422  ;;  %v3327_v62 = vadd.f32 1.0, %v6421_v22 }
 0x65c   :  { %v3339_v26 = vadd.f32 1.0, %v6423_v58 }
 0x65d   :  { %v6425_v27 = vpop.eup %6424  ;;  %6428 = vrcp.f32 %v3327_v62 }
 0x65e   :  { %v6427_v37 = vpop.eup %6426  ;;  %v3340_v48 = vadd.f32 1.0, %v6425_v27  ;;  %6430 = vrcp.f32 %v3339_v26 }
 0x65f   :  { %v3328_v42 = vadd.f32 1.0, %v6427_v37 }
 0x660   :  { %6432 = vrcp.f32 %v3340_v48 }
 0x667   :  { %v6429_v62 = vpop.eup %6428 }
 0x668   :  { %v6431_v26 = vpop.eup %6430 }
 0x669   :  { %v3359_v55 = vmul.f32 %v6431_v26, %v8250_v29 }
 0x66a   :  { %v6433_v48 = vpop.eup %6432 }
 0x66b   :  { %v3014_v54 = vpop.f32.mrb[12].mxu1  ;;  %v8415_v33 = vpop.f32.mrb[44].mxu0 }
 0x66c   :  { %v5891_v17 = vadd.f32 %v3014_v54, %v7811_v63  ;;  %v3016_v3 = vpop.f32.mrb[13].mxu1  ;;  %v3102_v45 = vpop.f32.mrb[45].mxu0 }
 0x66d   :  { %v5892_v47 = vadd.f32 %v3016_v3, %v7806_v52  ;;  %v3018_v38 = vpop.f32.mrb[14].mxu1  ;;  %v3104_v8 = vpop.f32.mrb[46].mxu0 }
 0x66e   :  { %6434 = vtanh.f32 %v5891_v17  ;;  %v5893_v12 = vadd.f32 %v3018_v38, %v7811_v63  ;;  %v3020_v35 = vpop.f32.mrb[15].mxu1  ;;  %v3106_v22 = vpop.f32.mrb[47].mxu0  ;;  %v3360_v63 = vmul.f32 %v6433_v48, %v8257_v16 }
 0x66f   :  { %6436 = vrcp.f32 %v3328_v42  ;;  %v5575_v37 = vmul.f32 -1.442695, %v5892_v47  ;;  %v5894_v58 = vadd.f32 %v3020_v35, %v7806_v52 }
 0x670   :  { %6438 = vtanh.f32 %v5893_v12 }
 0x671   :  { %6440 = vpow2.f32 %v5575_v37  ;;  %v5576_v27 = vmul.f32 -1.442695, %v5894_v58 }
 0x673   :  { %6442 = vpow2.f32 %v5576_v27 }
 0x678   :  { %v6435_v54 = vpop.eup %6434 }
 0x679   :  { %v6437_v3 = vpop.eup %6436  ;;  %v3361_v17 = vmul.f32 %v6435_v54, %v6429_v62 }
 0x67a   :  { %v6439_v34 = vpop.eup %6438 }
 0x67b   :  { %v6441_v38 = vpop.eup %6440  ;;  %v8423_v42 = vadd.f32 %v3361_v17, %v3359_v55  ;;  %v3362_v47 = vmul.f32 %v6439_v34, %v6437_v3 }
 0x67c   :  { %v3353_v35 = vadd.f32 1.0, %v6441_v38 }
 0x67d   :  { %9972 = vst [vmem:[#allocation58_spill] sm:$0xff] %v8423_v42  ;;  %v8425_v12 = vadd.f32 %v3362_v47, %v3360_v63  ;;  %v6443_v37 = vpop.eup %6442  ;;  %6444 = vtanh.f32 %v8423_v42 }
 0x67e   :  { %6446 = vrcp.f32 %v3353_v35  ;;  %v3354_v58 = vadd.f32 1.0, %v6443_v37 }
 0x67f   :  { %9973 = vst [vmem:[#allocation21_spill] sm:$0xff] %v8425_v12  ;;  %6448 = vtanh.f32 %v8425_v12 }
 0x680   :  { %6450 = vrcp.f32 %v3354_v58 }
 0x687   :  { %v6445_v29 = vpop.eup %6444 }
 0x688   :  { %v6447_v27 = vpop.eup %6446 }
 0x689   :  { %v6449_v62 = vpop.eup %6448  ;;  %v3367_v34 = vmul.f32 %v6447_v27, %v6445_v29  ;;  %v3116_v29 = vadd.f32 %v3106_v22, %v7991_v10  ;;  %v3111_v27 = vadd.f32 %v8415_v33, %v7996_v18 }
 0x68a   :  { %v6451_v26 = vpop.eup %6450 }
 0x68b   :  { %v3057_v54 = vpop.f32.mrb[40].mxu1  ;;  %v3368_v48 = vmul.f32 %v6451_v26, %v6449_v62  ;;  %v3115_v26 = vadd.f32 %v3104_v8, %v7996_v18 }
 0x68c   :  { %v3109_v55 = vadd.f32 %v3057_v54, %v7972_v14  ;;  %v3059_v16 = vpop.f32.mrb[41].mxu1  ;;  %v3112_v54 = vadd.f32 %v3102_v45, %v7991_v10 }
 0x68d   :  { %v3110_v63 = vadd.f32 %v3059_v16, %v7977_v23  ;;  %v3061_v3 = vpop.f32.mrb[42].mxu1  ;;  %v8432_v35 = vpack.c.bf16 %v3368_v48, %v3367_v34 }
 0x68e   :  { %v5565_v17 = vmul.f32 -1.442695, %v3109_v55  ;;  %v3113_v38 = vadd.f32 %v3061_v3, %v7972_v14  ;;  %v3063_v47 = vpop.f32.mrb[43].mxu1  ;;  %v5569_v62 = vmul.f32 -1.442695, %v3112_v54 }
 0x68f   :  { %v5567_v37 = vmul.f32 -1.442695, %v3110_v63  ;;  %v3114_v58 = vadd.f32 %v3063_v47, %v7977_v23  ;;  %v5570_v55 = vmul.f32 -1.442695, %v3116_v29 }
 0x690   :  { %6452 = vpow2.f32 %v5565_v17  ;;  %v5566_v12 = vmul.f32 -1.442695, %v3113_v38 }
 0x691   :  { %6454 = vpow2.f32 %v5567_v37  ;;  %v5568_v42 = vmul.f32 -1.442695, %v3114_v58 }
 0x692   :  { %6456 = vpow2.f32 %v5566_v12 }
 0x693   :  { %6458 = vpow2.f32 %v5568_v42 }
 0x694   :  { %6460 = vtanh.f32 %v3111_v27 }
 0x695   :  { %6462 = vpow2.f32 %v5569_v62 }
 0x696   :  { %6464 = vtanh.f32 %v3115_v26 }
 0x697   :  { %6466 = vpow2.f32 %v5570_v55 }
 0x69a   :  { %v6453_v16 = vpop.eup %6452 }
 0x69b   :  { %v6455_v34 = vpop.eup %6454  ;;  %v3131_v48 = vadd.f32 1.0, %v6453_v16 }
 0x69c   :  { %v6457_v63 = vpop.eup %6456  ;;  %v3143_v45 = vadd.f32 1.0, %v6455_v34 }
 0x69d   :  { %v6459_v12 = vpop.eup %6458  ;;  %6468 = vrcp.f32 %v3131_v48  ;;  %v3132_v42 = vadd.f32 1.0, %v6457_v63 }
 0x69e   :  { %6470 = vrcp.f32 %v3143_v45  ;;  %v3144_v22 = vadd.f32 1.0, %v6459_v12  ;;  %v6461_v33 = vpop.eup %6460 }
 0x69f   :  { %6472 = vrcp.f32 %v3132_v42  ;;  %v6463_v3 = vpop.eup %6462 }
 0x6a0   :  { %6474 = vrcp.f32 %v3144_v22  ;;  %v6465_v8 = vpop.eup %6464  ;;  %v3157_v37 = vadd.f32 1.0, %v6463_v3  ;;  %v8463_v3 = vld [vmem:[#allocation8 + $0x60] ss:$20 sps:$4 sm:$0xff]  }
 0x6a1   :  { %v6467_v17 = vpop.eup %6466 }
 0x6a2   :  { %v3158_v62 = vadd.f32 1.0, %v6467_v17  ;;  %6476 = vrcp.f32 %v3157_v37  ;;  %v8475_v17 = vld [vmem:[#allocation8 + $0xb0] ss:$20 sps:$4 sm:$0xff]   ;;  %v8493_v37 = vld [vmem:[#allocation8 + $0x128] ss:$20 sps:$4 sm:$0xff]  }
 0x6a7   :  { %v6469_v38 = vpop.eup %6468 }
 0x6a8   :  { %v6471_v47 = vpop.eup %6470  ;;  %v3165_v58 = vmul.f32 %v6469_v38, %v6461_v33  ;;  %v8448_v33 = vld [vmem:[#allocation8 + $0x10] ss:$20 sps:$4 sm:$0xff]   ;;  %v8481_v38 = vld [vmem:[#allocation8 + $0xd8] ss:$20 sps:$4 sm:$0xff]  }
 0x6a9   :  { %v6473_v54 = vpop.eup %6472  ;;  %v3163_v29 = vmul.f32 %v6471_v47, %v8272_v56  ;;  %v8487_v47 = vld [vmem:[#allocation8 + $0x100] ss:$20 sps:$4 sm:$0xff]  }
 0x6aa   :  { %v6475_v27 = vpop.eup %6474  ;;  %v3166_v26 = vmul.f32 %v6473_v54, %v6465_v8  ;;  %v8469_v8 = vld [vmem:[#allocation8 + $0x88] ss:$20 sps:$4 sm:$0xff]   ;;  %v9975_v54 = vld [vmem:[#allocation32_spill] sm:$0xff] }
 0x6ab   :  { %v8441_v55 = vadd.f32 %v3165_v58, %v3163_v29  ;;  %v3164_v16 = vmul.f32 %v6475_v27, %v8276_v20  ;;  %v8457_v20 = vld [vmem:[#allocation8 + $0x38] ss:$20 sps:$4 sm:$0xff]   ;;  %v9974_v58 = vld [vmem:[#allocation16_spill] sm:$0xff]  ;;  %v9977_v27 = vld [vmem:[#allocation34_spill] sm:$0xff] }
 0x6ac   :  { %v6477_v48 = vpop.eup %6476  ;;  %v9976_v29 = vld [vmem:[#allocation72_spill] sm:$0xff] }
 0x6ad   :  { %6478 = vtanh.f32 %v8441_v55  ;;  %v8445_v34 = vadd.f32 %v3166_v26, %v3164_v16  ;;  %v9979_v26 = vld [vmem:[#allocation36_spill] sm:$0xff] }
 0x6ae   :  { %6480 = vrcp.f32 %v3158_v62  ;;  %v9978_v62 = vld [vmem:[#allocation74_spill] sm:$0xff]  ;;  %v9980_v16 = vld [vmem:[#allocation76_spill] sm:$0xff] }
 0x6af   :  { %6482 = vtanh.f32 %v8445_v34 }
 0x6b7   :  { %v6479_v63 = vpop.eup %6478 }
 0x6b8   :  { %v6481_v45 = vpop.eup %6480  ;;  %v3171_v56 = vmul.f32 %v6479_v63, %v6477_v48  ;;  %v9981_v48 = vld [vmem:[#allocation38_spill] sm:$0xff] }
 0x6b9   :  { %v6483_v12 = vpop.eup %6482  ;;  %v9982_v63 = vld [vmem:[#allocation78_spill] sm:$0xff] }
 0x6ba   :  { %v3172_v42 = vmul.f32 %v6483_v12, %v6481_v45  ;;  %v9983_v45 = vld [vmem:[#allocation40_spill] sm:$0xff] }
 0x6bb   :  { %v9984_v12 = vld [vmem:[#allocation80_spill] sm:$0xff] }
 0x6bc   :  { %v3173_v22 = vpack.c.bf16 %v3172_v42, %v3171_v56  ;;  %v9985_v56 = vld [vmem:[#allocation42_spill] sm:$0xff] }
 0x6bd   :  { %v9986_v42 = vld [vmem:[#allocation82_spill] sm:$0xff] }
 0x6be   :  { %3207 = vmatmul.mubr.bf16.vlgmr.msra.gmra.mrb[48].mxu0 %v3173_v22  ;;  %3250 = vmatmul.mubr.bf16.vlgmr.msra.gmra.mrb[48].mxu1 %v3173_v22 }
 0x6bf   :  { %5744 = vmatpush3.bf16.msra.mxu0 %v8448_v33  ;;  %3414 = vmatpush1.bf16.msra.mxu1 %v7535_v9 }
 0x6c0   :  { %5745 = vmatprep.subr.bf16.mxu0 %v9878_v61  ;;  %3415 = vmatprep.subr.bf16.mxu1 %v7541_v11 }
 0x6c1   :  { %5759 = vmatprep.mubr.msk.bf16.mxu0 %vm7032_vm8, %v9878_v61  ;;  %3445 = vmatprep.mubr.bf16.mxu1 %v9770_v2 }
 0x6c3   :  { %5746 = vmatpush3.bf16.msra.mxu0 %v8457_v20  ;;  %3416 = vmatpush1.bf16.msra.mxu1 %v9896_v59 }
 0x6c4   :  { %5747 = vmatprep.subr.bf16.mxu0 %v9878_v61  ;;  %3417 = vmatprep.subr.bf16.mxu1 %v9898_v0 }
 0x6c7   :  { %5748 = vmatpush3.bf16.msra.mxu0 %v8463_v3  ;;  %3418 = vmatpush1.bf16.msra.mxu1 %v9900_v39  ;;  %v10040_v39 = vld [vmem:[#allocation56_spill] sm:$0xff] }
 0x6c8   :  { %5749 = vmatprep.subr.bf16.mxu0 %v9878_v61  ;;  %3419 = vmatprep.subr.bf16.mxu1 %v9902_v53 }
 0x6cb   :  { %5750 = vmatpush3.bf16.msra.mxu0 %v8469_v8  ;;  %3420 = vmatpush1.bf16.msra.mxu1 %v9904_v31 }
 0x6cc   :  { %5751 = vmatprep.subr.bf16.mxu0 %v9878_v61  ;;  %3421 = vmatprep.subr.bf16.mxu1 %v9906_v40 }
 0x6cf   :  { %5752 = vmatpush3.bf16.msra.mxu0 %v8475_v17  ;;  %3422 = vmatpush1.bf16.msra.mxu1 %v9908_v7 }
 0x6d0   :  { %5753 = vmatprep.subr.bf16.mxu0 %v9878_v61  ;;  %3423 = vmatprep.subr.bf16.mxu1 %v9910_v24 }
 0x6d3   :  { %5754 = vmatpush3.bf16.msra.mxu0 %v8481_v38  ;;  %3424 = vmatpush1.bf16.msra.mxu1 %v9912_v57 }
 0x6d4   :  { %5755 = vmatprep.subr.bf16.mxu0 %v9878_v61  ;;  %3425 = vmatprep.subr.bf16.mxu1 %v9914_v19  ;;  %v8550_v19 = vld [vmem:[#allocation8 + $0x28] ss:$20 sps:$4 sm:$0xff]  }
 0x6d5   :  { %9997 = vst [vmem:[#allocation48_spill] sm:$0xff] %v8550_v19 }
 0x6d7   :  { %5756 = vmatpush3.bf16.msra.mxu0 %v8487_v47  ;;  %3426 = vmatpush1.bf16.msra.mxu1 %v9916_v51  ;;  %v8533_v51 = vld [vmem:[#allocation8 + $0x4] ss:$20 sps:$4 sm:$0xff]  }
 0x6d8   :  { %5757 = vmatprep.subr.bf16.mxu0 %v9878_v61  ;;  %3427 = vmatprep.subr.bf16.mxu1 %v9918_v49  ;;  %v9989_v49 = vld [vmem:[#allocation49_spill] sm:$0xff]  ;;  %9990 = vst [vmem:[#allocation60_spill] sm:$0xff] %v8533_v51 }
 0x6db   :  { %5758 = vmatpush3.bf16.msra.mxu0 %v8493_v37  ;;  %3428 = vmatpush1.bf16.msra.mxu1 %v9920_v25  ;;  %v9988_v25 = vld [vmem:[#allocation84_spill] sm:$0xff] }
 0x6dc   :  { %3370 = vmatprep.subr.bf16.mxu0 %v9974_v58  ;;  %3499 = vmatprep.subr.bf16.mxu1 %v9826_v60 }
 0x6de   :  { %5760 = vmatmul.mubr.bf16.vlgmr.msra.gmra.mrb[52].mxu0 %v3173_v22  ;;  %3446 = vmatmul.mubr.bf16.vlgmr.msra.gmra.mrb[16].mxu1 %v8432_v35  ;;  %v9987_v22 = vld [vmem:[#allocation44_spill] sm:$0xff] }
 0x6df   :  { %3371 = vmatpush1.bf16.msra.mxu0 %v9827_v44  ;;  %3500 = vmatpush1.bf16.msra.mxu1 %v9828_v4 }
 0x6e0   :  { %3372 = vmatprep.subr.bf16.mxu0 %v9829_v5  ;;  %3501 = vmatprep.subr.bf16.mxu1 %v9895_v13 }
 0x6e1   :  { %3402 = vmatprep.mubr.bf16.mxu0 %v9770_v2  ;;  %3531 = vmatprep.mubr.bf16.mxu1 %v9770_v2 }
 0x6e3   :  { %3373 = vmatpush1.bf16.msra.mxu0 %v9831_v15  ;;  %3502 = vmatpush1.bf16.msra.mxu1 %v9897_v30 }
 0x6e4   :  { %3374 = vmatprep.subr.bf16.mxu0 %v9833_v21  ;;  %3503 = vmatprep.subr.bf16.mxu1 %v9899_v36 }
 0x6e7   :  { %3375 = vmatpush1.bf16.msra.mxu0 %v9835_v28  ;;  %3504 = vmatpush1.bf16.msra.mxu1 %v9901_v46 }
 0x6e8   :  { %3376 = vmatprep.subr.bf16.mxu0 %v9837_v50  ;;  %3505 = vmatprep.subr.bf16.mxu1 %v9903_v41 }
 0x6eb   :  { %3377 = vmatpush1.bf16.msra.mxu0 %v9839_v32  ;;  %3506 = vmatpush1.bf16.msra.mxu1 %v9905_v6 }
 0x6ec   :  { %3378 = vmatprep.subr.bf16.mxu0 %v9841_v1  ;;  %3507 = vmatprep.subr.bf16.mxu1 %v9907_v43  ;;  %v10039_v43 = vld [vmem:[#allocation54_spill] sm:$0xff] }
 0x6ef   :  { %3379 = vmatpush1.bf16.msra.mxu0 %v9975_v54  ;;  %3508 = vmatpush1.bf16.msra.mxu1 %v9976_v29 }
 0x6f0   :  { %3380 = vmatprep.subr.bf16.mxu0 %v9977_v27  ;;  %3509 = vmatprep.subr.bf16.mxu1 %v9978_v62 }
 0x6f3   :  { %3381 = vmatpush1.bf16.msra.mxu0 %v9979_v26  ;;  %3510 = vmatpush1.bf16.msra.mxu1 %v9980_v16  ;;  %v8558_v16 = vld [vmem:[#allocation8 + $0x50] ss:$20 sps:$4 sm:$0xff]  }
 0x6f4   :  { %3382 = vmatprep.subr.bf16.mxu0 %v9981_v48  ;;  %3511 = vmatprep.subr.bf16.mxu1 %v9982_v63  ;;  %v9991_v63 = vld [vmem:[#allocation51_spill] sm:$0xff]  ;;  %10001 = vst [vmem:[#allocation18_spill] sm:$0xff] %v8558_v16 }
 0x6f7   :  { %3383 = vmatpush1.bf16.msra.mxu0 %v9983_v45  ;;  %3512 = vmatpush1.bf16.msra.mxu1 %v9984_v12  ;;  %v9992_v12 = vld [vmem:[#allocation57_spill] sm:$0xff] }
 0x6f8   :  { %3384 = vmatprep.subr.bf16.mxu0 %v9985_v56  ;;  %3513 = vmatprep.subr.bf16.mxu1 %v9986_v42  ;;  %v8541_v42 = vld [vmem:[#allocation8] ss:$20 sps:$4 sm:$0xff]  }
 0x6f9   :  { %9993 = vst [vmem:[#allocation46_spill] sm:$0xff] %v8541_v42 }
 0x6fb   :  { %3385 = vmatpush1.bf16.msra.mxu0 %v9987_v22  ;;  %3514 = vmatpush1.bf16.msra.mxu1 %v9988_v25  ;;  %v8544_v25 = vld [vmem:[#allocation8 + $0x2c] ss:$20 sps:$4 sm:$0xff]  }
 0x6fc   :  { %3456 = vmatprep.subr.bf16.mxu0 %v9989_v49  ;;  %3607 = vmatprep.subr.bf16.mxu1 %v8533_v51  ;;  %9994 = vst [vmem:[#allocation47_spill] sm:$0xff] %v8544_v25  ;;  %v9995_v51 = vld [vmem:[#allocation59_spill] sm:$0xff]  ;;  %v9996_v49 = vld [vmem:[#allocation61_spill] sm:$0xff] }
 0x6fe   :  { %3403 = vmatmul.mubr.bf16.vlgmr.msra.gmra.mrb[16].mxu0 %v8432_v35  ;;  %3532 = vmatmul.mubr.bf16.vlgmr.msra.gmra.mrb[48].mxu1 %v8432_v35 }
 0x6ff   :  { %3457 = vmatpush1.bf16.msra.mxu0 %v9991_v63  ;;  %3488 = vmatprep.mubr.bf16.mxu0 %v9770_v2  ;;  %v8553_v63 = vld [vmem:[#allocation8 + $0x54] ss:$20 sps:$4 sm:$0xff]  }
 0x700   :  { %3458 = vmatprep.subr.bf16.mxu0 %v9992_v12  ;;  %3608 = vmatpush1.bf16.msra.mxu1 %v8541_v42  ;;  %9998 = vst [vmem:[#allocation50_spill] sm:$0xff] %v8553_v63  ;;  %v9999_v12 = vld [vmem:[#allocation63_spill] sm:$0xff]  ;;  %v10000_v42 = vld [vmem:[#allocation65_spill] sm:$0xff] }
 0x701   :  { %3609 = vmatprep.subr.bf16.mxu1 %v8544_v25  ;;  %3639 = vmatprep.mubr.bf16.mxu1 %v9770_v2  ;;  %v8561_v25 = vld [vmem:[#allocation8 + $0x7c] ss:$20 sps:$4 sm:$0xff]  }
 0x702   :  { %10002 = vst [vmem:[#allocation52_spill] sm:$0xff] %v8561_v25 }
 0x703   :  { %3459 = vmatpush1.bf16.msra.mxu0 %v9995_v51  ;;  %v10004_v51 = vld [vmem:[#allocation69_spill] sm:$0xff] }
 0x704   :  { %3460 = vmatprep.subr.bf16.mxu0 %v9996_v49  ;;  %3610 = vmatpush1.bf16.msra.mxu1 %v8550_v19  ;;  %v10003_v49 = vld [vmem:[#allocation67_spill] sm:$0xff] }
 0x705   :  { %3611 = vmatprep.subr.bf16.mxu1 %v8553_v63  ;;  %v8566_v19 = vld [vmem:[#allocation8 + $0x78] ss:$20 sps:$4 sm:$0xff]  }
 0x706   :  { %10005 = vst [vmem:[#allocation19_spill] sm:$0xff] %v8566_v19  ;;  %v8569_v63 = vld [vmem:[#allocation8 + $0xa4] ss:$20 sps:$4 sm:$0xff]  }
 0x707   :  { %3461 = vmatpush1.bf16.msra.mxu0 %v9999_v12  ;;  %10006 = vst [vmem:[#allocation20_spill] sm:$0xff] %v8569_v63  ;;  %v10008_v12 = vld [vmem:[#allocation73_spill] sm:$0xff] }
 0x708   :  { %3462 = vmatprep.subr.bf16.mxu0 %v10000_v42  ;;  %3612 = vmatpush1.bf16.msra.mxu1 %v8558_v16  ;;  %v10007_v42 = vld [vmem:[#allocation71_spill] sm:$0xff]  ;;  %v8574_v16 = vld [vmem:[#allocation8 + $0xa0] ss:$20 sps:$4 sm:$0xff]  }
 0x709   :  { %3613 = vmatprep.subr.bf16.mxu1 %v8561_v25  ;;  %10009 = vst [vmem:[#allocation22_spill] sm:$0xff] %v8574_v16  ;;  %v8577_v25 = vld [vmem:[#allocation8 + $0xcc] ss:$20 sps:$4 sm:$0xff]  }
 0x70a   :  { %10010 = vst [vmem:[#allocation24_spill] sm:$0xff] %v8577_v25 }
 0x70b   :  { %3463 = vmatpush1.bf16.msra.mxu0 %v10003_v49  ;;  %v10012_v49 = vld [vmem:[#allocation77_spill] sm:$0xff] }
 0x70c   :  { %3464 = vmatprep.subr.bf16.mxu0 %v10004_v51  ;;  %3614 = vmatpush1.bf16.msra.mxu1 %v8566_v19  ;;  %v10011_v51 = vld [vmem:[#allocation75_spill] sm:$0xff] }
 0x70d   :  { %3615 = vmatprep.subr.bf16.mxu1 %v8569_v63  ;;  %v8582_v19 = vld [vmem:[#allocation8 + $0xc8] ss:$20 sps:$4 sm:$0xff]  }
 0x70e   :  { %10013 = vst [vmem:[#allocation26_spill] sm:$0xff] %v8582_v19  ;;  %v8585_v63 = vld [vmem:[#allocation8 + $0xf4] ss:$20 sps:$4 sm:$0xff]  }
 0x70f   :  { %3465 = vmatpush1.bf16.msra.mxu0 %v10007_v42  ;;  %10014 = vst [vmem:[#allocation28_spill] sm:$0xff] %v8585_v63  ;;  %v10016_v42 = vld [vmem:[#allocation81_spill] sm:$0xff] }
 0x710   :  { %3466 = vmatprep.subr.bf16.mxu0 %v10008_v12  ;;  %3616 = vmatpush1.bf16.msra.mxu1 %v8574_v16  ;;  %v10015_v12 = vld [vmem:[#allocation79_spill] sm:$0xff]  ;;  %v8590_v16 = vld [vmem:[#allocation8 + $0xf0] ss:$20 sps:$4 sm:$0xff]  }
 0x711   :  { %3617 = vmatprep.subr.bf16.mxu1 %v8577_v25  ;;  %10017 = vst [vmem:[#allocation30_spill] sm:$0xff] %v8590_v16  ;;  %v8593_v25 = vld [vmem:[#allocation8 + $0x11c] ss:$20 sps:$4 sm:$0xff]  }
 0x712   :  { %10018 = vst [vmem:[#allocation85_spill] sm:$0xff] %v8593_v25 }
 0x713   :  { %3467 = vmatpush1.bf16.msra.mxu0 %v10011_v51  ;;  %v8597_v51 = vld [vmem:[#allocation8 + $0xc] ss:$20 sps:$4 sm:$0xff]  }
 0x714   :  { %3468 = vmatprep.subr.bf16.mxu0 %v10012_v49  ;;  %3618 = vmatpush1.bf16.msra.mxu1 %v8582_v19  ;;  %v10019_v49 = vld [vmem:[#allocation83_spill] sm:$0xff]  ;;  %10020 = vst [vmem:[#allocation86_spill] sm:$0xff] %v8597_v51 }
 0x715   :  { %3619 = vmatprep.subr.bf16.mxu1 %v8585_v63  ;;  %v8600_v19 = vld [vmem:[#allocation8 + $0x118] ss:$20 sps:$4 sm:$0xff]  }
 0x716   :  { %10021 = vst [vmem:[#allocation87_spill] sm:$0xff] %v8600_v19 }
 0x717   :  { %3469 = vmatpush1.bf16.msra.mxu0 %v10015_v12 }
 0x718   :  { %3470 = vmatprep.subr.bf16.mxu0 %v10016_v42  ;;  %3620 = vmatpush1.bf16.msra.mxu1 %v8590_v16  ;;  %v8605_v42 = vld [vmem:[#allocation8 + $0x8] ss:$20 sps:$4 sm:$0xff]  }
 0x719   :  { %3621 = vmatprep.subr.bf16.mxu1 %v8593_v25  ;;  %10022 = vst [vmem:[#allocation88_spill] sm:$0xff] %v8605_v42  ;;  %v8609_v25 = vld [vmem:[#allocation8 + $0x34] ss:$20 sps:$4 sm:$0xff]  }
 0x71a   :  { %10023 = vst [vmem:[#allocation89_spill] sm:$0xff] %v8609_v25 }
 0x71b   :  { %3471 = vmatpush1.bf16.msra.mxu0 %v10019_v49  ;;  %v8612_v49 = vld [vmem:[#allocation8 + $0x30] ss:$20 sps:$4 sm:$0xff]  }
 0x71c   :  { %3650 = vmatprep.subr.bf16.mxu0 %v8597_v51  ;;  %3622 = vmatpush1.bf16.msra.mxu1 %v8600_v19  ;;  %10024 = vst [vmem:[#allocation90_spill] sm:$0xff] %v8612_v49  ;;  %v8615_v51 = vld [vmem:[#allocation8 + $0x5c] ss:$20 sps:$4 sm:$0xff]   ;;  %v8618_v19 = vld [vmem:[#allocation8 + $0x58] ss:$20 sps:$4 sm:$0xff]  }
 0x71d   :  { %5763 = vmatprep.subr.bf16.mxu1 %v9878_v61  ;;  %10025 = vst [vmem:[#allocation91_spill] sm:$0xff] %v8615_v51  ;;  %10026 = vst [vmem:[#allocation92_spill] sm:$0xff] %v8618_v19 }
 0x71e   :  { %3489 = vmatmul.mubr.bf16.vlgmr.msra.gmra.mrb[48].mxu0 %v8432_v35  ;;  %v8621_v35 = vld [vmem:[#allocation8 + $0x84] ss:$20 sps:$4 sm:$0xff]  }
 0x71f   :  { %3651 = vmatpush1.bf16.msra.mxu0 %v8605_v42  ;;  %3682 = vmatprep.mubr.bf16.mxu0 %v9770_v2  ;;  %10027 = vst [vmem:[#allocation93_spill] sm:$0xff] %v8621_v35  ;;  %v8624_v42 = vld [vmem:[#allocation8 + $0x80] ss:$20 sps:$4 sm:$0xff]  }
 0x720   :  { %3652 = vmatprep.subr.bf16.mxu0 %v8609_v25  ;;  %10028 = vst [vmem:[#allocation94_spill] sm:$0xff] %v8624_v42  ;;  %v8627_v25 = vld [vmem:[#allocation8 + $0xac] ss:$20 sps:$4 sm:$0xff]  }
 0x721   :  { %10029 = vst [vmem:[#allocation95_spill] sm:$0xff] %v8627_v25 }
 0x723   :  { %3653 = vmatpush1.bf16.msra.mxu0 %v8612_v49  ;;  %v8630_v49 = vld [vmem:[#allocation8 + $0xa8] ss:$20 sps:$4 sm:$0xff]  }
 0x724   :  { %3654 = vmatprep.subr.bf16.mxu0 %v8615_v51  ;;  %10030 = vst [vmem:[#allocation96_spill] sm:$0xff] %v8630_v49  ;;  %v8633_v51 = vld [vmem:[#allocation8 + $0xd4] ss:$20 sps:$4 sm:$0xff]  }
 0x725   :  { %10031 = vst [vmem:[#allocation97_spill] sm:$0xff] %v8633_v51 }
 0x727   :  { %3655 = vmatpush1.bf16.msra.mxu0 %v8618_v19  ;;  %v8636_v19 = vld [vmem:[#allocation8 + $0xd0] ss:$20 sps:$4 sm:$0xff]  }
 0x728   :  { %3656 = vmatprep.subr.bf16.mxu0 %v8621_v35  ;;  %10032 = vst [vmem:[#allocation98_spill] sm:$0xff] %v8636_v19  ;;  %v8639_v35 = vld [vmem:[#allocation8 + $0xfc] ss:$20 sps:$4 sm:$0xff]  }
 0x729   :  { %10033 = vst [vmem:[#allocation99_spill] sm:$0xff] %v8639_v35 }
 0x72b   :  { %3657 = vmatpush1.bf16.msra.mxu0 %v8624_v42  ;;  %v8642_v42 = vld [vmem:[#allocation8 + $0xf8] ss:$20 sps:$4 sm:$0xff]  }
 0x72c   :  { %3658 = vmatprep.subr.bf16.mxu0 %v8627_v25  ;;  %10034 = vst [vmem:[#allocation100_spill] sm:$0xff] %v8642_v42  ;;  %v8645_v25 = vld [vmem:[#allocation8 + $0x124] ss:$20 sps:$4 sm:$0xff]  }
 0x72d   :  { %10035 = vst [vmem:[#allocation101_spill] sm:$0xff] %v8645_v25 }
 0x72f   :  { %3659 = vmatpush1.bf16.msra.mxu0 %v8630_v49  ;;  %v8648_v49 = vld [vmem:[#allocation8 + $0x120] ss:$20 sps:$4 sm:$0xff]  }
 0x730   :  { %3660 = vmatprep.subr.bf16.mxu0 %v8633_v51  ;;  %10036 = vst [vmem:[#allocation102_spill] sm:$0xff] %v8648_v49 }
 0x733   :  { %3661 = vmatpush1.bf16.msra.mxu0 %v8636_v19 }
 0x734   :  { %3662 = vmatprep.subr.bf16.mxu0 %v8639_v35  ;;  %v8655_v35 = vld [vmem:[%s9422_s8] ss:$0 sm:$0xff] }
 0x735   :  { %10037 = vst [vmem:[#allocation103_spill] sm:$0xff] %v8655_v35 }
 0x737   :  { %3663 = vmatpush1.bf16.msra.mxu0 %v8642_v42 }
 0x738   :  { %3664 = vmatprep.subr.bf16.mxu0 %v8645_v25 }
 0x73b   :  { %3665 = vmatpush1.bf16.msra.mxu0 %v8648_v49 }
 0x73c   :  { %3803 = vmatprep.subr.bf16.mxu0 %v9974_v58 }
 0x7b1   :  { %v3294_v51 = vpop.f32.mrb[52].mxu0  ;;  %v3447_v19 = vpop.f32.mrb[16].mxu1 }
 0x7b2   :  { %v3301_v16 = vadd.f32 %v8655_v35, %v3294_v51  ;;  %v5761_v42 = vpop.f32.mrb[53].mxu0  ;;  %v3449_v12 = vpop.f32.mrb[17].mxu1  ;;  %v10038_v51 = vld [vmem:[#allocation53_spill] sm:$0xff] }
 0x7b3   :  { %v3297_v63 = vpop.f32.mrb[54].mxu0  ;;  %v3451_v57 = vpop.f32.mrb[18].mxu1  ;;  %v5900_v46 = vadd.f32 %v3449_v12, %v7806_v52 }
 0x7b4   :  { %3303 = vst [vmem:[%s9423_s9 + $0x10] sm:$0xff] %v3301_v16  ;;  %v3302_v49 = vadd.f32 %v8655_v35, %v3297_v63  ;;  %v5762_v58 = vpop.f32.mrb[55].mxu0  ;;  %v3453_v25 = vpop.f32.mrb[19].mxu1 }
 0x7b5   :  { %v5587_v36 = vmul.f32 -1.442695, %v5900_v46 }
 0x7b6   :  { %3304 = vst [vmem:[%s9423_s9 + $0x50] sm:$0xff] %v3302_v49 }
 0x7d1   :  { %v3404_v62 = vpop.f32.mrb[16].mxu0  ;;  %v8665_v24 = vpop.f32.mrb[48].mxu1 }
 0x7d2   :  { %v5895_v42 = vadd.f32 %v3404_v62, %v10038_v51  ;;  %v3406_v29 = vpop.f32.mrb[17].mxu0  ;;  %v8668_v7 = vpop.f32.mrb[49].mxu1 }
 0x7d3   :  { %v5896_v40 = vadd.f32 %v3406_v29, %v10039_v43  ;;  %v3408_v6 = vpop.f32.mrb[18].mxu0  ;;  %v8671_v16 = vpop.f32.mrb[50].mxu1  ;;  %v5902_v29 = vadd.f32 %v3453_v25, %v7806_v52 }
 0x7d4   :  { %v5583_v63 = vmul.f32 -1.442695, %v5895_v42  ;;  %v5897_v58 = vadd.f32 %v3408_v6, %v10038_v51  ;;  %v3410_v35 = vpop.f32.mrb[19].mxu0  ;;  %v8674_v31 = vpop.f32.mrb[51].mxu1  ;;  %v5899_v42 = vadd.f32 %v3447_v19, %v10040_v39 }
 0x7d5   :  { %v5585_v49 = vmul.f32 -1.442695, %v5896_v40  ;;  %v5898_v41 = vadd.f32 %v3410_v35, %v10039_v43  ;;  %v5588_v6 = vmul.f32 -1.442695, %v5902_v29  ;;  %v5901_v40 = vadd.f32 %v3451_v57, %v10040_v39 }
 0x7d6   :  { %6484 = vpow2.f32 %v5583_v63  ;;  %v5584_v53 = vmul.f32 -1.442695, %v5897_v58 }
 0x7d7   :  { %6486 = vpow2.f32 %v5585_v49  ;;  %v5586_v62 = vmul.f32 -1.442695, %v5898_v41 }
 0x7d8   :  { %6488 = vpow2.f32 %v5584_v53 }
 0x7d9   :  { %6490 = vpow2.f32 %v5586_v62 }
 0x7da   :  { %6492 = vtanh.f32 %v5899_v42 }
 0x7db   :  { %6494 = vpow2.f32 %v5587_v36 }
 0x7dc   :  { %6496 = vpow2.f32 %v5588_v6 }
 0x7e0   :  { %v6485_v51 = vpop.eup %6484 }
 0x7e1   :  { %v6487_v0 = vpop.eup %6486  ;;  %v3760_v35 = vadd.f32 1.0, %v6485_v51  ;;  %v10041_v51 = vld [vmem:[#allocation58_spill] sm:$0xff] }
 0x7e2   :  { %v3772_v63 = vadd.f32 1.0, %v6487_v0  ;;  %v6489_v41 = vpop.eup %6488 }
 0x7e3   :  { %6498 = vrcp.f32 %v3760_v35  ;;  %v3761_v53 = vadd.f32 1.0, %v6489_v41  ;;  %v6491_v12 = vpop.eup %6490 }
 0x7e4   :  { %6500 = vrcp.f32 %v3772_v63  ;;  %v3773_v25 = vadd.f32 1.0, %v6491_v12  ;;  %v6493_v46 = vpop.eup %6492 }
 0x7e5   :  { %6502 = vtanh.f32 %v5901_v40  ;;  %v6495_v19 = vpop.eup %6494 }
 0x7e6   :  { %6504 = vrcp.f32 %v3761_v53  ;;  %v6497_v58 = vpop.eup %6496  ;;  %v3786_v57 = vadd.f32 1.0, %v6495_v19 }
 0x7e7   :  { %6506 = vrcp.f32 %v3773_v25  ;;  %v3787_v6 = vadd.f32 1.0, %v6497_v58  ;;  %v10042_v25 = vld [vmem:[#allocation21_spill] sm:$0xff] }
 0x7e8   :  { %6508 = vrcp.f32 %v3786_v57 }
 0x7e9   :  { %6510 = vrcp.f32 %v3787_v6 }
 0x7ed   :  { %v6499_v49 = vpop.eup %6498 }
 0x7ee   :  { %v6501_v62 = vpop.eup %6500  ;;  %v3794_v36 = vmul.f32 %v6499_v49, %v6493_v46 }
 0x7ef   :  { %v6503_v29 = vpop.eup %6502  ;;  %v3792_v42 = vmul.f32 %v6501_v62, %v10041_v51 }
 0x7f0   :  { %v6505_v0 = vpop.eup %6504 }
 0x7f1   :  { %v8682_v35 = vadd.f32 %v3794_v36, %v3792_v42  ;;  %v3795_v63 = vmul.f32 %v6505_v0, %v6503_v29  ;;  %v3490_v41 = vpop.f32.mrb[48].mxu0  ;;  %v6507_v40 = vpop.eup %6506  ;;  %v3545_v42 = vadd.f32 %v8668_v7, %v7991_v10  ;;  %v3544_v0 = vadd.f32 %v8665_v24, %v7996_v18 }
 0x7f2   :  { %v3542_v53 = vadd.f32 %v3490_v41, %v7972_v14  ;;  %v3492_v12 = vpop.f32.mrb[49].mxu0  ;;  %v3793_v52 = vmul.f32 %v6507_v40, %v10042_v25  ;;  %v3548_v41 = vadd.f32 %v8671_v16, %v7996_v18 }
 0x7f3   :  { %v3543_v39 = vadd.f32 %v3492_v12, %v7977_v23  ;;  %v3494_v46 = vpop.f32.mrb[50].mxu0  ;;  %6512 = vtanh.f32 %v8682_v35  ;;  %v5581_v6 = vmul.f32 -1.442695, %v3545_v42 }
 0x7f4   :  { %v5577_v19 = vmul.f32 -1.442695, %v3542_v53  ;;  %v3546_v49 = vadd.f32 %v3494_v46, %v7972_v14  ;;  %v3496_v62 = vpop.f32.mrb[51].mxu0  ;;  %v8689_v58 = vadd.f32 %v3795_v63, %v3793_v52  ;;  %v3549_v52 = vadd.f32 %v8674_v31, %v7991_v10 }
 0x7f5   :  { %v5579_v36 = vmul.f32 -1.442695, %v3543_v39  ;;  %v3547_v29 = vadd.f32 %v3496_v62, %v7977_v23  ;;  %v6509_v39 = vpop.eup %6508 }
 0x7f6   :  { %6514 = vpow2.f32 %v5577_v19  ;;  %v5578_v51 = vmul.f32 -1.442695, %v3546_v49  ;;  %v6511_v63 = vpop.eup %6510  ;;  %v5582_v12 = vmul.f32 -1.442695, %v3549_v52 }
 0x7f7   :  { %6516 = vtanh.f32 %v8689_v58  ;;  %v5580_v57 = vmul.f32 -1.442695, %v3547_v29 }
 0x7f8   :  { %6518 = vpow2.f32 %v5579_v36 }
 0x7f9   :  { %6520 = vpow2.f32 %v5578_v51 }
 0x7fa   :  { %6522 = vpow2.f32 %v5580_v57 }
 0x7fb   :  { %6524 = vtanh.f32 %v3544_v0 }
 0x7fc   :  { %6526 = vpow2.f32 %v5581_v6 }
 0x7fd   :  { %v6513_v40 = vpop.eup %6512  ;;  %6528 = vtanh.f32 %v3548_v41 }
 0x7fe   :  { %v3800_v19 = vmul.f32 %v6513_v40, %v6509_v39 }
 0x800   :  { %v6515_v53 = vpop.eup %6514 }
 0x801   :  { %v6517_v25 = vpop.eup %6516  ;;  %v3564_v7 = vadd.f32 1.0, %v6515_v53 }
 0x802   :  { %v6519_v46 = vpop.eup %6518  ;;  %v3801_v24 = vmul.f32 %v6517_v25, %v6511_v63 }
 0x803   :  { %v6521_v49 = vpop.eup %6520  ;;  %6530 = vrcp.f32 %v3564_v7  ;;  %v3576_v31 = vadd.f32 1.0, %v6519_v46 }
 0x804   :  { %v6523_v62 = vpop.eup %6522  ;;  %6532 = vpow2.f32 %v5582_v12  ;;  %v3565_v36 = vadd.f32 1.0, %v6521_v49  ;;  %v8701_v29 = vpack.c.bf16 %v3801_v24, %v3800_v19 }
 0x805   :  { %6534 = vrcp.f32 %v3576_v31  ;;  %v3577_v16 = vadd.f32 1.0, %v6523_v62  ;;  %v6525_v51 = vpop.eup %6524 }
 0x806   :  { %6536 = vrcp.f32 %v3565_v36  ;;  %v6527_v57 = vpop.eup %6526 }
 0x807   :  { %6538 = vrcp.f32 %v3577_v16  ;;  %v6529_v42 = vpop.eup %6528  ;;  %v3590_v63 = vadd.f32 1.0, %v6527_v57  ;;  %v10053_v57 = vld [vmem:[#allocation70_spill] sm:$0xff] }
 0x809   :  { %6540 = vrcp.f32 %v3590_v63  ;;  %v10059_v63 = vld [vmem:[#allocation76_spill] sm:$0xff] }
 0x80d   :  { %v6531_v0 = vpop.eup %6530 }
 0x80e   :  { %v6533_v52 = vpop.eup %6532  ;;  %v3598_v6 = vmul.f32 %v6531_v0, %v6525_v51  ;;  %v10052_v51 = vld [vmem:[#allocation31_spill] sm:$0xff]  ;;  %v10055_v0 = vld [vmem:[#allocation72_spill] sm:$0xff] }
 0x80f   :  { %v6535_v39 = vpop.eup %6534  ;;  %v3591_v12 = vadd.f32 1.0, %v6533_v52  ;;  %v10056_v52 = vld [vmem:[#allocation35_spill] sm:$0xff] }
 0x810   :  { %v6537_v41 = vpop.eup %6536  ;;  %v3596_v40 = vmul.f32 %v6535_v39, %v8441_v55  ;;  %v10058_v39 = vld [vmem:[#allocation37_spill] sm:$0xff] }
 0x811   :  { %v6539_v53 = vpop.eup %6538  ;;  %v3599_v25 = vmul.f32 %v6537_v41, %v6529_v42  ;;  %v10054_v42 = vld [vmem:[#allocation33_spill] sm:$0xff]  ;;  %v10060_v41 = vld [vmem:[#allocation39_spill] sm:$0xff] }
 0x812   :  { %v8704_v7 = vadd.f32 %v3598_v6, %v3596_v40  ;;  %v3597_v46 = vmul.f32 %v6539_v53, %v8445_v34  ;;  %v10043_v34 = vld [vmem:[#allocation17_spill] sm:$0xff]  ;;  %v10057_v6 = vld [vmem:[#allocation74_spill] sm:$0xff] }
 0x813   :  { %v6541_v24 = vpop.eup %6540  ;;  %v10061_v40 = vld [vmem:[#allocation78_spill] sm:$0xff]  ;;  %v10062_v53 = vld [vmem:[#allocation41_spill] sm:$0xff] }
 0x814   :  { %6542 = vtanh.f32 %v8704_v7  ;;  %v8708_v19 = vadd.f32 %v3599_v25, %v3597_v46  ;;  %v10064_v25 = vld [vmem:[#allocation43_spill] sm:$0xff]  ;;  %v10065_v46 = vld [vmem:[#allocation82_spill] sm:$0xff] }
 0x815   :  { %6544 = vrcp.f32 %v3591_v12  ;;  %v10063_v12 = vld [vmem:[#allocation80_spill] sm:$0xff] }
 0x816   :  { %6546 = vtanh.f32 %v8708_v19 }
 0x81e   :  { %v6543_v49 = vpop.eup %6542 }
 0x81f   :  { %v6545_v31 = vpop.eup %6544  ;;  %v3604_v55 = vmul.f32 %v6543_v49, %v6541_v24  ;;  %v10066_v24 = vld [vmem:[#allocation45_spill] sm:$0xff]  ;;  %v10067_v49 = vld [vmem:[#allocation84_spill] sm:$0xff] }
 0x820   :  { %v6547_v62 = vpop.eup %6546 }
 0x821   :  { %v3605_v36 = vmul.f32 %v6547_v62, %v6545_v31  ;;  %v10068_v31 = vld [vmem:[#allocation49_spill] sm:$0xff]  ;;  %v10069_v62 = vld [vmem:[#allocation60_spill] sm:$0xff] }
 0x823   :  { %v3606_v16 = vpack.c.bf16 %v3605_v36, %v3604_v55  ;;  %v10070_v55 = vld [vmem:[#allocation51_spill] sm:$0xff]  ;;  %v10071_v36 = vld [vmem:[#allocation57_spill] sm:$0xff] }
 0x825   :  { %3640 = vmatmul.mubr.bf16.vlgmr.msra.gmra.mrb[52].mxu1 %v3606_v16  ;;  %3683 = vmatmul.mubr.bf16.vlgmr.msra.gmra.mrb[56].mxu0 %v3606_v16 }
 0x826   :  { %5764 = vmatpush3.bf16.msra.mxu1 %v8448_v33  ;;  %3804 = vmatpush1.bf16.msra.mxu0 %v9827_v44  ;;  %v10044_v33 = vld [vmem:[#allocation23_spill] sm:$0xff] }
 0x827   :  { %5765 = vmatprep.subr.bf16.mxu1 %v9878_v61  ;;  %3805 = vmatprep.subr.bf16.mxu0 %v9829_v5 }
 0x828   :  { %5779 = vmatprep.mubr.msk.bf16.mxu1 %vm7032_vm8, %v9878_v61  ;;  %3835 = vmatprep.mubr.bf16.mxu0 %v9770_v2 }
 0x82a   :  { %5766 = vmatpush3.bf16.msra.mxu1 %v8457_v20  ;;  %3806 = vmatpush1.bf16.msra.mxu0 %v9831_v15  ;;  %v10045_v20 = vld [vmem:[#allocation62_spill] sm:$0xff] }
 0x82b   :  { %5767 = vmatprep.subr.bf16.mxu1 %v9878_v61  ;;  %3807 = vmatprep.subr.bf16.mxu0 %v9833_v21 }
 0x82e   :  { %5768 = vmatpush3.bf16.msra.mxu1 %v8463_v3  ;;  %3808 = vmatpush1.bf16.msra.mxu0 %v9835_v28  ;;  %v10046_v3 = vld [vmem:[#allocation25_spill] sm:$0xff] }
 0x82f   :  { %5769 = vmatprep.subr.bf16.mxu1 %v9878_v61  ;;  %3809 = vmatprep.subr.bf16.mxu0 %v9837_v50 }
 0x832   :  { %5770 = vmatpush3.bf16.msra.mxu1 %v8469_v8  ;;  %3810 = vmatpush1.bf16.msra.mxu0 %v9839_v32  ;;  %v10047_v8 = vld [vmem:[#allocation64_spill] sm:$0xff] }
 0x833   :  { %5771 = vmatprep.subr.bf16.mxu1 %v9878_v61  ;;  %3811 = vmatprep.subr.bf16.mxu0 %v9841_v1 }
 0x836   :  { %5772 = vmatpush3.bf16.msra.mxu1 %v8475_v17  ;;  %3812 = vmatpush1.bf16.msra.mxu0 %v9975_v54  ;;  %v10048_v17 = vld [vmem:[#allocation27_spill] sm:$0xff] }
 0x837   :  { %5773 = vmatprep.subr.bf16.mxu1 %v9878_v61  ;;  %3813 = vmatprep.subr.bf16.mxu0 %v9977_v27 }
 0x83a   :  { %5774 = vmatpush3.bf16.msra.mxu1 %v8481_v38  ;;  %3814 = vmatpush1.bf16.msra.mxu0 %v9979_v26  ;;  %v10049_v38 = vld [vmem:[#allocation66_spill] sm:$0xff] }
 0x83b   :  { %5775 = vmatprep.subr.bf16.mxu1 %v9878_v61  ;;  %3815 = vmatprep.subr.bf16.mxu0 %v9981_v48 }
 0x83e   :  { %5776 = vmatpush3.bf16.msra.mxu1 %v8487_v47  ;;  %3816 = vmatpush1.bf16.msra.mxu0 %v9983_v45  ;;  %v10050_v47 = vld [vmem:[#allocation29_spill] sm:$0xff]  ;;  %v10084_v45 = vld [vmem:[#allocation19_spill] sm:$0xff] }
 0x83f   :  { %5777 = vmatprep.subr.bf16.mxu1 %v9878_v61  ;;  %3817 = vmatprep.subr.bf16.mxu0 %v9985_v56  ;;  %v10078_v56 = vld [vmem:[#allocation63_spill] sm:$0xff] }
 0x842   :  { %5778 = vmatpush3.bf16.msra.mxu1 %v8493_v37  ;;  %3818 = vmatpush1.bf16.msra.mxu0 %v9987_v22  ;;  %v10051_v37 = vld [vmem:[#allocation68_spill] sm:$0xff]  ;;  %v10073_v22 = vld [vmem:[#allocation47_spill] sm:$0xff] }
 0x843   :  { %3846 = vmatprep.subr.bf16.mxu1 %v10043_v34  ;;  %3932 = vmatprep.subr.bf16.mxu0 %v9826_v60 }
 0x845   :  { %5780 = vmatmul.mubr.bf16.vlgmr.msra.gmra.mrb[56].mxu1 %v3606_v16  ;;  %3836 = vmatmul.mubr.bf16.vlgmr.msra.gmra.mrb[20].mxu0 %v8701_v29  ;;  %v10072_v16 = vld [vmem:[#allocation46_spill] sm:$0xff] }
 0x846   :  { %3847 = vmatpush1.bf16.msra.mxu1 %v7535_v9  ;;  %3933 = vmatpush1.bf16.msra.mxu0 %v9828_v4 }
 0x847   :  { %3848 = vmatprep.subr.bf16.mxu1 %v7541_v11  ;;  %3934 = vmatprep.subr.bf16.mxu0 %v9895_v13 }
 0x848   :  { %3878 = vmatprep.mubr.bf16.mxu1 %v9770_v2  ;;  %3964 = vmatprep.mubr.bf16.mxu0 %v9770_v2 }
 0x84a   :  { %3849 = vmatpush1.bf16.msra.mxu1 %v9896_v59  ;;  %3935 = vmatpush1.bf16.msra.mxu0 %v9897_v30 }
 0x84b   :  { %3850 = vmatprep.subr.bf16.mxu1 %v10044_v33  ;;  %3936 = vmatprep.subr.bf16.mxu0 %v10045_v20 }
 0x84e   :  { %3851 = vmatpush1.bf16.msra.mxu1 %v10046_v3  ;;  %3937 = vmatpush1.bf16.msra.mxu0 %v10047_v8 }
 0x84f   :  { %3852 = vmatprep.subr.bf16.mxu1 %v10048_v17  ;;  %3938 = vmatprep.subr.bf16.mxu0 %v10049_v38 }
 0x852   :  { %3853 = vmatpush1.bf16.msra.mxu1 %v10050_v47  ;;  %3939 = vmatpush1.bf16.msra.mxu0 %v10051_v37 }
 0x853   :  { %3854 = vmatprep.subr.bf16.mxu1 %v10052_v51  ;;  %3940 = vmatprep.subr.bf16.mxu0 %v10053_v57 }
 0x856   :  { %3855 = vmatpush1.bf16.msra.mxu1 %v10054_v42  ;;  %3941 = vmatpush1.bf16.msra.mxu0 %v10055_v0 }
 0x857   :  { %3856 = vmatprep.subr.bf16.mxu1 %v10056_v52  ;;  %3942 = vmatprep.subr.bf16.mxu0 %v10057_v6 }
 0x85a   :  { %3857 = vmatpush1.bf16.msra.mxu1 %v10058_v39  ;;  %3943 = vmatpush1.bf16.msra.mxu0 %v10059_v63 }
 0x85b   :  { %3858 = vmatprep.subr.bf16.mxu1 %v10060_v41  ;;  %3944 = vmatprep.subr.bf16.mxu0 %v10061_v40 }
 0x85e   :  { %3859 = vmatpush1.bf16.msra.mxu1 %v10062_v53  ;;  %3945 = vmatpush1.bf16.msra.mxu0 %v10063_v12  ;;  %v10080_v12 = vld [vmem:[#allocation18_spill] sm:$0xff] }
 0x85f   :  { %3860 = vmatprep.subr.bf16.mxu1 %v10064_v25  ;;  %3946 = vmatprep.subr.bf16.mxu0 %v10065_v46  ;;  %v10077_v46 = vld [vmem:[#allocation50_spill] sm:$0xff] }
 0x862   :  { %3861 = vmatpush1.bf16.msra.mxu1 %v10066_v24  ;;  %3947 = vmatpush1.bf16.msra.mxu0 %v10067_v49  ;;  %v10074_v49 = vld [vmem:[#allocation59_spill] sm:$0xff] }
 0x863   :  { %3889 = vmatprep.subr.bf16.mxu1 %v10068_v31  ;;  %4040 = vmatprep.subr.bf16.mxu0 %v10069_v62  ;;  %v10075_v31 = vld [vmem:[#allocation61_spill] sm:$0xff]  ;;  %v10076_v62 = vld [vmem:[#allocation48_spill] sm:$0xff] }
 0x865   :  { %3879 = vmatmul.mubr.bf16.vlgmr.msra.gmra.mrb[20].mxu1 %v8701_v29  ;;  %3965 = vmatmul.mubr.bf16.vlgmr.msra.gmra.mrb[56].mxu0 %v8701_v29 }
 0x866   :  { %3890 = vmatpush1.bf16.msra.mxu1 %v10070_v55  ;;  %3921 = vmatprep.mubr.bf16.mxu1 %v9770_v2  ;;  %v10079_v55 = vld [vmem:[#allocation65_spill] sm:$0xff] }
 0x867   :  { %3891 = vmatprep.subr.bf16.mxu1 %v10071_v36  ;;  %4041 = vmatpush1.bf16.msra.mxu0 %v10072_v16  ;;  %v10081_v36 = vld [vmem:[#allocation52_spill] sm:$0xff]  ;;  %v10082_v16 = vld [vmem:[#allocation67_spill] sm:$0xff] }
 0x868   :  { %4042 = vmatprep.subr.bf16.mxu0 %v10073_v22  ;;  %4072 = vmatprep.mubr.bf16.mxu0 %v9770_v2  ;;  %v10083_v22 = vld [vmem:[#allocation69_spill] sm:$0xff] }
 0x86a   :  { %3892 = vmatpush1.bf16.msra.mxu1 %v10074_v49  ;;  %v10085_v49 = vld [vmem:[#allocation20_spill] sm:$0xff] }
 0x86b   :  { %3893 = vmatprep.subr.bf16.mxu1 %v10075_v31  ;;  %4043 = vmatpush1.bf16.msra.mxu0 %v10076_v62  ;;  %v10086_v31 = vld [vmem:[#allocation71_spill] sm:$0xff]  ;;  %v10087_v62 = vld [vmem:[#allocation73_spill] sm:$0xff] }
 0x86c   :  { %4044 = vmatprep.subr.bf16.mxu0 %v10077_v46  ;;  %v10088_v46 = vld [vmem:[#allocation22_spill] sm:$0xff] }
 0x86e   :  { %3894 = vmatpush1.bf16.msra.mxu1 %v10078_v56  ;;  %v10089_v56 = vld [vmem:[#allocation24_spill] sm:$0xff] }
 0x86f   :  { %3895 = vmatprep.subr.bf16.mxu1 %v10079_v55  ;;  %4045 = vmatpush1.bf16.msra.mxu0 %v10080_v12  ;;  %v10090_v55 = vld [vmem:[#allocation75_spill] sm:$0xff]  ;;  %v10091_v12 = vld [vmem:[#allocation77_spill] sm:$0xff] }
 0x870   :  { %4046 = vmatprep.subr.bf16.mxu0 %v10081_v36  ;;  %v10092_v36 = vld [vmem:[#allocation26_spill] sm:$0xff] }
 0x872   :  { %3896 = vmatpush1.bf16.msra.mxu1 %v10082_v16  ;;  %v10093_v16 = vld [vmem:[#allocation28_spill] sm:$0xff] }
 0x873   :  { %3897 = vmatprep.subr.bf16.mxu1 %v10083_v22  ;;  %4047 = vmatpush1.bf16.msra.mxu0 %v10084_v45  ;;  %v10094_v22 = vld [vmem:[#allocation79_spill] sm:$0xff]  ;;  %v10095_v45 = vld [vmem:[#allocation81_spill] sm:$0xff] }
 0x874   :  { %4048 = vmatprep.subr.bf16.mxu0 %v10085_v49  ;;  %v10096_v49 = vld [vmem:[#allocation30_spill] sm:$0xff] }
 0x876   :  { %3898 = vmatpush1.bf16.msra.mxu1 %v10086_v31  ;;  %v10097_v31 = vld [vmem:[#allocation85_spill] sm:$0xff] }
 0x877   :  { %3899 = vmatprep.subr.bf16.mxu1 %v10087_v62  ;;  %4049 = vmatpush1.bf16.msra.mxu0 %v10088_v46  ;;  %v10098_v62 = vld [vmem:[#allocation83_spill] sm:$0xff]  ;;  %v10099_v46 = vld [vmem:[#allocation86_spill] sm:$0xff] }
 0x878   :  { %4050 = vmatprep.subr.bf16.mxu0 %v10089_v56  ;;  %v10100_v56 = vld [vmem:[#allocation87_spill] sm:$0xff] }
 0x87a   :  { %3900 = vmatpush1.bf16.msra.mxu1 %v10090_v55 }
 0x87b   :  { %3901 = vmatprep.subr.bf16.mxu1 %v10091_v12  ;;  %4051 = vmatpush1.bf16.msra.mxu0 %v10092_v36  ;;  %v10101_v36 = vld [vmem:[#allocation88_spill] sm:$0xff]  ;;  %v10112_v12 = vld [vmem:[#allocation99_spill] sm:$0xff] }
 0x87c   :  { %4052 = vmatprep.subr.bf16.mxu0 %v10093_v16  ;;  %v10102_v16 = vld [vmem:[#allocation89_spill] sm:$0xff] }
 0x87e   :  { %3902 = vmatpush1.bf16.msra.mxu1 %v10094_v22  ;;  %v10109_v22 = vld [vmem:[#allocation96_spill] sm:$0xff] }
 0x87f   :  { %3903 = vmatprep.subr.bf16.mxu1 %v10095_v45  ;;  %4053 = vmatpush1.bf16.msra.mxu0 %v10096_v49  ;;  %v10103_v45 = vld [vmem:[#allocation90_spill] sm:$0xff]  ;;  %v10104_v49 = vld [vmem:[#allocation91_spill] sm:$0xff] }
 0x880   :  { %4054 = vmatprep.subr.bf16.mxu0 %v10097_v31  ;;  %v10105_v31 = vld [vmem:[#allocation92_spill] sm:$0xff] }
 0x882   :  { %3904 = vmatpush1.bf16.msra.mxu1 %v10098_v62  ;;  %v10106_v62 = vld [vmem:[#allocation93_spill] sm:$0xff] }
 0x883   :  { %4083 = vmatprep.subr.bf16.mxu1 %v10099_v46  ;;  %4055 = vmatpush1.bf16.msra.mxu0 %v10100_v56  ;;  %v10107_v46 = vld [vmem:[#allocation94_spill] sm:$0xff]  ;;  %v10108_v56 = vld [vmem:[#allocation95_spill] sm:$0xff] }
 0x884   :  { %5783 = vmatprep.subr.bf16.mxu0 %v9878_v61 }
 0x885   :  { %3922 = vmatmul.mubr.bf16.vlgmr.msra.gmra.mrb[52].mxu1 %v8701_v29  ;;  %v10110_v29 = vld [vmem:[#allocation97_spill] sm:$0xff] }
 0x886   :  { %4084 = vmatpush1.bf16.msra.mxu1 %v10101_v36  ;;  %4115 = vmatprep.mubr.bf16.mxu1 %v9770_v2  ;;  %v10111_v36 = vld [vmem:[#allocation98_spill] sm:$0xff] }
 0x887   :  { %4085 = vmatprep.subr.bf16.mxu1 %v10102_v16  ;;  %v10113_v16 = vld [vmem:[#allocation100_spill] sm:$0xff] }
 0x88a   :  { %4086 = vmatpush1.bf16.msra.mxu1 %v10103_v45  ;;  %v10114_v45 = vld [vmem:[#allocation101_spill] sm:$0xff] }
 0x88b   :  { %4087 = vmatprep.subr.bf16.mxu1 %v10104_v49  ;;  %v10115_v49 = vld [vmem:[#allocation102_spill] sm:$0xff] }
 0x88e   :  { %4088 = vmatpush1.bf16.msra.mxu1 %v10105_v31 }
 0x88f   :  { %4089 = vmatprep.subr.bf16.mxu1 %v10106_v62 }
 0x892   :  { %4090 = vmatpush1.bf16.msra.mxu1 %v10107_v46  ;;  %v10116_v46 = vld [vmem:[#allocation103_spill] sm:$0xff] }
 0x893   :  { %4091 = vmatprep.subr.bf16.mxu1 %v10108_v56 }
 0x896   :  { %4092 = vmatpush1.bf16.msra.mxu1 %v10109_v22 }
 0x897   :  { %4093 = vmatprep.subr.bf16.mxu1 %v10110_v29 }
 0x89a   :  { %4094 = vmatpush1.bf16.msra.mxu1 %v10111_v36 }
 0x89b   :  { %4095 = vmatprep.subr.bf16.mxu1 %v10112_v12 }
 0x89e   :  { %4096 = vmatpush1.bf16.msra.mxu1 %v10113_v16 }
 0x89f   :  { %4097 = vmatprep.subr.bf16.mxu1 %v10114_v45  ;;  %v10117_v45 = vld [vmem:[#allocation53_spill] sm:$0xff] }
 0x8a2   :  { %4098 = vmatpush1.bf16.msra.mxu1 %v10115_v49 }
 0x8a3   :  { %4279 = vmatprep.subr.bf16.mxu1 %v10043_v34 }
 0x918   :  { %v3727_v62 = vpop.f32.mrb[56].mxu1  ;;  %v3837_v31 = vpop.f32.mrb[20].mxu0 }
 0x919   :  { %v3734_v56 = vadd.f32 %v10116_v46, %v3727_v62  ;;  %v5781_v55 = vpop.f32.mrb[57].mxu1  ;;  %v3839_v22 = vpop.f32.mrb[21].mxu0  ;;  %v5903_v49 = vadd.f32 %v3837_v31, %v10117_v45 }
 0x91a   :  { %v3730_v40 = vpop.f32.mrb[58].mxu1  ;;  %v3841_v29 = vpop.f32.mrb[22].mxu0  ;;  %v5904_v62 = vadd.f32 %v3839_v22, %v10039_v43 }
 0x91b   :  { %3736 = vst [vmem:[%s9423_s9 + $0x18] sm:$0xff] %v3734_v56  ;;  %v3735_v12 = vadd.f32 %v10116_v46, %v3730_v40  ;;  %v5782_v36 = vpop.f32.mrb[59].mxu1  ;;  %v3843_v16 = vpop.f32.mrb[23].mxu0  ;;  %v5595_v34 = vmul.f32 -1.442695, %v5903_v49  ;;  %v5905_v48 = vadd.f32 %v3841_v29, %v10117_v45  ;;  %v10118_v29 = vld [vmem:[#allocation56_spill] sm:$0xff] }
 0x91c   :  { %v5906_v55 = vadd.f32 %v3843_v16, %v10039_v43  ;;  %v5597_v63 = vmul.f32 -1.442695, %v5904_v62 }
 0x91d   :  { %3737 = vst [vmem:[%s9423_s9 + $0x58] sm:$0xff] %v3735_v12  ;;  %6548 = vpow2.f32 %v5595_v34  ;;  %v5596_v56 = vmul.f32 -1.442695, %v5905_v48 }
 0x91e   :  { %v5598_v26 = vmul.f32 -1.442695, %v5906_v55  ;;  %6550 = vpow2.f32 %v5597_v63 }
 0x920   :  { %6552 = vpow2.f32 %v5598_v26  ;;  %v10119_v26 = vld [vmem:[#allocation55_spill] sm:$0xff] }
 0x921   :  { %6554 = vpow2.f32 %v5596_v56 }
 0x927   :  { %v6549_v40 = vpop.eup %6548 }
 0x928   :  { %v6551_v46 = vpop.eup %6550  ;;  %v4193_v12 = vadd.f32 1.0, %v6549_v40 }
 0x929   :  { %v4205_v31 = vadd.f32 1.0, %v6551_v46 }
 0x92a   :  { %v6553_v36 = vpop.eup %6552  ;;  %6556 = vrcp.f32 %v4193_v12 }
 0x92b   :  { %v6555_v6 = vpop.eup %6554  ;;  %v4206_v27 = vadd.f32 1.0, %v6553_v36  ;;  %6558 = vrcp.f32 %v4205_v31 }
 0x92c   :  { %v4194_v22 = vadd.f32 1.0, %v6555_v6 }
 0x92d   :  { %6560 = vrcp.f32 %v4206_v27 }
 0x938   :  { %v3880_v16 = vpop.f32.mrb[20].mxu1  ;;  %v8847_v49 = vpop.f32.mrb[56].mxu0 }
 0x939   :  { %v5907_v62 = vadd.f32 %v3880_v16, %v10118_v29  ;;  %v3882_v34 = vpop.f32.mrb[21].mxu1  ;;  %v3968_v48 = vpop.f32.mrb[57].mxu0 }
 0x93a   :  { %v5908_v63 = vadd.f32 %v3882_v34, %v10119_v26  ;;  %v3884_v55 = vpop.f32.mrb[22].mxu1  ;;  %v3970_v56 = vpop.f32.mrb[58].mxu0 }
 0x93b   :  { %6562 = vtanh.f32 %v5907_v62  ;;  %v5909_v40 = vadd.f32 %v3884_v55, %v10118_v29  ;;  %v3886_v46 = vpop.f32.mrb[23].mxu1  ;;  %v3972_v36 = vpop.f32.mrb[59].mxu0 }
 0x93c   :  { %6564 = vrcp.f32 %v4194_v22  ;;  %v5599_v6 = vmul.f32 -1.442695, %v5908_v63  ;;  %v5910_v12 = vadd.f32 %v3886_v46, %v10119_v26  ;;  %v6557_v16 = vpop.eup %6556 }
 0x93d   :  { %6566 = vtanh.f32 %v5909_v40  ;;  %v6559_v43 = vpop.eup %6558 }
 0x93e   :  { %6568 = vpow2.f32 %v5599_v6  ;;  %v5600_v31 = vmul.f32 -1.442695, %v5910_v12  ;;  %v6561_v27 = vpop.eup %6560  ;;  %v4225_v0 = vmul.f32 %v6559_v43, %v8682_v35 }
 0x93f   :  { %v4226_v29 = vmul.f32 %v6561_v27, %v8689_v58 }
 0x940   :  { %6570 = vpow2.f32 %v5600_v31 }
 0x945   :  { %v6563_v45 = vpop.eup %6562 }
 0x946   :  { %v6565_v34 = vpop.eup %6564  ;;  %v4227_v62 = vmul.f32 %v6563_v45, %v6557_v16 }
 0x947   :  { %v6567_v54 = vpop.eup %6566 }
 0x948   :  { %v6569_v55 = vpop.eup %6568  ;;  %v8855_v22 = vadd.f32 %v4227_v62, %v4225_v0  ;;  %v4228_v63 = vmul.f32 %v6567_v54, %v6565_v34 }
 0x949   :  { %v4219_v46 = vadd.f32 1.0, %v6569_v55 }
 0x94a   :  { %10120 = vst [vmem:[#allocation104_spill] sm:$0xff] %v8855_v22  ;;  %v8857_v40 = vadd.f32 %v4228_v63, %v4226_v29  ;;  %v6571_v6 = vpop.eup %6570  ;;  %6572 = vtanh.f32 %v8855_v22 }
 0x94b   :  { %6574 = vrcp.f32 %v4219_v46  ;;  %v4220_v12 = vadd.f32 1.0, %v6571_v6 }
 0x94c   :  { %10121 = vst [vmem:[#allocation58_spill] sm:$0xff] %v8857_v40  ;;  %6576 = vtanh.f32 %v8857_v40 }
 0x94d   :  { %6578 = vrcp.f32 %v4220_v12 }
 0x954   :  { %v6573_v43 = vpop.eup %6572 }
 0x955   :  { %v6575_v35 = vpop.eup %6574 }
 0x956   :  { %v6577_v45 = vpop.eup %6576  ;;  %v4233_v54 = vmul.f32 %v6575_v35, %v6573_v43  ;;  %v3982_v43 = vadd.f32 %v3972_v36, %v7991_v10  ;;  %v3977_v35 = vadd.f32 %v8847_v49, %v7996_v18 }
 0x957   :  { %v6579_v31 = vpop.eup %6578 }
 0x958   :  { %v3923_v16 = vpop.f32.mrb[52].mxu1  ;;  %v4234_v27 = vmul.f32 %v6579_v31, %v6577_v45  ;;  %v3981_v31 = vadd.f32 %v3970_v56, %v7996_v18 }
 0x959   :  { %v3975_v58 = vadd.f32 %v3923_v16, %v7972_v14  ;;  %v3925_v0 = vpop.f32.mrb[53].mxu1  ;;  %v3978_v16 = vadd.f32 %v3968_v48, %v7991_v10 }
 0x95a   :  { %v3976_v29 = vadd.f32 %v3925_v0, %v7977_v23  ;;  %v3927_v34 = vpop.f32.mrb[54].mxu1  ;;  %v8864_v46 = vpack.c.bf16 %v4234_v27, %v4233_v54 }
 0x95b   :  { %v5589_v62 = vmul.f32 -1.442695, %v3975_v58  ;;  %v3979_v55 = vadd.f32 %v3927_v34, %v7972_v14  ;;  %v3929_v63 = vpop.f32.mrb[55].mxu1  ;;  %v5593_v45 = vmul.f32 -1.442695, %v3978_v16 }
 0x95c   :  { %v5591_v6 = vmul.f32 -1.442695, %v3976_v29  ;;  %v3980_v12 = vadd.f32 %v3929_v63, %v7977_v23  ;;  %v5594_v58 = vmul.f32 -1.442695, %v3982_v43 }
 0x95d   :  { %6580 = vpow2.f32 %v5589_v62  ;;  %v5590_v40 = vmul.f32 -1.442695, %v3979_v55 }
 0x95e   :  { %6582 = vpow2.f32 %v5591_v6  ;;  %v5592_v22 = vmul.f32 -1.442695, %v3980_v12 }
 0x95f   :  { %6584 = vpow2.f32 %v5590_v40 }
 0x960   :  { %6586 = vpow2.f32 %v5592_v22 }
 0x961   :  { %6588 = vtanh.f32 %v3977_v35 }
 0x962   :  { %6590 = vpow2.f32 %v5593_v45 }
 0x963   :  { %6592 = vtanh.f32 %v3981_v31 }
 0x964   :  { %6594 = vpow2.f32 %v5594_v58 }
 0x967   :  { %v6581_v0 = vpop.eup %6580 }
 0x968   :  { %v6583_v54 = vpop.eup %6582  ;;  %v3997_v27 = vadd.f32 1.0, %v6581_v0 }
 0x969   :  { %v6585_v29 = vpop.eup %6584  ;;  %v4009_v48 = vadd.f32 1.0, %v6583_v54 }
 0x96a   :  { %v6587_v40 = vpop.eup %6586  ;;  %6596 = vrcp.f32 %v3997_v27  ;;  %v3998_v22 = vadd.f32 1.0, %v6585_v29 }
 0x96b   :  { %6598 = vrcp.f32 %v4009_v48  ;;  %v4010_v36 = vadd.f32 1.0, %v6587_v40  ;;  %v6589_v49 = vpop.eup %6588 }
 0x96c   :  { %6600 = vrcp.f32 %v3998_v22  ;;  %v6591_v34 = vpop.eup %6590 }
 0x96d   :  { %6602 = vrcp.f32 %v4010_v36  ;;  %v6593_v56 = vpop.eup %6592  ;;  %v4023_v6 = vadd.f32 1.0, %v6591_v34  ;;  %v8895_v34 = vld [vmem:[#allocation8 + $0x60] ss:$20 sps:$4 sm:$0xff]  }
 0x96e   :  { %v6595_v62 = vpop.eup %6594 }
 0x96f   :  { %v4024_v45 = vadd.f32 1.0, %v6595_v62  ;;  %6604 = vrcp.f32 %v4023_v6  ;;  %v8907_v62 = vld [vmem:[#allocation8 + $0xb0] ss:$20 sps:$4 sm:$0xff]   ;;  %v8925_v6 = vld [vmem:[#allocation8 + $0x128] ss:$20 sps:$4 sm:$0xff]  }
 0x974   :  { %v6597_v55 = vpop.eup %6596 }
 0x975   :  { %v6599_v63 = vpop.eup %6598  ;;  %v4031_v12 = vmul.f32 %v6597_v55, %v6589_v49  ;;  %v8880_v49 = vld [vmem:[#allocation8 + $0x10] ss:$20 sps:$4 sm:$0xff]   ;;  %v8913_v55 = vld [vmem:[#allocation8 + $0xd8] ss:$20 sps:$4 sm:$0xff]  }
 0x976   :  { %v6601_v16 = vpop.eup %6600  ;;  %v4029_v43 = vmul.f32 %v6599_v63, %v8704_v7  ;;  %v8919_v63 = vld [vmem:[#allocation8 + $0x100] ss:$20 sps:$4 sm:$0xff]  }
 0x977   :  { %v6603_v35 = vpop.eup %6602  ;;  %v4032_v31 = vmul.f32 %v6601_v16, %v6593_v56  ;;  %v8901_v56 = vld [vmem:[#allocation8 + $0x88] ss:$20 sps:$4 sm:$0xff]   ;;  %v10123_v16 = vld [vmem:[#allocation32_spill] sm:$0xff] }
 0x978   :  { %v8873_v58 = vadd.f32 %v4031_v12, %v4029_v43  ;;  %v4030_v0 = vmul.f32 %v6603_v35, %v8708_v19  ;;  %v8889_v19 = vld [vmem:[#allocation8 + $0x38] ss:$20 sps:$4 sm:$0xff]   ;;  %v10122_v12 = vld [vmem:[#allocation16_spill] sm:$0xff]  ;;  %v10125_v35 = vld [vmem:[#allocation34_spill] sm:$0xff] }
 0x979   :  { %v6605_v27 = vpop.eup %6604  ;;  %v10124_v43 = vld [vmem:[#allocation72_spill] sm:$0xff] }
 0x97a   :  { %6606 = vtanh.f32 %v8873_v58  ;;  %v8877_v54 = vadd.f32 %v4032_v31, %v4030_v0  ;;  %v10127_v31 = vld [vmem:[#allocation36_spill] sm:$0xff] }
 0x97b   :  { %6608 = vrcp.f32 %v4024_v45  ;;  %v10126_v45 = vld [vmem:[#allocation74_spill] sm:$0xff]  ;;  %v10128_v0 = vld [vmem:[#allocation76_spill] sm:$0xff] }
 0x97c   :  { %6610 = vtanh.f32 %v8877_v54 }
 0x984   :  { %v6607_v29 = vpop.eup %6606 }
 0x985   :  { %v6609_v48 = vpop.eup %6608  ;;  %v4037_v7 = vmul.f32 %v6607_v29, %v6605_v27  ;;  %v10129_v27 = vld [vmem:[#allocation38_spill] sm:$0xff] }
 0x986   :  { %v6611_v40 = vpop.eup %6610  ;;  %v10130_v29 = vld [vmem:[#allocation78_spill] sm:$0xff] }
 0x987   :  { %v4038_v22 = vmul.f32 %v6611_v40, %v6609_v48  ;;  %v10131_v48 = vld [vmem:[#allocation40_spill] sm:$0xff] }
 0x988   :  { %v10132_v40 = vld [vmem:[#allocation80_spill] sm:$0xff] }
 0x989   :  { %v4039_v36 = vpack.c.bf16 %v4038_v22, %v4037_v7  ;;  %v10133_v7 = vld [vmem:[#allocation42_spill] sm:$0xff] }
 0x98a   :  { %v10134_v22 = vld [vmem:[#allocation82_spill] sm:$0xff] }
 0x98b   :  { %4073 = vmatmul.mubr.bf16.vlgmr.msra.gmra.mrb[60].mxu0 %v4039_v36  ;;  %4116 = vmatmul.mubr.bf16.vlgmr.msra.gmra.mrb[60].mxu1 %v4039_v36 }
 0x98c   :  { %5784 = vmatpush3.bf16.msra.mxu0 %v8880_v49  ;;  %4280 = vmatpush1.bf16.msra.mxu1 %v7535_v9 }
 0x98d   :  { %5785 = vmatprep.subr.bf16.mxu0 %v9878_v61  ;;  %4281 = vmatprep.subr.bf16.mxu1 %v7541_v11 }
 0x98e   :  { %5799 = vmatprep.mubr.msk.bf16.mxu0 %vm7032_vm8, %v9878_v61  ;;  %4311 = vmatprep.mubr.bf16.mxu1 %v9770_v2 }
 0x990   :  { %5786 = vmatpush3.bf16.msra.mxu0 %v8889_v19  ;;  %4282 = vmatpush1.bf16.msra.mxu1 %v9896_v59 }
 0x991   :  { %5787 = vmatprep.subr.bf16.mxu0 %v9878_v61  ;;  %4283 = vmatprep.subr.bf16.mxu1 %v10044_v33 }
 0x994   :  { %5788 = vmatpush3.bf16.msra.mxu0 %v8895_v34  ;;  %4284 = vmatpush1.bf16.msra.mxu1 %v10046_v3  ;;  %v10188_v3 = vld [vmem:[#allocation56_spill] sm:$0xff] }
 0x995   :  { %5789 = vmatprep.subr.bf16.mxu0 %v9878_v61  ;;  %4285 = vmatprep.subr.bf16.mxu1 %v10048_v17 }
 0x998   :  { %5790 = vmatpush3.bf16.msra.mxu0 %v8901_v56  ;;  %4286 = vmatpush1.bf16.msra.mxu1 %v10050_v47 }
 0x999   :  { %5791 = vmatprep.subr.bf16.mxu0 %v9878_v61  ;;  %4287 = vmatprep.subr.bf16.mxu1 %v10052_v51 }
 0x99c   :  { %5792 = vmatpush3.bf16.msra.mxu0 %v8907_v62  ;;  %4288 = vmatpush1.bf16.msra.mxu1 %v10054_v42 }
 0x99d   :  { %5793 = vmatprep.subr.bf16.mxu0 %v9878_v61  ;;  %4289 = vmatprep.subr.bf16.mxu1 %v10056_v52 }
 0x9a0   :  { %5794 = vmatpush3.bf16.msra.mxu0 %v8913_v55  ;;  %4290 = vmatpush1.bf16.msra.mxu1 %v10058_v39 }
 0x9a1   :  { %5795 = vmatprep.subr.bf16.mxu0 %v9878_v61  ;;  %4291 = vmatprep.subr.bf16.mxu1 %v10060_v41  ;;  %v8982_v41 = vld [vmem:[#allocation8 + $0x28] ss:$20 sps:$4 sm:$0xff]  }
 0x9a2   :  { %10145 = vst [vmem:[#allocation47_spill] sm:$0xff] %v8982_v41 }
 0x9a4   :  { %5796 = vmatpush3.bf16.msra.mxu0 %v8919_v63  ;;  %4292 = vmatpush1.bf16.msra.mxu1 %v10062_v53  ;;  %v8965_v53 = vld [vmem:[#allocation8 + $0x4] ss:$20 sps:$4 sm:$0xff]  }
 0x9a5   :  { %5797 = vmatprep.subr.bf16.mxu0 %v9878_v61  ;;  %4293 = vmatprep.subr.bf16.mxu1 %v10064_v25  ;;  %v10137_v25 = vld [vmem:[#allocation49_spill] sm:$0xff]  ;;  %10138 = vst [vmem:[#allocation21_spill] sm:$0xff] %v8965_v53 }
 0x9a8   :  { %5798 = vmatpush3.bf16.msra.mxu0 %v8925_v6  ;;  %4294 = vmatpush1.bf16.msra.mxu1 %v10066_v24  ;;  %v10136_v24 = vld [vmem:[#allocation84_spill] sm:$0xff] }
 0x9a9   :  { %4236 = vmatprep.subr.bf16.mxu0 %v10122_v12  ;;  %4365 = vmatprep.subr.bf16.mxu1 %v9826_v60 }
 0x9ab   :  { %5800 = vmatmul.mubr.bf16.vlgmr.msra.gmra.mrb[64].mxu0 %v4039_v36  ;;  %4312 = vmatmul.mubr.bf16.vlgmr.msra.gmra.mrb[24].mxu1 %v8864_v46  ;;  %v10135_v36 = vld [vmem:[#allocation44_spill] sm:$0xff] }
 0x9ac   :  { %4237 = vmatpush1.bf16.msra.mxu0 %v9827_v44  ;;  %4366 = vmatpush1.bf16.msra.mxu1 %v9828_v4 }
 0x9ad   :  { %4238 = vmatprep.subr.bf16.mxu0 %v9829_v5  ;;  %4367 = vmatprep.subr.bf16.mxu1 %v9895_v13 }
 0x9ae   :  { %4268 = vmatprep.mubr.bf16.mxu0 %v9770_v2  ;;  %4397 = vmatprep.mubr.bf16.mxu1 %v9770_v2 }
 0x9b0   :  { %4239 = vmatpush1.bf16.msra.mxu0 %v9831_v15  ;;  %4368 = vmatpush1.bf16.msra.mxu1 %v9897_v30 }
 0x9b1   :  { %4240 = vmatprep.subr.bf16.mxu0 %v9833_v21  ;;  %4369 = vmatprep.subr.bf16.mxu1 %v10045_v20 }
 0x9b4   :  { %4241 = vmatpush1.bf16.msra.mxu0 %v9835_v28  ;;  %4370 = vmatpush1.bf16.msra.mxu1 %v10047_v8 }
 0x9b5   :  { %4242 = vmatprep.subr.bf16.mxu0 %v9837_v50  ;;  %4371 = vmatprep.subr.bf16.mxu1 %v10049_v38 }
 0x9b8   :  { %4243 = vmatpush1.bf16.msra.mxu0 %v9839_v32  ;;  %4372 = vmatpush1.bf16.msra.mxu1 %v10051_v37 }
 0x9b9   :  { %4244 = vmatprep.subr.bf16.mxu0 %v9841_v1  ;;  %4373 = vmatprep.subr.bf16.mxu1 %v10053_v57  ;;  %v10187_v57 = vld [vmem:[#allocation54_spill] sm:$0xff] }
 0x9bc   :  { %4245 = vmatpush1.bf16.msra.mxu0 %v10123_v16  ;;  %4374 = vmatpush1.bf16.msra.mxu1 %v10124_v43 }
 0x9bd   :  { %4246 = vmatprep.subr.bf16.mxu0 %v10125_v35  ;;  %4375 = vmatprep.subr.bf16.mxu1 %v10126_v45 }
 0x9c0   :  { %4247 = vmatpush1.bf16.msra.mxu0 %v10127_v31  ;;  %4376 = vmatpush1.bf16.msra.mxu1 %v10128_v0  ;;  %v8990_v0 = vld [vmem:[#allocation8 + $0x50] ss:$20 sps:$4 sm:$0xff]  }
 0x9c1   :  { %4248 = vmatprep.subr.bf16.mxu0 %v10129_v27  ;;  %4377 = vmatprep.subr.bf16.mxu1 %v10130_v29  ;;  %v10139_v29 = vld [vmem:[#allocation51_spill] sm:$0xff]  ;;  %10149 = vst [vmem:[#allocation50_spill] sm:$0xff] %v8990_v0 }
 0x9c4   :  { %4249 = vmatpush1.bf16.msra.mxu0 %v10131_v48  ;;  %4378 = vmatpush1.bf16.msra.mxu1 %v10132_v40  ;;  %v10140_v40 = vld [vmem:[#allocation57_spill] sm:$0xff] }
 0x9c5   :  { %4250 = vmatprep.subr.bf16.mxu0 %v10133_v7  ;;  %4379 = vmatprep.subr.bf16.mxu1 %v10134_v22  ;;  %v8973_v22 = vld [vmem:[#allocation8] ss:$20 sps:$4 sm:$0xff]  }
 0x9c6   :  { %10141 = vst [vmem:[#allocation60_spill] sm:$0xff] %v8973_v22 }
 0x9c8   :  { %4251 = vmatpush1.bf16.msra.mxu0 %v10135_v36  ;;  %4380 = vmatpush1.bf16.msra.mxu1 %v10136_v24  ;;  %v8976_v24 = vld [vmem:[#allocation8 + $0x2c] ss:$20 sps:$4 sm:$0xff]  }
 0x9c9   :  { %4322 = vmatprep.subr.bf16.mxu0 %v10137_v25  ;;  %4473 = vmatprep.subr.bf16.mxu1 %v8965_v53  ;;  %10142 = vst [vmem:[#allocation46_spill] sm:$0xff] %v8976_v24  ;;  %v10143_v53 = vld [vmem:[#allocation59_spill] sm:$0xff]  ;;  %v10144_v25 = vld [vmem:[#allocation61_spill] sm:$0xff] }
 0x9cb   :  { %4269 = vmatmul.mubr.bf16.vlgmr.msra.gmra.mrb[24].mxu0 %v8864_v46  ;;  %4398 = vmatmul.mubr.bf16.vlgmr.msra.gmra.mrb[60].mxu1 %v8864_v46 }
 0x9cc   :  { %4323 = vmatpush1.bf16.msra.mxu0 %v10139_v29  ;;  %4354 = vmatprep.mubr.bf16.mxu0 %v9770_v2  ;;  %v8985_v29 = vld [vmem:[#allocation8 + $0x54] ss:$20 sps:$4 sm:$0xff]  }
 0x9cd   :  { %4324 = vmatprep.subr.bf16.mxu0 %v10140_v40  ;;  %4474 = vmatpush1.bf16.msra.mxu1 %v8973_v22  ;;  %10146 = vst [vmem:[#allocation48_spill] sm:$0xff] %v8985_v29  ;;  %v10147_v40 = vld [vmem:[#allocation63_spill] sm:$0xff]  ;;  %v10148_v22 = vld [vmem:[#allocation65_spill] sm:$0xff] }
 0x9ce   :  { %4475 = vmatprep.subr.bf16.mxu1 %v8976_v24  ;;  %4505 = vmatprep.mubr.bf16.mxu1 %v9770_v2  ;;  %v8993_v24 = vld [vmem:[#allocation8 + $0x7c] ss:$20 sps:$4 sm:$0xff]  }
 0x9cf   :  { %10150 = vst [vmem:[#allocation18_spill] sm:$0xff] %v8993_v24 }
 0x9d0   :  { %4325 = vmatpush1.bf16.msra.mxu0 %v10143_v53  ;;  %v10152_v53 = vld [vmem:[#allocation69_spill] sm:$0xff] }
 0x9d1   :  { %4326 = vmatprep.subr.bf16.mxu0 %v10144_v25  ;;  %4476 = vmatpush1.bf16.msra.mxu1 %v8982_v41  ;;  %v10151_v25 = vld [vmem:[#allocation67_spill] sm:$0xff] }
 0x9d2   :  { %4477 = vmatprep.subr.bf16.mxu1 %v8985_v29  ;;  %v8998_v41 = vld [vmem:[#allocation8 + $0x78] ss:$20 sps:$4 sm:$0xff]  }
 0x9d3   :  { %10153 = vst [vmem:[#allocation52_spill] sm:$0xff] %v8998_v41  ;;  %v9001_v29 = vld [vmem:[#allocation8 + $0xa4] ss:$20 sps:$4 sm:$0xff]  }
 0x9d4   :  { %4327 = vmatpush1.bf16.msra.mxu0 %v10147_v40  ;;  %10154 = vst [vmem:[#allocation19_spill] sm:$0xff] %v9001_v29  ;;  %v10156_v40 = vld [vmem:[#allocation73_spill] sm:$0xff] }
 0x9d5   :  { %4328 = vmatprep.subr.bf16.mxu0 %v10148_v22  ;;  %4478 = vmatpush1.bf16.msra.mxu1 %v8990_v0  ;;  %v10155_v22 = vld [vmem:[#allocation71_spill] sm:$0xff]  ;;  %v9006_v0 = vld [vmem:[#allocation8 + $0xa0] ss:$20 sps:$4 sm:$0xff]  }
 0x9d6   :  { %4479 = vmatprep.subr.bf16.mxu1 %v8993_v24  ;;  %10157 = vst [vmem:[#allocation20_spill] sm:$0xff] %v9006_v0  ;;  %v9009_v24 = vld [vmem:[#allocation8 + $0xcc] ss:$20 sps:$4 sm:$0xff]  }
 0x9d7   :  { %10158 = vst [vmem:[#allocation22_spill] sm:$0xff] %v9009_v24 }
 0x9d8   :  { %4329 = vmatpush1.bf16.msra.mxu0 %v10151_v25  ;;  %v10160_v25 = vld [vmem:[#allocation77_spill] sm:$0xff] }
 0x9d9   :  { %4330 = vmatprep.subr.bf16.mxu0 %v10152_v53  ;;  %4480 = vmatpush1.bf16.msra.mxu1 %v8998_v41  ;;  %v10159_v53 = vld [vmem:[#allocation75_spill] sm:$0xff] }
 0x9da   :  { %4481 = vmatprep.subr.bf16.mxu1 %v9001_v29  ;;  %v9014_v41 = vld [vmem:[#allocation8 + $0xc8] ss:$20 sps:$4 sm:$0xff]  }
 0x9db   :  { %10161 = vst [vmem:[#allocation24_spill] sm:$0xff] %v9014_v41  ;;  %v9017_v29 = vld [vmem:[#allocation8 + $0xf4] ss:$20 sps:$4 sm:$0xff]  }
 0x9dc   :  { %4331 = vmatpush1.bf16.msra.mxu0 %v10155_v22  ;;  %10162 = vst [vmem:[#allocation26_spill] sm:$0xff] %v9017_v29  ;;  %v10164_v22 = vld [vmem:[#allocation81_spill] sm:$0xff] }
 0x9dd   :  { %4332 = vmatprep.subr.bf16.mxu0 %v10156_v40  ;;  %4482 = vmatpush1.bf16.msra.mxu1 %v9006_v0  ;;  %v10163_v40 = vld [vmem:[#allocation79_spill] sm:$0xff]  ;;  %v9022_v0 = vld [vmem:[#allocation8 + $0xf0] ss:$20 sps:$4 sm:$0xff]  }
 0x9de   :  { %4483 = vmatprep.subr.bf16.mxu1 %v9009_v24  ;;  %10165 = vst [vmem:[#allocation28_spill] sm:$0xff] %v9022_v0  ;;  %v9025_v24 = vld [vmem:[#allocation8 + $0x11c] ss:$20 sps:$4 sm:$0xff]  }
 0x9df   :  { %10166 = vst [vmem:[#allocation30_spill] sm:$0xff] %v9025_v24 }
 0x9e0   :  { %4333 = vmatpush1.bf16.msra.mxu0 %v10159_v53  ;;  %v9029_v53 = vld [vmem:[#allocation8 + $0xc] ss:$20 sps:$4 sm:$0xff]  }
 0x9e1   :  { %4334 = vmatprep.subr.bf16.mxu0 %v10160_v25  ;;  %4484 = vmatpush1.bf16.msra.mxu1 %v9014_v41  ;;  %v10167_v25 = vld [vmem:[#allocation83_spill] sm:$0xff]  ;;  %10168 = vst [vmem:[#allocation85_spill] sm:$0xff] %v9029_v53 }
 0x9e2   :  { %4485 = vmatprep.subr.bf16.mxu1 %v9017_v29  ;;  %v9032_v41 = vld [vmem:[#allocation8 + $0x118] ss:$20 sps:$4 sm:$0xff]  }
 0x9e3   :  { %10169 = vst [vmem:[#allocation86_spill] sm:$0xff] %v9032_v41 }
 0x9e4   :  { %4335 = vmatpush1.bf16.msra.mxu0 %v10163_v40 }
 0x9e5   :  { %4336 = vmatprep.subr.bf16.mxu0 %v10164_v22  ;;  %4486 = vmatpush1.bf16.msra.mxu1 %v9022_v0  ;;  %v9037_v22 = vld [vmem:[#allocation8 + $0x8] ss:$20 sps:$4 sm:$0xff]  }
 0x9e6   :  { %4487 = vmatprep.subr.bf16.mxu1 %v9025_v24  ;;  %10170 = vst [vmem:[#allocation87_spill] sm:$0xff] %v9037_v22  ;;  %v9041_v24 = vld [vmem:[#allocation8 + $0x34] ss:$20 sps:$4 sm:$0xff]  }
 0x9e7   :  { %10171 = vst [vmem:[#allocation88_spill] sm:$0xff] %v9041_v24 }
 0x9e8   :  { %4337 = vmatpush1.bf16.msra.mxu0 %v10167_v25  ;;  %v9044_v25 = vld [vmem:[#allocation8 + $0x30] ss:$20 sps:$4 sm:$0xff]  }
 0x9e9   :  { %4516 = vmatprep.subr.bf16.mxu0 %v9029_v53  ;;  %4488 = vmatpush1.bf16.msra.mxu1 %v9032_v41  ;;  %10172 = vst [vmem:[#allocation89_spill] sm:$0xff] %v9044_v25  ;;  %v9047_v53 = vld [vmem:[#allocation8 + $0x5c] ss:$20 sps:$4 sm:$0xff]   ;;  %v9050_v41 = vld [vmem:[#allocation8 + $0x58] ss:$20 sps:$4 sm:$0xff]  }
 0x9ea   :  { %5803 = vmatprep.subr.bf16.mxu1 %v9878_v61  ;;  %10173 = vst [vmem:[#allocation90_spill] sm:$0xff] %v9047_v53  ;;  %10174 = vst [vmem:[#allocation91_spill] sm:$0xff] %v9050_v41 }
 0x9eb   :  { %4355 = vmatmul.mubr.bf16.vlgmr.msra.gmra.mrb[60].mxu0 %v8864_v46  ;;  %v9053_v46 = vld [vmem:[#allocation8 + $0x84] ss:$20 sps:$4 sm:$0xff]  }
 0x9ec   :  { %4517 = vmatpush1.bf16.msra.mxu0 %v9037_v22  ;;  %4548 = vmatprep.mubr.bf16.mxu0 %v9770_v2  ;;  %10175 = vst [vmem:[#allocation92_spill] sm:$0xff] %v9053_v46  ;;  %v9056_v22 = vld [vmem:[#allocation8 + $0x80] ss:$20 sps:$4 sm:$0xff]  }
 0x9ed   :  { %4518 = vmatprep.subr.bf16.mxu0 %v9041_v24  ;;  %10176 = vst [vmem:[#allocation93_spill] sm:$0xff] %v9056_v22  ;;  %v9059_v24 = vld [vmem:[#allocation8 + $0xac] ss:$20 sps:$4 sm:$0xff]  }
 0x9ee   :  { %10177 = vst [vmem:[#allocation94_spill] sm:$0xff] %v9059_v24 }
 0x9f0   :  { %4519 = vmatpush1.bf16.msra.mxu0 %v9044_v25  ;;  %v9062_v25 = vld [vmem:[#allocation8 + $0xa8] ss:$20 sps:$4 sm:$0xff]  }
 0x9f1   :  { %4520 = vmatprep.subr.bf16.mxu0 %v9047_v53  ;;  %10178 = vst [vmem:[#allocation95_spill] sm:$0xff] %v9062_v25  ;;  %v9065_v53 = vld [vmem:[#allocation8 + $0xd4] ss:$20 sps:$4 sm:$0xff]  }
 0x9f2   :  { %10179 = vst [vmem:[#allocation96_spill] sm:$0xff] %v9065_v53 }
 0x9f4   :  { %4521 = vmatpush1.bf16.msra.mxu0 %v9050_v41  ;;  %v9068_v41 = vld [vmem:[#allocation8 + $0xd0] ss:$20 sps:$4 sm:$0xff]  }
 0x9f5   :  { %4522 = vmatprep.subr.bf16.mxu0 %v9053_v46  ;;  %10180 = vst [vmem:[#allocation97_spill] sm:$0xff] %v9068_v41  ;;  %v9071_v46 = vld [vmem:[#allocation8 + $0xfc] ss:$20 sps:$4 sm:$0xff]  }
 0x9f6   :  { %10181 = vst [vmem:[#allocation98_spill] sm:$0xff] %v9071_v46 }
 0x9f8   :  { %4523 = vmatpush1.bf16.msra.mxu0 %v9056_v22  ;;  %v9074_v22 = vld [vmem:[#allocation8 + $0xf8] ss:$20 sps:$4 sm:$0xff]  }
 0x9f9   :  { %4524 = vmatprep.subr.bf16.mxu0 %v9059_v24  ;;  %10182 = vst [vmem:[#allocation99_spill] sm:$0xff] %v9074_v22  ;;  %v9077_v24 = vld [vmem:[#allocation8 + $0x124] ss:$20 sps:$4 sm:$0xff]  }
 0x9fa   :  { %10183 = vst [vmem:[#allocation100_spill] sm:$0xff] %v9077_v24 }
 0x9fc   :  { %4525 = vmatpush1.bf16.msra.mxu0 %v9062_v25  ;;  %v9080_v25 = vld [vmem:[#allocation8 + $0x120] ss:$20 sps:$4 sm:$0xff]  }
 0x9fd   :  { %4526 = vmatprep.subr.bf16.mxu0 %v9065_v53  ;;  %10184 = vst [vmem:[#allocation101_spill] sm:$0xff] %v9080_v25 }
 0xa00   :  { %4527 = vmatpush1.bf16.msra.mxu0 %v9068_v41 }
 0xa01   :  { %4528 = vmatprep.subr.bf16.mxu0 %v9071_v46  ;;  %v9087_v46 = vld [vmem:[%s9422_s8] ss:$0 sm:$0xff] }
 0xa02   :  { %10185 = vst [vmem:[#allocation102_spill] sm:$0xff] %v9087_v46 }
 0xa04   :  { %4529 = vmatpush1.bf16.msra.mxu0 %v9074_v22 }
 0xa05   :  { %4530 = vmatprep.subr.bf16.mxu0 %v9077_v24 }
 0xa08   :  { %4531 = vmatpush1.bf16.msra.mxu0 %v9080_v25 }
 0xa09   :  { %4669 = vmatprep.subr.bf16.mxu0 %v10122_v12 }
 0xa7e   :  { %v4160_v53 = vpop.f32.mrb[64].mxu0  ;;  %v4313_v41 = vpop.f32.mrb[24].mxu1 }
 0xa7f   :  { %v4167_v0 = vadd.f32 %v9087_v46, %v4160_v53  ;;  %v5801_v22 = vpop.f32.mrb[65].mxu0  ;;  %v4315_v40 = vpop.f32.mrb[25].mxu1  ;;  %v10186_v53 = vld [vmem:[#allocation53_spill] sm:$0xff] }
 0xa80   :  { %v4163_v29 = vpop.f32.mrb[66].mxu0  ;;  %v4317_v39 = vpop.f32.mrb[26].mxu1  ;;  %v5916_v8 = vadd.f32 %v4315_v40, %v10119_v26 }
 0xa81   :  { %4169 = vst [vmem:[%s9423_s9 + $0x20] sm:$0xff] %v4167_v0  ;;  %v4168_v25 = vadd.f32 %v9087_v46, %v4163_v29  ;;  %v5802_v12 = vpop.f32.mrb[67].mxu0  ;;  %v4319_v24 = vpop.f32.mrb[27].mxu1 }
 0xa82   :  { %v5611_v20 = vmul.f32 -1.442695, %v5916_v8 }
 0xa83   :  { %4170 = vst [vmem:[%s9423_s9 + $0x60] sm:$0xff] %v4168_v25 }
 0xa9e   :  { %v4270_v45 = vpop.f32.mrb[24].mxu0  ;;  %v9097_v52 = vpop.f32.mrb[60].mxu1 }
 0xa9f   :  { %v5911_v22 = vadd.f32 %v4270_v45, %v10186_v53  ;;  %v4272_v43 = vpop.f32.mrb[25].mxu0  ;;  %v9100_v42 = vpop.f32.mrb[61].mxu1 }
 0xaa0   :  { %v5912_v51 = vadd.f32 %v4272_v43, %v10187_v57  ;;  %v4274_v37 = vpop.f32.mrb[26].mxu0  ;;  %v9103_v0 = vpop.f32.mrb[62].mxu1  ;;  %v5918_v43 = vadd.f32 %v4319_v24, %v10119_v26 }
 0xaa1   :  { %v5607_v29 = vmul.f32 -1.442695, %v5911_v22  ;;  %v5913_v12 = vadd.f32 %v4274_v37, %v10186_v53  ;;  %v4276_v46 = vpop.f32.mrb[27].mxu0  ;;  %v9106_v47 = vpop.f32.mrb[63].mxu1  ;;  %v5915_v22 = vadd.f32 %v4313_v41, %v10188_v3 }
 0xaa2   :  { %v5609_v25 = vmul.f32 -1.442695, %v5912_v51  ;;  %v5914_v38 = vadd.f32 %v4276_v46, %v10187_v57  ;;  %v5612_v37 = vmul.f32 -1.442695, %v5918_v43  ;;  %v5917_v51 = vadd.f32 %v4317_v39, %v10188_v3 }
 0xaa3   :  { %6612 = vpow2.f32 %v5607_v29  ;;  %v5608_v17 = vmul.f32 -1.442695, %v5913_v12 }
 0xaa4   :  { %6614 = vpow2.f32 %v5609_v25  ;;  %v5610_v45 = vmul.f32 -1.442695, %v5914_v38 }
 0xaa5   :  { %6616 = vpow2.f32 %v5608_v17 }
 0xaa6   :  { %6618 = vpow2.f32 %v5610_v45 }
 0xaa7   :  { %6620 = vtanh.f32 %v5915_v22 }
 0xaa8   :  { %6622 = vpow2.f32 %v5611_v20 }
 0xaa9   :  { %6624 = vpow2.f32 %v5612_v37 }
 0xaad   :  { %v6613_v53 = vpop.eup %6612 }
 0xaae   :  { %v6615_v33 = vpop.eup %6614  ;;  %v4626_v46 = vadd.f32 1.0, %v6613_v53  ;;  %v10189_v53 = vld [vmem:[#allocation104_spill] sm:$0xff] }
 0xaaf   :  { %v4638_v29 = vadd.f32 1.0, %v6615_v33  ;;  %v6617_v38 = vpop.eup %6616 }
 0xab0   :  { %6626 = vrcp.f32 %v4626_v46  ;;  %v4627_v17 = vadd.f32 1.0, %v6617_v38  ;;  %v6619_v40 = vpop.eup %6618 }
 0xab1   :  { %6628 = vrcp.f32 %v4638_v29  ;;  %v4639_v24 = vadd.f32 1.0, %v6619_v40  ;;  %v6621_v8 = vpop.eup %6620 }
 0xab2   :  { %6630 = vtanh.f32 %v5917_v51  ;;  %v6623_v41 = vpop.eup %6622 }
 0xab3   :  { %6632 = vrcp.f32 %v4627_v17  ;;  %v6625_v12 = vpop.eup %6624  ;;  %v4652_v39 = vadd.f32 1.0, %v6623_v41 }
 0xab4   :  { %6634 = vrcp.f32 %v4639_v24  ;;  %v4653_v37 = vadd.f32 1.0, %v6625_v12  ;;  %v10190_v24 = vld [vmem:[#allocation58_spill] sm:$0xff] }
 0xab5   :  { %6636 = vrcp.f32 %v4652_v39 }
 0xab6   :  { %6638 = vrcp.f32 %v4653_v37 }
 0xaba   :  { %v6627_v25 = vpop.eup %6626 }
 0xabb   :  { %v6629_v45 = vpop.eup %6628  ;;  %v4660_v20 = vmul.f32 %v6627_v25, %v6621_v8 }
 0xabc   :  { %v6631_v43 = vpop.eup %6630  ;;  %v4658_v22 = vmul.f32 %v6629_v45, %v10189_v53 }
 0xabd   :  { %v6633_v33 = vpop.eup %6632 }
 0xabe   :  { %v9114_v46 = vadd.f32 %v4660_v20, %v4658_v22  ;;  %v4661_v29 = vmul.f32 %v6633_v33, %v6631_v43  ;;  %v4356_v38 = vpop.f32.mrb[60].mxu0  ;;  %v6635_v51 = vpop.eup %6634  ;;  %v4411_v22 = vadd.f32 %v9100_v42, %v7991_v10  ;;  %v4410_v33 = vadd.f32 %v9097_v52, %v7996_v18 }
 0xabf   :  { %v4408_v17 = vadd.f32 %v4356_v38, %v7972_v14  ;;  %v4358_v40 = vpop.f32.mrb[61].mxu0  ;;  %v4659_v26 = vmul.f32 %v6635_v51, %v10190_v24  ;;  %v4414_v38 = vadd.f32 %v9103_v0, %v7996_v18 }
 0xac0   :  { %v4409_v3 = vadd.f32 %v4358_v40, %v7977_v23  ;;  %v4360_v8 = vpop.f32.mrb[62].mxu0  ;;  %6640 = vtanh.f32 %v9114_v46  ;;  %v5605_v37 = vmul.f32 -1.442695, %v4411_v22 }
 0xac1   :  { %v5601_v41 = vmul.f32 -1.442695, %v4408_v17  ;;  %v4412_v25 = vadd.f32 %v4360_v8, %v7972_v14  ;;  %v4362_v45 = vpop.f32.mrb[63].mxu0  ;;  %v9121_v12 = vadd.f32 %v4661_v29, %v4659_v26  ;;  %v4415_v26 = vadd.f32 %v9106_v47, %v7991_v10 }
 0xac2   :  { %v5603_v20 = vmul.f32 -1.442695, %v4409_v3  ;;  %v4413_v43 = vadd.f32 %v4362_v45, %v7977_v23  ;;  %v6637_v3 = vpop.eup %6636 }
 0xac3   :  { %6642 = vpow2.f32 %v5601_v41  ;;  %v5602_v53 = vmul.f32 -1.442695, %v4412_v25  ;;  %v6639_v29 = vpop.eup %6638  ;;  %v5606_v40 = vmul.f32 -1.442695, %v4415_v26 }
 0xac4   :  { %6644 = vtanh.f32 %v9121_v12  ;;  %v5604_v39 = vmul.f32 -1.442695, %v4413_v43 }
 0xac5   :  { %6646 = vpow2.f32 %v5603_v20 }
 0xac6   :  { %6648 = vpow2.f32 %v5602_v53 }
 0xac7   :  { %6650 = vpow2.f32 %v5604_v39 }
 0xac8   :  { %6652 = vtanh.f32 %v4410_v33 }
 0xac9   :  { %6654 = vpow2.f32 %v5605_v37 }
 0xaca   :  { %v6641_v51 = vpop.eup %6640  ;;  %6656 = vtanh.f32 %v4414_v38 }
 0xacb   :  { %v4666_v41 = vmul.f32 %v6641_v51, %v6637_v3 }
 0xacd   :  { %v6643_v17 = vpop.eup %6642 }
 0xace   :  { %v6645_v24 = vpop.eup %6644  ;;  %v4430_v42 = vadd.f32 1.0, %v6643_v17 }
 0xacf   :  { %v6647_v8 = vpop.eup %6646  ;;  %v4667_v52 = vmul.f32 %v6645_v24, %v6639_v29 }
 0xad0   :  { %v6649_v25 = vpop.eup %6648  ;;  %6658 = vrcp.f32 %v4430_v42  ;;  %v4442_v47 = vadd.f32 1.0, %v6647_v8 }
 0xad1   :  { %v6651_v45 = vpop.eup %6650  ;;  %6660 = vpow2.f32 %v5606_v40  ;;  %v4431_v20 = vadd.f32 1.0, %v6649_v25  ;;  %v9133_v43 = vpack.c.bf16 %v4667_v52, %v4666_v41 }
 0xad2   :  { %6662 = vrcp.f32 %v4442_v47  ;;  %v4443_v0 = vadd.f32 1.0, %v6651_v45  ;;  %v6653_v53 = vpop.eup %6652 }
 0xad3   :  { %6664 = vrcp.f32 %v4431_v20  ;;  %v6655_v39 = vpop.eup %6654 }
 0xad4   :  { %6666 = vrcp.f32 %v4443_v0  ;;  %v6657_v22 = vpop.eup %6656  ;;  %v4456_v29 = vadd.f32 1.0, %v6655_v39  ;;  %v10219_v39 = vld [vmem:[#allocation57_spill] sm:$0xff] }
 0xad6   :  { %6668 = vrcp.f32 %v4456_v29  ;;  %v10225_v29 = vld [vmem:[#allocation48_spill] sm:$0xff] }
 0xada   :  { %v6659_v33 = vpop.eup %6658 }
 0xadb   :  { %v6661_v26 = vpop.eup %6660  ;;  %v4464_v37 = vmul.f32 %v6659_v33, %v6653_v53  ;;  %v10218_v53 = vld [vmem:[#allocation51_spill] sm:$0xff]  ;;  %v10221_v33 = vld [vmem:[#allocation46_spill] sm:$0xff] }
 0xadc   :  { %v6663_v3 = vpop.eup %6662  ;;  %v4457_v40 = vadd.f32 1.0, %v6661_v26  ;;  %v10222_v26 = vld [vmem:[#allocation59_spill] sm:$0xff] }
 0xadd   :  { %v6665_v38 = vpop.eup %6664  ;;  %v4462_v51 = vmul.f32 %v6663_v3, %v8873_v58  ;;  %v10224_v3 = vld [vmem:[#allocation47_spill] sm:$0xff] }
 0xade   :  { %v6667_v17 = vpop.eup %6666  ;;  %v4465_v24 = vmul.f32 %v6665_v38, %v6657_v22  ;;  %v10220_v22 = vld [vmem:[#allocation60_spill] sm:$0xff]  ;;  %v10226_v38 = vld [vmem:[#allocation63_spill] sm:$0xff] }
 0xadf   :  { %v9136_v42 = vadd.f32 %v4464_v37, %v4462_v51  ;;  %v4463_v8 = vmul.f32 %v6667_v17, %v8877_v54  ;;  %v10202_v54 = vld [vmem:[#allocation33_spill] sm:$0xff]  ;;  %v10228_v17 = vld [vmem:[#allocation50_spill] sm:$0xff] }
 0xae0   :  { %v6669_v52 = vpop.eup %6668  ;;  %v10223_v37 = vld [vmem:[#allocation61_spill] sm:$0xff] }
 0xae1   :  { %6670 = vtanh.f32 %v9136_v42  ;;  %v9140_v41 = vadd.f32 %v4465_v24, %v4463_v8  ;;  %v10227_v51 = vld [vmem:[#allocation65_spill] sm:$0xff]  ;;  %v10230_v24 = vld [vmem:[#allocation67_spill] sm:$0xff] }
 0xae2   :  { %6672 = vrcp.f32 %v4457_v40  ;;  %v10229_v40 = vld [vmem:[#allocation18_spill] sm:$0xff]  ;;  %v10231_v8 = vld [vmem:[#allocation69_spill] sm:$0xff] }
 0xae3   :  { %6674 = vtanh.f32 %v9140_v41 }
 0xaeb   :  { %v6671_v25 = vpop.eup %6670 }
 0xaec   :  { %v6673_v47 = vpop.eup %6672  ;;  %v4470_v58 = vmul.f32 %v6671_v25, %v6669_v52  ;;  %v10232_v52 = vld [vmem:[#allocation52_spill] sm:$0xff]  ;;  %v10233_v25 = vld [vmem:[#allocation19_spill] sm:$0xff] }
 0xaed   :  { %v6675_v45 = vpop.eup %6674 }
 0xaee   :  { %v4471_v20 = vmul.f32 %v6675_v45, %v6673_v47  ;;  %v10234_v47 = vld [vmem:[#allocation71_spill] sm:$0xff]  ;;  %v10235_v45 = vld [vmem:[#allocation73_spill] sm:$0xff] }
 0xaf0   :  { %v4472_v0 = vpack.c.bf16 %v4471_v20, %v4470_v58  ;;  %v10236_v58 = vld [vmem:[#allocation20_spill] sm:$0xff]  ;;  %v10237_v20 = vld [vmem:[#allocation22_spill] sm:$0xff] }
 0xaf2   :  { %4506 = vmatmul.mubr.bf16.vlgmr.msra.gmra.mrb[64].mxu1 %v4472_v0  ;;  %4549 = vmatmul.mubr.bf16.vlgmr.msra.gmra.mrb[68].mxu0 %v4472_v0 }
 0xaf3   :  { %5804 = vmatpush3.bf16.msra.mxu1 %v8880_v49  ;;  %4670 = vmatpush1.bf16.msra.mxu0 %v9827_v44  ;;  %v10193_v44 = vld [vmem:[#allocation62_spill] sm:$0xff]  ;;  %v10203_v49 = vld [vmem:[#allocation72_spill] sm:$0xff] }
 0xaf4   :  { %5805 = vmatprep.subr.bf16.mxu1 %v9878_v61  ;;  %4671 = vmatprep.subr.bf16.mxu0 %v9829_v5  ;;  %v10194_v5 = vld [vmem:[#allocation25_spill] sm:$0xff] }
 0xaf5   :  { %5819 = vmatprep.mubr.msk.bf16.mxu1 %vm7032_vm8, %v9878_v61  ;;  %4701 = vmatprep.mubr.bf16.mxu0 %v9770_v2 }
 0xaf7   :  { %5806 = vmatpush3.bf16.msra.mxu1 %v8889_v19  ;;  %4672 = vmatpush1.bf16.msra.mxu0 %v9831_v15  ;;  %v10196_v15 = vld [vmem:[#allocation27_spill] sm:$0xff] }
 0xaf8   :  { %5807 = vmatprep.subr.bf16.mxu1 %v9878_v61  ;;  %4673 = vmatprep.subr.bf16.mxu0 %v9833_v21  ;;  %v10198_v21 = vld [vmem:[#allocation29_spill] sm:$0xff]  ;;  %v10204_v19 = vld [vmem:[#allocation35_spill] sm:$0xff] }
 0xafb   :  { %5808 = vmatpush3.bf16.msra.mxu1 %v8895_v34  ;;  %4674 = vmatpush1.bf16.msra.mxu0 %v9835_v28  ;;  %v10199_v28 = vld [vmem:[#allocation68_spill] sm:$0xff]  ;;  %v10205_v34 = vld [vmem:[#allocation74_spill] sm:$0xff] }
 0xafc   :  { %5809 = vmatprep.subr.bf16.mxu1 %v9878_v61  ;;  %4675 = vmatprep.subr.bf16.mxu0 %v9837_v50  ;;  %v10200_v50 = vld [vmem:[#allocation31_spill] sm:$0xff] }
 0xaff   :  { %5810 = vmatpush3.bf16.msra.mxu1 %v8901_v56  ;;  %4676 = vmatpush1.bf16.msra.mxu0 %v9839_v32  ;;  %v10192_v32 = vld [vmem:[#allocation23_spill] sm:$0xff]  ;;  %v10206_v56 = vld [vmem:[#allocation37_spill] sm:$0xff] }
 0xb00   :  { %5811 = vmatprep.subr.bf16.mxu1 %v9878_v61  ;;  %4677 = vmatprep.subr.bf16.mxu0 %v9841_v1  ;;  %v10191_v1 = vld [vmem:[#allocation17_spill] sm:$0xff] }
 0xb03   :  { %5812 = vmatpush3.bf16.msra.mxu1 %v8907_v62  ;;  %4678 = vmatpush1.bf16.msra.mxu0 %v10123_v16  ;;  %v10207_v62 = vld [vmem:[#allocation76_spill] sm:$0xff] }
 0xb04   :  { %5813 = vmatprep.subr.bf16.mxu1 %v9878_v61  ;;  %4679 = vmatprep.subr.bf16.mxu0 %v10125_v35  ;;  %v10211_v16 = vld [vmem:[#allocation80_spill] sm:$0xff]  ;;  %v10212_v35 = vld [vmem:[#allocation43_spill] sm:$0xff] }
 0xb07   :  { %5814 = vmatpush3.bf16.msra.mxu1 %v8913_v55  ;;  %4680 = vmatpush1.bf16.msra.mxu0 %v10127_v31  ;;  %v10208_v55 = vld [vmem:[#allocation39_spill] sm:$0xff]  ;;  %v10213_v31 = vld [vmem:[#allocation82_spill] sm:$0xff] }
 0xb08   :  { %5815 = vmatprep.subr.bf16.mxu1 %v9878_v61  ;;  %4681 = vmatprep.subr.bf16.mxu0 %v10129_v27  ;;  %v10214_v27 = vld [vmem:[#allocation45_spill] sm:$0xff] }
 0xb0b   :  { %5816 = vmatpush3.bf16.msra.mxu1 %v8919_v63  ;;  %4682 = vmatpush1.bf16.msra.mxu0 %v10131_v48  ;;  %v10209_v63 = vld [vmem:[#allocation78_spill] sm:$0xff]  ;;  %v10215_v48 = vld [vmem:[#allocation84_spill] sm:$0xff] }
 0xb0c   :  { %5817 = vmatprep.subr.bf16.mxu1 %v9878_v61  ;;  %4683 = vmatprep.subr.bf16.mxu0 %v10133_v7  ;;  %v10216_v7 = vld [vmem:[#allocation49_spill] sm:$0xff] }
 0xb0f   :  { %5818 = vmatpush3.bf16.msra.mxu1 %v8925_v6  ;;  %4684 = vmatpush1.bf16.msra.mxu0 %v10135_v36  ;;  %v10210_v6 = vld [vmem:[#allocation41_spill] sm:$0xff] }
 0xb10   :  { %4712 = vmatprep.subr.bf16.mxu1 %v10191_v1  ;;  %4798 = vmatprep.subr.bf16.mxu0 %v9826_v60  ;;  %v10217_v36 = vld [vmem:[#allocation21_spill] sm:$0xff] }
 0xb11   :  { %v10239_v1 = vld [vmem:[#allocation77_spill] sm:$0xff] }
 0xb12   :  { %5820 = vmatmul.mubr.bf16.vlgmr.msra.gmra.mrb[68].mxu1 %v4472_v0  ;;  %4702 = vmatmul.mubr.bf16.vlgmr.msra.gmra.mrb[28].mxu0 %v9133_v43  ;;  %v10238_v0 = vld [vmem:[#allocation75_spill] sm:$0xff] }
 0xb13   :  { %4713 = vmatpush1.bf16.msra.mxu1 %v7535_v9  ;;  %4799 = vmatpush1.bf16.msra.mxu0 %v9828_v4  ;;  %v10195_v9 = vld [vmem:[#allocation64_spill] sm:$0xff] }
 0xb14   :  { %4714 = vmatprep.subr.bf16.mxu1 %v7541_v11  ;;  %4800 = vmatprep.subr.bf16.mxu0 %v9895_v13  ;;  %v10197_v11 = vld [vmem:[#allocation66_spill] sm:$0xff] }
 0xb15   :  { %4744 = vmatprep.mubr.bf16.mxu1 %v9770_v2  ;;  %4830 = vmatprep.mubr.bf16.mxu0 %v9770_v2 }
 0xb17   :  { %4715 = vmatpush1.bf16.msra.mxu1 %v9896_v59  ;;  %4801 = vmatpush1.bf16.msra.mxu0 %v9897_v30  ;;  %v10201_v59 = vld [vmem:[#allocation70_spill] sm:$0xff] }
 0xb18   :  { %4716 = vmatprep.subr.bf16.mxu1 %v10192_v32  ;;  %4802 = vmatprep.subr.bf16.mxu0 %v10193_v44  ;;  %v10240_v32 = vld [vmem:[#allocation24_spill] sm:$0xff] }
 0xb1b   :  { %4717 = vmatpush1.bf16.msra.mxu1 %v10194_v5  ;;  %4803 = vmatpush1.bf16.msra.mxu0 %v10195_v9  ;;  %v10241_v5 = vld [vmem:[#allocation26_spill] sm:$0xff] }
 0xb1c   :  { %4718 = vmatprep.subr.bf16.mxu1 %v10196_v15  ;;  %4804 = vmatprep.subr.bf16.mxu0 %v10197_v11  ;;  %v10242_v15 = vld [vmem:[#allocation79_spill] sm:$0xff] }
 0xb1f   :  { %4719 = vmatpush1.bf16.msra.mxu1 %v10198_v21  ;;  %4805 = vmatpush1.bf16.msra.mxu0 %v10199_v28  ;;  %v10243_v21 = vld [vmem:[#allocation81_spill] sm:$0xff] }
 0xb20   :  { %4720 = vmatprep.subr.bf16.mxu1 %v10200_v50  ;;  %4806 = vmatprep.subr.bf16.mxu0 %v10201_v59  ;;  %v10244_v50 = vld [vmem:[#allocation28_spill] sm:$0xff] }
 0xb23   :  { %4721 = vmatpush1.bf16.msra.mxu1 %v10202_v54  ;;  %4807 = vmatpush1.bf16.msra.mxu0 %v10203_v49  ;;  %v10245_v54 = vld [vmem:[#allocation30_spill] sm:$0xff] }
 0xb24   :  { %4722 = vmatprep.subr.bf16.mxu1 %v10204_v19  ;;  %4808 = vmatprep.subr.bf16.mxu0 %v10205_v34  ;;  %v10246_v19 = vld [vmem:[#allocation83_spill] sm:$0xff] }
 0xb27   :  { %4723 = vmatpush1.bf16.msra.mxu1 %v10206_v56  ;;  %4809 = vmatpush1.bf16.msra.mxu0 %v10207_v62  ;;  %v10247_v56 = vld [vmem:[#allocation85_spill] sm:$0xff] }
 0xb28   :  { %4724 = vmatprep.subr.bf16.mxu1 %v10208_v55  ;;  %4810 = vmatprep.subr.bf16.mxu0 %v10209_v63  ;;  %v10248_v55 = vld [vmem:[#allocation86_spill] sm:$0xff] }
 0xb2b   :  { %4725 = vmatpush1.bf16.msra.mxu1 %v10210_v6  ;;  %4811 = vmatpush1.bf16.msra.mxu0 %v10211_v16  ;;  %v10249_v6 = vld [vmem:[#allocation87_spill] sm:$0xff] }
 0xb2c   :  { %4726 = vmatprep.subr.bf16.mxu1 %v10212_v35  ;;  %4812 = vmatprep.subr.bf16.mxu0 %v10213_v31  ;;  %v10250_v35 = vld [vmem:[#allocation88_spill] sm:$0xff] }
 0xb2f   :  { %4727 = vmatpush1.bf16.msra.mxu1 %v10214_v27  ;;  %4813 = vmatpush1.bf16.msra.mxu0 %v10215_v48  ;;  %v10251_v27 = vld [vmem:[#allocation89_spill] sm:$0xff] }
 0xb30   :  { %4755 = vmatprep.subr.bf16.mxu1 %v10216_v7  ;;  %4906 = vmatprep.subr.bf16.mxu0 %v10217_v36  ;;  %v10252_v36 = vld [vmem:[#allocation90_spill] sm:$0xff] }
 0xb32   :  { %4745 = vmatmul.mubr.bf16.vlgmr.msra.gmra.mrb[28].mxu1 %v9133_v43  ;;  %4831 = vmatmul.mubr.bf16.vlgmr.msra.gmra.mrb[68].mxu0 %v9133_v43 }
 0xb33   :  { %4756 = vmatpush1.bf16.msra.mxu1 %v10218_v53  ;;  %4787 = vmatprep.mubr.bf16.mxu1 %v9770_v2 }
 0xb34   :  { %4757 = vmatprep.subr.bf16.mxu1 %v10219_v39  ;;  %4907 = vmatpush1.bf16.msra.mxu0 %v10220_v22  ;;  %v10253_v22 = vld [vmem:[#allocation91_spill] sm:$0xff] }
 0xb35   :  { %4908 = vmatprep.subr.bf16.mxu0 %v10221_v33  ;;  %4938 = vmatprep.mubr.bf16.mxu0 %v9770_v2  ;;  %v10254_v33 = vld [vmem:[#allocation92_spill] sm:$0xff] }
 0xb37   :  { %4758 = vmatpush1.bf16.msra.mxu1 %v10222_v26 }
 0xb38   :  { %4759 = vmatprep.subr.bf16.mxu1 %v10223_v37  ;;  %4909 = vmatpush1.bf16.msra.mxu0 %v10224_v3  ;;  %v10255_v3 = vld [vmem:[#allocation93_spill] sm:$0xff] }
 0xb39   :  { %4910 = vmatprep.subr.bf16.mxu0 %v10225_v29  ;;  %v10256_v29 = vld [vmem:[#allocation94_spill] sm:$0xff] }
 0xb3b   :  { %4760 = vmatpush1.bf16.msra.mxu1 %v10226_v38 }
 0xb3c   :  { %4761 = vmatprep.subr.bf16.mxu1 %v10227_v51  ;;  %4911 = vmatpush1.bf16.msra.mxu0 %v10228_v17  ;;  %v10257_v17 = vld [vmem:[#allocation95_spill] sm:$0xff] }
 0xb3d   :  { %4912 = vmatprep.subr.bf16.mxu0 %v10229_v40  ;;  %v10259_v40 = vld [vmem:[#allocation97_spill] sm:$0xff] }
 0xb3f   :  { %4762 = vmatpush1.bf16.msra.mxu1 %v10230_v24 }
 0xb40   :  { %4763 = vmatprep.subr.bf16.mxu1 %v10231_v8  ;;  %4913 = vmatpush1.bf16.msra.mxu0 %v10232_v52  ;;  %v10260_v52 = vld [vmem:[#allocation98_spill] sm:$0xff] }
 0xb41   :  { %4914 = vmatprep.subr.bf16.mxu0 %v10233_v25  ;;  %v10261_v25 = vld [vmem:[#allocation99_spill] sm:$0xff] }
 0xb43   :  { %4764 = vmatpush1.bf16.msra.mxu1 %v10234_v47 }
 0xb44   :  { %4765 = vmatprep.subr.bf16.mxu1 %v10235_v45  ;;  %4915 = vmatpush1.bf16.msra.mxu0 %v10236_v58  ;;  %v10262_v58 = vld [vmem:[#allocation100_spill] sm:$0xff] }
 0xb45   :  { %4916 = vmatprep.subr.bf16.mxu0 %v10237_v20  ;;  %v10263_v20 = vld [vmem:[#allocation101_spill] sm:$0xff] }
 0xb47   :  { %4766 = vmatpush1.bf16.msra.mxu1 %v10238_v0 }
 0xb48   :  { %4767 = vmatprep.subr.bf16.mxu1 %v10239_v1  ;;  %4917 = vmatpush1.bf16.msra.mxu0 %v10240_v32 }
 0xb49   :  { %4918 = vmatprep.subr.bf16.mxu0 %v10241_v5 }
 0xb4b   :  { %4768 = vmatpush1.bf16.msra.mxu1 %v10242_v15 }
 0xb4c   :  { %4769 = vmatprep.subr.bf16.mxu1 %v10243_v21  ;;  %4919 = vmatpush1.bf16.msra.mxu0 %v10244_v50  ;;  %v10264_v50 = vld [vmem:[#allocation102_spill] sm:$0xff] }
 0xb4d   :  { %4920 = vmatprep.subr.bf16.mxu0 %v10245_v54 }
 0xb4f   :  { %4770 = vmatpush1.bf16.msra.mxu1 %v10246_v19 }
 0xb50   :  { %4949 = vmatprep.subr.bf16.mxu1 %v10247_v56  ;;  %4921 = vmatpush1.bf16.msra.mxu0 %v10248_v55 }
 0xb51   :  { %5823 = vmatprep.subr.bf16.mxu0 %v9878_v61 }
 0xb52   :  { %4788 = vmatmul.mubr.bf16.vlgmr.msra.gmra.mrb[64].mxu1 %v9133_v43  ;;  %v10258_v43 = vld [vmem:[#allocation96_spill] sm:$0xff] }
 0xb53   :  { %4950 = vmatpush1.bf16.msra.mxu1 %v10249_v6  ;;  %4981 = vmatprep.mubr.bf16.mxu1 %v9770_v2 }
 0xb54   :  { %4951 = vmatprep.subr.bf16.mxu1 %v10250_v35 }
 0xb57   :  { %4952 = vmatpush1.bf16.msra.mxu1 %v10251_v27 }
 0xb58   :  { %4953 = vmatprep.subr.bf16.mxu1 %v10252_v36 }
 0xb5b   :  { %4954 = vmatpush1.bf16.msra.mxu1 %v10253_v22 }
 0xb5c   :  { %4955 = vmatprep.subr.bf16.mxu1 %v10254_v33 }
 0xb5f   :  { %4956 = vmatpush1.bf16.msra.mxu1 %v10255_v3 }
 0xb60   :  { %4957 = vmatprep.subr.bf16.mxu1 %v10256_v29 }
 0xb63   :  { %4958 = vmatpush1.bf16.msra.mxu1 %v10257_v17 }
 0xb64   :  { %4959 = vmatprep.subr.bf16.mxu1 %v10258_v43 }
 0xb67   :  { %4960 = vmatpush1.bf16.msra.mxu1 %v10259_v40 }
 0xb68   :  { %4961 = vmatprep.subr.bf16.mxu1 %v10260_v52 }
 0xb6b   :  { %4962 = vmatpush1.bf16.msra.mxu1 %v10261_v25 }
 0xb6c   :  { %4963 = vmatprep.subr.bf16.mxu1 %v10262_v58 }
 0xb6f   :  { %4964 = vmatpush1.bf16.msra.mxu1 %v10263_v20 }
 0xb70   :  { %5145 = vmatprep.subr.bf16.mxu1 %v9826_v60  ;;  %v10265_v60 = vld [vmem:[#allocation53_spill] sm:$0xff] }
 0xbe5   :  { %v4593_v32 = vpop.f32.mrb[68].mxu1  ;;  %v4703_v5 = vpop.f32.mrb[28].mxu0 }
 0xbe6   :  { %v4600_v54 = vadd.f32 %v10264_v50, %v4593_v32  ;;  %v5821_v56 = vpop.f32.mrb[69].mxu1  ;;  %v4705_v55 = vpop.f32.mrb[29].mxu0  ;;  %v5919_v33 = vadd.f32 %v4703_v5, %v10265_v60 }
 0xbe7   :  { %v4596_v6 = vpop.f32.mrb[70].mxu1  ;;  %v4707_v35 = vpop.f32.mrb[30].mxu0  ;;  %v5920_v3 = vadd.f32 %v4705_v55, %v10187_v57 }
 0xbe8   :  { %4602 = vst [vmem:[%s9423_s9 + $0x28] sm:$0xff] %v4600_v54  ;;  %v4601_v27 = vadd.f32 %v10264_v50, %v4596_v6  ;;  %v5822_v36 = vpop.f32.mrb[71].mxu1  ;;  %v4709_v22 = vpop.f32.mrb[31].mxu0  ;;  %v5619_v17 = vmul.f32 -1.442695, %v5919_v33  ;;  %v5921_v43 = vadd.f32 %v4707_v35, %v10265_v60  ;;  %v10266_v35 = vld [vmem:[#allocation56_spill] sm:$0xff] }
 0xbe9   :  { %v5922_v29 = vadd.f32 %v4709_v22, %v10187_v57  ;;  %v5621_v40 = vmul.f32 -1.442695, %v5920_v3  ;;  %v10267_v33 = vld [vmem:[#allocation55_spill] sm:$0xff] }
 0xbea   :  { %4603 = vst [vmem:[%s9423_s9 + $0x68] sm:$0xff] %v4601_v27  ;;  %6676 = vpow2.f32 %v5619_v17  ;;  %v5620_v25 = vmul.f32 -1.442695, %v5921_v43 }
 0xbeb   :  { %v5622_v52 = vmul.f32 -1.442695, %v5922_v29  ;;  %6678 = vpow2.f32 %v5621_v40 }
 0xbed   :  { %6680 = vpow2.f32 %v5622_v52 }
 0xbee   :  { %6682 = vpow2.f32 %v5620_v25 }
 0xbf4   :  { %v6677_v58 = vpop.eup %6676 }
 0xbf5   :  { %v6679_v20 = vpop.eup %6678  ;;  %v5059_v54 = vadd.f32 1.0, %v6677_v58 }
 0xbf6   :  { %v5071_v5 = vadd.f32 1.0, %v6679_v20 }
 0xbf7   :  { %v6681_v32 = vpop.eup %6680  ;;  %6684 = vrcp.f32 %v5059_v54 }
 0xbf8   :  { %v6683_v56 = vpop.eup %6682  ;;  %v5072_v6 = vadd.f32 1.0, %v6681_v32  ;;  %6686 = vrcp.f32 %v5071_v5 }
 0xbf9   :  { %v5060_v55 = vadd.f32 1.0, %v6683_v56 }
 0xbfa   :  { %6688 = vrcp.f32 %v5072_v6 }
 0xc01   :  { %v6685_v32 = vpop.eup %6684 }
 0xc02   :  { %v6687_v54 = vpop.eup %6686 }
 0xc04   :  { %v6689_v56 = vpop.eup %6688 }
 0xc05   :  { %v4746_v57 = vpop.f32.mrb[28].mxu1  ;;  %v9279_v27 = vpop.f32.mrb[68].mxu0 }
 0xc06   :  { %v5923_v36 = vadd.f32 %v4746_v57, %v10266_v35  ;;  %v4748_v22 = vpop.f32.mrb[29].mxu1  ;;  %v4834_v60 = vpop.f32.mrb[69].mxu0  ;;  %v5091_v57 = vmul.f32 %v6687_v54, %v9114_v46 }
 0xc07   :  { %v5924_v3 = vadd.f32 %v4748_v22, %v10267_v33  ;;  %v4750_v29 = vpop.f32.mrb[30].mxu1  ;;  %v9283_v17 = vpop.f32.mrb[70].mxu0 }
 0xc08   :  { %6690 = vtanh.f32 %v5923_v36  ;;  %v5925_v43 = vadd.f32 %v4750_v29, %v10266_v35  ;;  %v4752_v40 = vpop.f32.mrb[31].mxu1  ;;  %v4838_v52 = vpop.f32.mrb[71].mxu0  ;;  %v5092_v29 = vmul.f32 %v6689_v56, %v9121_v12 }
 0xc09   :  { %6692 = vrcp.f32 %v5060_v55  ;;  %v5623_v25 = vmul.f32 -1.442695, %v5924_v3  ;;  %v5926_v58 = vadd.f32 %v4752_v40, %v10267_v33 }
 0xc0a   :  { %6694 = vtanh.f32 %v5925_v43 }
 0xc0b   :  { %6696 = vpow2.f32 %v5623_v25  ;;  %v5624_v20 = vmul.f32 -1.442695, %v5926_v58 }
 0xc0d   :  { %6698 = vpow2.f32 %v5624_v20 }
 0xc12   :  { %v6691_v5 = vpop.eup %6690 }
 0xc13   :  { %v6693_v6 = vpop.eup %6692  ;;  %v5093_v36 = vmul.f32 %v6691_v5, %v6685_v32 }
 0xc14   :  { %v6695_v22 = vpop.eup %6694 }
 0xc15   :  { %v6697_v35 = vpop.eup %6696  ;;  %v5095_v55 = vadd.f32 %v5093_v36, %v5091_v57  ;;  %v5094_v3 = vmul.f32 %v6695_v22, %v6693_v6 }
 0xc16   :  { %v5085_v50 = vadd.f32 1.0, %v6697_v35 }
 0xc17   :  { %6700 = vtanh.f32 %v5095_v55  ;;  %5303 = vst [vmem:[#allocation10] sm:$0xff] %v5095_v55  ;;  %v5096_v33 = vadd.f32 %v5094_v3, %v5092_v29  ;;  %v6699_v43 = vpop.eup %6698 }
 0xc18   :  { %6702 = vrcp.f32 %v5085_v50  ;;  %v5086_v40 = vadd.f32 1.0, %v6699_v43  ;;  %v4844_v43 = vadd.f32 %v4834_v60, %v7991_v10 }
 0xc19   :  { %5304 = vst [vmem:[#allocation10 + $0x8] sm:$0xff] %v5096_v33  ;;  %6704 = vtanh.f32 %v5096_v33 }
 0xc1a   :  { %6706 = vrcp.f32 %v5086_v40  ;;  %v4848_v40 = vadd.f32 %v4838_v52, %v7991_v10 }
 0xc21   :  { %v6701_v25 = vpop.eup %6700 }
 0xc22   :  { %v6703_v58 = vpop.eup %6702 }
 0xc23   :  { %v5099_v46 = vmul.f32 %v6703_v58, %v6701_v25  ;;  %v6705_v20 = vpop.eup %6704  ;;  %v4843_v25 = vadd.f32 %v9279_v27, %v7996_v18  ;;  %v5617_v58 = vmul.f32 -1.442695, %v4844_v43 }
 0xc24   :  { %v6707_v32 = vpop.eup %6706 }
 0xc25   :  { %v4789_v54 = vpop.f32.mrb[64].mxu1  ;;  %5298 = vst [vmem:[#allocation9] sm:$0xff] %v5099_v46  ;;  %v5100_v5 = vmul.f32 %v6707_v32, %v6705_v20  ;;  %v5618_v20 = vmul.f32 -1.442695, %v4848_v40 }
 0xc26   :  { %v4841_v12 = vadd.f32 %v4789_v54, %v7972_v14  ;;  %v4791_v56 = vpop.f32.mrb[65].mxu1 }
 0xc27   :  { %v4842_v6 = vadd.f32 %v4791_v56, %v7977_v23  ;;  %v4793_v57 = vpop.f32.mrb[66].mxu1  ;;  %v9292_v35 = vpack.c.bf16 %v5100_v5, %v5099_v46  ;;  %5299 = vst [vmem:[#allocation9 + $0x8] sm:$0xff] %v5100_v5  ;;  %v4847_v46 = vadd.f32 %v9283_v17, %v7996_v18 }
 0xc28   :  { %v5613_v36 = vmul.f32 -1.442695, %v4841_v12  ;;  %v4845_v50 = vadd.f32 %v4793_v57, %v7972_v14  ;;  %v4795_v22 = vpop.f32.mrb[67].mxu1 }
 0xc29   :  { %v5615_v29 = vmul.f32 -1.442695, %v4842_v6  ;;  %v4846_v55 = vadd.f32 %v4795_v22, %v7977_v23 }
 0xc2a   :  { %6708 = vpow2.f32 %v5613_v36  ;;  %v5614_v3 = vmul.f32 -1.442695, %v4845_v50 }
 0xc2b   :  { %6710 = vpow2.f32 %v5615_v29  ;;  %v5616_v33 = vmul.f32 -1.442695, %v4846_v55 }
 0xc2c   :  { %6712 = vpow2.f32 %v5614_v3 }
 0xc2d   :  { %6714 = vpow2.f32 %v5616_v33 }
 0xc2e   :  { %6716 = vtanh.f32 %v4843_v25 }
 0xc2f   :  { %6718 = vpow2.f32 %v5617_v58 }
 0xc30   :  { %6720 = vtanh.f32 %v4847_v46 }
 0xc31   :  { %6722 = vpow2.f32 %v5618_v20 }
 0xc34   :  { %v6709_v32 = vpop.eup %6708 }
 0xc35   :  { %v6711_v54 = vpop.eup %6710  ;;  %v4863_v12 = vadd.f32 1.0, %v6709_v32 }
 0xc36   :  { %v6713_v56 = vpop.eup %6712  ;;  %v4875_v60 = vadd.f32 1.0, %v6711_v54 }
 0xc37   :  { %v6715_v5 = vpop.eup %6714  ;;  %6724 = vrcp.f32 %v4863_v12  ;;  %v4864_v52 = vadd.f32 1.0, %v6713_v56 }
 0xc38   :  { %6726 = vrcp.f32 %v4875_v60  ;;  %v4876_v6 = vadd.f32 1.0, %v6715_v5  ;;  %v6717_v27 = vpop.eup %6716 }
 0xc39   :  { %6728 = vrcp.f32 %v4864_v52  ;;  %v6719_v57 = vpop.eup %6718  ;;  %v6886_v52 = vld [vmem:[#allocation8 + $0x10] ss:$20 sps:$4 sm:$0xff]  }
 0xc3a   :  { %6730 = vrcp.f32 %v4876_v6  ;;  %v6721_v17 = vpop.eup %6720  ;;  %v4889_v29 = vadd.f32 1.0, %v6719_v57  ;;  %v6888_v6 = vld [vmem:[#allocation8 + $0x60] ss:$20 sps:$4 sm:$0xff]  }
 0xc3b   :  { %v6723_v36 = vpop.eup %6722 }
 0xc3c   :  { %v4890_v40 = vadd.f32 1.0, %v6723_v36  ;;  %6732 = vrcp.f32 %v4889_v29 }
 0xc41   :  { %v6725_v50 = vpop.eup %6724 }
 0xc42   :  { %v6727_v22 = vpop.eup %6726  ;;  %v4897_v55 = vmul.f32 %v6725_v50, %v6717_v27 }
 0xc43   :  { %v6729_v3 = vpop.eup %6728  ;;  %v4895_v33 = vmul.f32 %v6727_v22, %v9136_v42 }
 0xc44   :  { %v6731_v43 = vpop.eup %6730  ;;  %v4898_v25 = vmul.f32 %v6729_v3, %v6721_v17 }
 0xc45   :  { %v9302_v58 = vadd.f32 %v4897_v55, %v4895_v33  ;;  %v4896_v46 = vmul.f32 %v6731_v43, %v9140_v41  ;;  %v6887_v41 = vld [vmem:[#allocation8 + $0x38] ss:$20 sps:$4 sm:$0xff]  }
 0xc46   :  { %v6733_v32 = vpop.eup %6732 }
 0xc47   :  { %6734 = vtanh.f32 %v9302_v58  ;;  %v9306_v20 = vadd.f32 %v4898_v25, %v4896_v46 }
 0xc48   :  { %6736 = vrcp.f32 %v4890_v40 }
 0xc49   :  { %6738 = vtanh.f32 %v9306_v20 }
 0xc51   :  { %v6735_v54 = vpop.eup %6734 }
 0xc52   :  { %v6737_v12 = vpop.eup %6736  ;;  %v4903_v42 = vmul.f32 %v6735_v54, %v6733_v32 }
 0xc53   :  { %v6739_v56 = vpop.eup %6738 }
 0xc54   :  { %v4904_v60 = vmul.f32 %v6739_v56, %v6737_v12 }
 0xc56   :  { %v4905_v5 = vpack.c.bf16 %v4904_v60, %v4903_v42 }
 0xc58   :  { %4939 = vmatmul.mubr.bf16.vlgmr.msra.gmra.mrb[72].mxu0 %v4905_v5  ;;  %4982 = vmatmul.mubr.bf16.vlgmr.msra.gmra.mrb[72].mxu1 %v4905_v5 }
 0xc59   :  { %5824 = vmatpush3.bf16.msra.mxu0 %v6886_v52  ;;  %5146 = vmatpush1.bf16.msra.mxu1 %v9828_v4  ;;  %v6889_v4 = vld [vmem:[#allocation8 + $0x88] ss:$20 sps:$4 sm:$0xff]  }
 0xc5a   :  { %5825 = vmatprep.subr.bf16.mxu0 %v9878_v61  ;;  %5147 = vmatprep.subr.bf16.mxu1 %v9895_v13  ;;  %v6890_v13 = vld [vmem:[#allocation8 + $0xb0] ss:$20 sps:$4 sm:$0xff]  }
 0xc5b   :  { %5839 = vmatprep.mubr.msk.bf16.mxu0 %vm7032_vm8, %v9878_v61  ;;  %5177 = vmatprep.mubr.bf16.mxu1 %v9770_v2 }
 0xc5d   :  { %5826 = vmatpush3.bf16.msra.mxu0 %v6887_v41  ;;  %5148 = vmatpush1.bf16.msra.mxu1 %v9897_v30  ;;  %v6891_v30 = vld [vmem:[#allocation8 + $0xd8] ss:$20 sps:$4 sm:$0xff]  }
 0xc5e   :  { %5827 = vmatprep.subr.bf16.mxu0 %v9878_v61  ;;  %5149 = vmatprep.subr.bf16.mxu1 %v10193_v44  ;;  %v6892_v44 = vld [vmem:[#allocation8 + $0x100] ss:$20 sps:$4 sm:$0xff]  }
 0xc61   :  { %5828 = vmatpush3.bf16.msra.mxu0 %v6888_v6  ;;  %5150 = vmatpush1.bf16.msra.mxu1 %v10195_v9  ;;  %v6893_v9 = vld [vmem:[#allocation8 + $0x128] ss:$20 sps:$4 sm:$0xff]  }
 0xc62   :  { %5829 = vmatprep.subr.bf16.mxu0 %v9878_v61  ;;  %5151 = vmatprep.subr.bf16.mxu1 %v10197_v11 }
 0xc65   :  { %5830 = vmatpush3.bf16.msra.mxu0 %v6889_v4  ;;  %5152 = vmatpush1.bf16.msra.mxu1 %v10199_v28  ;;  %v10268_v28 = vld [vmem:[#allocation102_spill] sm:$0xff] }
 0xc66   :  { %5831 = vmatprep.subr.bf16.mxu0 %v9878_v61  ;;  %5153 = vmatprep.subr.bf16.mxu1 %v10201_v59 }
 0xc69   :  { %5832 = vmatpush3.bf16.msra.mxu0 %v6890_v13  ;;  %5154 = vmatpush1.bf16.msra.mxu1 %v10203_v49 }
 0xc6a   :  { %5833 = vmatprep.subr.bf16.mxu0 %v9878_v61  ;;  %5155 = vmatprep.subr.bf16.mxu1 %v10205_v34 }
 0xc6d   :  { %5834 = vmatpush3.bf16.msra.mxu0 %v6891_v30  ;;  %5156 = vmatpush1.bf16.msra.mxu1 %v10207_v62 }
 0xc6e   :  { %5835 = vmatprep.subr.bf16.mxu0 %v9878_v61  ;;  %5157 = vmatprep.subr.bf16.mxu1 %v10209_v63 }
 0xc71   :  { %5836 = vmatpush3.bf16.msra.mxu0 %v6892_v44  ;;  %5158 = vmatpush1.bf16.msra.mxu1 %v10211_v16 }
 0xc72   :  { %5837 = vmatprep.subr.bf16.mxu0 %v9878_v61  ;;  %5159 = vmatprep.subr.bf16.mxu1 %v10213_v31 }
 0xc75   :  { %5838 = vmatpush3.bf16.msra.mxu0 %v6893_v9  ;;  %5160 = vmatpush1.bf16.msra.mxu1 %v10215_v48 }
 0xc76   :  { %5102 = vmatprep.subr.bf16.mxu0 %v10216_v7  ;;  %5843 = vmatprep.subr.bf16.mxu1 %v9878_v61 }
 0xc78   :  { %5840 = vmatmul.mubr.bf16.vlgmr.msra.gmra.mrb[76].mxu0 %v4905_v5  ;;  %5178 = vmatmul.mubr.bf16.vlgmr.msra.gmra.mrb[72].mxu1 %v9292_v35 }
 0xc79   :  { %5103 = vmatpush1.bf16.msra.mxu0 %v10218_v53  ;;  %5134 = vmatprep.mubr.bf16.mxu0 %v9770_v2 }
 0xc7a   :  { %5104 = vmatprep.subr.bf16.mxu0 %v10219_v39  ;;  %5844 = vmatpush3.bf16.msra.mxu1 %v6886_v52 }
 0xc7b   :  { %5845 = vmatprep.subr.bf16.mxu1 %v9878_v61  ;;  %5859 = vmatprep.mubr.msk.bf16.mxu1 %vm7032_vm8, %v9878_v61 }
 0xc7d   :  { %5105 = vmatpush1.bf16.msra.mxu0 %v10222_v26 }
 0xc7e   :  { %5106 = vmatprep.subr.bf16.mxu0 %v10223_v37  ;;  %5846 = vmatpush3.bf16.msra.mxu1 %v6887_v41 }
 0xc7f   :  { %5847 = vmatprep.subr.bf16.mxu1 %v9878_v61 }
 0xc81   :  { %5107 = vmatpush1.bf16.msra.mxu0 %v10226_v38 }
 0xc82   :  { %5108 = vmatprep.subr.bf16.mxu0 %v10227_v51  ;;  %5848 = vmatpush3.bf16.msra.mxu1 %v6888_v6 }
 0xc83   :  { %5849 = vmatprep.subr.bf16.mxu1 %v9878_v61 }
 0xc85   :  { %5109 = vmatpush1.bf16.msra.mxu0 %v10230_v24 }
 0xc86   :  { %5110 = vmatprep.subr.bf16.mxu0 %v10231_v8  ;;  %5850 = vmatpush3.bf16.msra.mxu1 %v6889_v4 }
 0xc87   :  { %5851 = vmatprep.subr.bf16.mxu1 %v9878_v61 }
 0xc89   :  { %5111 = vmatpush1.bf16.msra.mxu0 %v10234_v47 }
 0xc8a   :  { %5112 = vmatprep.subr.bf16.mxu0 %v10235_v45  ;;  %5852 = vmatpush3.bf16.msra.mxu1 %v6890_v13 }
 0xc8b   :  { %5853 = vmatprep.subr.bf16.mxu1 %v9878_v61 }
 0xc8d   :  { %5113 = vmatpush1.bf16.msra.mxu0 %v10238_v0 }
 0xc8e   :  { %5114 = vmatprep.subr.bf16.mxu0 %v10239_v1  ;;  %5854 = vmatpush3.bf16.msra.mxu1 %v6891_v30 }
 0xc8f   :  { %5855 = vmatprep.subr.bf16.mxu1 %v9878_v61 }
 0xc91   :  { %5115 = vmatpush1.bf16.msra.mxu0 %v10242_v15 }
 0xc92   :  { %5116 = vmatprep.subr.bf16.mxu0 %v10243_v21  ;;  %5856 = vmatpush3.bf16.msra.mxu1 %v6892_v44 }
 0xc93   :  { %5857 = vmatprep.subr.bf16.mxu1 %v9878_v61 }
 0xc95   :  { %5117 = vmatpush1.bf16.msra.mxu0 %v10246_v19 }
 0xc96   :  { %5858 = vmatpush3.bf16.msra.mxu1 %v6893_v9 }
 0xc98   :  { %5135 = vmatmul.mubr.bf16.vlgmr.msra.gmra.mrb[72].mxu0 %v9292_v35 }
 0xd4b   :  { %v5026_v2 = vpop.f32.mrb[76].mxu0  ;;  %v5179_v11 = vpop.f32.mrb[72].mxu1 }
 0xd4c   :  { %v5033_v59 = vadd.f32 %v10268_v28, %v5026_v2  ;;  %v5841_v49 = vpop.f32.mrb[77].mxu0  ;;  %v5181_v34 = vpop.f32.mrb[73].mxu1  ;;  %v5190_v15 = vadd.f32 %v5179_v11, %v7996_v18 }
 0xd4d   :  { %v5029_v62 = vpop.f32.mrb[78].mxu0  ;;  %v5183_v63 = vpop.f32.mrb[74].mxu1  ;;  %v5191_v0 = vadd.f32 %v5181_v34, %v7991_v10 }
 0xd4e   :  { %5035 = vst [vmem:[%s9423_s9 + $0x30] sm:$0xff] %v5033_v59  ;;  %v5034_v16 = vadd.f32 %v10268_v28, %v5029_v62  ;;  %v5842_v61 = vpop.f32.mrb[79].mxu0  ;;  %v5185_v31 = vpop.f32.mrb[75].mxu1  ;;  %v5194_v21 = vadd.f32 %v5183_v63, %v7996_v18 }
 0xd4f   :  { %v5195_v1 = vadd.f32 %v5185_v31, %v7991_v10  ;;  %v5629_v19 = vmul.f32 -1.442695, %v5191_v0 }
 0xd50   :  { %5036 = vst [vmem:[%s9423_s9 + $0x70] sm:$0xff] %v5034_v16 }
 0xd6b   :  { %v5136_v48 = vpop.f32.mrb[72].mxu0 }
 0xd6c   :  { %v5188_v7 = vadd.f32 %v5136_v48, %v7972_v14  ;;  %v5138_v53 = vpop.f32.mrb[73].mxu0 }
 0xd6d   :  { %v5189_v39 = vadd.f32 %v5138_v53, %v7977_v23  ;;  %v5140_v26 = vpop.f32.mrb[74].mxu0 }
 0xd6e   :  { %v5625_v37 = vmul.f32 -1.442695, %v5188_v7  ;;  %v5192_v38 = vadd.f32 %v5140_v26, %v7972_v14  ;;  %v5142_v51 = vpop.f32.mrb[75].mxu0  ;;  %v5630_v14 = vmul.f32 -1.442695, %v5195_v1 }
 0xd6f   :  { %v5627_v24 = vmul.f32 -1.442695, %v5189_v39  ;;  %v5193_v8 = vadd.f32 %v5142_v51, %v7977_v23 }
 0xd70   :  { %6740 = vpow2.f32 %v5625_v37  ;;  %v5626_v47 = vmul.f32 -1.442695, %v5192_v38 }
 0xd71   :  { %6742 = vpow2.f32 %v5627_v24  ;;  %v5628_v45 = vmul.f32 -1.442695, %v5193_v8 }
 0xd72   :  { %6744 = vpow2.f32 %v5626_v47 }
 0xd73   :  { %6746 = vpow2.f32 %v5628_v45 }
 0xd74   :  { %6748 = vtanh.f32 %v5190_v15 }
 0xd75   :  { %6750 = vtanh.f32 %v5194_v21 }
 0xd76   :  { %6752 = vpow2.f32 %v5629_v19 }
 0xd77   :  { %6754 = vpow2.f32 %v5630_v14 }
 0xd7a   :  { %v6741_v35 = vpop.eup %6740 }
 0xd7b   :  { %v6743_v23 = vpop.eup %6742  ;;  %v5210_v27 = vadd.f32 1.0, %v6741_v35 }
 0xd7c   :  { %v6745_v57 = vpop.eup %6744  ;;  %v5222_v17 = vadd.f32 1.0, %v6743_v23 }
 0xd7d   :  { %v6747_v36 = vpop.eup %6746  ;;  %6756 = vrcp.f32 %v5210_v27  ;;  %v5211_v50 = vadd.f32 1.0, %v6745_v57 }
 0xd7e   :  { %6758 = vrcp.f32 %v5222_v17  ;;  %v5223_v10 = vadd.f32 1.0, %v6747_v36  ;;  %v6749_v22 = vpop.eup %6748 }
 0xd7f   :  { %6760 = vrcp.f32 %v5211_v50  ;;  %v6751_v18 = vpop.eup %6750 }
 0xd80   :  { %6762 = vrcp.f32 %v5223_v10  ;;  %v6753_v29 = vpop.eup %6752 }
 0xd81   :  { %v6755_v55 = vpop.eup %6754  ;;  %v5236_v43 = vadd.f32 1.0, %v6753_v29 }
 0xd82   :  { %v5237_v54 = vadd.f32 1.0, %v6755_v55 }
 0xd83   :  { %6764 = vrcp.f32 %v5236_v43 }
 0xd87   :  { %v6757_v3 = vpop.eup %6756 }
 0xd88   :  { %v6759_v33 = vpop.eup %6758  ;;  %v5244_v40 = vmul.f32 %v6757_v3, %v6749_v22 }
 0xd89   :  { %v6761_v25 = vpop.eup %6760  ;;  %v5242_v46 = vmul.f32 %v6759_v33, %v9302_v58 }
 0xd8a   :  { %v6763_v32 = vpop.eup %6762  ;;  %v5245_v12 = vmul.f32 %v6761_v25, %v6751_v18 }
 0xd8b   :  { %v5246_v56 = vadd.f32 %v5244_v40, %v5242_v46  ;;  %v5243_v42 = vmul.f32 %v6763_v32, %v9306_v20 }
 0xd8d   :  { %6766 = vtanh.f32 %v5246_v56  ;;  %5306 = vst [vmem:[#allocation10 + $0x10] sm:$0xff] %v5246_v56  ;;  %v5247_v60 = vadd.f32 %v5245_v12, %v5243_v42  ;;  %v6765_v5 = vpop.eup %6764 }
 0xd8e   :  { %6768 = vrcp.f32 %v5237_v54 }
 0xd8f   :  { %6770 = vtanh.f32 %v5247_v60  ;;  %5307 = vst [vmem:[#allocation10 + $0x18] sm:$0xff] %v5247_v60 }
 0xd97   :  { %v6767_v52 = vpop.eup %6766 }
 0xd98   :  { %v6769_v41 = vpop.eup %6768  ;;  %v5250_v6 = vmul.f32 %v6767_v52, %v6765_v5 }
 0xd99   :  { %v6771_v4 = vpop.eup %6770 }
 0xd9a   :  { %v5251_v13 = vmul.f32 %v6771_v4, %v6769_v41  ;;  %5301 = vst [vmem:[#allocation9 + $0x10] sm:$0xff] %v5250_v6 }
 0xd9c   :  { %v5252_v58 = vpack.c.bf16 %v5251_v13, %v5250_v6  ;;  %5302 = vst [vmem:[#allocation9 + $0x18] sm:$0xff] %v5251_v13 }
 0xd9e   :  { %5860 = vmatmul.mubr.bf16.vlgmr.msra.gmra.mrb[76].mxu1 %v5252_v58 }
 0xd9f   :  { %6972 = shalt.err (!%p6969_p0)
}
 0xda0   :  { %s6973_s25 = scalar_lea.hbm %s9424_s10, 512 }
 0xda1   :  { %p6974_p1 = scmp.ne.s32.totalorder %s9424_s10, %s6973_s25  ;;  %p6977_p2 = scmp.lt.u32.totalorder %s6973_s25, %s9424_s10 }
 0xda3   :  { %p6979_p3 = pnand %p6977_p2, %p6974_p1 }
 0xda5   :  { %6982 = shalt.err (!%p6979_p3)
}
 0xda6   :  { %s7034_s4 = smov 128   ;;  %s7035_s29 = smov 8  }
 0xda7   :  { %5321 = dma.vmem_to_hbm [thread:$0]  %s5316_s5, 512, %s9424_s10, [#allocation5], %s7034_s4, %s7034_s4, %s7035_s29  }
 0xda8   :  { %s7036_s14 = smov [#allocation10]  }
 0xda9   :  { %s5327_s15 = sshll.u32 %s7036_s14, 4  ;;  %s5328_s15 = int_to_ptr.vmem [resolvable:$true] %s5327_s15 }
 0xdaa   :  { %s6983_s6 = scalar_lea.vmem %s5328_s15, 512  ;;  %p6988_p5 = scmp.lt.s32.totalorder %s5328_s15, %s5328_s15 }
 0xdab   :  { %p6984_p4 = scmp.ne.s32.totalorder %s5328_s15, %s6983_s6  ;;  %p6989_p6 = scmp.lt.s32.totalorder %s6983_s6, %s6983_s6 }
 0xdad   :  { %p6990_p7 = por %p6989_p6, %p6988_p5 }
 0xdaf   :  { %p6991_p8 = pnand %p6990_p7, %p6984_p4 }
 0xdb1   :  { %6994 = shalt.err (!%p6991_p8)
}
 0xdb2   :  { %s6995_s13 = scalar_lea.hbm %s9425_s11, 512 }
 0xdb3   :  { %p6996_p9 = scmp.ne.s32.totalorder %s9425_s11, %s6995_s13  ;;  %p6999_p10 = scmp.lt.u32.totalorder %s6995_s13, %s9425_s11 }
 0xdb5   :  { %p7001_p11 = pnand %p6999_p10, %p6996_p9 }
 0xdb7   :  { %7004 = shalt.err (!%p7001_p11)
}
 0xdb8   :  { %5333 = dma.vmem_to_hbm [thread:$0]  %s5328_s15, 512, %s9425_s11, [#allocation11], %s7034_s4, %s7034_s4, %s7035_s29  }
 0xdb9   :  { %v6894_v30 = vld [vmem:[%s9422_s8] ss:$0 sm:$0xff] }
 0xe71   :  { %v5287_v20 = vpop.f32.mrb[76].mxu1 }
 0xe72   :  { %v5294_v44 = vadd.f32 %v6894_v30, %v5287_v20  ;;  %v5861_v9 = vpop.f32.mrb[77].mxu1 }
 0xe73   :  { %v5290_v2 = vpop.f32.mrb[78].mxu1 }
 0xe74   :  { %5296 = vst [vmem:[%s9423_s9 + $0x38] sm:$0xff] %v5294_v44  ;;  %v5295_v11 = vadd.f32 %v6894_v30, %v5290_v2  ;;  %v5862_v28 = vpop.f32.mrb[79].mxu1 }
 0xe76   :  { %5297 = vst [vmem:[%s9423_s9 + $0x78] sm:$0xff] %v5295_v11 }
 0xe77   :  { %7009 = dma.done.wait [#allocation5], 512  }
 0xe78   :  { %7010 = vsyncadd [#allocation5], 4294966784 }
 0xe79   :  { %7011 = dma.done.wait [#allocation11], 512  }
 0xe7a   :  { %7012 = vsyncadd [#allocation11], 4294966784 }
 0xe7b   :  { %5342 = vsyncpa [#allocation4], 1 }
 0xe7c   :  { %5343 = vsyncpa [#allocation7], 1 }
 0xe7d   :  { %5344 = vsyncpa [#allocation5], 1 }
 0xe7e   :  { %5345 = vsyncpa [#allocation11], 1 }

</bundles_post_ra>
